<compile_context>
chip_gen: v7x
topology: tpu7x:2x2x1
jax: 0.10.0
libtpu: 0.0.40
codegen_flags: <defaults>
</compile_context>

<pallas_src>
import functools

import jax
import jax.numpy as jnp
from jax.experimental import pallas as pl
from jax.experimental.pallas import tpu as pltpu

LEAKY_SLOPE = 0.01   # PyTorch nn.LeakyReLU default negative_slope
BN_EPS = 1e-5        # PyTorch BatchNorm default eps
MXU_DTYPE = jnp.bfloat16   # MXU input dtype (accumulation stays float32)


# ----------------------------------------------------------------------------
# In-kernel helpers (all f32 math for the epilogue — v5e-friendly)
# ----------------------------------------------------------------------------
def _leaky(y):
    return jnp.where(y >= 0, y, LEAKY_SLOPE * y)


def _apply_act(y, act):
    if act == "leaky":
        return _leaky(y)
    if act == "sigmoid":
        return jax.nn.sigmoid(y)
    return y


def _bn_affine(y, gamma, beta):
    """BatchNorm with training-mode (biased) batch statistics over rows."""
    mean = jnp.mean(y, axis=0, keepdims=True)
    var = jnp.mean((y - mean) ** 2, axis=0, keepdims=True)
    scale = gamma * jax.lax.rsqrt(var + BN_EPS)
    return (y - mean) * scale + beta


# ----------------------------------------------------------------------------
# Fused GEMM kernel: (x @ w) [+bias] [-> BatchNorm(batch stats)] [+residual] -> act
# n_groups > 1 handles the phase-packed transposed conv, where the N axis holds
# n_groups copies of the same physical output channels (BN stats reduce over all).
# ----------------------------------------------------------------------------
def _make_gemm_kernel(*, act, has_bias, has_bn, has_residual, n_groups, n_cols):
    def kernel(*refs):
        i = 0
        x_ref = refs[i]; i += 1
        w_ref = refs[i]; i += 1
        bias_ref = gamma_ref = beta_ref = res_ref = None
        if has_bias:
            bias_ref = refs[i]; i += 1
        if has_bn:
            gamma_ref = refs[i]; i += 1
            beta_ref = refs[i]; i += 1
        if has_residual:
            res_ref = refs[i]; i += 1
        o_ref = refs[i]

        y = jnp.dot(x_ref[...], w_ref[...], preferred_element_type=jnp.float32)
        if has_bias:
            y = y + bias_ref[...]

        if not has_bn:
            out = y + res_ref[...] if has_residual else y
            o_ref[...] = _apply_act(out, act)
            return

        if n_groups == 1:
            out = _bn_affine(y, gamma_ref[...], beta_ref[...])
            if has_residual:
                out = out + res_ref[...]
            o_ref[...] = _apply_act(out, act)
            return

        # Phase-packed transposed conv: combine batch stats across the phase groups.
        C = n_cols
        groups = [y[:, g * C:(g + 1) * C] for g in range(n_groups)]
        mean = jnp.mean(groups[0], axis=0, keepdims=True)
        for gv in groups[1:]:
            mean = mean + jnp.mean(gv, axis=0, keepdims=True)
        mean = mean * (1.0 / n_groups)
        var = jnp.mean((groups[0] - mean) ** 2, axis=0, keepdims=True)
        for gv in groups[1:]:
            var = var + jnp.mean((gv - mean) ** 2, axis=0, keepdims=True)
        var = var * (1.0 / n_groups)
        scale = gamma_ref[...] * jax.lax.rsqrt(var + BN_EPS)
        shift = beta_ref[...] - mean * scale
        for g in range(n_groups):
            o_ref[:, g * C:(g + 1) * C] = _apply_act(groups[g] * scale + shift, act)

    return kernel


def _full2d(r, c):
    return pl.BlockSpec((r, c), lambda i: (0, 0))


def gemm_fused(x, w, *, act="none", bias=None, gamma=None, beta=None,
               residual=None, n_groups=1):
    """Single-block fused matmul + epilogue.  All operands are full VMEM blocks;
    no padding, no K tiling (largest K here is 576)."""
    M, K = x.shape
    K2, N = w.shape
    assert K == K2
    has_bias = bias is not None
    has_bn = gamma is not None
    has_res = residual is not None
    n_cols = N // n_groups

    args = [x.astype(MXU_DTYPE), w.astype(MXU_DTYPE)]
    specs = [_full2d(M, K), _full2d(K, N)]
    if has_bias:
        args.append(bias.reshape(1, N).astype(jnp.float32))
        specs.append(_full2d(1, N))
    if has_bn:
        args.append(gamma.reshape(1, n_cols).astype(jnp.float32))
        specs.append(_full2d(1, n_cols))
        args.append(beta.reshape(1, n_cols).astype(jnp.float32))
        specs.append(_full2d(1, n_cols))
    if has_res:
        args.append(residual.astype(jnp.float32))
        specs.append(_full2d(M, N))

    kernel = _make_gemm_kernel(act=act, has_bias=has_bias, has_bn=has_bn,
                               has_residual=has_res, n_groups=n_groups, n_cols=n_cols)
    return pl.pallas_call(
        kernel,
        out_shape=jax.ShapeDtypeStruct((M, N), jnp.float32),
        grid=(1,),
        in_specs=specs,
        out_specs=_full2d(M, N),
        compiler_params=pltpu.CompilerParams(dimension_semantics=("arbitrary",)),
    )(*args)


# ----------------------------------------------------------------------------
# Fused Residual block kernel: leaky input `a` -> conv3x3 -> BN -> leaky
#                              -> conv1x1 -> BN -> (+a) -> leaky
# (the trailing leaky is the NEXT block's in-place activation / the stack's final
#  activation, folded in so the whole stack needs exactly one kernel per block)
# ----------------------------------------------------------------------------
def _resblock_kernel(p_ref, w3_ref, g1_ref, b1_ref, w1_ref, g2_ref, b2_ref,
                     a_ref, o_ref):
    h = jnp.dot(p_ref[...], w3_ref[...], preferred_element_type=jnp.float32)
    h = _leaky(_bn_affine(h, g1_ref[...], b1_ref[...]))
    y = jnp.dot(h.astype(w1_ref.dtype), w1_ref[...], preferred_element_type=jnp.float32)
    y = _bn_affine(y, g2_ref[...], b2_ref[...])
    o_ref[...] = _leaky(y + a_ref[...])


def residual_block_fused(a_nhwc, bp):
    """One Residual block (inputs already LeakyReLU'd — PyTorch's inplace activation
    rewrites the skip tensor, so the residual connection adds leaky(x))."""
    B, H, W, C = a_nhwc.shape
    M = B * H * W
    patches = im2col_3x3(a_nhwc)                                     # (M, 9C)
    w3_mat = jnp.transpose(bp["w1"], (2, 3, 1, 0)).reshape(9 * C, C)
    w1_mat = bp["w2"].reshape(C, C).T

    args = [patches.astype(MXU_DTYPE), w3_mat.astype(MXU_DTYPE),
            bp["g1"].reshape(1, C), bp["b1"].reshape(1, C),
            w1_mat.astype(MXU_DTYPE),
            bp["g2"].reshape(1, C), bp["b2"].reshape(1, C),
            a_nhwc.reshape(M, C)]
    specs = [_full2d(M, 9 * C), _full2d(9 * C, C),
             _full2d(1, C), _full2d(1, C),
             _full2d(C, C),
             _full2d(1, C), _full2d(1, C),
             _full2d(M, C)]
    out = pl.pallas_call(
        _resblock_kernel,
        out_shape=jax.ShapeDtypeStruct((M, C), jnp.float32),
        grid=(1,),
        in_specs=specs,
        out_specs=_full2d(M, C),
        compiler_params=pltpu.CompilerParams(dimension_semantics=("arbitrary",)),
    )(*args)
    return out.reshape(B, H, W, C)


# ----------------------------------------------------------------------------
# Glue: patch extraction and (transposed-)conv weight packing
# TODO(synk): patch gather / phase de-interleave are tiny XLA reshapes; they could be
#             moved in-kernel via manual VMEM slicing, left to XLA at these sizes.
# ----------------------------------------------------------------------------
def im2col_3x3(x_nhwc):
    """3x3-footprint patch matrix (padding 1): (B,H,W,C) -> (B*H*W, 9*C)."""
    B, H, W, C = x_nhwc.shape
    xp = jnp.pad(x_nhwc, ((0, 0), (1, 1), (1, 1), (0, 0)))
    cols = [xp[:, a:a + H, b:b + W, :] for a in range(3) for b in range(3)]
    return jnp.concatenate(cols, axis=-1).reshape(B * H * W, 9 * C)


def _deconv_phase_weights(w):
    """Pack ConvTranspose2d(k=4, s=2, p=1) weight (Cin,Cout,4,4) into (9*Cin, 4*Cout):
    4 output-parity phases, each a 3x3-footprint conv on the non-dilated input."""
    Cin, Cout = w.shape[0], w.shape[1]
    zero = jnp.zeros((Cin, Cout), w.dtype)
    phase_mats = []
    for ph in (0, 1):
        rows = (3, 1, None) if ph == 0 else (None, 2, 0)      # tap a -> kernel row kh
        for pw in (0, 1):
            cols = (3, 1, None) if pw == 0 else (None, 2, 0)  # tap b -> kernel col kw
            taps = [zero if (kh is None or kw is None) else w[:, :, kh, kw]
                    for kh in rows for kw in cols]             # 9 x (Cin, Cout)
            phase_mats.append(jnp.concatenate(taps, axis=0))   # (9*Cin, Cout)
    return jnp.concatenate(phase_mats, axis=1)                 # (9*Cin, 4*Cout)


def conv3x3_bn_act(x_nhwc, w, gamma, beta, act):
    """Conv2d(k=3, s=1, p=1, bias=False) + BatchNorm + activation, one kernel."""
    B, H, W, Cin = x_nhwc.shape
    Cout = w.shape[0]
    patches = im2col_3x3(x_nhwc)
    w_mat = jnp.transpose(w, (2, 3, 1, 0)).reshape(9 * Cin, Cout)
    y = gemm_fused(patches, w_mat, act=act, gamma=gamma, beta=beta)
    return y.reshape(B, H, W, Cout)


def conv_transpose4x4_s2(x_nhwc, w, *, gamma=None, beta=None, act="none"):
    """ConvTranspose2d(k=4, s=2, p=1, bias=False) (+ optional fused BN + activation)."""
    B, H, W, Cin = x_nhwc.shape
    Cout = w.shape[1]
    patches = im2col_3x3(x_nhwc)                               # (B*H*W, 9*Cin)
    w_packed = _deconv_phase_weights(w)                        # (9*Cin, 4*Cout)
    y = gemm_fused(patches, w_packed, act=act, gamma=gamma, beta=beta, n_groups=4)
    # de-interleave the 4 output-parity phases -> (B, 2H, 2W, Cout)
    y = y.reshape(B, H, W, 2, 2, Cout).transpose(0, 1, 3, 2, 4, 5)
    return y.reshape(B, 2 * H, 2 * W, Cout)


# ----------------------------------------------------------------------------
# Decoder forward
# ----------------------------------------------------------------------------
def decoder_forward(z, p, base_channels=8, out_channels=1, output_size=32, layers=4):
    bc = base_channels
    c8 = 8 * bc
    init_size = output_size // 2 ** layers
    B = z.shape[0]

    # _lin_1 + _bn1 (batch stats) + LeakyReLU — one fused kernel.
    h = gemm_fused(z, p["lin_w"].T, bias=p["lin_b"],
                   gamma=p["bn1_g"], beta=p["bn1_b"], act="leaky")

    # _unflatten: (B, C*H*W) -> NCHW -> NHWC
    h = h.reshape(B, c8, init_size, init_size).transpose(0, 2, 3, 1)

    # _conv_1 + _bn2; trailing leaky = residual-stack-1's first in-place LeakyReLU
    # (which also rewrites the skip tensor).
    h = conv3x3_bn_act(h, p["conv1_w"], p["bn2_g"], p["bn2_b"], "leaky")

    # _residual_stack_1 (one kernel per block; the stack's final activation is the
    # last block's fused trailing leaky).
    for bp in p["res1"]:
        h = residual_block_fused(h, bp)

    # _conv_trans_1 + _bn3 + LeakyReLU
    h = conv_transpose4x4_s2(h, p["ct1_w"], gamma=p["bn3_g"], beta=p["bn3_b"], act="leaky")

    # _conv_trans_2 + _bn4 (+ residual-stack-2's first in-place LeakyReLU)
    h = conv_transpose4x4_s2(h, p["ct2_w"], gamma=p["bn4_g"], beta=p["bn4_b"], act="leaky")

    # _residual_stack_2
    for bp in p["res2"]:
        h = residual_block_fused(h, bp)

    # _conv_trans_3 + _bn5 + LeakyReLU
    h = conv_transpose4x4_s2(h, p["ct3_w"], gamma=p["bn5_g"], beta=p["bn5_b"], act="leaky")

    # _conv_trans_4 + sigmoid
    h = conv_transpose4x4_s2(h, p["ct4_w"], act="sigmoid")

    return h.transpose(0, 3, 1, 2)      # NHWC -> NCHW to match PyTorch
    # TODO(synk): BatchNorm running-stat buffer updates (train-mode side effect) are
    #             not modeled; they do not affect this forward output.


# ----------------------------------------------------------------------------
# Deterministic parameter initialization (shapes per Decoder.__init__)
# ----------------------------------------------------------------------------
def init_params(key, base_channels, out_channels, latent_dim, output_size, layers):
    bc = base_channels
    c8, c4, c2, c1 = 8 * bc, 4 * bc, 2 * bc, bc
    init_size = output_size // 2 ** layers
    lin_out = c8 * init_size * init_size
    keys = iter(jax.random.split(key, 64))

    def w(shape, fan_in):
        return jax.random.normal(next(keys), shape, jnp.float32) / jnp.sqrt(float(fan_in))

    def res_block(c):
        return {
            "w1": w((c, c, 3, 3), c * 9),
            "g1": jnp.ones((c,), jnp.float32), "b1": jnp.zeros((c,), jnp.float32),
            "w2": w((c, c, 1, 1), c),
            "g2": jnp.ones((c,), jnp.float32), "b2": jnp.zeros((c,), jnp.float32),
        }

    return {
        "lin_w": w((lin_out, latent_dim), latent_dim),
        "lin_b": w((lin_out,), latent_dim),
        "bn1_g": jnp.ones((lin_out,), jnp.float32),
        "bn1_b": jnp.zeros((lin_out,), jnp.float32),
        "conv1_w": w((c8, c8, 3, 3), c8 * 9),
        "bn2_g": jnp.ones((c8,), jnp.float32), "bn2_b": jnp.zeros((c8,), jnp.float32),
        "res1": [res_block(c8) for _ in range(layers)],
        "ct1_w": w((c8, c4, 4, 4), c8 * 16),
        "bn3_g": jnp.ones((c4,), jnp.float32), "bn3_b": jnp.zeros((c4,), jnp.float32),
        "ct2_w": w((c4, c2, 4, 4), c4 * 16),
        "bn4_g": jnp.ones((c2,), jnp.float32), "bn4_b": jnp.zeros((c2,), jnp.float32),
        "res2": [res_block(c2) for _ in range(layers)],
        "ct3_w": w((c2, c1, 4, 4), c2 * 16),
        "bn5_g": jnp.ones((c1,), jnp.float32), "bn5_b": jnp.zeros((c1,), jnp.float32),
        "ct4_w": w((c1, out_channels, 4, 4), c1 * 16),
    }


if __name__ == "__main__":
    key = jax.random.PRNGKey(0)
    kz, kp = jax.random.split(key)

    # Small but consistent config: base_channels=8, latent_dim=10, output_size=32, layers=4
    B, latent_dim = 2, 10
    base_channels, out_channels, output_size, layers = 8, 1, 32, 4

    params = init_params(kp, base_channels, out_channels, latent_dim, output_size, layers)
    z = jax.random.normal(kz, (B, latent_dim), jnp.float32)

    fwd = jax.jit(functools.partial(decoder_forward,
                                    base_channels=base_channels,
                                    out_channels=out_channels,
                                    output_size=output_size,
                                    layers=layers))
    out = jax.block_until_ready(fwd(z, params))

    assert out.shape == (B, out_channels, output_size, output_size), out.shape
    assert bool(jnp.all(jnp.isfinite(out)))
    print("KERNEL_OK")
</pallas_src>

<mosaic_0001>
module attributes {stable_mosaic.version = 11 : i64} {
  func.func @kernel(%arg0: i32, %arg1: memref<2x10xbf16, #tpu.memory_space<vmem>>, %arg2: memref<10x256xbf16, #tpu.memory_space<vmem>>, %arg3: memref<1x256xf32, #tpu.memory_space<vmem>>, %arg4: memref<1x256xf32, #tpu.memory_space<vmem>>, %arg5: memref<1x256xf32, #tpu.memory_space<vmem>>, %arg6: memref<2x256xf32, #tpu.memory_space<vmem>>) attributes {dimension_semantics = [#tpu.dimension_semantics<arbitrary>], iteration_bounds = array<i64: 1>, scalar_prefetch = 0 : i64, scratch_operands = 0 : i64, tpu.core_type = #tpu.core_type<tc>, window_params = [{pipeline_mode = #tpu.pipeline_mode<synchronous>, transform_indices = @transform_0, window_bounds = array<i64: 2, 10>}, {pipeline_mode = #tpu.pipeline_mode<synchronous>, transform_indices = @transform_1, window_bounds = array<i64: 10, 256>}, {pipeline_mode = #tpu.pipeline_mode<synchronous>, transform_indices = @transform_2, window_bounds = array<i64: 1, 256>}, {pipeline_mode = #tpu.pipeline_mode<synchronous>, transform_indices = @transform_3, window_bounds = array<i64: 1, 256>}, {pipeline_mode = #tpu.pipeline_mode<synchronous>, transform_indices = @transform_4, window_bounds = array<i64: 1, 256>}, {pipeline_mode = #tpu.pipeline_mode<synchronous>, transform_indices = @transform_5, window_bounds = array<i64: 2, 256>}]} {
    %c0 = arith.constant 0 : index
    %c0_0 = arith.constant 0 : index
    %0 = vector.load %arg1[%c0, %c0_0] : memref<2x10xbf16, #tpu.memory_space<vmem>>, vector<2x10xbf16>
    %c0_1 = arith.constant 0 : index
    %c0_2 = arith.constant 0 : index
    %1 = vector.load %arg2[%c0_1, %c0_2] : memref<10x256xbf16, #tpu.memory_space<vmem>>, vector<10x256xbf16>
    %cst = arith.constant dense<0.000000e+00> : vector<2x256xf32>
    %2 = tpu.matmul %0, %1, %cst {dimension_numbers = #tpu.dot_dimension_numbers<[1], [0], [0], [1], [0, 0, 1, 1], [], []>} : vector<2x10xbf16>, vector<10x256xbf16>, vector<2x256xf32> -> vector<2x256xf32>
    %c0_3 = arith.constant 0 : index
    %c0_4 = arith.constant 0 : index
    %3 = vector.load %arg3[%c0_3, %c0_4] : memref<1x256xf32, #tpu.memory_space<vmem>>, vector<1x256xf32>
    %4 = vector.broadcast %3 : vector<1x256xf32> to vector<2x256xf32>
    %5 = arith.addf %2, %4 : vector<2x256xf32>
    %c0_5 = arith.constant 0 : index
    %c0_6 = arith.constant 0 : index
    %6 = vector.load %arg4[%c0_5, %c0_6] : memref<1x256xf32, #tpu.memory_space<vmem>>, vector<1x256xf32>
    %c0_7 = arith.constant 0 : index
    %c0_8 = arith.constant 0 : index
    %7 = vector.load %arg5[%c0_7, %c0_8] : memref<1x256xf32, #tpu.memory_space<vmem>>, vector<1x256xf32>
    %cst_9 = arith.constant dense<0.000000e+00> : vector<256xf32>
    %8 = vector.multi_reduction <add>, %5, %cst_9 [0] : vector<2x256xf32> to vector<256xf32>
    %9 = vector.shape_cast %8 : vector<256xf32> to vector<1x256xf32>
    %cst_10 = arith.constant 2.000000e+00 : f32
    %10 = vector.broadcast %cst_10 : f32 to vector<1x256xf32>
    %11 = arith.divf %9, %10 : vector<1x256xf32>
    %12 = vector.broadcast %11 : vector<1x256xf32> to vector<2x256xf32>
    %13 = arith.subf %5, %12 : vector<2x256xf32>
    %14 = arith.mulf %13, %13 : vector<2x256xf32>
    %cst_11 = arith.constant dense<0.000000e+00> : vector<256xf32>
    %15 = vector.multi_reduction <add>, %14, %cst_11 [0] : vector<2x256xf32> to vector<256xf32>
    %16 = vector.shape_cast %15 : vector<256xf32> to vector<1x256xf32>
    %cst_12 = arith.constant 2.000000e+00 : f32
    %17 = vector.broadcast %cst_12 : f32 to vector<1x256xf32>
    %18 = arith.divf %16, %17 : vector<1x256xf32>
    %cst_13 = arith.constant 9.99999974E-6 : f32
    %19 = vector.broadcast %cst_13 : f32 to vector<1x256xf32>
    %20 = arith.addf %18, %19 : vector<1x256xf32>
    %21 = math.rsqrt %20 : vector<1x256xf32>
    %22 = arith.mulf %6, %21 : vector<1x256xf32>
    %23 = vector.broadcast %11 : vector<1x256xf32> to vector<2x256xf32>
    %24 = arith.subf %5, %23 : vector<2x256xf32>
    %25 = vector.broadcast %22 : vector<1x256xf32> to vector<2x256xf32>
    %26 = arith.mulf %24, %25 : vector<2x256xf32>
    %27 = vector.broadcast %7 : vector<1x256xf32> to vector<2x256xf32>
    %28 = arith.addf %26, %27 : vector<2x256xf32>
    %cst_14 = arith.constant 0.000000e+00 : f32
    %29 = vector.broadcast %cst_14 : f32 to vector<2x256xf32>
    %30 = arith.cmpf oge, %28, %29 : vector<2x256xf32>
    %cst_15 = arith.constant 0.00999999977 : f32
    %31 = vector.broadcast %cst_15 : f32 to vector<2x256xf32>
    %32 = arith.mulf %31, %28 : vector<2x256xf32>
    %33 = arith.select %30, %28, %32 : vector<2x256xi1>, vector<2x256xf32>
    %c0_16 = arith.constant 0 : index
    %c0_17 = arith.constant 0 : index
    %34 = vector.load %arg6[%c0_16, %c0_17] : memref<2x256xf32, #tpu.memory_space<vmem>>, vector<2x256xf32>
    tpu.vector_store %arg6[%c0_16, %c0_17], %33 {strides = array<i32>} : memref<2x256xf32, #tpu.memory_space<vmem>>, vector<2x256xf32>,
    return
  }
  func.func @transform_0(%arg0: i32) -> (i32, i32) {
    %c0_i32 = arith.constant 0 : i32
    %c0_i32_0 = arith.constant 0 : i32
    %c0_i32_1 = arith.constant 0 : i32
    return %c0_i32, %c0_i32_0 : i32, i32
  }
  func.func @transform_1(%arg0: i32) -> (i32, i32) {
    %c0_i32 = arith.constant 0 : i32
    %c0_i32_0 = arith.constant 0 : i32
    %c0_i32_1 = arith.constant 0 : i32
    return %c0_i32, %c0_i32_0 : i32, i32
  }
  func.func @transform_2(%arg0: i32) -> (i32, i32) {
    %c0_i32 = arith.constant 0 : i32
    %c0_i32_0 = arith.constant 0 : i32
    %c0_i32_1 = arith.constant 0 : i32
    return %c0_i32, %c0_i32_0 : i32, i32
  }
  func.func @transform_3(%arg0: i32) -> (i32, i32) {
    %c0_i32 = arith.constant 0 : i32
    %c0_i32_0 = arith.constant 0 : i32
    %c0_i32_1 = arith.constant 0 : i32
    return %c0_i32, %c0_i32_0 : i32, i32
  }
  func.func @transform_4(%arg0: i32) -> (i32, i32) {
    %c0_i32 = arith.constant 0 : i32
    %c0_i32_0 = arith.constant 0 : i32
    %c0_i32_1 = arith.constant 0 : i32
    return %c0_i32, %c0_i32_0 : i32, i32
  }
  func.func @transform_5(%arg0: i32) -> (i32, i32) {
    %c0_i32 = arith.constant 0 : i32
    %c0_i32_0 = arith.constant 0 : i32
    %c0_i32_1 = arith.constant 0 : i32
    return %c0_i32, %c0_i32_0 : i32, i32
  }
}

module attributes {stable_mosaic.version = 11 : i64} {
  func.func @kernel(%arg0: i32, %arg1: memref<8x576xbf16, #tpu.memory_space<vmem>>, %arg2: memref<576x64xbf16, #tpu.memory_space<vmem>>, %arg3: memref<1x64xf32, #tpu.memory_space<vmem>>, %arg4: memref<1x64xf32, #tpu.memory_space<vmem>>, %arg5: memref<8x64xf32, #tpu.memory_space<vmem>>) attributes {dimension_semantics = [#tpu.dimension_semantics<arbitrary>], iteration_bounds = array<i64: 1>, scalar_prefetch = 0 : i64, scratch_operands = 0 : i64, tpu.core_type = #tpu.core_type<tc>, window_params = [{pipeline_mode = #tpu.pipeline_mode<synchronous>, transform_indices = @transform_0, window_bounds = array<i64: 8, 576>}, {pipeline_mode = #tpu.pipeline_mode<synchronous>, transform_indices = @transform_1, window_bounds = array<i64: 576, 64>}, {pipeline_mode = #tpu.pipeline_mode<synchronous>, transform_indices = @transform_2, window_bounds = array<i64: 1, 64>}, {pipeline_mode = #tpu.pipeline_mode<synchronous>, transform_indices = @transform_3, window_bounds = array<i64: 1, 64>}, {pipeline_mode = #tpu.pipeline_mode<synchronous>, transform_indices = @transform_4, window_bounds = array<i64: 8, 64>}]} {
    %c0 = arith.constant 0 : index
    %c0_0 = arith.constant 0 : index
    %0 = vector.load %arg1[%c0, %c0_0] : memref<8x576xbf16, #tpu.memory_space<vmem>>, vector<8x576xbf16>
    %c0_1 = arith.constant 0 : index
    %c0_2 = arith.constant 0 : index
    %1 = vector.load %arg2[%c0_1, %c0_2] : memref<576x64xbf16, #tpu.memory_space<vmem>>, vector<576x64xbf16>
    %cst = arith.constant dense<0.000000e+00> : vector<8x64xf32>
    %2 = tpu.matmul %0, %1, %cst {dimension_numbers = #tpu.dot_dimension_numbers<[1], [0], [0], [1], [0, 0, 1, 1], [], []>} : vector<8x576xbf16>, vector<576x64xbf16>, vector<8x64xf32> -> vector<8x64xf32>
    %c0_3 = arith.constant 0 : index
    %c0_4 = arith.constant 0 : index
    %3 = vector.load %arg3[%c0_3, %c0_4] : memref<1x64xf32, #tpu.memory_space<vmem>>, vector<1x64xf32>
    %c0_5 = arith.constant 0 : index
    %c0_6 = arith.constant 0 : index
    %4 = vector.load %arg4[%c0_5, %c0_6] : memref<1x64xf32, #tpu.memory_space<vmem>>, vector<1x64xf32>
    %cst_7 = arith.constant dense<0.000000e+00> : vector<64xf32>
    %5 = vector.multi_reduction <add>, %2, %cst_7 [0] : vector<8x64xf32> to vector<64xf32>
    %6 = vector.shape_cast %5 : vector<64xf32> to vector<1x64xf32>
    %cst_8 = arith.constant 8.000000e+00 : f32
    %7 = vector.broadcast %cst_8 : f32 to vector<1x64xf32>
    %8 = arith.divf %6, %7 : vector<1x64xf32>
    %9 = vector.broadcast %8 : vector<1x64xf32> to vector<8x64xf32>
    %10 = arith.subf %2, %9 : vector<8x64xf32>
    %11 = arith.mulf %10, %10 : vector<8x64xf32>
    %cst_9 = arith.constant dense<0.000000e+00> : vector<64xf32>
    %12 = vector.multi_reduction <add>, %11, %cst_9 [0] : vector<8x64xf32> to vector<64xf32>
    %13 = vector.shape_cast %12 : vector<64xf32> to vector<1x64xf32>
    %cst_10 = arith.constant 8.000000e+00 : f32
    %14 = vector.broadcast %cst_10 : f32 to vector<1x64xf32>
    %15 = arith.divf %13, %14 : vector<1x64xf32>
    %cst_11 = arith.constant 9.99999974E-6 : f32
    %16 = vector.broadcast %cst_11 : f32 to vector<1x64xf32>
    %17 = arith.addf %15, %16 : vector<1x64xf32>
    %18 = math.rsqrt %17 : vector<1x64xf32>
    %19 = arith.mulf %3, %18 : vector<1x64xf32>
    %20 = vector.broadcast %8 : vector<1x64xf32> to vector<8x64xf32>
    %21 = arith.subf %2, %20 : vector<8x64xf32>
    %22 = vector.broadcast %19 : vector<1x64xf32> to vector<8x64xf32>
    %23 = arith.mulf %21, %22 : vector<8x64xf32>
    %24 = vector.broadcast %4 : vector<1x64xf32> to vector<8x64xf32>
    %25 = arith.addf %23, %24 : vector<8x64xf32>
    %cst_12 = arith.constant 0.000000e+00 : f32
    %26 = vector.broadcast %cst_12 : f32 to vector<8x64xf32>
    %27 = arith.cmpf oge, %25, %26 : vector<8x64xf32>
    %cst_13 = arith.constant 0.00999999977 : f32
    %28 = vector.broadcast %cst_13 : f32 to vector<8x64xf32>
    %29 = arith.mulf %28, %25 : vector<8x64xf32>
    %30 = arith.select %27, %25, %29 : vector<8x64xi1>, vector<8x64xf32>
    %c0_14 = arith.constant 0 : index
    %c0_15 = arith.constant 0 : index
    %31 = vector.load %arg5[%c0_14, %c0_15] : memref<8x64xf32, #tpu.memory_space<vmem>>, vector<8x64xf32>
    tpu.vector_store %arg5[%c0_14, %c0_15], %30 {strides = array<i32>} : memref<8x64xf32, #tpu.memory_space<vmem>>, vector<8x64xf32>,
    return
  }
  func.func @transform_0(%arg0: i32) -> (i32, i32) {
    %c0_i32 = arith.constant 0 : i32
    %c0_i32_0 = arith.constant 0 : i32
    %c0_i32_1 = arith.constant 0 : i32
    return %c0_i32, %c0_i32_0 : i32, i32
  }
  func.func @transform_1(%arg0: i32) -> (i32, i32) {
    %c0_i32 = arith.constant 0 : i32
    %c0_i32_0 = arith.constant 0 : i32
    %c0_i32_1 = arith.constant 0 : i32
    return %c0_i32, %c0_i32_0 : i32, i32
  }
  func.func @transform_2(%arg0: i32) -> (i32, i32) {
    %c0_i32 = arith.constant 0 : i32
    %c0_i32_0 = arith.constant 0 : i32
    %c0_i32_1 = arith.constant 0 : i32
    return %c0_i32, %c0_i32_0 : i32, i32
  }
  func.func @transform_3(%arg0: i32) -> (i32, i32) {
    %c0_i32 = arith.constant 0 : i32
    %c0_i32_0 = arith.constant 0 : i32
    %c0_i32_1 = arith.constant 0 : i32
    return %c0_i32, %c0_i32_0 : i32, i32
  }
  func.func @transform_4(%arg0: i32) -> (i32, i32) {
    %c0_i32 = arith.constant 0 : i32
    %c0_i32_0 = arith.constant 0 : i32
    %c0_i32_1 = arith.constant 0 : i32
    return %c0_i32, %c0_i32_0 : i32, i32
  }
}

module attributes {stable_mosaic.version = 11 : i64} {
  func.func @_resblock_kernel(%arg0: i32, %arg1: memref<8x576xbf16, #tpu.memory_space<vmem>>, %arg2: memref<576x64xbf16, #tpu.memory_space<vmem>>, %arg3: memref<1x64xf32, #tpu.memory_space<vmem>>, %arg4: memref<1x64xf32, #tpu.memory_space<vmem>>, %arg5: memref<64x64xbf16, #tpu.memory_space<vmem>>, %arg6: memref<1x64xf32, #tpu.memory_space<vmem>>, %arg7: memref<1x64xf32, #tpu.memory_space<vmem>>, %arg8: memref<8x64xf32, #tpu.memory_space<vmem>>, %arg9: memref<8x64xf32, #tpu.memory_space<vmem>>) attributes {dimension_semantics = [#tpu.dimension_semantics<arbitrary>], iteration_bounds = array<i64: 1>, scalar_prefetch = 0 : i64, scratch_operands = 0 : i64, tpu.core_type = #tpu.core_type<tc>, window_params = [{pipeline_mode = #tpu.pipeline_mode<synchronous>, transform_indices = @transform_0, window_bounds = array<i64: 8, 576>}, {pipeline_mode = #tpu.pipeline_mode<synchronous>, transform_indices = @transform_1, window_bounds = array<i64: 576, 64>}, {pipeline_mode = #tpu.pipeline_mode<synchronous>, transform_indices = @transform_2, window_bounds = array<i64: 1, 64>}, {pipeline_mode = #tpu.pipeline_mode<synchronous>, transform_indices = @transform_3, window_bounds = array<i64: 1, 64>}, {pipeline_mode = #tpu.pipeline_mode<synchronous>, transform_indices = @transform_4, window_bounds = array<i64: 64, 64>}, {pipeline_mode = #tpu.pipeline_mode<synchronous>, transform_indices = @transform_5, window_bounds = array<i64: 1, 64>}, {pipeline_mode = #tpu.pipeline_mode<synchronous>, transform_indices = @transform_6, window_bounds = array<i64: 1, 64>}, {pipeline_mode = #tpu.pipeline_mode<synchronous>, transform_indices = @transform_7, window_bounds = array<i64: 8, 64>}, {pipeline_mode = #tpu.pipeline_mode<synchronous>, transform_indices = @transform_8, window_bounds = array<i64: 8, 64>}]} {
    %c0 = arith.constant 0 : index
    %c0_0 = arith.constant 0 : index
    %0 = vector.load %arg1[%c0, %c0_0] : memref<8x576xbf16, #tpu.memory_space<vmem>>, vector<8x576xbf16>
    %c0_1 = arith.constant 0 : index
    %c0_2 = arith.constant 0 : index
    %1 = vector.load %arg2[%c0_1, %c0_2] : memref<576x64xbf16, #tpu.memory_space<vmem>>, vector<576x64xbf16>
    %cst = arith.constant dense<0.000000e+00> : vector<8x64xf32>
    %2 = tpu.matmul %0, %1, %cst {dimension_numbers = #tpu.dot_dimension_numbers<[1], [0], [0], [1], [0, 0, 1, 1], [], []>} : vector<8x576xbf16>, vector<576x64xbf16>, vector<8x64xf32> -> vector<8x64xf32>
    %c0_3 = arith.constant 0 : index
    %c0_4 = arith.constant 0 : index
    %3 = vector.load %arg3[%c0_3, %c0_4] : memref<1x64xf32, #tpu.memory_space<vmem>>, vector<1x64xf32>
    %c0_5 = arith.constant 0 : index
    %c0_6 = arith.constant 0 : index
    %4 = vector.load %arg4[%c0_5, %c0_6] : memref<1x64xf32, #tpu.memory_space<vmem>>, vector<1x64xf32>
    %cst_7 = arith.constant dense<0.000000e+00> : vector<64xf32>
    %5 = vector.multi_reduction <add>, %2, %cst_7 [0] : vector<8x64xf32> to vector<64xf32>
    %6 = vector.shape_cast %5 : vector<64xf32> to vector<1x64xf32>
    %cst_8 = arith.constant 8.000000e+00 : f32
    %7 = vector.broadcast %cst_8 : f32 to vector<1x64xf32>
    %8 = arith.divf %6, %7 : vector<1x64xf32>
    %9 = vector.broadcast %8 : vector<1x64xf32> to vector<8x64xf32>
    %10 = arith.subf %2, %9 : vector<8x64xf32>
    %11 = arith.mulf %10, %10 : vector<8x64xf32>
    %cst_9 = arith.constant dense<0.000000e+00> : vector<64xf32>
    %12 = vector.multi_reduction <add>, %11, %cst_9 [0] : vector<8x64xf32> to vector<64xf32>
    %13 = vector.shape_cast %12 : vector<64xf32> to vector<1x64xf32>
    %cst_10 = arith.constant 8.000000e+00 : f32
    %14 = vector.broadcast %cst_10 : f32 to vector<1x64xf32>
    %15 = arith.divf %13, %14 : vector<1x64xf32>
    %cst_11 = arith.constant 9.99999974E-6 : f32
    %16 = vector.broadcast %cst_11 : f32 to vector<1x64xf32>
    %17 = arith.addf %15, %16 : vector<1x64xf32>
    %18 = math.rsqrt %17 : vector<1x64xf32>
    %19 = arith.mulf %3, %18 : vector<1x64xf32>
    %20 = vector.broadcast %8 : vector<1x64xf32> to vector<8x64xf32>
    %21 = arith.subf %2, %20 : vector<8x64xf32>
    %22 = vector.broadcast %19 : vector<1x64xf32> to vector<8x64xf32>
    %23 = arith.mulf %21, %22 : vector<8x64xf32>
    %24 = vector.broadcast %4 : vector<1x64xf32> to vector<8x64xf32>
    %25 = arith.addf %23, %24 : vector<8x64xf32>
    %cst_12 = arith.constant 0.000000e+00 : f32
    %26 = vector.broadcast %cst_12 : f32 to vector<8x64xf32>
    %27 = arith.cmpf oge, %25, %26 : vector<8x64xf32>
    %cst_13 = arith.constant 0.00999999977 : f32
    %28 = vector.broadcast %cst_13 : f32 to vector<8x64xf32>
    %29 = arith.mulf %28, %25 : vector<8x64xf32>
    %30 = arith.select %27, %25, %29 : vector<8x64xi1>, vector<8x64xf32>
    %31 = arith.truncf %30 : vector<8x64xf32> to vector<8x64xbf16>
    %c0_14 = arith.constant 0 : index
    %c0_15 = arith.constant 0 : index
    %32 = vector.load %arg5[%c0_14, %c0_15] : memref<64x64xbf16, #tpu.memory_space<vmem>>, vector<64x64xbf16>
    %cst_16 = arith.constant dense<0.000000e+00> : vector<8x64xf32>
    %33 = tpu.matmul %31, %32, %cst_16 {dimension_numbers = #tpu.dot_dimension_numbers<[1], [0], [0], [1], [0, 0, 1, 1], [], []>} : vector<8x64xbf16>, vector<64x64xbf16>, vector<8x64xf32> -> vector<8x64xf32>
    %c0_17 = arith.constant 0 : index
    %c0_18 = arith.constant 0 : index
    %34 = vector.load %arg6[%c0_17, %c0_18] : memref<1x64xf32, #tpu.memory_space<vmem>>, vector<1x64xf32>
    %c0_19 = arith.constant 0 : index
    %c0_20 = arith.constant 0 : index
    %35 = vector.load %arg7[%c0_19, %c0_20] : memref<1x64xf32, #tpu.memory_space<vmem>>, vector<1x64xf32>
    %cst_21 = arith.constant dense<0.000000e+00> : vector<64xf32>
    %36 = vector.multi_reduction <add>, %33, %cst_21 [0] : vector<8x64xf32> to vector<64xf32>
    %37 = vector.shape_cast %36 : vector<64xf32> to vector<1x64xf32>
    %cst_22 = arith.constant 8.000000e+00 : f32
    %38 = vector.broadcast %cst_22 : f32 to vector<1x64xf32>
    %39 = arith.divf %37, %38 : vector<1x64xf32>
    %40 = vector.broadcast %39 : vector<1x64xf32> to vector<8x64xf32>
    %41 = arith.subf %33, %40 : vector<8x64xf32>
    %42 = arith.mulf %41, %41 : vector<8x64xf32>
    %cst_23 = arith.constant dense<0.000000e+00> : vector<64xf32>
    %43 = vector.multi_reduction <add>, %42, %cst_23 [0] : vector<8x64xf32> to vector<64xf32>
    %44 = vector.shape_cast %43 : vector<64xf32> to vector<1x64xf32>
    %cst_24 = arith.constant 8.000000e+00 : f32
    %45 = vector.broadcast %cst_24 : f32 to vector<1x64xf32>
    %46 = arith.divf %44, %45 : vector<1x64xf32>
    %cst_25 = arith.constant 9.99999974E-6 : f32
    %47 = vector.broadcast %cst_25 : f32 to vector<1x64xf32>
    %48 = arith.addf %46, %47 : vector<1x64xf32>
    %49 = math.rsqrt %48 : vector<1x64xf32>
    %50 = arith.mulf %34, %49 : vector<1x64xf32>
    %51 = vector.broadcast %39 : vector<1x64xf32> to vector<8x64xf32>
    %52 = arith.subf %33, %51 : vector<8x64xf32>
    %53 = vector.broadcast %50 : vector<1x64xf32> to vector<8x64xf32>
    %54 = arith.mulf %52, %53 : vector<8x64xf32>
    %55 = vector.broadcast %35 : vector<1x64xf32> to vector<8x64xf32>
    %56 = arith.addf %54, %55 : vector<8x64xf32>
    %c0_26 = arith.constant 0 : index
    %c0_27 = arith.constant 0 : index
    %57 = vector.load %arg8[%c0_26, %c0_27] : memref<8x64xf32, #tpu.memory_space<vmem>>, vector<8x64xf32>
    %58 = arith.addf %56, %57 : vector<8x64xf32>
    %cst_28 = arith.constant 0.000000e+00 : f32
    %59 = vector.broadcast %cst_28 : f32 to vector<8x64xf32>
    %60 = arith.cmpf oge, %58, %59 : vector<8x64xf32>
    %cst_29 = arith.constant 0.00999999977 : f32
    %61 = vector.broadcast %cst_29 : f32 to vector<8x64xf32>
    %62 = arith.mulf %61, %58 : vector<8x64xf32>
    %63 = arith.select %60, %58, %62 : vector<8x64xi1>, vector<8x64xf32>
    %c0_30 = arith.constant 0 : index
    %c0_31 = arith.constant 0 : index
    %64 = vector.load %arg9[%c0_30, %c0_31] : memref<8x64xf32, #tpu.memory_space<vmem>>, vector<8x64xf32>
    tpu.vector_store %arg9[%c0_30, %c0_31], %63 {strides = array<i32>} : memref<8x64xf32, #tpu.memory_space<vmem>>, vector<8x64xf32>,
    return
  }
  func.func @transform_0(%arg0: i32) -> (i32, i32) {
    %c0_i32 = arith.constant 0 : i32
    %c0_i32_0 = arith.constant 0 : i32
    %c0_i32_1 = arith.constant 0 : i32
    return %c0_i32, %c0_i32_0 : i32, i32
  }
  func.func @transform_1(%arg0: i32) -> (i32, i32) {
    %c0_i32 = arith.constant 0 : i32
    %c0_i32_0 = arith.constant 0 : i32
    %c0_i32_1 = arith.constant 0 : i32
    return %c0_i32, %c0_i32_0 : i32, i32
  }
  func.func @transform_2(%arg0: i32) -> (i32, i32) {
    %c0_i32 = arith.constant 0 : i32
    %c0_i32_0 = arith.constant 0 : i32
    %c0_i32_1 = arith.constant 0 : i32
    return %c0_i32, %c0_i32_0 : i32, i32
  }
  func.func @transform_3(%arg0: i32) -> (i32, i32) {
    %c0_i32 = arith.constant 0 : i32
    %c0_i32_0 = arith.constant 0 : i32
    %c0_i32_1 = arith.constant 0 : i32
    return %c0_i32, %c0_i32_0 : i32, i32
  }
  func.func @transform_4(%arg0: i32) -> (i32, i32) {
    %c0_i32 = arith.constant 0 : i32
    %c0_i32_0 = arith.constant 0 : i32
    %c0_i32_1 = arith.constant 0 : i32
    return %c0_i32, %c0_i32_0 : i32, i32
  }
  func.func @transform_5(%arg0: i32) -> (i32, i32) {
    %c0_i32 = arith.constant 0 : i32
    %c0_i32_0 = arith.constant 0 : i32
    %c0_i32_1 = arith.constant 0 : i32
    return %c0_i32, %c0_i32_0 : i32, i32
  }
  func.func @transform_6(%arg0: i32) -> (i32, i32) {
    %c0_i32 = arith.constant 0 : i32
    %c0_i32_0 = arith.constant 0 : i32
    %c0_i32_1 = arith.constant 0 : i32
    return %c0_i32, %c0_i32_0 : i32, i32
  }
  func.func @transform_7(%arg0: i32) -> (i32, i32) {
    %c0_i32 = arith.constant 0 : i32
    %c0_i32_0 = arith.constant 0 : i32
    %c0_i32_1 = arith.constant 0 : i32
    return %c0_i32, %c0_i32_0 : i32, i32
  }
  func.func @transform_8(%arg0: i32) -> (i32, i32) {
    %c0_i32 = arith.constant 0 : i32
    %c0_i32_0 = arith.constant 0 : i32
    %c0_i32_1 = arith.constant 0 : i32
    return %c0_i32, %c0_i32_0 : i32, i32
  }
}

module attributes {stable_mosaic.version = 11 : i64} {
  func.func @kernel(%arg0: i32, %arg1: memref<8x576xbf16, #tpu.memory_space<vmem>>, %arg2: memref<576x128xbf16, #tpu.memory_space<vmem>>, %arg3: memref<1x32xf32, #tpu.memory_space<vmem>>, %arg4: memref<1x32xf32, #tpu.memory_space<vmem>>, %arg5: memref<8x128xf32, #tpu.memory_space<vmem>>) attributes {dimension_semantics = [#tpu.dimension_semantics<arbitrary>], iteration_bounds = array<i64: 1>, scalar_prefetch = 0 : i64, scratch_operands = 0 : i64, tpu.core_type = #tpu.core_type<tc>, window_params = [{pipeline_mode = #tpu.pipeline_mode<synchronous>, transform_indices = @transform_0, window_bounds = array<i64: 8, 576>}, {pipeline_mode = #tpu.pipeline_mode<synchronous>, transform_indices = @transform_1, window_bounds = array<i64: 576, 128>}, {pipeline_mode = #tpu.pipeline_mode<synchronous>, transform_indices = @transform_2, window_bounds = array<i64: 1, 32>}, {pipeline_mode = #tpu.pipeline_mode<synchronous>, transform_indices = @transform_3, window_bounds = array<i64: 1, 32>}, {pipeline_mode = #tpu.pipeline_mode<synchronous>, transform_indices = @transform_4, window_bounds = array<i64: 8, 128>}]} {
    %c0 = arith.constant 0 : index
    %c0_0 = arith.constant 0 : index
    %0 = vector.load %arg1[%c0, %c0_0] : memref<8x576xbf16, #tpu.memory_space<vmem>>, vector<8x576xbf16>
    %c0_1 = arith.constant 0 : index
    %c0_2 = arith.constant 0 : index
    %1 = vector.load %arg2[%c0_1, %c0_2] : memref<576x128xbf16, #tpu.memory_space<vmem>>, vector<576x128xbf16>
    %cst = arith.constant dense<0.000000e+00> : vector<8x128xf32>
    %2 = tpu.matmul %0, %1, %cst {dimension_numbers = #tpu.dot_dimension_numbers<[1], [0], [0], [1], [0, 0, 1, 1], [], []>} : vector<8x576xbf16>, vector<576x128xbf16>, vector<8x128xf32> -> vector<8x128xf32>
    %3 = vector.extract_strided_slice %2 {offsets = [0, 0], sizes = [8, 32], strides = [1, 1]} : vector<8x128xf32> to vector<8x32xf32>
    %4 = vector.extract_strided_slice %2 {offsets = [0, 32], sizes = [8, 32], strides = [1, 1]} : vector<8x128xf32> to vector<8x32xf32>
    %5 = vector.extract_strided_slice %2 {offsets = [0, 64], sizes = [8, 32], strides = [1, 1]} : vector<8x128xf32> to vector<8x32xf32>
    %6 = vector.extract_strided_slice %2 {offsets = [0, 96], sizes = [8, 32], strides = [1, 1]} : vector<8x128xf32> to vector<8x32xf32>
    %cst_3 = arith.constant dense<0.000000e+00> : vector<32xf32>
    %7 = vector.multi_reduction <add>, %3, %cst_3 [0] : vector<8x32xf32> to vector<32xf32>
    %8 = vector.shape_cast %7 : vector<32xf32> to vector<1x32xf32>
    %cst_4 = arith.constant 8.000000e+00 : f32
    %9 = vector.broadcast %cst_4 : f32 to vector<1x32xf32>
    %10 = arith.divf %8, %9 : vector<1x32xf32>
    %cst_5 = arith.constant dense<0.000000e+00> : vector<32xf32>
    %11 = vector.multi_reduction <add>, %4, %cst_5 [0] : vector<8x32xf32> to vector<32xf32>
    %12 = vector.shape_cast %11 : vector<32xf32> to vector<1x32xf32>
    %cst_6 = arith.constant 8.000000e+00 : f32
    %13 = vector.broadcast %cst_6 : f32 to vector<1x32xf32>
    %14 = arith.divf %12, %13 : vector<1x32xf32>
    %15 = arith.addf %10, %14 : vector<1x32xf32>
    %cst_7 = arith.constant dense<0.000000e+00> : vector<32xf32>
    %16 = vector.multi_reduction <add>, %5, %cst_7 [0] : vector<8x32xf32> to vector<32xf32>
    %17 = vector.shape_cast %16 : vector<32xf32> to vector<1x32xf32>
    %cst_8 = arith.constant 8.000000e+00 : f32
    %18 = vector.broadcast %cst_8 : f32 to vector<1x32xf32>
    %19 = arith.divf %17, %18 : vector<1x32xf32>
    %20 = arith.addf %15, %19 : vector<1x32xf32>
    %cst_9 = arith.constant dense<0.000000e+00> : vector<32xf32>
    %21 = vector.multi_reduction <add>, %6, %cst_9 [0] : vector<8x32xf32> to vector<32xf32>
    %22 = vector.shape_cast %21 : vector<32xf32> to vector<1x32xf32>
    %cst_10 = arith.constant 8.000000e+00 : f32
    %23 = vector.broadcast %cst_10 : f32 to vector<1x32xf32>
    %24 = arith.divf %22, %23 : vector<1x32xf32>
    %25 = arith.addf %20, %24 : vector<1x32xf32>
    %cst_11 = arith.constant 2.500000e-01 : f32
    %26 = vector.broadcast %cst_11 : f32 to vector<1x32xf32>
    %27 = arith.mulf %25, %26 : vector<1x32xf32>
    %28 = vector.broadcast %27 : vector<1x32xf32> to vector<8x32xf32>
    %29 = arith.subf %3, %28 : vector<8x32xf32>
    %30 = arith.mulf %29, %29 : vector<8x32xf32>
    %cst_12 = arith.constant dense<0.000000e+00> : vector<32xf32>
    %31 = vector.multi_reduction <add>, %30, %cst_12 [0] : vector<8x32xf32> to vector<32xf32>
    %32 = vector.shape_cast %31 : vector<32xf32> to vector<1x32xf32>
    %cst_13 = arith.constant 8.000000e+00 : f32
    %33 = vector.broadcast %cst_13 : f32 to vector<1x32xf32>
    %34 = arith.divf %32, %33 : vector<1x32xf32>
    %35 = vector.broadcast %27 : vector<1x32xf32> to vector<8x32xf32>
    %36 = arith.subf %4, %35 : vector<8x32xf32>
    %37 = arith.mulf %36, %36 : vector<8x32xf32>
    %cst_14 = arith.constant dense<0.000000e+00> : vector<32xf32>
    %38 = vector.multi_reduction <add>, %37, %cst_14 [0] : vector<8x32xf32> to vector<32xf32>
    %39 = vector.shape_cast %38 : vector<32xf32> to vector<1x32xf32>
    %cst_15 = arith.constant 8.000000e+00 : f32
    %40 = vector.broadcast %cst_15 : f32 to vector<1x32xf32>
    %41 = arith.divf %39, %40 : vector<1x32xf32>
    %42 = arith.addf %34, %41 : vector<1x32xf32>
    %43 = vector.broadcast %27 : vector<1x32xf32> to vector<8x32xf32>
    %44 = arith.subf %5, %43 : vector<8x32xf32>
    %45 = arith.mulf %44, %44 : vector<8x32xf32>
    %cst_16 = arith.constant dense<0.000000e+00> : vector<32xf32>
    %46 = vector.multi_reduction <add>, %45, %cst_16 [0] : vector<8x32xf32> to vector<32xf32>
    %47 = vector.shape_cast %46 : vector<32xf32> to vector<1x32xf32>
    %cst_17 = arith.constant 8.000000e+00 : f32
    %48 = vector.broadcast %cst_17 : f32 to vector<1x32xf32>
    %49 = arith.divf %47, %48 : vector<1x32xf32>
    %50 = arith.addf %42, %49 : vector<1x32xf32>
    %51 = vector.broadcast %27 : vector<1x32xf32> to vector<8x32xf32>
    %52 = arith.subf %6, %51 : vector<8x32xf32>
    %53 = arith.mulf %52, %52 : vector<8x32xf32>
    %cst_18 = arith.constant dense<0.000000e+00> : vector<32xf32>
    %54 = vector.multi_reduction <add>, %53, %cst_18 [0] : vector<8x32xf32> to vector<32xf32>
    %55 = vector.shape_cast %54 : vector<32xf32> to vector<1x32xf32>
    %cst_19 = arith.constant 8.000000e+00 : f32
    %56 = vector.broadcast %cst_19 : f32 to vector<1x32xf32>
    %57 = arith.divf %55, %56 : vector<1x32xf32>
    %58 = arith.addf %50, %57 : vector<1x32xf32>
    %cst_20 = arith.constant 2.500000e-01 : f32
    %59 = vector.broadcast %cst_20 : f32 to vector<1x32xf32>
    %60 = arith.mulf %58, %59 : vector<1x32xf32>
    %c0_21 = arith.constant 0 : index
    %c0_22 = arith.constant 0 : index
    %61 = vector.load %arg3[%c0_21, %c0_22] : memref<1x32xf32, #tpu.memory_space<vmem>>, vector<1x32xf32>
    %cst_23 = arith.constant 9.99999974E-6 : f32
    %62 = vector.broadcast %cst_23 : f32 to vector<1x32xf32>
    %63 = arith.addf %60, %62 : vector<1x32xf32>
    %64 = math.rsqrt %63 : vector<1x32xf32>
    %65 = arith.mulf %61, %64 : vector<1x32xf32>
    %c0_24 = arith.constant 0 : index
    %c0_25 = arith.constant 0 : index
    %66 = vector.load %arg4[%c0_24, %c0_25] : memref<1x32xf32, #tpu.memory_space<vmem>>, vector<1x32xf32>
    %67 = arith.mulf %27, %65 : vector<1x32xf32>
    %68 = arith.subf %66, %67 : vector<1x32xf32>
    %69 = vector.broadcast %65 : vector<1x32xf32> to vector<8x32xf32>
    %70 = arith.mulf %3, %69 : vector<8x32xf32>
    %71 = vector.broadcast %68 : vector<1x32xf32> to vector<8x32xf32>
    %72 = arith.addf %70, %71 : vector<8x32xf32>
    %cst_26 = arith.constant 0.000000e+00 : f32
    %73 = vector.broadcast %cst_26 : f32 to vector<8x32xf32>
    %74 = arith.cmpf oge, %72, %73 : vector<8x32xf32>
    %cst_27 = arith.constant 0.00999999977 : f32
    %75 = vector.broadcast %cst_27 : f32 to vector<8x32xf32>
    %76 = arith.mulf %75, %72 : vector<8x32xf32>
    %77 = arith.select %74, %72, %76 : vector<8x32xi1>, vector<8x32xf32>
    %c0_28 = arith.constant 0 : index
    %c0_29 = arith.constant 0 : index
    %78 = vector.load %arg5[%c0_28, %c0_29] : memref<8x128xf32, #tpu.memory_space<vmem>>, vector<8x32xf32>
    tpu.vector_store %arg5[%c0_28, %c0_29], %77 {strides = array<i32>} : memref<8x128xf32, #tpu.memory_space<vmem>>, vector<8x32xf32>,
    %79 = vector.broadcast %65 : vector<1x32xf32> to vector<8x32xf32>
    %80 = arith.mulf %4, %79 : vector<8x32xf32>
    %81 = vector.broadcast %68 : vector<1x32xf32> to vector<8x32xf32>
    %82 = arith.addf %80, %81 : vector<8x32xf32>
    %cst_30 = arith.constant 0.000000e+00 : f32
    %83 = vector.broadcast %cst_30 : f32 to vector<8x32xf32>
    %84 = arith.cmpf oge, %82, %83 : vector<8x32xf32>
    %cst_31 = arith.constant 0.00999999977 : f32
    %85 = vector.broadcast %cst_31 : f32 to vector<8x32xf32>
    %86 = arith.mulf %85, %82 : vector<8x32xf32>
    %87 = arith.select %84, %82, %86 : vector<8x32xi1>, vector<8x32xf32>
    %c0_32 = arith.constant 0 : index
    %c32 = arith.constant 32 : index
    %88 = vector.load %arg5[%c0_32, %c32] : memref<8x128xf32, #tpu.memory_space<vmem>>, vector<8x32xf32>
    tpu.vector_store %arg5[%c0_32, %c32], %87 {strides = array<i32>} : memref<8x128xf32, #tpu.memory_space<vmem>>, vector<8x32xf32>,
    %89 = vector.broadcast %65 : vector<1x32xf32> to vector<8x32xf32>
    %90 = arith.mulf %5, %89 : vector<8x32xf32>
    %91 = vector.broadcast %68 : vector<1x32xf32> to vector<8x32xf32>
    %92 = arith.addf %90, %91 : vector<8x32xf32>
    %cst_33 = arith.constant 0.000000e+00 : f32
    %93 = vector.broadcast %cst_33 : f32 to vector<8x32xf32>
    %94 = arith.cmpf oge, %92, %93 : vector<8x32xf32>
    %cst_34 = arith.constant 0.00999999977 : f32
    %95 = vector.broadcast %cst_34 : f32 to vector<8x32xf32>
    %96 = arith.mulf %95, %92 : vector<8x32xf32>
    %97 = arith.select %94, %92, %96 : vector<8x32xi1>, vector<8x32xf32>
    %c0_35 = arith.constant 0 : index
    %c64 = arith.constant 64 : index
    %98 = vector.load %arg5[%c0_35, %c64] : memref<8x128xf32, #tpu.memory_space<vmem>>, vector<8x32xf32>
    tpu.vector_store %arg5[%c0_35, %c64], %97 {strides = array<i32>} : memref<8x128xf32, #tpu.memory_space<vmem>>, vector<8x32xf32>,
    %99 = vector.broadcast %65 : vector<1x32xf32> to vector<8x32xf32>
    %100 = arith.mulf %6, %99 : vector<8x32xf32>
    %101 = vector.broadcast %68 : vector<1x32xf32> to vector<8x32xf32>
    %102 = arith.addf %100, %101 : vector<8x32xf32>
    %cst_36 = arith.constant 0.000000e+00 : f32
    %103 = vector.broadcast %cst_36 : f32 to vector<8x32xf32>
    %104 = arith.cmpf oge, %102, %103 : vector<8x32xf32>
    %cst_37 = arith.constant 0.00999999977 : f32
    %105 = vector.broadcast %cst_37 : f32 to vector<8x32xf32>
    %106 = arith.mulf %105, %102 : vector<8x32xf32>
    %107 = arith.select %104, %102, %106 : vector<8x32xi1>, vector<8x32xf32>
    %c0_38 = arith.constant 0 : index
    %c96 = arith.constant 96 : index
    %108 = vector.load %arg5[%c0_38, %c96] : memref<8x128xf32, #tpu.memory_space<vmem>>, vector<8x32xf32>
    tpu.vector_store %arg5[%c0_38, %c96], %107 {strides = array<i32>} : memref<8x128xf32, #tpu.memory_space<vmem>>, vector<8x32xf32>,
    return
  }
  func.func @transform_0(%arg0: i32) -> (i32, i32) {
    %c0_i32 = arith.constant 0 : i32
    %c0_i32_0 = arith.constant 0 : i32
    %c0_i32_1 = arith.constant 0 : i32
    return %c0_i32, %c0_i32_0 : i32, i32
  }
  func.func @transform_1(%arg0: i32) -> (i32, i32) {
    %c0_i32 = arith.constant 0 : i32
    %c0_i32_0 = arith.constant 0 : i32
    %c0_i32_1 = arith.constant 0 : i32
    return %c0_i32, %c0_i32_0 : i32, i32
  }
  func.func @transform_2(%arg0: i32) -> (i32, i32) {
    %c0_i32 = arith.constant 0 : i32
    %c0_i32_0 = arith.constant 0 : i32
    %c0_i32_1 = arith.constant 0 : i32
    return %c0_i32, %c0_i32_0 : i32, i32
  }
  func.func @transform_3(%arg0: i32) -> (i32, i32) {
    %c0_i32 = arith.constant 0 : i32
    %c0_i32_0 = arith.constant 0 : i32
    %c0_i32_1 = arith.constant 0 : i32
    return %c0_i32, %c0_i32_0 : i32, i32
  }
  func.func @transform_4(%arg0: i32) -> (i32, i32) {
    %c0_i32 = arith.constant 0 : i32
    %c0_i32_0 = arith.constant 0 : i32
    %c0_i32_1 = arith.constant 0 : i32
    return %c0_i32, %c0_i32_0 : i32, i32
  }
}

module attributes {stable_mosaic.version = 11 : i64} {
  func.func @kernel(%arg0: i32, %arg1: memref<32x288xbf16, #tpu.memory_space<vmem>>, %arg2: memref<288x64xbf16, #tpu.memory_space<vmem>>, %arg3: memref<1x16xf32, #tpu.memory_space<vmem>>, %arg4: memref<1x16xf32, #tpu.memory_space<vmem>>, %arg5: memref<32x64xf32, #tpu.memory_space<vmem>>) attributes {dimension_semantics = [#tpu.dimension_semantics<arbitrary>], iteration_bounds = array<i64: 1>, scalar_prefetch = 0 : i64, scratch_operands = 0 : i64, tpu.core_type = #tpu.core_type<tc>, window_params = [{pipeline_mode = #tpu.pipeline_mode<synchronous>, transform_indices = @transform_0, window_bounds = array<i64: 32, 288>}, {pipeline_mode = #tpu.pipeline_mode<synchronous>, transform_indices = @transform_1, window_bounds = array<i64: 288, 64>}, {pipeline_mode = #tpu.pipeline_mode<synchronous>, transform_indices = @transform_2, window_bounds = array<i64: 1, 16>}, {pipeline_mode = #tpu.pipeline_mode<synchronous>, transform_indices = @transform_3, window_bounds = array<i64: 1, 16>}, {pipeline_mode = #tpu.pipeline_mode<synchronous>, transform_indices = @transform_4, window_bounds = array<i64: 32, 64>}]} {
    %c0 = arith.constant 0 : index
    %c0_0 = arith.constant 0 : index
    %0 = vector.load %arg1[%c0, %c0_0] : memref<32x288xbf16, #tpu.memory_space<vmem>>, vector<32x288xbf16>
    %c0_1 = arith.constant 0 : index
    %c0_2 = arith.constant 0 : index
    %1 = vector.load %arg2[%c0_1, %c0_2] : memref<288x64xbf16, #tpu.memory_space<vmem>>, vector<288x64xbf16>
    %cst = arith.constant dense<0.000000e+00> : vector<32x64xf32>
    %2 = tpu.matmul %0, %1, %cst {dimension_numbers = #tpu.dot_dimension_numbers<[1], [0], [0], [1], [0, 0, 1, 1], [], []>} : vector<32x288xbf16>, vector<288x64xbf16>, vector<32x64xf32> -> vector<32x64xf32>
    %3 = vector.extract_strided_slice %2 {offsets = [0, 0], sizes = [32, 16], strides = [1, 1]} : vector<32x64xf32> to vector<32x16xf32>
    %4 = vector.extract_strided_slice %2 {offsets = [0, 16], sizes = [32, 16], strides = [1, 1]} : vector<32x64xf32> to vector<32x16xf32>
    %5 = vector.extract_strided_slice %2 {offsets = [0, 32], sizes = [32, 16], strides = [1, 1]} : vector<32x64xf32> to vector<32x16xf32>
    %6 = vector.extract_strided_slice %2 {offsets = [0, 48], sizes = [32, 16], strides = [1, 1]} : vector<32x64xf32> to vector<32x16xf32>
    %cst_3 = arith.constant dense<0.000000e+00> : vector<16xf32>
    %7 = vector.multi_reduction <add>, %3, %cst_3 [0] : vector<32x16xf32> to vector<16xf32>
    %8 = vector.shape_cast %7 : vector<16xf32> to vector<1x16xf32>
    %cst_4 = arith.constant 3.200000e+01 : f32
    %9 = vector.broadcast %cst_4 : f32 to vector<1x16xf32>
    %10 = arith.divf %8, %9 : vector<1x16xf32>
    %cst_5 = arith.constant dense<0.000000e+00> : vector<16xf32>
    %11 = vector.multi_reduction <add>, %4, %cst_5 [0] : vector<32x16xf32> to vector<16xf32>
    %12 = vector.shape_cast %11 : vector<16xf32> to vector<1x16xf32>
    %cst_6 = arith.constant 3.200000e+01 : f32
    %13 = vector.broadcast %cst_6 : f32 to vector<1x16xf32>
    %14 = arith.divf %12, %13 : vector<1x16xf32>
    %15 = arith.addf %10, %14 : vector<1x16xf32>
    %cst_7 = arith.constant dense<0.000000e+00> : vector<16xf32>
    %16 = vector.multi_reduction <add>, %5, %cst_7 [0] : vector<32x16xf32> to vector<16xf32>
    %17 = vector.shape_cast %16 : vector<16xf32> to vector<1x16xf32>
    %cst_8 = arith.constant 3.200000e+01 : f32
    %18 = vector.broadcast %cst_8 : f32 to vector<1x16xf32>
    %19 = arith.divf %17, %18 : vector<1x16xf32>
    %20 = arith.addf %15, %19 : vector<1x16xf32>
    %cst_9 = arith.constant dense<0.000000e+00> : vector<16xf32>
    %21 = vector.multi_reduction <add>, %6, %cst_9 [0] : vector<32x16xf32> to vector<16xf32>
    %22 = vector.shape_cast %21 : vector<16xf32> to vector<1x16xf32>
    %cst_10 = arith.constant 3.200000e+01 : f32
    %23 = vector.broadcast %cst_10 : f32 to vector<1x16xf32>
    %24 = arith.divf %22, %23 : vector<1x16xf32>
    %25 = arith.addf %20, %24 : vector<1x16xf32>
    %cst_11 = arith.constant 2.500000e-01 : f32
    %26 = vector.broadcast %cst_11 : f32 to vector<1x16xf32>
    %27 = arith.mulf %25, %26 : vector<1x16xf32>
    %28 = vector.broadcast %27 : vector<1x16xf32> to vector<32x16xf32>
    %29 = arith.subf %3, %28 : vector<32x16xf32>
    %30 = arith.mulf %29, %29 : vector<32x16xf32>
    %cst_12 = arith.constant dense<0.000000e+00> : vector<16xf32>
    %31 = vector.multi_reduction <add>, %30, %cst_12 [0] : vector<32x16xf32> to vector<16xf32>
    %32 = vector.shape_cast %31 : vector<16xf32> to vector<1x16xf32>
    %cst_13 = arith.constant 3.200000e+01 : f32
    %33 = vector.broadcast %cst_13 : f32 to vector<1x16xf32>
    %34 = arith.divf %32, %33 : vector<1x16xf32>
    %35 = vector.broadcast %27 : vector<1x16xf32> to vector<32x16xf32>
    %36 = arith.subf %4, %35 : vector<32x16xf32>
    %37 = arith.mulf %36, %36 : vector<32x16xf32>
    %cst_14 = arith.constant dense<0.000000e+00> : vector<16xf32>
    %38 = vector.multi_reduction <add>, %37, %cst_14 [0] : vector<32x16xf32> to vector<16xf32>
    %39 = vector.shape_cast %38 : vector<16xf32> to vector<1x16xf32>
    %cst_15 = arith.constant 3.200000e+01 : f32
    %40 = vector.broadcast %cst_15 : f32 to vector<1x16xf32>
    %41 = arith.divf %39, %40 : vector<1x16xf32>
    %42 = arith.addf %34, %41 : vector<1x16xf32>
    %43 = vector.broadcast %27 : vector<1x16xf32> to vector<32x16xf32>
    %44 = arith.subf %5, %43 : vector<32x16xf32>
    %45 = arith.mulf %44, %44 : vector<32x16xf32>
    %cst_16 = arith.constant dense<0.000000e+00> : vector<16xf32>
    %46 = vector.multi_reduction <add>, %45, %cst_16 [0] : vector<32x16xf32> to vector<16xf32>
    %47 = vector.shape_cast %46 : vector<16xf32> to vector<1x16xf32>
    %cst_17 = arith.constant 3.200000e+01 : f32
    %48 = vector.broadcast %cst_17 : f32 to vector<1x16xf32>
    %49 = arith.divf %47, %48 : vector<1x16xf32>
    %50 = arith.addf %42, %49 : vector<1x16xf32>
    %51 = vector.broadcast %27 : vector<1x16xf32> to vector<32x16xf32>
    %52 = arith.subf %6, %51 : vector<32x16xf32>
    %53 = arith.mulf %52, %52 : vector<32x16xf32>
    %cst_18 = arith.constant dense<0.000000e+00> : vector<16xf32>
    %54 = vector.multi_reduction <add>, %53, %cst_18 [0] : vector<32x16xf32> to vector<16xf32>
    %55 = vector.shape_cast %54 : vector<16xf32> to vector<1x16xf32>
    %cst_19 = arith.constant 3.200000e+01 : f32
    %56 = vector.broadcast %cst_19 : f32 to vector<1x16xf32>
    %57 = arith.divf %55, %56 : vector<1x16xf32>
    %58 = arith.addf %50, %57 : vector<1x16xf32>
    %cst_20 = arith.constant 2.500000e-01 : f32
    %59 = vector.broadcast %cst_20 : f32 to vector<1x16xf32>
    %60 = arith.mulf %58, %59 : vector<1x16xf32>
    %c0_21 = arith.constant 0 : index
    %c0_22 = arith.constant 0 : index
    %61 = vector.load %arg3[%c0_21, %c0_22] : memref<1x16xf32, #tpu.memory_space<vmem>>, vector<1x16xf32>
    %cst_23 = arith.constant 9.99999974E-6 : f32
    %62 = vector.broadcast %cst_23 : f32 to vector<1x16xf32>
    %63 = arith.addf %60, %62 : vector<1x16xf32>
    %64 = math.rsqrt %63 : vector<1x16xf32>
    %65 = arith.mulf %61, %64 : vector<1x16xf32>
    %c0_24 = arith.constant 0 : index
    %c0_25 = arith.constant 0 : index
    %66 = vector.load %arg4[%c0_24, %c0_25] : memref<1x16xf32, #tpu.memory_space<vmem>>, vector<1x16xf32>
    %67 = arith.mulf %27, %65 : vector<1x16xf32>
    %68 = arith.subf %66, %67 : vector<1x16xf32>
    %69 = vector.broadcast %65 : vector<1x16xf32> to vector<32x16xf32>
    %70 = arith.mulf %3, %69 : vector<32x16xf32>
    %71 = vector.broadcast %68 : vector<1x16xf32> to vector<32x16xf32>
    %72 = arith.addf %70, %71 : vector<32x16xf32>
    %cst_26 = arith.constant 0.000000e+00 : f32
    %73 = vector.broadcast %cst_26 : f32 to vector<32x16xf32>
    %74 = arith.cmpf oge, %72, %73 : vector<32x16xf32>
    %cst_27 = arith.constant 0.00999999977 : f32
    %75 = vector.broadcast %cst_27 : f32 to vector<32x16xf32>
    %76 = arith.mulf %75, %72 : vector<32x16xf32>
    %77 = arith.select %74, %72, %76 : vector<32x16xi1>, vector<32x16xf32>
    %c0_28 = arith.constant 0 : index
    %c0_29 = arith.constant 0 : index
    %78 = vector.load %arg5[%c0_28, %c0_29] : memref<32x64xf32, #tpu.memory_space<vmem>>, vector<32x16xf32>
    tpu.vector_store %arg5[%c0_28, %c0_29], %77 {strides = array<i32>} : memref<32x64xf32, #tpu.memory_space<vmem>>, vector<32x16xf32>,
    %79 = vector.broadcast %65 : vector<1x16xf32> to vector<32x16xf32>
    %80 = arith.mulf %4, %79 : vector<32x16xf32>
    %81 = vector.broadcast %68 : vector<1x16xf32> to vector<32x16xf32>
    %82 = arith.addf %80, %81 : vector<32x16xf32>
    %cst_30 = arith.constant 0.000000e+00 : f32
    %83 = vector.broadcast %cst_30 : f32 to vector<32x16xf32>
    %84 = arith.cmpf oge, %82, %83 : vector<32x16xf32>
    %cst_31 = arith.constant 0.00999999977 : f32
    %85 = vector.broadcast %cst_31 : f32 to vector<32x16xf32>
    %86 = arith.mulf %85, %82 : vector<32x16xf32>
    %87 = arith.select %84, %82, %86 : vector<32x16xi1>, vector<32x16xf32>
    %c0_32 = arith.constant 0 : index
    %c16 = arith.constant 16 : index
    %88 = vector.load %arg5[%c0_32, %c16] : memref<32x64xf32, #tpu.memory_space<vmem>>, vector<32x16xf32>
    tpu.vector_store %arg5[%c0_32, %c16], %87 {strides = array<i32>} : memref<32x64xf32, #tpu.memory_space<vmem>>, vector<32x16xf32>,
    %89 = vector.broadcast %65 : vector<1x16xf32> to vector<32x16xf32>
    %90 = arith.mulf %5, %89 : vector<32x16xf32>
    %91 = vector.broadcast %68 : vector<1x16xf32> to vector<32x16xf32>
    %92 = arith.addf %90, %91 : vector<32x16xf32>
    %cst_33 = arith.constant 0.000000e+00 : f32
    %93 = vector.broadcast %cst_33 : f32 to vector<32x16xf32>
    %94 = arith.cmpf oge, %92, %93 : vector<32x16xf32>
    %cst_34 = arith.constant 0.00999999977 : f32
    %95 = vector.broadcast %cst_34 : f32 to vector<32x16xf32>
    %96 = arith.mulf %95, %92 : vector<32x16xf32>
    %97 = arith.select %94, %92, %96 : vector<32x16xi1>, vector<32x16xf32>
    %c0_35 = arith.constant 0 : index
    %c32 = arith.constant 32 : index
    %98 = vector.load %arg5[%c0_35, %c32] : memref<32x64xf32, #tpu.memory_space<vmem>>, vector<32x16xf32>
    tpu.vector_store %arg5[%c0_35, %c32], %97 {strides = array<i32>} : memref<32x64xf32, #tpu.memory_space<vmem>>, vector<32x16xf32>,
    %99 = vector.broadcast %65 : vector<1x16xf32> to vector<32x16xf32>
    %100 = arith.mulf %6, %99 : vector<32x16xf32>
    %101 = vector.broadcast %68 : vector<1x16xf32> to vector<32x16xf32>
    %102 = arith.addf %100, %101 : vector<32x16xf32>
    %cst_36 = arith.constant 0.000000e+00 : f32
    %103 = vector.broadcast %cst_36 : f32 to vector<32x16xf32>
    %104 = arith.cmpf oge, %102, %103 : vector<32x16xf32>
    %cst_37 = arith.constant 0.00999999977 : f32
    %105 = vector.broadcast %cst_37 : f32 to vector<32x16xf32>
    %106 = arith.mulf %105, %102 : vector<32x16xf32>
    %107 = arith.select %104, %102, %106 : vector<32x16xi1>, vector<32x16xf32>
    %c0_38 = arith.constant 0 : index
    %c48 = arith.constant 48 : index
    %108 = vector.load %arg5[%c0_38, %c48] : memref<32x64xf32, #tpu.memory_space<vmem>>, vector<32x16xf32>
    tpu.vector_store %arg5[%c0_38, %c48], %107 {strides = array<i32>} : memref<32x64xf32, #tpu.memory_space<vmem>>, vector<32x16xf32>,
    return
  }
  func.func @transform_0(%arg0: i32) -> (i32, i32) {
    %c0_i32 = arith.constant 0 : i32
    %c0_i32_0 = arith.constant 0 : i32
    %c0_i32_1 = arith.constant 0 : i32
    return %c0_i32, %c0_i32_0 : i32, i32
  }
  func.func @transform_1(%arg0: i32) -> (i32, i32) {
    %c0_i32 = arith.constant 0 : i32
    %c0_i32_0 = arith.constant 0 : i32
    %c0_i32_1 = arith.constant 0 : i32
    return %c0_i32, %c0_i32_0 : i32, i32
  }
  func.func @transform_2(%arg0: i32) -> (i32, i32) {
    %c0_i32 = arith.constant 0 : i32
    %c0_i32_0 = arith.constant 0 : i32
    %c0_i32_1 = arith.constant 0 : i32
    return %c0_i32, %c0_i32_0 : i32, i32
  }
  func.func @transform_3(%arg0: i32) -> (i32, i32) {
    %c0_i32 = arith.constant 0 : i32
    %c0_i32_0 = arith.constant 0 : i32
    %c0_i32_1 = arith.constant 0 : i32
    return %c0_i32, %c0_i32_0 : i32, i32
  }
  func.func @transform_4(%arg0: i32) -> (i32, i32) {
    %c0_i32 = arith.constant 0 : i32
    %c0_i32_0 = arith.constant 0 : i32
    %c0_i32_1 = arith.constant 0 : i32
    return %c0_i32, %c0_i32_0 : i32, i32
  }
}

module attributes {stable_mosaic.version = 11 : i64} {
  func.func @_resblock_kernel(%arg0: i32, %arg1: memref<128x144xbf16, #tpu.memory_space<vmem>>, %arg2: memref<144x16xbf16, #tpu.memory_space<vmem>>, %arg3: memref<1x16xf32, #tpu.memory_space<vmem>>, %arg4: memref<1x16xf32, #tpu.memory_space<vmem>>, %arg5: memref<16x16xbf16, #tpu.memory_space<vmem>>, %arg6: memref<1x16xf32, #tpu.memory_space<vmem>>, %arg7: memref<1x16xf32, #tpu.memory_space<vmem>>, %arg8: memref<128x16xf32, #tpu.memory_space<vmem>>, %arg9: memref<128x16xf32, #tpu.memory_space<vmem>>) attributes {dimension_semantics = [#tpu.dimension_semantics<arbitrary>], iteration_bounds = array<i64: 1>, scalar_prefetch = 0 : i64, scratch_operands = 0 : i64, tpu.core_type = #tpu.core_type<tc>, window_params = [{pipeline_mode = #tpu.pipeline_mode<synchronous>, transform_indices = @transform_0, window_bounds = array<i64: 128, 144>}, {pipeline_mode = #tpu.pipeline_mode<synchronous>, transform_indices = @transform_1, window_bounds = array<i64: 144, 16>}, {pipeline_mode = #tpu.pipeline_mode<synchronous>, transform_indices = @transform_2, window_bounds = array<i64: 1, 16>}, {pipeline_mode = #tpu.pipeline_mode<synchronous>, transform_indices = @transform_3, window_bounds = array<i64: 1, 16>}, {pipeline_mode = #tpu.pipeline_mode<synchronous>, transform_indices = @transform_4, window_bounds = array<i64: 16, 16>}, {pipeline_mode = #tpu.pipeline_mode<synchronous>, transform_indices = @transform_5, window_bounds = array<i64: 1, 16>}, {pipeline_mode = #tpu.pipeline_mode<synchronous>, transform_indices = @transform_6, window_bounds = array<i64: 1, 16>}, {pipeline_mode = #tpu.pipeline_mode<synchronous>, transform_indices = @transform_7, window_bounds = array<i64: 128, 16>}, {pipeline_mode = #tpu.pipeline_mode<synchronous>, transform_indices = @transform_8, window_bounds = array<i64: 128, 16>}]} {
    %c0 = arith.constant 0 : index
    %c0_0 = arith.constant 0 : index
    %0 = vector.load %arg1[%c0, %c0_0] : memref<128x144xbf16, #tpu.memory_space<vmem>>, vector<128x144xbf16>
    %c0_1 = arith.constant 0 : index
    %c0_2 = arith.constant 0 : index
    %1 = vector.load %arg2[%c0_1, %c0_2] : memref<144x16xbf16, #tpu.memory_space<vmem>>, vector<144x16xbf16>
    %cst = arith.constant dense<0.000000e+00> : vector<128x16xf32>
    %2 = tpu.matmul %0, %1, %cst {dimension_numbers = #tpu.dot_dimension_numbers<[1], [0], [0], [1], [0, 0, 1, 1], [], []>} : vector<128x144xbf16>, vector<144x16xbf16>, vector<128x16xf32> -> vector<128x16xf32>
    %c0_3 = arith.constant 0 : index
    %c0_4 = arith.constant 0 : index
    %3 = vector.load %arg3[%c0_3, %c0_4] : memref<1x16xf32, #tpu.memory_space<vmem>>, vector<1x16xf32>
    %c0_5 = arith.constant 0 : index
    %c0_6 = arith.constant 0 : index
    %4 = vector.load %arg4[%c0_5, %c0_6] : memref<1x16xf32, #tpu.memory_space<vmem>>, vector<1x16xf32>
    %cst_7 = arith.constant dense<0.000000e+00> : vector<16xf32>
    %5 = vector.multi_reduction <add>, %2, %cst_7 [0] : vector<128x16xf32> to vector<16xf32>
    %6 = vector.shape_cast %5 : vector<16xf32> to vector<1x16xf32>
    %cst_8 = arith.constant 1.280000e+02 : f32
    %7 = vector.broadcast %cst_8 : f32 to vector<1x16xf32>
    %8 = arith.divf %6, %7 : vector<1x16xf32>
    %9 = vector.broadcast %8 : vector<1x16xf32> to vector<128x16xf32>
    %10 = arith.subf %2, %9 : vector<128x16xf32>
    %11 = arith.mulf %10, %10 : vector<128x16xf32>
    %cst_9 = arith.constant dense<0.000000e+00> : vector<16xf32>
    %12 = vector.multi_reduction <add>, %11, %cst_9 [0] : vector<128x16xf32> to vector<16xf32>
    %13 = vector.shape_cast %12 : vector<16xf32> to vector<1x16xf32>
    %cst_10 = arith.constant 1.280000e+02 : f32
    %14 = vector.broadcast %cst_10 : f32 to vector<1x16xf32>
    %15 = arith.divf %13, %14 : vector<1x16xf32>
    %cst_11 = arith.constant 9.99999974E-6 : f32
    %16 = vector.broadcast %cst_11 : f32 to vector<1x16xf32>
    %17 = arith.addf %15, %16 : vector<1x16xf32>
    %18 = math.rsqrt %17 : vector<1x16xf32>
    %19 = arith.mulf %3, %18 : vector<1x16xf32>
    %20 = vector.broadcast %8 : vector<1x16xf32> to vector<128x16xf32>
    %21 = arith.subf %2, %20 : vector<128x16xf32>
    %22 = vector.broadcast %19 : vector<1x16xf32> to vector<128x16xf32>
    %23 = arith.mulf %21, %22 : vector<128x16xf32>
    %24 = vector.broadcast %4 : vector<1x16xf32> to vector<128x16xf32>
    %25 = arith.addf %23, %24 : vector<128x16xf32>
    %cst_12 = arith.constant 0.000000e+00 : f32
    %26 = vector.broadcast %cst_12 : f32 to vector<128x16xf32>
    %27 = arith.cmpf oge, %25, %26 : vector<128x16xf32>
    %cst_13 = arith.constant 0.00999999977 : f32
    %28 = vector.broadcast %cst_13 : f32 to vector<128x16xf32>
    %29 = arith.mulf %28, %25 : vector<128x16xf32>
    %30 = arith.select %27, %25, %29 : vector<128x16xi1>, vector<128x16xf32>
    %31 = arith.truncf %30 : vector<128x16xf32> to vector<128x16xbf16>
    %c0_14 = arith.constant 0 : index
    %c0_15 = arith.constant 0 : index
    %32 = vector.load %arg5[%c0_14, %c0_15] : memref<16x16xbf16, #tpu.memory_space<vmem>>, vector<16x16xbf16>
    %cst_16 = arith.constant dense<0.000000e+00> : vector<128x16xf32>
    %33 = tpu.matmul %31, %32, %cst_16 {dimension_numbers = #tpu.dot_dimension_numbers<[1], [0], [0], [1], [0, 0, 1, 1], [], []>} : vector<128x16xbf16>, vector<16x16xbf16>, vector<128x16xf32> -> vector<128x16xf32>
    %c0_17 = arith.constant 0 : index
    %c0_18 = arith.constant 0 : index
    %34 = vector.load %arg6[%c0_17, %c0_18] : memref<1x16xf32, #tpu.memory_space<vmem>>, vector<1x16xf32>
    %c0_19 = arith.constant 0 : index
    %c0_20 = arith.constant 0 : index
    %35 = vector.load %arg7[%c0_19, %c0_20] : memref<1x16xf32, #tpu.memory_space<vmem>>, vector<1x16xf32>
    %cst_21 = arith.constant dense<0.000000e+00> : vector<16xf32>
    %36 = vector.multi_reduction <add>, %33, %cst_21 [0] : vector<128x16xf32> to vector<16xf32>
    %37 = vector.shape_cast %36 : vector<16xf32> to vector<1x16xf32>
    %cst_22 = arith.constant 1.280000e+02 : f32
    %38 = vector.broadcast %cst_22 : f32 to vector<1x16xf32>
    %39 = arith.divf %37, %38 : vector<1x16xf32>
    %40 = vector.broadcast %39 : vector<1x16xf32> to vector<128x16xf32>
    %41 = arith.subf %33, %40 : vector<128x16xf32>
    %42 = arith.mulf %41, %41 : vector<128x16xf32>
    %cst_23 = arith.constant dense<0.000000e+00> : vector<16xf32>
    %43 = vector.multi_reduction <add>, %42, %cst_23 [0] : vector<128x16xf32> to vector<16xf32>
    %44 = vector.shape_cast %43 : vector<16xf32> to vector<1x16xf32>
    %cst_24 = arith.constant 1.280000e+02 : f32
    %45 = vector.broadcast %cst_24 : f32 to vector<1x16xf32>
    %46 = arith.divf %44, %45 : vector<1x16xf32>
    %cst_25 = arith.constant 9.99999974E-6 : f32
    %47 = vector.broadcast %cst_25 : f32 to vector<1x16xf32>
    %48 = arith.addf %46, %47 : vector<1x16xf32>
    %49 = math.rsqrt %48 : vector<1x16xf32>
    %50 = arith.mulf %34, %49 : vector<1x16xf32>
    %51 = vector.broadcast %39 : vector<1x16xf32> to vector<128x16xf32>
    %52 = arith.subf %33, %51 : vector<128x16xf32>
    %53 = vector.broadcast %50 : vector<1x16xf32> to vector<128x16xf32>
    %54 = arith.mulf %52, %53 : vector<128x16xf32>
    %55 = vector.broadcast %35 : vector<1x16xf32> to vector<128x16xf32>
    %56 = arith.addf %54, %55 : vector<128x16xf32>
    %c0_26 = arith.constant 0 : index
    %c0_27 = arith.constant 0 : index
    %57 = vector.load %arg8[%c0_26, %c0_27] : memref<128x16xf32, #tpu.memory_space<vmem>>, vector<128x16xf32>
    %58 = arith.addf %56, %57 : vector<128x16xf32>
    %cst_28 = arith.constant 0.000000e+00 : f32
    %59 = vector.broadcast %cst_28 : f32 to vector<128x16xf32>
    %60 = arith.cmpf oge, %58, %59 : vector<128x16xf32>
    %cst_29 = arith.constant 0.00999999977 : f32
    %61 = vector.broadcast %cst_29 : f32 to vector<128x16xf32>
    %62 = arith.mulf %61, %58 : vector<128x16xf32>
    %63 = arith.select %60, %58, %62 : vector<128x16xi1>, vector<128x16xf32>
    %c0_30 = arith.constant 0 : index
    %c0_31 = arith.constant 0 : index
    %64 = vector.load %arg9[%c0_30, %c0_31] : memref<128x16xf32, #tpu.memory_space<vmem>>, vector<128x16xf32>
    tpu.vector_store %arg9[%c0_30, %c0_31], %63 {strides = array<i32>} : memref<128x16xf32, #tpu.memory_space<vmem>>, vector<128x16xf32>,
    return
  }
  func.func @transform_0(%arg0: i32) -> (i32, i32) {
    %c0_i32 = arith.constant 0 : i32
    %c0_i32_0 = arith.constant 0 : i32
    %c0_i32_1 = arith.constant 0 : i32
    return %c0_i32, %c0_i32_0 : i32, i32
  }
  func.func @transform_1(%arg0: i32) -> (i32, i32) {
    %c0_i32 = arith.constant 0 : i32
    %c0_i32_0 = arith.constant 0 : i32
    %c0_i32_1 = arith.constant 0 : i32
    return %c0_i32, %c0_i32_0 : i32, i32
  }
  func.func @transform_2(%arg0: i32) -> (i32, i32) {
    %c0_i32 = arith.constant 0 : i32
    %c0_i32_0 = arith.constant 0 : i32
    %c0_i32_1 = arith.constant 0 : i32
    return %c0_i32, %c0_i32_0 : i32, i32
  }
  func.func @transform_3(%arg0: i32) -> (i32, i32) {
    %c0_i32 = arith.constant 0 : i32
    %c0_i32_0 = arith.constant 0 : i32
    %c0_i32_1 = arith.constant 0 : i32
    return %c0_i32, %c0_i32_0 : i32, i32
  }
  func.func @transform_4(%arg0: i32) -> (i32, i32) {
    %c0_i32 = arith.constant 0 : i32
    %c0_i32_0 = arith.constant 0 : i32
    %c0_i32_1 = arith.constant 0 : i32
    return %c0_i32, %c0_i32_0 : i32, i32
  }
  func.func @transform_5(%arg0: i32) -> (i32, i32) {
    %c0_i32 = arith.constant 0 : i32
    %c0_i32_0 = arith.constant 0 : i32
    %c0_i32_1 = arith.constant 0 : i32
    return %c0_i32, %c0_i32_0 : i32, i32
  }
  func.func @transform_6(%arg0: i32) -> (i32, i32) {
    %c0_i32 = arith.constant 0 : i32
    %c0_i32_0 = arith.constant 0 : i32
    %c0_i32_1 = arith.constant 0 : i32
    return %c0_i32, %c0_i32_0 : i32, i32
  }
  func.func @transform_7(%arg0: i32) -> (i32, i32) {
    %c0_i32 = arith.constant 0 : i32
    %c0_i32_0 = arith.constant 0 : i32
    %c0_i32_1 = arith.constant 0 : i32
    return %c0_i32, %c0_i32_0 : i32, i32
  }
  func.func @transform_8(%arg0: i32) -> (i32, i32) {
    %c0_i32 = arith.constant 0 : i32
    %c0_i32_0 = arith.constant 0 : i32
    %c0_i32_1 = arith.constant 0 : i32
    return %c0_i32, %c0_i32_0 : i32, i32
  }
}

module attributes {stable_mosaic.version = 11 : i64} {
  func.func @kernel(%arg0: i32, %arg1: memref<128x144xbf16, #tpu.memory_space<vmem>>, %arg2: memref<144x32xbf16, #tpu.memory_space<vmem>>, %arg3: memref<1x8xf32, #tpu.memory_space<vmem>>, %arg4: memref<1x8xf32, #tpu.memory_space<vmem>>, %arg5: memref<128x32xf32, #tpu.memory_space<vmem>>) attributes {dimension_semantics = [#tpu.dimension_semantics<arbitrary>], iteration_bounds = array<i64: 1>, scalar_prefetch = 0 : i64, scratch_operands = 0 : i64, tpu.core_type = #tpu.core_type<tc>, window_params = [{pipeline_mode = #tpu.pipeline_mode<synchronous>, transform_indices = @transform_0, window_bounds = array<i64: 128, 144>}, {pipeline_mode = #tpu.pipeline_mode<synchronous>, transform_indices = @transform_1, window_bounds = array<i64: 144, 32>}, {pipeline_mode = #tpu.pipeline_mode<synchronous>, transform_indices = @transform_2, window_bounds = array<i64: 1, 8>}, {pipeline_mode = #tpu.pipeline_mode<synchronous>, transform_indices = @transform_3, window_bounds = array<i64: 1, 8>}, {pipeline_mode = #tpu.pipeline_mode<synchronous>, transform_indices = @transform_4, window_bounds = array<i64: 128, 32>}]} {
    %c0 = arith.constant 0 : index
    %c0_0 = arith.constant 0 : index
    %0 = vector.load %arg1[%c0, %c0_0] : memref<128x144xbf16, #tpu.memory_space<vmem>>, vector<128x144xbf16>
    %c0_1 = arith.constant 0 : index
    %c0_2 = arith.constant 0 : index
    %1 = vector.load %arg2[%c0_1, %c0_2] : memref<144x32xbf16, #tpu.memory_space<vmem>>, vector<144x32xbf16>
    %cst = arith.constant dense<0.000000e+00> : vector<128x32xf32>
    %2 = tpu.matmul %0, %1, %cst {dimension_numbers = #tpu.dot_dimension_numbers<[1], [0], [0], [1], [0, 0, 1, 1], [], []>} : vector<128x144xbf16>, vector<144x32xbf16>, vector<128x32xf32> -> vector<128x32xf32>
    %3 = vector.extract_strided_slice %2 {offsets = [0, 0], sizes = [128, 8], strides = [1, 1]} : vector<128x32xf32> to vector<128x8xf32>
    %4 = vector.extract_strided_slice %2 {offsets = [0, 8], sizes = [128, 8], strides = [1, 1]} : vector<128x32xf32> to vector<128x8xf32>
    %5 = vector.extract_strided_slice %2 {offsets = [0, 16], sizes = [128, 8], strides = [1, 1]} : vector<128x32xf32> to vector<128x8xf32>
    %6 = vector.extract_strided_slice %2 {offsets = [0, 24], sizes = [128, 8], strides = [1, 1]} : vector<128x32xf32> to vector<128x8xf32>
    %cst_3 = arith.constant dense<0.000000e+00> : vector<8xf32>
    %7 = vector.multi_reduction <add>, %3, %cst_3 [0] : vector<128x8xf32> to vector<8xf32>
    %8 = vector.shape_cast %7 : vector<8xf32> to vector<1x8xf32>
    %cst_4 = arith.constant 1.280000e+02 : f32
    %9 = vector.broadcast %cst_4 : f32 to vector<1x8xf32>
    %10 = arith.divf %8, %9 : vector<1x8xf32>
    %cst_5 = arith.constant dense<0.000000e+00> : vector<8xf32>
    %11 = vector.multi_reduction <add>, %4, %cst_5 [0] : vector<128x8xf32> to vector<8xf32>
    %12 = vector.shape_cast %11 : vector<8xf32> to vector<1x8xf32>
    %cst_6 = arith.constant 1.280000e+02 : f32
    %13 = vector.broadcast %cst_6 : f32 to vector<1x8xf32>
    %14 = arith.divf %12, %13 : vector<1x8xf32>
    %15 = arith.addf %10, %14 : vector<1x8xf32>
    %cst_7 = arith.constant dense<0.000000e+00> : vector<8xf32>
    %16 = vector.multi_reduction <add>, %5, %cst_7 [0] : vector<128x8xf32> to vector<8xf32>
    %17 = vector.shape_cast %16 : vector<8xf32> to vector<1x8xf32>
    %cst_8 = arith.constant 1.280000e+02 : f32
    %18 = vector.broadcast %cst_8 : f32 to vector<1x8xf32>
    %19 = arith.divf %17, %18 : vector<1x8xf32>
    %20 = arith.addf %15, %19 : vector<1x8xf32>
    %cst_9 = arith.constant dense<0.000000e+00> : vector<8xf32>
    %21 = vector.multi_reduction <add>, %6, %cst_9 [0] : vector<128x8xf32> to vector<8xf32>
    %22 = vector.shape_cast %21 : vector<8xf32> to vector<1x8xf32>
    %cst_10 = arith.constant 1.280000e+02 : f32
    %23 = vector.broadcast %cst_10 : f32 to vector<1x8xf32>
    %24 = arith.divf %22, %23 : vector<1x8xf32>
    %25 = arith.addf %20, %24 : vector<1x8xf32>
    %cst_11 = arith.constant 2.500000e-01 : f32
    %26 = vector.broadcast %cst_11 : f32 to vector<1x8xf32>
    %27 = arith.mulf %25, %26 : vector<1x8xf32>
    %28 = vector.broadcast %27 : vector<1x8xf32> to vector<128x8xf32>
    %29 = arith.subf %3, %28 : vector<128x8xf32>
    %30 = arith.mulf %29, %29 : vector<128x8xf32>
    %cst_12 = arith.constant dense<0.000000e+00> : vector<8xf32>
    %31 = vector.multi_reduction <add>, %30, %cst_12 [0] : vector<128x8xf32> to vector<8xf32>
    %32 = vector.shape_cast %31 : vector<8xf32> to vector<1x8xf32>
    %cst_13 = arith.constant 1.280000e+02 : f32
    %33 = vector.broadcast %cst_13 : f32 to vector<1x8xf32>
    %34 = arith.divf %32, %33 : vector<1x8xf32>
    %35 = vector.broadcast %27 : vector<1x8xf32> to vector<128x8xf32>
    %36 = arith.subf %4, %35 : vector<128x8xf32>
    %37 = arith.mulf %36, %36 : vector<128x8xf32>
    %cst_14 = arith.constant dense<0.000000e+00> : vector<8xf32>
    %38 = vector.multi_reduction <add>, %37, %cst_14 [0] : vector<128x8xf32> to vector<8xf32>
    %39 = vector.shape_cast %38 : vector<8xf32> to vector<1x8xf32>
    %cst_15 = arith.constant 1.280000e+02 : f32
    %40 = vector.broadcast %cst_15 : f32 to vector<1x8xf32>
    %41 = arith.divf %39, %40 : vector<1x8xf32>
    %42 = arith.addf %34, %41 : vector<1x8xf32>
    %43 = vector.broadcast %27 : vector<1x8xf32> to vector<128x8xf32>
    %44 = arith.subf %5, %43 : vector<128x8xf32>
    %45 = arith.mulf %44, %44 : vector<128x8xf32>
    %cst_16 = arith.constant dense<0.000000e+00> : vector<8xf32>
    %46 = vector.multi_reduction <add>, %45, %cst_16 [0] : vector<128x8xf32> to vector<8xf32>
    %47 = vector.shape_cast %46 : vector<8xf32> to vector<1x8xf32>
    %cst_17 = arith.constant 1.280000e+02 : f32
    %48 = vector.broadcast %cst_17 : f32 to vector<1x8xf32>
    %49 = arith.divf %47, %48 : vector<1x8xf32>
    %50 = arith.addf %42, %49 : vector<1x8xf32>
    %51 = vector.broadcast %27 : vector<1x8xf32> to vector<128x8xf32>
    %52 = arith.subf %6, %51 : vector<128x8xf32>
    %53 = arith.mulf %52, %52 : vector<128x8xf32>
    %cst_18 = arith.constant dense<0.000000e+00> : vector<8xf32>
    %54 = vector.multi_reduction <add>, %53, %cst_18 [0] : vector<128x8xf32> to vector<8xf32>
    %55 = vector.shape_cast %54 : vector<8xf32> to vector<1x8xf32>
    %cst_19 = arith.constant 1.280000e+02 : f32
    %56 = vector.broadcast %cst_19 : f32 to vector<1x8xf32>
    %57 = arith.divf %55, %56 : vector<1x8xf32>
    %58 = arith.addf %50, %57 : vector<1x8xf32>
    %cst_20 = arith.constant 2.500000e-01 : f32
    %59 = vector.broadcast %cst_20 : f32 to vector<1x8xf32>
    %60 = arith.mulf %58, %59 : vector<1x8xf32>
    %c0_21 = arith.constant 0 : index
    %c0_22 = arith.constant 0 : index
    %61 = vector.load %arg3[%c0_21, %c0_22] : memref<1x8xf32, #tpu.memory_space<vmem>>, vector<1x8xf32>
    %cst_23 = arith.constant 9.99999974E-6 : f32
    %62 = vector.broadcast %cst_23 : f32 to vector<1x8xf32>
    %63 = arith.addf %60, %62 : vector<1x8xf32>
    %64 = math.rsqrt %63 : vector<1x8xf32>
    %65 = arith.mulf %61, %64 : vector<1x8xf32>
    %c0_24 = arith.constant 0 : index
    %c0_25 = arith.constant 0 : index
    %66 = vector.load %arg4[%c0_24, %c0_25] : memref<1x8xf32, #tpu.memory_space<vmem>>, vector<1x8xf32>
    %67 = arith.mulf %27, %65 : vector<1x8xf32>
    %68 = arith.subf %66, %67 : vector<1x8xf32>
    %69 = vector.broadcast %65 : vector<1x8xf32> to vector<128x8xf32>
    %70 = arith.mulf %3, %69 : vector<128x8xf32>
    %71 = vector.broadcast %68 : vector<1x8xf32> to vector<128x8xf32>
    %72 = arith.addf %70, %71 : vector<128x8xf32>
    %cst_26 = arith.constant 0.000000e+00 : f32
    %73 = vector.broadcast %cst_26 : f32 to vector<128x8xf32>
    %74 = arith.cmpf oge, %72, %73 : vector<128x8xf32>
    %cst_27 = arith.constant 0.00999999977 : f32
    %75 = vector.broadcast %cst_27 : f32 to vector<128x8xf32>
    %76 = arith.mulf %75, %72 : vector<128x8xf32>
    %77 = arith.select %74, %72, %76 : vector<128x8xi1>, vector<128x8xf32>
    %c0_28 = arith.constant 0 : index
    %c0_29 = arith.constant 0 : index
    %78 = vector.load %arg5[%c0_28, %c0_29] : memref<128x32xf32, #tpu.memory_space<vmem>>, vector<128x8xf32>
    tpu.vector_store %arg5[%c0_28, %c0_29], %77 {strides = array<i32>} : memref<128x32xf32, #tpu.memory_space<vmem>>, vector<128x8xf32>,
    %79 = vector.broadcast %65 : vector<1x8xf32> to vector<128x8xf32>
    %80 = arith.mulf %4, %79 : vector<128x8xf32>
    %81 = vector.broadcast %68 : vector<1x8xf32> to vector<128x8xf32>
    %82 = arith.addf %80, %81 : vector<128x8xf32>
    %cst_30 = arith.constant 0.000000e+00 : f32
    %83 = vector.broadcast %cst_30 : f32 to vector<128x8xf32>
    %84 = arith.cmpf oge, %82, %83 : vector<128x8xf32>
    %cst_31 = arith.constant 0.00999999977 : f32
    %85 = vector.broadcast %cst_31 : f32 to vector<128x8xf32>
    %86 = arith.mulf %85, %82 : vector<128x8xf32>
    %87 = arith.select %84, %82, %86 : vector<128x8xi1>, vector<128x8xf32>
    %c0_32 = arith.constant 0 : index
    %c8 = arith.constant 8 : index
    %88 = vector.load %arg5[%c0_32, %c8] : memref<128x32xf32, #tpu.memory_space<vmem>>, vector<128x8xf32>
    tpu.vector_store %arg5[%c0_32, %c8], %87 {strides = array<i32>} : memref<128x32xf32, #tpu.memory_space<vmem>>, vector<128x8xf32>,
    %89 = vector.broadcast %65 : vector<1x8xf32> to vector<128x8xf32>
    %90 = arith.mulf %5, %89 : vector<128x8xf32>
    %91 = vector.broadcast %68 : vector<1x8xf32> to vector<128x8xf32>
    %92 = arith.addf %90, %91 : vector<128x8xf32>
    %cst_33 = arith.constant 0.000000e+00 : f32
    %93 = vector.broadcast %cst_33 : f32 to vector<128x8xf32>
    %94 = arith.cmpf oge, %92, %93 : vector<128x8xf32>
    %cst_34 = arith.constant 0.00999999977 : f32
    %95 = vector.broadcast %cst_34 : f32 to vector<128x8xf32>
    %96 = arith.mulf %95, %92 : vector<128x8xf32>
    %97 = arith.select %94, %92, %96 : vector<128x8xi1>, vector<128x8xf32>
    %c0_35 = arith.constant 0 : index
    %c16 = arith.constant 16 : index
    %98 = vector.load %arg5[%c0_35, %c16] : memref<128x32xf32, #tpu.memory_space<vmem>>, vector<128x8xf32>
    tpu.vector_store %arg5[%c0_35, %c16], %97 {strides = array<i32>} : memref<128x32xf32, #tpu.memory_space<vmem>>, vector<128x8xf32>,
    %99 = vector.broadcast %65 : vector<1x8xf32> to vector<128x8xf32>
    %100 = arith.mulf %6, %99 : vector<128x8xf32>
    %101 = vector.broadcast %68 : vector<1x8xf32> to vector<128x8xf32>
    %102 = arith.addf %100, %101 : vector<128x8xf32>
    %cst_36 = arith.constant 0.000000e+00 : f32
    %103 = vector.broadcast %cst_36 : f32 to vector<128x8xf32>
    %104 = arith.cmpf oge, %102, %103 : vector<128x8xf32>
    %cst_37 = arith.constant 0.00999999977 : f32
    %105 = vector.broadcast %cst_37 : f32 to vector<128x8xf32>
    %106 = arith.mulf %105, %102 : vector<128x8xf32>
    %107 = arith.select %104, %102, %106 : vector<128x8xi1>, vector<128x8xf32>
    %c0_38 = arith.constant 0 : index
    %c24 = arith.constant 24 : index
    %108 = vector.load %arg5[%c0_38, %c24] : memref<128x32xf32, #tpu.memory_space<vmem>>, vector<128x8xf32>
    tpu.vector_store %arg5[%c0_38, %c24], %107 {strides = array<i32>} : memref<128x32xf32, #tpu.memory_space<vmem>>, vector<128x8xf32>,
    return
  }
  func.func @transform_0(%arg0: i32) -> (i32, i32) {
    %c0_i32 = arith.constant 0 : i32
    %c0_i32_0 = arith.constant 0 : i32
    %c0_i32_1 = arith.constant 0 : i32
    return %c0_i32, %c0_i32_0 : i32, i32
  }
  func.func @transform_1(%arg0: i32) -> (i32, i32) {
    %c0_i32 = arith.constant 0 : i32
    %c0_i32_0 = arith.constant 0 : i32
    %c0_i32_1 = arith.constant 0 : i32
    return %c0_i32, %c0_i32_0 : i32, i32
  }
  func.func @transform_2(%arg0: i32) -> (i32, i32) {
    %c0_i32 = arith.constant 0 : i32
    %c0_i32_0 = arith.constant 0 : i32
    %c0_i32_1 = arith.constant 0 : i32
    return %c0_i32, %c0_i32_0 : i32, i32
  }
  func.func @transform_3(%arg0: i32) -> (i32, i32) {
    %c0_i32 = arith.constant 0 : i32
    %c0_i32_0 = arith.constant 0 : i32
    %c0_i32_1 = arith.constant 0 : i32
    return %c0_i32, %c0_i32_0 : i32, i32
  }
  func.func @transform_4(%arg0: i32) -> (i32, i32) {
    %c0_i32 = arith.constant 0 : i32
    %c0_i32_0 = arith.constant 0 : i32
    %c0_i32_1 = arith.constant 0 : i32
    return %c0_i32, %c0_i32_0 : i32, i32
  }
}

module attributes {stable_mosaic.version = 11 : i64} {
  func.func @kernel(%arg0: i32, %arg1: memref<512x72xbf16, #tpu.memory_space<vmem>>, %arg2: memref<72x4xbf16, #tpu.memory_space<vmem>>, %arg3: memref<512x4xf32, #tpu.memory_space<vmem>>) attributes {dimension_semantics = [#tpu.dimension_semantics<arbitrary>], iteration_bounds = array<i64: 1>, scalar_prefetch = 0 : i64, scratch_operands = 0 : i64, tpu.core_type = #tpu.core_type<tc>, window_params = [{pipeline_mode = #tpu.pipeline_mode<synchronous>, transform_indices = @transform_0, window_bounds = array<i64: 512, 72>}, {pipeline_mode = #tpu.pipeline_mode<synchronous>, transform_indices = @transform_1, window_bounds = array<i64: 72, 4>}, {pipeline_mode = #tpu.pipeline_mode<synchronous>, transform_indices = @transform_2, window_bounds = array<i64: 512, 4>}]} {
    %c0 = arith.constant 0 : index
    %c0_0 = arith.constant 0 : index
    %0 = vector.load %arg1[%c0, %c0_0] : memref<512x72xbf16, #tpu.memory_space<vmem>>, vector<512x72xbf16>
    %c0_1 = arith.constant 0 : index
    %c0_2 = arith.constant 0 : index
    %1 = vector.load %arg2[%c0_1, %c0_2] : memref<72x4xbf16, #tpu.memory_space<vmem>>, vector<72x4xbf16>
    %cst = arith.constant dense<0.000000e+00> : vector<512x4xf32>
    %2 = tpu.matmul %0, %1, %cst {dimension_numbers = #tpu.dot_dimension_numbers<[1], [0], [0], [1], [0, 0, 1, 1], [], []>} : vector<512x72xbf16>, vector<72x4xbf16>, vector<512x4xf32> -> vector<512x4xf32>
    %3 = arith.negf %2 : vector<512x4xf32>
    %4 = math.exp %3 : vector<512x4xf32>
    %cst_3 = arith.constant 1.000000e+00 : f32
    %5 = vector.broadcast %cst_3 : f32 to vector<512x4xf32>
    %6 = arith.addf %5, %4 : vector<512x4xf32>
    %7 = arith.divf %5, %6 : vector<512x4xf32>
    %c0_4 = arith.constant 0 : index
    %c0_5 = arith.constant 0 : index
    %8 = vector.load %arg3[%c0_4, %c0_5] : memref<512x4xf32, #tpu.memory_space<vmem>>, vector<512x4xf32>
    tpu.vector_store %arg3[%c0_4, %c0_5], %7 {strides = array<i32>} : memref<512x4xf32, #tpu.memory_space<vmem>>, vector<512x4xf32>,
    return
  }
  func.func @transform_0(%arg0: i32) -> (i32, i32) {
    %c0_i32 = arith.constant 0 : i32
    %c0_i32_0 = arith.constant 0 : i32
    %c0_i32_1 = arith.constant 0 : i32
    return %c0_i32, %c0_i32_0 : i32, i32
  }
  func.func @transform_1(%arg0: i32) -> (i32, i32) {
    %c0_i32 = arith.constant 0 : i32
    %c0_i32_0 = arith.constant 0 : i32
    %c0_i32_1 = arith.constant 0 : i32
    return %c0_i32, %c0_i32_0 : i32, i32
  }
  func.func @transform_2(%arg0: i32) -> (i32, i32) {
    %c0_i32 = arith.constant 0 : i32
    %c0_i32_0 = arith.constant 0 : i32
    %c0_i32_1 = arith.constant 0 : i32
    return %c0_i32, %c0_i32_0 : i32, i32
  }
}

</mosaic_0001>

<bundles_post_ra>
// kernel: decoder_forward.14
= control target key start
LH: loop header
LB: loop body
LE: loop exit
PB: predicated region body
PF: predicated region fallthrough
CT: control target
= control target key end

     0   :  { %vm48_vm0 = vcmask 1044480   ;;  %v221_v1 = vmov 0   ;;  %vm44_vm1 = vcmask 80896   ;;  %v26_v5 = vlaneseq  ;;  %s288_s1 = inlined_call_operand.vmem [shape: bf16[10,256], index: 1, kind: input, shape index: {}]   ;;  %s289_s0 = inlined_call_operand.vmem [shape: bf16[2,10], index: 0, kind: input, shape index: {}]   ;;  %s290_s2 = inlined_call_operand.vmem [shape: f32[1,256], index: 2, kind: input, shape index: {}]   ;;  %s291_s3 = inlined_call_operand.vmem [shape: f32[1,256], index: 3, kind: input, shape index: {}]   ;;  %s292_s4 = inlined_call_operand.vmem [shape: f32[1,256], index: 4, kind: input, shape index: {}]   ;;  %s293_s5 = inlined_call_operand.vmem [shape: f32[2,256], index: 5, kind: output, shape index: {}]  }
   0x1   :  { %v214_v0 = vld [vmem:[%s288_s1 + $0x4] ss:$8 sps:$4 sm:$0x1f]   ;;  %87 = vmatprep.mubr.bf16.mxu0 %v221_v1  ;;  %v216_v2 = vld [vmem:[%s288_s1] ss:$8 sps:$4 sm:$0x1f]  }
   0x2   :  { %209 = vmatprep.subr.msk.bf16.mxu0 %vm48_vm0, %v214_v0  ;;  %v50_v3 = vsel %vm48_vm0, %v216_v2, 0  ;;  %v21_v4 = vld [vmem:[%s289_s0] sm:$0x1]  ;;  %v27_v6 = vshrl.u32 %v26_v5, 7  ;;  %vm98_vm2 = vcmask 1041408  }
   0x3   :  { %56 = vmatpush1.bf16.msra.mxu0 %v50_v3  ;;  %v24_v8 = vld [vmem:[%s290_s2] sm:$0x3]  ;;  %v222_v56 = vmov 1966171168  }
   0x4   :  { %v262_v7 = vsub.s32 0, %v27_v6  ;;  %v267_v9 = vsub.s32 1, %v27_v6  ;;  %v144_v57 = vunpack.c.l.s4 %v222_v56  ;;  %v96_v0 = vld [vmem:[%s291_s3] sm:$0x3] }
   0x5   :  { %v97_v2 = vld [vmem:[%s292_s4] sm:$0x3] }
   0x6   :  { %210 = vmatmul.mubr.msk.bf16.vlgmr.msra.gmra.mrb[0].mxu0 %vm44_vm1, %v21_v4  ;;  %v29_v10 = vrot.slane %v24_v8, %v262_v7  ;;  %v33_v11 = vrot.slane %v24_v8, %v267_v9  ;;  %v145_v58 = vunpack.c.0.s8 %v144_v57  ;;  %v176_v8 = vrot.slane %v97_v2, %v262_v7 }
   0x8   :  { %v148_v60 = vsub.s32 %v145_v58, %v27_v6  ;;  %v180_v6 = vrot.slane %v97_v2, %v267_v9 }
  0xd9   :  { %v89_v12 = vpop.f32.mrb[0].mxu0 }
  0xda   :  { %v90_v13 = vadd.f32 %v89_v12, %v29_v10  ;;  %v91_v14 = vpop.f32.mrb[1].mxu0 }
  0xdb   :  { %v92_v15 = vadd.f32 %v91_v14, %v33_v11  ;;  %v93_v16 = vpop.f32.mrb[2].mxu0 }
  0xdc   :  { %v99_v17 = vsel %vm98_vm2, %v90_v13, 0.0  ;;  %v94_v18 = vpop.f32.mrb[3].mxu0 }
  0xdd   :  { %v100_v19 = vrot.slane %v99_v17, 4  ;;  %v106_v20 = vsel %vm98_vm2, %v92_v15, 0.0 }
  0xde   :  { %v107_v21 = vrot.slane %v106_v20, 4 }
  0xdf   :  { %v101_v22 = vadd.f32 %v100_v19, %v99_v17 }
  0xe0   :  { %v108_v23 = vadd.f32 %v107_v21, %v106_v20 }
  0xe1   :  { %v102_v24 = vrot.slane %v101_v22, 2 }
  0xe2   :  { %v109_v25 = vrot.slane %v108_v23, 2 }
  0xe3   :  { %v103_v26 = vadd.f32 %v102_v24, %v101_v22 }
  0xe4   :  { %v110_v27 = vadd.f32 %v109_v25, %v108_v23 }
  0xe5   :  { %v104_v28 = vrot.slane %v103_v26, 1 }
  0xe6   :  { %v111_v29 = vrot.slane %v110_v27, 1 }
  0xe7   :  { %v105_v30 = vadd.f32 %v104_v28, %v103_v26 }
  0xe8   :  { %v112_v31 = vadd.f32 %v111_v29, %v110_v27 }
  0xe9   :  { %v114_v32 = vmul.f32 0.5, %v105_v30 }
  0xea   :  { %v115_v33 = vmul.f32 0.5, %v112_v31 }
  0xeb   :  { %v116_v34 = vsub.f32 %v90_v13, %v114_v32 }
  0xec   :  { %v117_v35 = vsub.f32 %v92_v15, %v115_v33 }
  0xed   :  { %v118_v36 = vmul.f32 %v116_v34, %v116_v34 }
  0xee   :  { %v119_v37 = vmul.f32 %v117_v35, %v117_v35 }
  0xef   :  { %v120_v38 = vsel %vm98_vm2, %v118_v36, 0.0 }
  0xf0   :  { %v121_v39 = vrot.slane %v120_v38, 4  ;;  %v127_v40 = vsel %vm98_vm2, %v119_v37, 0.0 }
  0xf1   :  { %v128_v41 = vrot.slane %v127_v40, 4 }
  0xf2   :  { %v122_v42 = vadd.f32 %v121_v39, %v120_v38 }
  0xf3   :  { %v129_v43 = vadd.f32 %v128_v41, %v127_v40 }
  0xf4   :  { %v123_v44 = vrot.slane %v122_v42, 2 }
  0xf5   :  { %v130_v45 = vrot.slane %v129_v43, 2 }
  0xf6   :  { %v124_v46 = vadd.f32 %v123_v44, %v122_v42 }
  0xf7   :  { %v131_v47 = vadd.f32 %v130_v45, %v129_v43 }
  0xf8   :  { %v125_v48 = vrot.slane %v124_v46, 1 }
  0xf9   :  { %v132_v49 = vrot.slane %v131_v47, 1 }
  0xfa   :  { %v126_v50 = vadd.f32 %v125_v48, %v124_v46 }
  0xfb   :  { %v133_v51 = vadd.f32 %v132_v49, %v131_v47 }
  0xfc   :  { %v134_v52 = vmul.f32 0.5, %v126_v50 }
  0xfd   :  { %v135_v53 = vmul.f32 0.5, %v133_v51 }
  0xfe   :  { %v136_v54 = vadd.f32 1e-05, %v134_v52 }
  0xff   :  { %v137_v55 = vadd.f32 1e-05, %v135_v53 }
 0x100   :  { %217 = vrsqrt.f32 %v136_v54 }
 0x101   :  { %219 = vrsqrt.f32 %v137_v55 }
 0x10a   :  { %v218_v59 = vpop.eup %217 }
 0x10b   :  { %v220_v61 = vpop.eup %219 }
 0x10c   :  { %v142_v62 = vcombine.low %v218_v59, %v220_v61 }
 0x10e   :  { %v149_v63 = vrot.slane %v142_v62, %v148_v60 }
 0x110   :  { %v156_v1 = vrot.slane %v149_v63, %v148_v60 }
 0x112   :  { %v158_v3 = vmul.f32 %v156_v1, %v96_v0 }
 0x114   :  { %v163_v4 = vrot.slane %v158_v3, %v262_v7  ;;  %v167_v5 = vrot.slane %v158_v3, %v267_v9 }
 0x116   :  { %v170_v10 = vmul.f32 %v163_v4, %v116_v34  ;;  %v171_v11 = vmul.f32 %v167_v5, %v117_v35 }
 0x118   :  { %v183_v12 = vadd.f32 %v176_v8, %v170_v10  ;;  %v184_v13 = vadd.f32 %v180_v6, %v171_v11 }
 0x11a   :  { %vm185_vm3 = vcmp.ge.f32.partialorder %v183_v12, 0.0  ;;  %vm186_vm4 = vcmp.ge.f32.partialorder %v184_v13, 0.0  ;;  %v187_v14 = vmul.f32 0.01, %v183_v12  ;;  %v188_v15 = vmul.f32 0.01, %v184_v13 }
 0x11c   :  { %v189_v16 = vsel %vm185_vm3, %v183_v12, %v187_v14  ;;  %v190_v17 = vsel %vm186_vm4, %v184_v13, %v188_v15 }
 0x11d   :  { %v193_v18 = vcombine.low %v189_v16, %v190_v17 }
 0x11f   :  { %211 = vst.sshfl [vmem:[%s293_s5] sm:$0x33 pattern:$0x76325410] %v193_v18 }

// kernel: decoder_forward.15
= control target key start
LH: loop header
LB: loop body
LE: loop exit
PB: predicated region body
PF: predicated region fallthrough
CT: control target
= control target key end

     0   :  { %v645_v36 = vmov 0.0   ;;  %vm646_vm0 = vmmov 0   ;;  %vm326_vm1 = vcmask 523264   ;;  %s802_s1 = inlined_call_operand.vmem [shape: bf16[576,64], index: 1, kind: input, shape index: {}]   ;;  %s803_s0 = inlined_call_operand.vmem [shape: bf16[8,576], index: 0, kind: input, shape index: {}]   ;;  %s804_s2 = inlined_call_operand.vmem [shape: f32[1,64], index: 2, kind: input, shape index: {}]   ;;  %s805_s3 = inlined_call_operand.vmem [shape: f32[1,64], index: 3, kind: input, shape index: {}]   ;;  %s806_s4 = inlined_call_operand.vmem [shape: f32[8,64], index: 4, kind: output, shape index: {}]  }
   0x1   :  { %v602_v0 = vld [vmem:[%s802_s1 + $0x40] sm:$0xff]   ;;  %v606_v4 = vld [vmem:[%s802_s1 + $0x48] sm:$0xff]   ;;  %v610_v8 = vld [vmem:[%s802_s1 + $0x50] sm:$0xff]  }
   0x2   :  { %v603_v1 = vld [vmem:[%s802_s1 + $0xc0] sm:$0xff]   ;;  %539 = vmatprep.subr.bf16.mxu0 %v602_v0  ;;  %v607_v5 = vld [vmem:[%s802_s1 + $0xc8] sm:$0xff]   ;;  %v611_v9 = vld [vmem:[%s802_s1 + $0xd0] sm:$0xff]  }
   0x3   :  { %v604_v2 = vld [vmem:[%s802_s1] sm:$0xff]   ;;  %561 = vmatprep.subr.bf16.mxu1 %v603_v1  ;;  %v608_v6 = vld [vmem:[%s802_s1 + $0x8] sm:$0xff]   ;;  %v612_v10 = vld [vmem:[%s802_s1 + $0x10] sm:$0xff]  }
   0x4   :  { %v605_v3 = vld [vmem:[%s802_s1 + $0x80] sm:$0xff]   ;;  %540 = vmatpush3.bf16.msra.mxu0 %v604_v2  ;;  %v609_v7 = vld [vmem:[%s802_s1 + $0x88] sm:$0xff]   ;;  %v613_v11 = vld [vmem:[%s802_s1 + $0x90] sm:$0xff]  }
   0x5   :  { %562 = vmatpush3.bf16.msra.mxu1 %v605_v3  ;;  %541 = vmatprep.subr.bf16.mxu0 %v606_v4  ;;  %v614_v12 = vld [vmem:[%s802_s1 + $0x58] sm:$0xff]   ;;  %v618_v16 = vld [vmem:[%s802_s1 + $0x60] sm:$0xff]   ;;  %v622_v20 = vld [vmem:[%s802_s1 + $0x68] sm:$0xff]  }
   0x6   :  { %563 = vmatprep.subr.bf16.mxu1 %v607_v5  ;;  %v615_v13 = vld [vmem:[%s802_s1 + $0xd8] sm:$0xff]   ;;  %v619_v17 = vld [vmem:[%s802_s1 + $0xe0] sm:$0xff]   ;;  %v623_v21 = vld [vmem:[%s802_s1 + $0xe8] sm:$0xff]  }
   0x7   :  { %v616_v14 = vld [vmem:[%s802_s1 + $0x18] sm:$0xff]   ;;  %v620_v18 = vld [vmem:[%s802_s1 + $0x20] sm:$0xff]   ;;  %v624_v22 = vld [vmem:[%s802_s1 + $0x28] sm:$0xff]  }
   0x8   :  { %542 = vmatpush3.bf16.msra.mxu0 %v608_v6  ;;  %v617_v15 = vld [vmem:[%s802_s1 + $0x98] sm:$0xff]   ;;  %v621_v19 = vld [vmem:[%s802_s1 + $0xa0] sm:$0xff]   ;;  %v625_v23 = vld [vmem:[%s802_s1 + $0xa8] sm:$0xff]  }
   0x9   :  { %564 = vmatpush3.bf16.msra.mxu1 %v609_v7  ;;  %543 = vmatprep.subr.bf16.mxu0 %v610_v8  ;;  %v626_v24 = vld [vmem:[%s802_s1 + $0x70] sm:$0xff]   ;;  %v630_v28 = vld [vmem:[%s802_s1 + $0x78] sm:$0xff]   ;;  %v18_v32 = vld [vmem:[%s803_s0] sm:$0xff] }
   0xa   :  { %565 = vmatprep.subr.bf16.mxu1 %v611_v9  ;;  %v627_v25 = vld [vmem:[%s802_s1 + $0xf0] sm:$0xff]   ;;  %v631_v29 = vld [vmem:[%s802_s1 + $0xf8] sm:$0xff]   ;;  %v496_v33 = vcombine.low %v18_v32, %v18_v32  ;;  %v497_v34 = vcombine.high %v18_v32, %v18_v32  ;;  %v19_v35 = vld [vmem:[%s803_s0 + $0x8] sm:$0xff] }
   0xb   :  { %v628_v26 = vld [vmem:[%s802_s1 + $0x30] sm:$0xff]   ;;  %v632_v30 = vld [vmem:[%s802_s1 + $0x38] sm:$0xff]   ;;  %v498_v37 = vcombine.low %v19_v35, %v19_v35  ;;  %v499_v38 = vcombine.high %v19_v35, %v19_v35  ;;  %v639_v39 = vld [vmem:[%s802_s1 + $0x100] sm:$0xff]  }
   0xc   :  { %544 = vmatpush3.bf16.msra.mxu0 %v612_v10  ;;  %v629_v27 = vld [vmem:[%s802_s1 + $0xb0] sm:$0xff]   ;;  %v633_v31 = vld [vmem:[%s802_s1 + $0xb8] sm:$0xff]   ;;  %362 = vmatprep.mubr.bf16.mxu0 %v497_v34  ;;  %v640_v40 = vld [vmem:[%s802_s1 + $0x108] sm:$0xff]  }
   0xd   :  { %566 = vmatpush3.bf16.msra.mxu1 %v613_v11  ;;  %545 = vmatprep.subr.bf16.mxu0 %v614_v12  ;;  %v641_v41 = vld [vmem:[%s802_s1 + $0x110] sm:$0xff]   ;;  %v642_v42 = vld [vmem:[%s802_s1 + $0x118] sm:$0xff]  }
   0xe   :  { %567 = vmatprep.subr.bf16.mxu1 %v615_v13  ;;  %402 = vmatprep.mubr.bf16.mxu1 %v499_v38  ;;  %v636_v43 = vld [vmem:[%s803_s0 + $0x10] ss:$0 sps:$4 sm:$0xff]  }
  0x10   :  { %546 = vmatpush3.bf16.msra.mxu0 %v616_v14 }
  0x11   :  { %568 = vmatpush3.bf16.msra.mxu1 %v617_v15  ;;  %547 = vmatprep.subr.bf16.mxu0 %v618_v16  ;;  %v475_v15 = vlaneseq }
  0x12   :  { %569 = vmatprep.subr.bf16.mxu1 %v619_v17  ;;  %v450_v17 = vld [vmem:[%s804_s2] sm:$0x1] }
  0x13   :  { %v476_v16 = vshrl.u32 %v475_v15, 7 }
  0x14   :  { %548 = vmatpush3.bf16.msra.mxu0 %v620_v18 }
  0x15   :  { %570 = vmatpush3.bf16.msra.mxu1 %v621_v19  ;;  %549 = vmatprep.subr.bf16.mxu0 %v622_v20  ;;  %v477_v18 = vsub.s32 0, %v476_v16 }
  0x16   :  { %571 = vmatprep.subr.bf16.mxu1 %v623_v21 }
  0x18   :  { %550 = vmatpush3.bf16.msra.mxu0 %v624_v22  ;;  %v538_v22 = vld [vmem:[%s805_s3] ss:$0 sm:$0xff] }
  0x19   :  { %572 = vmatpush3.bf16.msra.mxu1 %v625_v23  ;;  %551 = vmatprep.subr.bf16.mxu0 %v626_v24 }
  0x1a   :  { %573 = vmatprep.subr.bf16.mxu1 %v627_v25 }
  0x1c   :  { %552 = vmatpush3.bf16.msra.mxu0 %v628_v26 }
  0x1d   :  { %574 = vmatpush3.bf16.msra.mxu1 %v629_v27  ;;  %553 = vmatprep.subr.bf16.mxu0 %v630_v28 }
  0x1e   :  { %575 = vmatprep.subr.bf16.mxu1 %v631_v29 }
  0x20   :  { %554 = vmatpush3.bf16.msra.mxu0 %v632_v30 }
  0x21   :  { %576 = vmatpush3.bf16.msra.mxu1 %v633_v31  ;;  %588 = vmatprep.subr.bf16.mxu0 %v645_v36 }
  0x23   :  { %363 = vmatmul.mubr.bf16.vlgmr.msra.gmra.mrb[0].mxu0 %v496_v33 }
  0x24   :  { %403 = vmatmul.mubr.bf16.vlgmr.msra.gmra.mrb[0].mxu1 %v498_v37  ;;  %589 = vmatpush3.bf16.msra.mxu0 %v639_v39 }
  0x25   :  { %590 = vmatprep.subr.bf16.mxu0 %v645_v36  ;;  %596 = vmatprep.mubr.msk.bf16.mxu0 %vm646_vm0, %v645_v36 }
  0x28   :  { %591 = vmatpush3.bf16.msra.mxu0 %v640_v40 }
  0x29   :  { %592 = vmatprep.subr.bf16.mxu0 %v645_v36 }
  0x2c   :  { %593 = vmatpush3.bf16.msra.mxu0 %v641_v41 }
  0x2d   :  { %594 = vmatprep.subr.bf16.mxu0 %v645_v36 }
  0x30   :  { %595 = vmatpush3.bf16.msra.mxu0 %v642_v42 }
  0x33   :  { %597 = vmatmul.mubr.msk.bf16.vlgmr.msra.gmra.mrb[4].mxu0 %vm326_vm1, %v636_v43 }
  0xf6   :  { %v555_v44 = vpop.f32.mrb[0].mxu0 }
  0xf7   :  { %v577_v45 = vpop.f32.mrb[0].mxu1  ;;  %v556_v46 = vpop.f32.mrb[1].mxu0 }
  0xf8   :  { %v557_v47 = vadd.f32 %v556_v46, %v555_v44  ;;  %v578_v48 = vpop.f32.mrb[1].mxu1  ;;  %v558_v49 = vpop.f32.mrb[2].mxu0 }
  0xf9   :  { %v579_v50 = vadd.f32 %v578_v48, %v577_v45  ;;  %v559_v51 = vpop.f32.mrb[3].mxu0  ;;  %v580_v52 = vpop.f32.mrb[2].mxu1 }
  0xfa   :  { %v581_v53 = vpop.f32.mrb[3].mxu1 }
  0xfb   :  { %v405_v54 = vadd.f32 %v579_v50, %v557_v47 }
 0x106   :  { %v444_v55 = vpop.f32.mrb[4].mxu0 }
 0x107   :  { %v445_v56 = vadd.f32 %v444_v55, %v405_v54  ;;  %v598_v57 = vpop.f32.mrb[5].mxu0 }
 0x108   :  { %v447_v58 = vpop.f32.mrb[6].mxu0 }
 0x109   :  { %v452_v59 = vsel %vm326_vm1, %v445_v56, 0.0  ;;  %v599_v60 = vpop.f32.mrb[7].mxu0 }
 0x10a   :  { %v453_v61 = vrot.slane %v452_v59, 4 }
 0x10c   :  { %v454_v62 = vadd.f32 %v453_v61, %v452_v59 }
 0x10e   :  { %v455_v63 = vrot.slane %v454_v62, 2 }
 0x110   :  { %v456_v0 = vadd.f32 %v455_v63, %v454_v62 }
 0x112   :  { %v457_v1 = vrot.slane %v456_v0, 1 }
 0x114   :  { %v458_v2 = vadd.f32 %v457_v1, %v456_v0 }
 0x116   :  { %v460_v3 = vmul.f32 0.125, %v458_v2 }
 0x118   :  { %v461_v4 = vsub.f32 %v445_v56, %v460_v3 }
 0x11a   :  { %v462_v5 = vmul.f32 %v461_v4, %v461_v4 }
 0x11c   :  { %v463_v6 = vsel %vm326_vm1, %v462_v5, 0.0 }
 0x11d   :  { %v464_v7 = vrot.slane %v463_v6, 4 }
 0x11f   :  { %v465_v8 = vadd.f32 %v464_v7, %v463_v6 }
 0x121   :  { %v466_v9 = vrot.slane %v465_v8, 2 }
 0x123   :  { %v467_v10 = vadd.f32 %v466_v9, %v465_v8 }
 0x125   :  { %v468_v11 = vrot.slane %v467_v10, 1 }
 0x127   :  { %v469_v12 = vadd.f32 %v468_v11, %v467_v10 }
 0x129   :  { %v470_v13 = vmul.f32 0.125, %v469_v12 }
 0x12b   :  { %v471_v14 = vadd.f32 1e-05, %v470_v13 }
 0x12d   :  { %643 = vrsqrt.f32 %v471_v14 }
 0x137   :  { %v644_v19 = vpop.eup %643 }
 0x138   :  { %v473_v20 = vmul.f32 %v644_v19, %v450_v17 }
 0x13a   :  { %v478_v21 = vrot.slane %v473_v20, %v477_v18 }
 0x13c   :  { %v480_v23 = vmul.f32 %v478_v21, %v461_v4 }
 0x13e   :  { %v487_v24 = vadd.f32 %v538_v22, %v480_v23 }
 0x140   :  { %vm488_vm2 = vcmp.ge.f32.partialorder %v487_v24, 0.0  ;;  %v489_v25 = vmul.f32 0.01, %v487_v24 }
 0x142   :  { %v490_v26 = vsel %vm488_vm2, %v487_v24, %v489_v25 }
 0x143   :  { %491 = vst.msk [vmem:[%s806_s4] sm:$0xff] %vm326_vm1, %v490_v26 }

// kernel: decoder_forward.16
= control target key start
LH: loop header
LB: loop body
LE: loop exit
PB: predicated region body
PF: predicated region fallthrough
CT: control target
= control target key end

     0   :  { %v804_v36 = vmov 0.0   ;;  %vm805_vm0 = vmmov 0   ;;  %vm338_vm1 = vcmask 523264   ;;  %s1005_s1 = inlined_call_operand.vmem [shape: bf16[576,64], index: 1, kind: input, shape index: {}]   ;;  %s1006_s0 = inlined_call_operand.vmem [shape: bf16[8,576], index: 0, kind: input, shape index: {}]   ;;  %s1007_s4 = inlined_call_operand.vmem [shape: bf16[64,64], index: 4, kind: input, shape index: {}]   ;;  %s1008_s2 = inlined_call_operand.vmem [shape: f32[1,64], index: 2, kind: input, shape index: {}]   ;;  %s1009_s3 = inlined_call_operand.vmem [shape: f32[1,64], index: 3, kind: input, shape index: {}]   ;;  %s1010_s5 = inlined_call_operand.vmem [shape: f32[1,64], index: 5, kind: input, shape index: {}]   ;;  %s1011_s6 = inlined_call_operand.vmem [shape: f32[1,64], index: 6, kind: input, shape index: {}]   ;;  %s1012_s7 = inlined_call_operand.vmem [shape: f32[8,64], index: 7, kind: input, shape index: {}]   ;;  %s1013_s8 = inlined_call_operand.vmem [shape: f32[8,64], index: 8, kind: output, shape index: {}]  }
   0x1   :  { %v755_v0 = vld [vmem:[%s1005_s1 + $0x40] sm:$0xff]   ;;  %v759_v4 = vld [vmem:[%s1005_s1 + $0x48] sm:$0xff]   ;;  %v763_v8 = vld [vmem:[%s1005_s1 + $0x50] sm:$0xff]  }
   0x2   :  { %v756_v1 = vld [vmem:[%s1005_s1 + $0xc0] sm:$0xff]   ;;  %675 = vmatprep.subr.bf16.mxu0 %v755_v0  ;;  %v760_v5 = vld [vmem:[%s1005_s1 + $0xc8] sm:$0xff]   ;;  %v764_v9 = vld [vmem:[%s1005_s1 + $0xd0] sm:$0xff]  }
   0x3   :  { %v757_v2 = vld [vmem:[%s1005_s1] sm:$0xff]   ;;  %697 = vmatprep.subr.bf16.mxu1 %v756_v1  ;;  %v761_v6 = vld [vmem:[%s1005_s1 + $0x8] sm:$0xff]   ;;  %v765_v10 = vld [vmem:[%s1005_s1 + $0x10] sm:$0xff]  }
   0x4   :  { %v758_v3 = vld [vmem:[%s1005_s1 + $0x80] sm:$0xff]   ;;  %676 = vmatpush3.bf16.msra.mxu0 %v757_v2  ;;  %v762_v7 = vld [vmem:[%s1005_s1 + $0x88] sm:$0xff]   ;;  %v766_v11 = vld [vmem:[%s1005_s1 + $0x90] sm:$0xff]  }
   0x5   :  { %698 = vmatpush3.bf16.msra.mxu1 %v758_v3  ;;  %677 = vmatprep.subr.bf16.mxu0 %v759_v4  ;;  %v767_v12 = vld [vmem:[%s1005_s1 + $0x58] sm:$0xff]   ;;  %v771_v16 = vld [vmem:[%s1005_s1 + $0x60] sm:$0xff]   ;;  %v775_v20 = vld [vmem:[%s1005_s1 + $0x68] sm:$0xff]  }
   0x6   :  { %699 = vmatprep.subr.bf16.mxu1 %v760_v5  ;;  %v768_v13 = vld [vmem:[%s1005_s1 + $0xd8] sm:$0xff]   ;;  %v772_v17 = vld [vmem:[%s1005_s1 + $0xe0] sm:$0xff]   ;;  %v776_v21 = vld [vmem:[%s1005_s1 + $0xe8] sm:$0xff]  }
   0x7   :  { %v769_v14 = vld [vmem:[%s1005_s1 + $0x18] sm:$0xff]   ;;  %v773_v18 = vld [vmem:[%s1005_s1 + $0x20] sm:$0xff]   ;;  %v777_v22 = vld [vmem:[%s1005_s1 + $0x28] sm:$0xff]  }
   0x8   :  { %678 = vmatpush3.bf16.msra.mxu0 %v761_v6  ;;  %v770_v15 = vld [vmem:[%s1005_s1 + $0x98] sm:$0xff]   ;;  %v774_v19 = vld [vmem:[%s1005_s1 + $0xa0] sm:$0xff]   ;;  %v778_v23 = vld [vmem:[%s1005_s1 + $0xa8] sm:$0xff]  }
   0x9   :  { %700 = vmatpush3.bf16.msra.mxu1 %v762_v7  ;;  %679 = vmatprep.subr.bf16.mxu0 %v763_v8  ;;  %v779_v24 = vld [vmem:[%s1005_s1 + $0x70] sm:$0xff]   ;;  %v783_v28 = vld [vmem:[%s1005_s1 + $0x78] sm:$0xff]   ;;  %v30_v32 = vld [vmem:[%s1006_s0] sm:$0xff] }
   0xa   :  { %701 = vmatprep.subr.bf16.mxu1 %v764_v9  ;;  %v780_v25 = vld [vmem:[%s1005_s1 + $0xf0] sm:$0xff]   ;;  %v784_v29 = vld [vmem:[%s1005_s1 + $0xf8] sm:$0xff]   ;;  %v626_v33 = vcombine.low %v30_v32, %v30_v32  ;;  %v627_v34 = vcombine.high %v30_v32, %v30_v32  ;;  %v31_v35 = vld [vmem:[%s1006_s0 + $0x8] sm:$0xff] }
   0xb   :  { %v781_v26 = vld [vmem:[%s1005_s1 + $0x30] sm:$0xff]   ;;  %v785_v30 = vld [vmem:[%s1005_s1 + $0x38] sm:$0xff]   ;;  %v628_v37 = vcombine.low %v31_v35, %v31_v35  ;;  %v629_v38 = vcombine.high %v31_v35, %v31_v35  ;;  %v792_v39 = vld [vmem:[%s1005_s1 + $0x100] sm:$0xff]  }
   0xc   :  { %680 = vmatpush3.bf16.msra.mxu0 %v765_v10  ;;  %v782_v27 = vld [vmem:[%s1005_s1 + $0xb0] sm:$0xff]   ;;  %v786_v31 = vld [vmem:[%s1005_s1 + $0xb8] sm:$0xff]   ;;  %374 = vmatprep.mubr.bf16.mxu0 %v627_v34  ;;  %v793_v40 = vld [vmem:[%s1005_s1 + $0x108] sm:$0xff]  }
   0xd   :  { %702 = vmatpush3.bf16.msra.mxu1 %v766_v11  ;;  %681 = vmatprep.subr.bf16.mxu0 %v767_v12  ;;  %v794_v41 = vld [vmem:[%s1005_s1 + $0x110] sm:$0xff]   ;;  %v795_v42 = vld [vmem:[%s1005_s1 + $0x118] sm:$0xff]   ;;  %v796_v44 = vld [vmem:[%s1007_s4] sm:$0xff]  }
   0xe   :  { %703 = vmatprep.subr.bf16.mxu1 %v768_v13  ;;  %414 = vmatprep.mubr.bf16.mxu1 %v629_v38  ;;  %v789_v43 = vld [vmem:[%s1006_s0 + $0x10] ss:$0 sps:$4 sm:$0xff]   ;;  %v797_v45 = vld [vmem:[%s1007_s4 + $0x8] sm:$0xff]   ;;  %v799_v47 = vld [vmem:[%s1007_s4 + $0x18] sm:$0xff]  }
   0xf   :  { %v798_v46 = vld [vmem:[%s1007_s4 + $0x10] sm:$0xff]  }
  0x10   :  { %682 = vmatpush3.bf16.msra.mxu0 %v769_v14 }
  0x11   :  { %704 = vmatpush3.bf16.msra.mxu1 %v770_v15  ;;  %683 = vmatprep.subr.bf16.mxu0 %v771_v16 }
  0x12   :  { %705 = vmatprep.subr.bf16.mxu1 %v772_v17 }
  0x14   :  { %684 = vmatpush3.bf16.msra.mxu0 %v773_v18 }
  0x15   :  { %706 = vmatpush3.bf16.msra.mxu1 %v774_v19  ;;  %685 = vmatprep.subr.bf16.mxu0 %v775_v20  ;;  %v487_v19 = vlaneseq }
  0x16   :  { %707 = vmatprep.subr.bf16.mxu1 %v776_v21  ;;  %v462_v21 = vld [vmem:[%s1008_s2] sm:$0x1] }
  0x17   :  { %v488_v20 = vshrl.u32 %v487_v19, 7 }
  0x18   :  { %686 = vmatpush3.bf16.msra.mxu0 %v777_v22 }
  0x19   :  { %708 = vmatpush3.bf16.msra.mxu1 %v778_v23  ;;  %687 = vmatprep.subr.bf16.mxu0 %v779_v24  ;;  %v489_v22 = vsub.s32 0, %v488_v20 }
  0x1a   :  { %709 = vmatprep.subr.bf16.mxu1 %v780_v25 }
  0x1c   :  { %688 = vmatpush3.bf16.msra.mxu0 %v781_v26  ;;  %v668_v26 = vld [vmem:[%s1009_s3] ss:$0 sm:$0xff] }
  0x1d   :  { %710 = vmatpush3.bf16.msra.mxu1 %v782_v27  ;;  %689 = vmatprep.subr.bf16.mxu0 %v783_v28 }
  0x1e   :  { %711 = vmatprep.subr.bf16.mxu1 %v784_v29 }
  0x20   :  { %690 = vmatpush3.bf16.msra.mxu0 %v785_v30 }
  0x21   :  { %712 = vmatpush3.bf16.msra.mxu1 %v786_v31  ;;  %729 = vmatprep.subr.bf16.mxu0 %v804_v36 }
  0x22   :  { %741 = vmatprep.subr.bf16.mxu1 %v804_v36 }
  0x23   :  { %375 = vmatmul.mubr.bf16.vlgmr.msra.gmra.mrb[0].mxu0 %v626_v33 }
  0x24   :  { %415 = vmatmul.mubr.bf16.vlgmr.msra.gmra.mrb[0].mxu1 %v628_v37  ;;  %730 = vmatpush3.bf16.msra.mxu0 %v792_v39 }
  0x25   :  { %731 = vmatprep.subr.bf16.mxu0 %v804_v36  ;;  %737 = vmatprep.mubr.msk.bf16.mxu0 %vm805_vm0, %v804_v36 }
  0x26   :  { %749 = vmatprep.mubr.msk.bf16.mxu1 %vm805_vm0, %v804_v36  ;;  %742 = vmatpush3.bf16.msra.mxu1 %v796_v44 }
  0x27   :  { %743 = vmatprep.subr.bf16.mxu1 %v804_v36 }
  0x28   :  { %732 = vmatpush3.bf16.msra.mxu0 %v793_v40 }
  0x29   :  { %733 = vmatprep.subr.bf16.mxu0 %v804_v36 }
  0x2a   :  { %744 = vmatpush3.bf16.msra.mxu1 %v797_v45 }
  0x2b   :  { %745 = vmatprep.subr.bf16.mxu1 %v804_v36 }
  0x2c   :  { %734 = vmatpush3.bf16.msra.mxu0 %v794_v41 }
  0x2d   :  { %735 = vmatprep.subr.bf16.mxu0 %v804_v36 }
  0x2e   :  { %746 = vmatpush3.bf16.msra.mxu1 %v798_v46 }
  0x2f   :  { %747 = vmatprep.subr.bf16.mxu1 %v804_v36 }
  0x30   :  { %736 = vmatpush3.bf16.msra.mxu0 %v795_v42 }
  0x32   :  { %748 = vmatpush3.bf16.msra.mxu1 %v799_v47 }
  0x33   :  { %738 = vmatmul.mubr.msk.bf16.vlgmr.msra.gmra.mrb[4].mxu0 %vm338_vm1, %v789_v43 }
  0xf6   :  { %v691_v48 = vpop.f32.mrb[0].mxu0 }
  0xf7   :  { %v713_v49 = vpop.f32.mrb[0].mxu1  ;;  %v692_v50 = vpop.f32.mrb[1].mxu0 }
  0xf8   :  { %v693_v51 = vadd.f32 %v692_v50, %v691_v48  ;;  %v714_v52 = vpop.f32.mrb[1].mxu1  ;;  %v694_v53 = vpop.f32.mrb[2].mxu0 }
  0xf9   :  { %v715_v54 = vadd.f32 %v714_v52, %v713_v49  ;;  %v695_v55 = vpop.f32.mrb[3].mxu0  ;;  %v716_v56 = vpop.f32.mrb[2].mxu1 }
  0xfa   :  { %v717_v57 = vpop.f32.mrb[3].mxu1  ;;  %v579_v55 = vld [vmem:[%s1010_s5] sm:$0x1] }
  0xfb   :  { %v417_v58 = vadd.f32 %v715_v54, %v693_v51 }
 0x106   :  { %v456_v59 = vpop.f32.mrb[4].mxu0 }
 0x107   :  { %v457_v60 = vadd.f32 %v456_v59, %v417_v58  ;;  %v739_v61 = vpop.f32.mrb[5].mxu0  ;;  %v674_v59 = vld [vmem:[%s1011_s6] ss:$0 sm:$0xff] }
 0x108   :  { %v459_v62 = vpop.f32.mrb[6].mxu0  ;;  %v616_v61 = vld [vmem:[%s1012_s7] sm:$0xff] }
 0x109   :  { %v464_v63 = vsel %vm338_vm1, %v457_v60, 0.0  ;;  %v740_v0 = vpop.f32.mrb[7].mxu0 }
 0x10a   :  { %v465_v1 = vrot.slane %v464_v63, 4 }
 0x10c   :  { %v466_v2 = vadd.f32 %v465_v1, %v464_v63 }
 0x10e   :  { %v467_v3 = vrot.slane %v466_v2, 2 }
 0x110   :  { %v468_v4 = vadd.f32 %v467_v3, %v466_v2 }
 0x112   :  { %v469_v5 = vrot.slane %v468_v4, 1 }
 0x114   :  { %v470_v6 = vadd.f32 %v469_v5, %v468_v4 }
 0x116   :  { %v472_v7 = vmul.f32 0.125, %v470_v6 }
 0x118   :  { %v473_v8 = vsub.f32 %v457_v60, %v472_v7 }
 0x11a   :  { %v474_v9 = vmul.f32 %v473_v8, %v473_v8 }
 0x11c   :  { %v475_v10 = vsel %vm338_vm1, %v474_v9, 0.0 }
 0x11d   :  { %v476_v11 = vrot.slane %v475_v10, 4 }
 0x11f   :  { %v477_v12 = vadd.f32 %v476_v11, %v475_v10 }
 0x121   :  { %v478_v13 = vrot.slane %v477_v12, 2 }
 0x123   :  { %v479_v14 = vadd.f32 %v478_v13, %v477_v12 }
 0x125   :  { %v480_v15 = vrot.slane %v479_v14, 1 }
 0x127   :  { %v481_v16 = vadd.f32 %v480_v15, %v479_v14 }
 0x129   :  { %v482_v17 = vmul.f32 0.125, %v481_v16 }
 0x12b   :  { %v483_v18 = vadd.f32 1e-05, %v482_v17 }
 0x12d   :  { %800 = vrsqrt.f32 %v483_v18 }
 0x137   :  { %v801_v23 = vpop.eup %800 }
 0x138   :  { %v485_v24 = vmul.f32 %v801_v23, %v462_v21 }
 0x13a   :  { %v490_v25 = vrot.slane %v485_v24, %v489_v22 }
 0x13c   :  { %v492_v27 = vmul.f32 %v490_v25, %v473_v8 }
 0x13e   :  { %v499_v28 = vadd.f32 %v668_v26, %v492_v27 }
 0x140   :  { %vm500_vm2 = vcmp.ge.f32.partialorder %v499_v28, 0.0  ;;  %v501_v29 = vmul.f32 0.01, %v499_v28 }
 0x142   :  { %v502_v30 = vsel %vm500_vm2, %v499_v28, %v501_v29 }
 0x143   :  { %v503_v31 = vpack.c.bf16 %v502_v30, %v502_v30 }
 0x145   :  { %750 = vmatmul.mubr.msk.bf16.vlgmr.msra.gmra.mrb[4].mxu1 %vm338_vm1, %v503_v31 }
 0x218   :  { %v573_v32 = vpop.f32.mrb[4].mxu1 }
 0x219   :  { %v581_v33 = vsel %vm338_vm1, %v573_v32, 0.0  ;;  %v751_v34 = vpop.f32.mrb[5].mxu1 }
 0x21a   :  { %v582_v35 = vrot.slane %v581_v33, 4  ;;  %v576_v36 = vpop.f32.mrb[6].mxu1 }
 0x21b   :  { %v752_v37 = vpop.f32.mrb[7].mxu1 }
 0x21c   :  { %v583_v38 = vadd.f32 %v582_v35, %v581_v33 }
 0x21e   :  { %v584_v39 = vrot.slane %v583_v38, 2 }
 0x220   :  { %v585_v40 = vadd.f32 %v584_v39, %v583_v38 }
 0x222   :  { %v586_v41 = vrot.slane %v585_v40, 1 }
 0x224   :  { %v587_v42 = vadd.f32 %v586_v41, %v585_v40 }
 0x226   :  { %v588_v43 = vmul.f32 0.125, %v587_v42 }
 0x228   :  { %v589_v44 = vsub.f32 %v573_v32, %v588_v43 }
 0x22a   :  { %v590_v45 = vmul.f32 %v589_v44, %v589_v44 }
 0x22c   :  { %v591_v46 = vsel %vm338_vm1, %v590_v45, 0.0 }
 0x22d   :  { %v592_v47 = vrot.slane %v591_v46, 4 }
 0x22f   :  { %v593_v48 = vadd.f32 %v592_v47, %v591_v46 }
 0x231   :  { %v594_v49 = vrot.slane %v593_v48, 2 }
 0x233   :  { %v595_v50 = vadd.f32 %v594_v49, %v593_v48 }
 0x235   :  { %v596_v51 = vrot.slane %v595_v50, 1 }
 0x237   :  { %v597_v52 = vadd.f32 %v596_v51, %v595_v50 }
 0x239   :  { %v598_v53 = vmul.f32 0.125, %v597_v52 }
 0x23b   :  { %v599_v54 = vadd.f32 1e-05, %v598_v53 }
 0x23d   :  { %802 = vrsqrt.f32 %v599_v54 }
 0x247   :  { %v803_v56 = vpop.eup %802 }
 0x248   :  { %v601_v57 = vmul.f32 %v803_v56, %v579_v55 }
 0x24a   :  { %v606_v58 = vrot.slane %v601_v57, %v489_v22 }
 0x24c   :  { %v608_v60 = vmul.f32 %v606_v58, %v589_v44 }
 0x24e   :  { %v615_v62 = vadd.f32 %v674_v59, %v608_v60 }
 0x250   :  { %v617_v63 = vadd.f32 %v616_v61, %v615_v62 }
 0x252   :  { %vm618_vm3 = vcmp.ge.f32.partialorder %v617_v63, 0.0  ;;  %v619_v0 = vmul.f32 0.01, %v617_v63 }
 0x254   :  { %v620_v1 = vsel %vm618_vm3, %v617_v63, %v619_v0 }
 0x255   :  { %621 = vst.msk [vmem:[%s1013_s8] sm:$0xff] %vm338_vm1, %v620_v1 }

// kernel: decoder_forward.20
= control target key start
LH: loop header
LB: loop body
LE: loop exit
PB: predicated region body
PF: predicated region fallthrough
CT: control target
= control target key end

     0   :  { %v789_v36 = vmov 0.0   ;;  %vm790_vm0 = vmmov 0   ;;  %vm326_vm1 = vcmask 523264   ;;  %vm488_vm2 = vcmask 1048320   ;;  %s793_s15 = smov 64   ;;  %s1004_s1 = inlined_call_operand.vmem [shape: bf16[576,128], index: 1, kind: input, shape index: {}]   ;;  %s1005_s0 = inlined_call_operand.vmem [shape: bf16[8,576], index: 0, kind: input, shape index: {}]   ;;  %s1006_s2 = inlined_call_operand.vmem [shape: f32[1,32], index: 2, kind: input, shape index: {}]   ;;  %s1007_s3 = inlined_call_operand.vmem [shape: f32[1,32], index: 3, kind: input, shape index: {}]   ;;  %s1008_s4 = inlined_call_operand.vmem [shape: f32[8,128], index: 4, kind: output, shape index: {}]  }
   0x1   :  { %v746_v0 = vld [vmem:[%s1004_s1 + $0x40] sm:$0xff]   ;;  %v750_v4 = vld [vmem:[%s1004_s1 + $0x48] sm:$0xff]   ;;  %v754_v8 = vld [vmem:[%s1004_s1 + $0x50] sm:$0xff]   ;;  %vm460_vm3 = vcmask 523520   ;;  %vm474_vm4 = vcmask 785920   ;;  %vm450_vm5 = vcmask 261120  }
   0x2   :  { %v747_v1 = vld [vmem:[%s1004_s1 + $0xc0] sm:$0xff]   ;;  %680 = vmatprep.subr.bf16.mxu0 %v746_v0  ;;  %v751_v5 = vld [vmem:[%s1004_s1 + $0xc8] sm:$0xff]   ;;  %v755_v9 = vld [vmem:[%s1004_s1 + $0xd0] sm:$0xff]  }
   0x3   :  { %v748_v2 = vld [vmem:[%s1004_s1] sm:$0xff]   ;;  %702 = vmatprep.subr.bf16.mxu1 %v747_v1  ;;  %v752_v6 = vld [vmem:[%s1004_s1 + $0x8] sm:$0xff]   ;;  %v756_v10 = vld [vmem:[%s1004_s1 + $0x10] sm:$0xff]  }
   0x4   :  { %v749_v3 = vld [vmem:[%s1004_s1 + $0x80] sm:$0xff]   ;;  %681 = vmatpush3.bf16.msra.mxu0 %v748_v2  ;;  %v753_v7 = vld [vmem:[%s1004_s1 + $0x88] sm:$0xff]   ;;  %v757_v11 = vld [vmem:[%s1004_s1 + $0x90] sm:$0xff]  }
   0x5   :  { %703 = vmatpush3.bf16.msra.mxu1 %v749_v3  ;;  %682 = vmatprep.subr.bf16.mxu0 %v750_v4  ;;  %v758_v12 = vld [vmem:[%s1004_s1 + $0x58] sm:$0xff]   ;;  %v762_v16 = vld [vmem:[%s1004_s1 + $0x60] sm:$0xff]   ;;  %v766_v20 = vld [vmem:[%s1004_s1 + $0x68] sm:$0xff]  }
   0x6   :  { %704 = vmatprep.subr.bf16.mxu1 %v751_v5  ;;  %v759_v13 = vld [vmem:[%s1004_s1 + $0xd8] sm:$0xff]   ;;  %v763_v17 = vld [vmem:[%s1004_s1 + $0xe0] sm:$0xff]   ;;  %v767_v21 = vld [vmem:[%s1004_s1 + $0xe8] sm:$0xff]  }
   0x7   :  { %v760_v14 = vld [vmem:[%s1004_s1 + $0x18] sm:$0xff]   ;;  %v764_v18 = vld [vmem:[%s1004_s1 + $0x20] sm:$0xff]   ;;  %v768_v22 = vld [vmem:[%s1004_s1 + $0x28] sm:$0xff]  }
   0x8   :  { %683 = vmatpush3.bf16.msra.mxu0 %v752_v6  ;;  %v761_v15 = vld [vmem:[%s1004_s1 + $0x98] sm:$0xff]   ;;  %v765_v19 = vld [vmem:[%s1004_s1 + $0xa0] sm:$0xff]   ;;  %v769_v23 = vld [vmem:[%s1004_s1 + $0xa8] sm:$0xff]  }
   0x9   :  { %705 = vmatpush3.bf16.msra.mxu1 %v753_v7  ;;  %684 = vmatprep.subr.bf16.mxu0 %v754_v8  ;;  %v770_v24 = vld [vmem:[%s1004_s1 + $0x70] sm:$0xff]   ;;  %v774_v28 = vld [vmem:[%s1004_s1 + $0x78] sm:$0xff]   ;;  %v18_v32 = vld [vmem:[%s1005_s0] sm:$0xff] }
   0xa   :  { %706 = vmatprep.subr.bf16.mxu1 %v755_v9  ;;  %v771_v25 = vld [vmem:[%s1004_s1 + $0xf0] sm:$0xff]   ;;  %v775_v29 = vld [vmem:[%s1004_s1 + $0xf8] sm:$0xff]   ;;  %v638_v33 = vcombine.low %v18_v32, %v18_v32  ;;  %v639_v34 = vcombine.high %v18_v32, %v18_v32  ;;  %v19_v35 = vld [vmem:[%s1005_s0 + $0x8] sm:$0xff] }
   0xb   :  { %v772_v26 = vld [vmem:[%s1004_s1 + $0x30] sm:$0xff]   ;;  %v776_v30 = vld [vmem:[%s1004_s1 + $0x38] sm:$0xff]   ;;  %v640_v37 = vcombine.low %v19_v35, %v19_v35  ;;  %v641_v38 = vcombine.high %v19_v35, %v19_v35  ;;  %v783_v39 = vld [vmem:[%s1004_s1 + $0x100] sm:$0xff]  }
   0xc   :  { %685 = vmatpush3.bf16.msra.mxu0 %v756_v10  ;;  %v773_v27 = vld [vmem:[%s1004_s1 + $0xb0] sm:$0xff]   ;;  %v777_v31 = vld [vmem:[%s1004_s1 + $0xb8] sm:$0xff]   ;;  %362 = vmatprep.mubr.bf16.mxu0 %v639_v34  ;;  %v784_v40 = vld [vmem:[%s1004_s1 + $0x108] sm:$0xff]  }
   0xd   :  { %707 = vmatpush3.bf16.msra.mxu1 %v757_v11  ;;  %686 = vmatprep.subr.bf16.mxu0 %v758_v12  ;;  %v785_v41 = vld [vmem:[%s1004_s1 + $0x110] sm:$0xff]   ;;  %v786_v42 = vld [vmem:[%s1004_s1 + $0x118] sm:$0xff]   ;;  %s792_s1 = smov 96  }
   0xe   :  { %708 = vmatprep.subr.bf16.mxu1 %v759_v13  ;;  %402 = vmatprep.mubr.bf16.mxu1 %v641_v38  ;;  %v780_v43 = vld [vmem:[%s1005_s0 + $0x10] ss:$0 sps:$4 sm:$0xff]   ;;  %s791_s0 = smov 32  }
  0x10   :  { %687 = vmatpush3.bf16.msra.mxu0 %v760_v14 }
  0x11   :  { %709 = vmatpush3.bf16.msra.mxu1 %v761_v15  ;;  %688 = vmatprep.subr.bf16.mxu0 %v762_v16 }
  0x12   :  { %710 = vmatprep.subr.bf16.mxu1 %v763_v17 }
  0x14   :  { %689 = vmatpush3.bf16.msra.mxu0 %v764_v18 }
  0x15   :  { %711 = vmatpush3.bf16.msra.mxu1 %v765_v19  ;;  %690 = vmatprep.subr.bf16.mxu0 %v766_v20 }
  0x16   :  { %712 = vmatprep.subr.bf16.mxu1 %v767_v21 }
  0x18   :  { %691 = vmatpush3.bf16.msra.mxu0 %v768_v22 }
  0x19   :  { %713 = vmatpush3.bf16.msra.mxu1 %v769_v23  ;;  %692 = vmatprep.subr.bf16.mxu0 %v770_v24 }
  0x1a   :  { %714 = vmatprep.subr.bf16.mxu1 %v771_v25 }
  0x1c   :  { %693 = vmatpush3.bf16.msra.mxu0 %v772_v26 }
  0x1d   :  { %715 = vmatpush3.bf16.msra.mxu1 %v773_v27  ;;  %694 = vmatprep.subr.bf16.mxu0 %v774_v28  ;;  %v503_v27 = vlaneseq }
  0x1e   :  { %716 = vmatprep.subr.bf16.mxu1 %v775_v29 }
  0x20   :  { %695 = vmatpush3.bf16.msra.mxu0 %v776_v30 }
  0x21   :  { %717 = vmatpush3.bf16.msra.mxu1 %v777_v31  ;;  %729 = vmatprep.subr.bf16.mxu0 %v789_v36  ;;  %v504_v31 = vshrl.u32 %v503_v27, 7  ;;  %v573_v27 = vld [vmem:[%s1006_s2] sm:$0x1] }
  0x23   :  { %363 = vmatmul.mubr.bf16.vlgmr.msra.gmra.mrb[0].mxu0 %v638_v33  ;;  %v949_v35 = vsub.s32 0, %v504_v31 }
  0x24   :  { %403 = vmatmul.mubr.bf16.vlgmr.msra.gmra.mrb[0].mxu1 %v640_v37  ;;  %730 = vmatpush3.bf16.msra.mxu0 %v783_v39 }
  0x25   :  { %731 = vmatprep.subr.bf16.mxu0 %v789_v36  ;;  %737 = vmatprep.mubr.msk.bf16.mxu0 %vm790_vm0, %v789_v36 }
  0x28   :  { %732 = vmatpush3.bf16.msra.mxu0 %v784_v40 }
  0x29   :  { %733 = vmatprep.subr.bf16.mxu0 %v789_v36 }
  0x2c   :  { %734 = vmatpush3.bf16.msra.mxu0 %v785_v41 }
  0x2d   :  { %735 = vmatprep.subr.bf16.mxu0 %v789_v36 }
  0x30   :  { %736 = vmatpush3.bf16.msra.mxu0 %v786_v42 }
  0x33   :  { %738 = vmatmul.mubr.msk.bf16.vlgmr.msra.gmra.mrb[4].mxu0 %vm326_vm1, %v780_v43 }
  0xf6   :  { %v696_v44 = vpop.f32.mrb[0].mxu0 }
  0xf7   :  { %v718_v45 = vpop.f32.mrb[0].mxu1  ;;  %v697_v46 = vpop.f32.mrb[1].mxu0 }
  0xf8   :  { %v698_v47 = vadd.f32 %v697_v46, %v696_v44  ;;  %v719_v48 = vpop.f32.mrb[1].mxu1  ;;  %v699_v49 = vpop.f32.mrb[2].mxu0 }
  0xf9   :  { %v720_v50 = vadd.f32 %v719_v48, %v718_v45  ;;  %v700_v51 = vpop.f32.mrb[3].mxu0  ;;  %v721_v52 = vpop.f32.mrb[2].mxu1 }
  0xfa   :  { %v722_v53 = vpop.f32.mrb[3].mxu1 }
  0xfb   :  { %v405_v54 = vadd.f32 %v720_v50, %v698_v47 }
 0x106   :  { %v444_v55 = vpop.f32.mrb[4].mxu0 }
 0x107   :  { %v936_v56 = vadd.f32 %v444_v55, %v405_v54  ;;  %v739_v57 = vpop.f32.mrb[5].mxu0 }
 0x108   :  { %v447_v58 = vpop.f32.mrb[6].mxu0 }
 0x109   :  { %v740_v59 = vpop.f32.mrb[7].mxu0  ;;  %v489_v60 = vsel %vm488_vm2, %v936_v56, 0.0  ;;  %v461_v61 = vsel %vm460_vm3, %v936_v56, 0.0  ;;  %v475_v62 = vsel %vm474_vm4, %v936_v56, 0.0  ;;  %v451_v20 = vsel %vm450_vm5, %v936_v56, 0.0 }
 0x10a   :  { %v490_v63 = vrot.slane %v489_v60, 4  ;;  %v462_v0 = vrot.slane %v461_v61, 4  ;;  %v476_v1 = vrot.slane %v475_v62, 4  ;;  %v452_v21 = vrot.slane %v451_v20, 4 }
 0x10c   :  { %v491_v2 = vadd.f32 %v490_v63, %v489_v60  ;;  %v463_v3 = vadd.f32 %v462_v0, %v461_v61  ;;  %v477_v4 = vadd.f32 %v476_v1, %v475_v62  ;;  %v453_v22 = vadd.f32 %v452_v21, %v451_v20 }
 0x10e   :  { %v492_v5 = vrot.slane %v491_v2, 2  ;;  %v464_v6 = vrot.slane %v463_v3, 2  ;;  %v478_v7 = vrot.slane %v477_v4, 2  ;;  %v454_v23 = vrot.slane %v453_v22, 2 }
 0x110   :  { %v493_v8 = vadd.f32 %v492_v5, %v491_v2  ;;  %v465_v9 = vadd.f32 %v464_v6, %v463_v3  ;;  %v479_v10 = vadd.f32 %v478_v7, %v477_v4  ;;  %v455_v24 = vadd.f32 %v454_v23, %v453_v22 }
 0x112   :  { %v494_v11 = vrot.slane %v493_v8, 1  ;;  %v466_v12 = vrot.slane %v465_v9, 1  ;;  %v480_v13 = vrot.slane %v479_v10, 1  ;;  %v456_v25 = vrot.slane %v455_v24, 1 }
 0x114   :  { %v495_v14 = vadd.f32 %v494_v11, %v493_v8  ;;  %v467_v15 = vadd.f32 %v466_v12, %v465_v9  ;;  %v481_v18 = vadd.f32 %v480_v13, %v479_v10  ;;  %v457_v26 = vadd.f32 %v456_v25, %v455_v24 }
 0x116   :  { %v496_v16 = vmul.f32 0.125, %v495_v14  ;;  %v468_v17 = vmul.f32 0.125, %v467_v15  ;;  %v482_v19 = vmul.f32 0.125, %v481_v18  ;;  %v459_v29 = vmul.f32 0.125, %v457_v26 }
 0x118   :  { %498 = vrot.lane.b32.xlu1 %v496_v16, %s791_s0  ;;  %470 = vrot.lane.b32.xlu0 %v468_v17, %s792_s1 }
 0x11c   :  { %484 = vrot.lane.b32.xlu0 %v482_v19, %s793_s15 }
 0x18a   :  { %v471_v28 = vpop.permute.xlu0 %470  ;;  %v499_v34 = vpop.permute.xlu1 %498 }
 0x18b   :  { %v473_v30 = vadd.f32 %v471_v28, %v459_v29 }
 0x18e   :  { %v485_v32 = vpop.permute.xlu0 %484 }
 0x18f   :  { %v487_v33 = vadd.f32 %v485_v32, %v473_v30  ;;  %v577_v30 = vld [vmem:[%s1007_s3] sm:$0x1] }
 0x191   :  { %v501_v36 = vadd.f32 %v499_v34, %v487_v33 }
 0x193   :  { %v951_v37 = vmul.f32 0.25, %v501_v36 }
 0x195   :  { %v506_v38 = vrot.slane %v951_v37, %v949_v35 }
 0x197   :  { %536 = vrot.lane.b32.xlu0 %v506_v38, %s793_s15  ;;  %518 = vrot.lane.b32.xlu1 %v506_v38, %s791_s0  ;;  %v507_v9 = vsub.f32 %v936_v56, %v506_v38 }
 0x199   :  { %v508_v10 = vmul.f32 %v507_v9, %v507_v9 }
 0x19b   :  { %554 = vrot.lane.b32.xlu1 %v506_v38, %s792_s1  ;;  %v509_v11 = vsel %vm450_vm5, %v508_v10, 0.0 }
 0x19c   :  { %v510_v12 = vrot.slane %v509_v11, 4 }
 0x19e   :  { %v511_v13 = vadd.f32 %v510_v12, %v509_v11 }
 0x1a0   :  { %v512_v14 = vrot.slane %v511_v13, 2 }
 0x1a2   :  { %v513_v15 = vadd.f32 %v512_v14, %v511_v13 }
 0x1a4   :  { %v514_v16 = vrot.slane %v513_v15, 1 }
 0x1a6   :  { %v515_v17 = vadd.f32 %v514_v16, %v513_v15 }
 0x1a8   :  { %v516_v18 = vmul.f32 0.125, %v515_v17 }
 0x209   :  { %v537_v39 = vpop.permute.xlu0 %536  ;;  %v519_v40 = vpop.permute.xlu1 %518 }
 0x20a   :  { %v539_v41 = vsub.f32 %v936_v56, %v537_v39  ;;  %v521_v42 = vsub.f32 %v936_v56, %v519_v40 }
 0x20c   :  { %v540_v43 = vmul.f32 %v539_v41, %v539_v41  ;;  %v522_v44 = vmul.f32 %v521_v42, %v521_v42 }
 0x20d   :  { %v555_v45 = vpop.permute.xlu1 %554 }
 0x20e   :  { %v541_v46 = vsel %vm474_vm4, %v540_v43, 0.0  ;;  %v523_v47 = vsel %vm460_vm3, %v522_v44, 0.0  ;;  %v557_v48 = vsub.f32 %v936_v56, %v555_v45 }
 0x20f   :  { %v542_v49 = vrot.slane %v541_v46, 4  ;;  %v524_v50 = vrot.slane %v523_v47, 4 }
 0x210   :  { %v558_v51 = vmul.f32 %v557_v48, %v557_v48 }
 0x211   :  { %v543_v52 = vadd.f32 %v542_v49, %v541_v46  ;;  %v525_v53 = vadd.f32 %v524_v50, %v523_v47 }
 0x212   :  { %v559_v54 = vsel %vm488_vm2, %v558_v51, 0.0 }
 0x213   :  { %v544_v55 = vrot.slane %v543_v52, 2  ;;  %v526_v57 = vrot.slane %v525_v53, 2  ;;  %v560_v58 = vrot.slane %v559_v54, 4 }
 0x215   :  { %v545_v59 = vadd.f32 %v544_v55, %v543_v52  ;;  %v527_v60 = vadd.f32 %v526_v57, %v525_v53  ;;  %v561_v61 = vadd.f32 %v560_v58, %v559_v54 }
 0x217   :  { %v562_v62 = vrot.slane %v561_v61, 2  ;;  %v546_v63 = vrot.slane %v545_v59, 1  ;;  %v528_v0 = vrot.slane %v527_v60, 1 }
 0x219   :  { %v563_v1 = vadd.f32 %v562_v62, %v561_v61  ;;  %v547_v2 = vadd.f32 %v546_v63, %v545_v59  ;;  %v529_v3 = vadd.f32 %v528_v0, %v527_v60 }
 0x21b   :  { %v548_v4 = vmul.f32 0.125, %v547_v2  ;;  %v530_v5 = vmul.f32 0.125, %v529_v3  ;;  %v564_v6 = vrot.slane %v563_v1, 1 }
 0x21d   :  { %550 = vrot.lane.b32.xlu1 %v548_v4, %s793_s15  ;;  %532 = vrot.lane.b32.xlu0 %v530_v5, %s792_s1  ;;  %v565_v7 = vadd.f32 %v564_v6, %v563_v1 }
 0x21f   :  { %v566_v8 = vmul.f32 0.125, %v565_v7 }
 0x221   :  { %568 = vrot.lane.b32.xlu0 %v566_v8, %s791_s0 }
 0x28f   :  { %v533_v19 = vpop.permute.xlu0 %532  ;;  %v551_v21 = vpop.permute.xlu1 %550 }
 0x290   :  { %v535_v20 = vadd.f32 %v533_v19, %v516_v18 }
 0x292   :  { %v553_v22 = vadd.f32 %v551_v21, %v535_v20 }
 0x293   :  { %v569_v23 = vpop.permute.xlu0 %568 }
 0x294   :  { %v571_v24 = vadd.f32 %v569_v23, %v553_v22 }
 0x296   :  { %v572_v25 = vmul.f32 0.25, %v571_v24 }
 0x298   :  { %v574_v26 = vadd.f32 1e-05, %v572_v25 }
 0x29a   :  { %787 = vrsqrt.f32 %v574_v26 }
 0x2a4   :  { %v788_v28 = vpop.eup %787 }
 0x2a5   :  { %v576_v29 = vmul.f32 %v788_v28, %v573_v27 }
 0x2a7   :  { %v584_v31 = vrot.slane %v576_v29, %v949_v35  ;;  %v578_v32 = vmul.f32 %v576_v29, %v951_v37 }
 0x2a9   :  { %610 = vrot.lane.b32.xlu0 %v584_v31, %s793_s15  ;;  %598 = vrot.lane.b32.xlu1 %v584_v31, %s791_s0  ;;  %v579_v33 = vsub.f32 %v577_v30, %v578_v32  ;;  %v586_v34 = vmul.f32 %v584_v31, %v936_v56 }
 0x2ab   :  { %v591_v36 = vrot.slane %v579_v33, %v949_v35 }
 0x2ad   :  { %622 = vrot.lane.b32.xlu0 %v584_v31, %s792_s1  ;;  %602 = vrot.lane.b32.xlu1 %v591_v36, %s791_s0  ;;  %v593_v38 = vadd.f32 %v591_v36, %v586_v34 }
 0x2af   :  { %vm594_vm6 = vcmp.ge.f32.partialorder %v593_v38, 0.0  ;;  %v595_v39 = vmul.f32 0.01, %v593_v38 }
 0x2b1   :  { %626 = vrot.lane.b32.xlu0 %v591_v36, %s792_s1  ;;  %614 = vrot.lane.b32.xlu1 %v591_v36, %s793_s15  ;;  %v596_v37 = vsel %vm594_vm6, %v593_v38, %v595_v39 }
 0x2b2   :  { %597 = vst.msk [vmem:[%s1008_s4] sm:$0xff] %vm450_vm5, %v596_v37 }
 0x31b   :  { %v611_v40 = vpop.permute.xlu0 %610  ;;  %v599_v41 = vpop.permute.xlu1 %598 }
 0x31c   :  { %v601_v35 = vmul.f32 %v599_v41, %v936_v56  ;;  %v613_v45 = vmul.f32 %v611_v40, %v936_v56 }
 0x31f   :  { %v623_v42 = vpop.permute.xlu0 %622  ;;  %v603_v43 = vpop.permute.xlu1 %602 }
 0x320   :  { %v605_v44 = vadd.f32 %v603_v43, %v601_v35  ;;  %v625_v46 = vmul.f32 %v623_v42, %v936_v56 }
 0x322   :  { %vm606_vm7 = vcmp.ge.f32.partialorder %v605_v44, 0.0  ;;  %v607_v47 = vmul.f32 0.01, %v605_v44 }
 0x323   :  { %v627_v48 = vpop.permute.xlu0 %626  ;;  %v615_v49 = vpop.permute.xlu1 %614 }
 0x324   :  { %v608_v50 = vsel %vm606_vm7, %v605_v44, %v607_v47  ;;  %v629_v51 = vadd.f32 %v627_v48, %v625_v46  ;;  %v617_v52 = vadd.f32 %v615_v49, %v613_v45 }
 0x325   :  { %609 = vst.msk [vmem:[%s1008_s4] sm:$0xff] %vm460_vm3, %v608_v50 }
 0x326   :  { %vm630_vm8 = vcmp.ge.f32.partialorder %v629_v51, 0.0  ;;  %v631_v53 = vmul.f32 0.01, %v629_v51  ;;  %vm618_vm9 = vcmp.ge.f32.partialorder %v617_v52, 0.0  ;;  %v619_v54 = vmul.f32 0.01, %v617_v52 }
 0x328   :  { %v632_v55 = vsel %vm630_vm8, %v629_v51, %v631_v53  ;;  %v620_v57 = vsel %vm618_vm9, %v617_v52, %v619_v54 }
 0x329   :  { %621 = vst.msk [vmem:[%s1008_s4] sm:$0xff] %vm474_vm4, %v620_v57 }
 0x32a   :  { %633 = vst.msk [vmem:[%s1008_s4] sm:$0xff] %vm488_vm2, %v632_v55 }

// kernel: decoder_forward.21
= control target key start
LH: loop header
LB: loop body
LE: loop exit
PB: predicated region body
PF: predicated region fallthrough
CT: control target
= control target key end

     0   :  { %vm200_vm0 = vcmask 261120   ;;  %vm361_vm1 = vcmask 523648   ;;  %vm321_vm2 = vcmask 261248   ;;  %vm341_vm3 = vcmask 392448   ;;  %s739_s11 = smov 96   ;;  %s740_s12 = smov 32   ;;  %s1032_s1 = inlined_call_operand.vmem [shape: bf16[288,64], index: 1, kind: input, shape index: {}]   ;;  %s1033_s0 = inlined_call_operand.vmem [shape: bf16[32,288], index: 0, kind: input, shape index: {}]   ;;  %s1034_s2 = inlined_call_operand.vmem [shape: f32[1,16], index: 2, kind: input, shape index: {}]   ;;  %s1035_s3 = inlined_call_operand.vmem [shape: f32[1,16], index: 3, kind: input, shape index: {}]   ;;  %s1036_s4 = inlined_call_operand.vmem [shape: f32[32,64], index: 4, kind: output, shape index: {}]  }
   0x1   :  { %v709_v0 = vld [vmem:[%s1032_s1 + $0x40] sm:$0xff]   ;;  %v711_v2 = vld [vmem:[%s1032_s1 + $0x48] sm:$0xff]   ;;  %v713_v4 = vld [vmem:[%s1032_s1 + $0x50] sm:$0xff]   ;;  %vm305_vm4 = vcmask 130048   ;;  %s741_s13 = smov 16   ;;  %s742_s14 = smov 48  }
   0x2   :  { %v710_v1 = vld [vmem:[%s1032_s1] sm:$0xff]   ;;  %663 = vmatprep.subr.bf16.mxu0 %v709_v0  ;;  %v712_v3 = vld [vmem:[%s1032_s1 + $0x8] sm:$0xff]   ;;  %v714_v5 = vld [vmem:[%s1032_s1 + $0x10] sm:$0xff]  }
   0x3   :  { %664 = vmatpush3.bf16.msra.mxu0 %v710_v1  ;;  %v715_v6 = vld [vmem:[%s1032_s1 + $0x58] sm:$0xff]   ;;  %v717_v8 = vld [vmem:[%s1032_s1 + $0x60] sm:$0xff]   ;;  %v719_v11 = vld [vmem:[%s1032_s1 + $0x68] sm:$0xff]  }
   0x4   :  { %665 = vmatprep.subr.bf16.mxu0 %v711_v2  ;;  %v716_v7 = vld [vmem:[%s1032_s1 + $0x18] sm:$0xff]   ;;  %v723_v9 = vld [vmem:[%s1032_s1 + $0x80] sm:$0xff]   ;;  %v720_v12 = vld [vmem:[%s1032_s1 + $0x28] sm:$0xff]  }
   0x5   :  { %v718_v10 = vld [vmem:[%s1032_s1 + $0x20] sm:$0xff]   ;;  %695 = vmatprep.subr.bf16.mxu1 %v723_v9  ;;  %v726_v13 = vld [vmem:[%s1032_s1 + $0x88] sm:$0xff]   ;;  %v721_v14 = vld [vmem:[%s1032_s1 + $0x70] sm:$0xff]  }
   0x6   :  { %696 = vmatpush3.bf16.msra.mxu1 %v723_v9  ;;  %v729_v15 = vld [vmem:[%s1033_s0 + $0x4] ss:$12 sps:$4 sm:$0xff]   ;;  %v730_v16 = vld [vmem:[%s1033_s0 + $0x8] ss:$12 sps:$4 sm:$0xff]   ;;  %v731_v17 = vld [vmem:[%s1033_s0 + $0x20] ss:$12 sps:$4 sm:$0xff]  }
   0x7   :  { %666 = vmatpush3.bf16.msra.mxu0 %v712_v3  ;;  %697 = vmatprep.subr.bf16.mxu1 %v726_v13  ;;  %v722_v18 = vld [vmem:[%s1032_s1 + $0x30] sm:$0xff]   ;;  %v724_v19 = vld [vmem:[%s1032_s1 + $0x78] sm:$0xff]   ;;  %v727_v21 = vld [vmem:[%s1033_s0] ss:$12 sps:$4 sm:$0xff]  }
   0x8   :  { %667 = vmatprep.subr.bf16.mxu0 %v713_v4  ;;  %239 = vmatprep.mubr.bf16.mxu0 %v729_v15  ;;  %v725_v20 = vld [vmem:[%s1032_s1 + $0x38] sm:$0xff]   ;;  %s738_s1 = smov 112  }
   0x9   :  { %699 = vmatprep.mubr.msk.bf16.mxu1 %vm200_vm0, %v730_v16  ;;  %v732_v22 = vld [vmem:[%s1033_s0 + $0x1c] ss:$12 sps:$4 sm:$0xff]   ;;  %v734_v23 = vld [vmem:[%s1033_s0 + $0x18] ss:$12 sps:$4 sm:$0xff]   ;;  %s737_s0 = smov 80  }
   0xa   :  { %698 = vmatpush3.bf16.msra.mxu1 %v726_v13 }
   0xb   :  { %668 = vmatpush3.bf16.msra.mxu0 %v714_v5 }
   0xc   :  { %669 = vmatprep.subr.bf16.mxu0 %v715_v6 }
   0xd   :  { %700 = vmatmul.mubr.msk.bf16.vlgmr.msra.gmra.mrb[0].mxu1 %vm200_vm0, %v731_v17 }
   0xf   :  { %670 = vmatpush3.bf16.msra.mxu0 %v716_v7 }
  0x10   :  { %671 = vmatprep.subr.bf16.mxu0 %v717_v8 }
  0x13   :  { %672 = vmatpush3.bf16.msra.mxu0 %v718_v10 }
  0x14   :  { %673 = vmatprep.subr.bf16.mxu0 %v719_v11 }
  0x17   :  { %674 = vmatpush3.bf16.msra.mxu0 %v720_v12 }
  0x18   :  { %675 = vmatprep.subr.bf16.mxu0 %v721_v14 }
  0x1b   :  { %676 = vmatpush3.bf16.msra.mxu0 %v722_v18 }
  0x1c   :  { %677 = vmatprep.subr.bf16.mxu0 %v724_v19 }
  0x1f   :  { %678 = vmatpush3.bf16.msra.mxu0 %v725_v20 }
  0x22   :  { %240 = vmatmul.mubr.bf16.vlgmr.msra.gmra.mrb[0].mxu0 %v727_v21 }
  0x23   :  { %247 = vmatprep.mubr.bf16.mxu0 %v732_v22 }
  0x2a   :  { %248 = vmatmul.mubr.bf16.gmra.mrb[4].mxu0 %v734_v23 }
  0xe0   :  { %v701_v24 = vpop.f32.mrb[0].mxu1 }
  0xe1   :  { %v290_v25 = vpop.f32.mrb[1].mxu1 }
  0xe2   :  { %v702_v26 = vpop.f32.mrb[2].mxu1 }
  0xe3   :  { %v293_v27 = vpop.f32.mrb[3].mxu1 }
  0xf5   :  { %v679_v28 = vpop.f32.mrb[0].mxu0 }
  0xf6   :  { %v680_v29 = vpop.f32.mrb[1].mxu0 }
  0xf7   :  { %v681_v30 = vadd.f32 %v680_v29, %v679_v28  ;;  %v682_v31 = vpop.f32.mrb[2].mxu0 }
  0xf8   :  { %v683_v32 = vpop.f32.mrb[3].mxu0 }
  0xf9   :  { %v684_v33 = vadd.f32 %v683_v32, %v682_v31  ;;  %v840_v34 = vadd.f32 %v681_v30, %v290_v25 }
  0xfb   :  { %v842_v35 = vadd.f32 %v684_v33, %v293_v27  ;;  %v362_v44 = vsel %vm361_vm1, %v840_v34, 0.0  ;;  %v322_v47 = vsel %vm321_vm2, %v840_v34, 0.0  ;;  %v342_v48 = vsel %vm341_vm3, %v840_v34, 0.0 }
  0xfd   :  { %v685_v36 = vpop.f32.mrb[4].mxu0  ;;  %v363_v40 = vsel %vm361_vm1, %v842_v35, 0.0  ;;  %v323_v41 = vsel %vm321_vm2, %v842_v35, 0.0  ;;  %v343_v42 = vsel %vm341_vm3, %v842_v35, 0.0  ;;  %v307_v22 = vsel %vm305_vm4, %v842_v35, 0.0 }
  0xfe   :  { %v686_v37 = vpop.f32.mrb[5].mxu0  ;;  %v364_v49 = vadd.f32 %v363_v40, %v362_v44  ;;  %v324_v50 = vadd.f32 %v323_v41, %v322_v47  ;;  %v344_v51 = vadd.f32 %v343_v42, %v342_v48 }
  0xff   :  { %v687_v38 = vadd.f32 %v686_v37, %v685_v36  ;;  %v688_v39 = vpop.f32.mrb[6].mxu0  ;;  %v382_v37 = vlaneseq }
 0x100   :  { %v689_v43 = vpop.f32.mrb[7].mxu0 }
 0x101   :  { %v852_v45 = vadd.f32 %v701_v24, %v687_v38  ;;  %v690_v46 = vadd.f32 %v689_v43, %v688_v39  ;;  %v306_v24 = vsel %vm305_vm4, %v840_v34, 0.0  ;;  %v383_v41 = vshrl.u32 %v382_v37, 7 }
 0x102   :  { %v308_v25 = vadd.f32 %v307_v22, %v306_v24 }
 0x103   :  { %v858_v52 = vadd.f32 %v702_v26, %v690_v46  ;;  %v365_v53 = vsel %vm361_vm1, %v852_v45, 0.0  ;;  %v325_v54 = vsel %vm321_vm2, %v852_v45, 0.0  ;;  %v345_v55 = vsel %vm341_vm3, %v852_v45, 0.0 }
 0x104   :  { %v366_v56 = vadd.f32 %v365_v53, %v364_v49  ;;  %v326_v57 = vadd.f32 %v325_v54, %v324_v50  ;;  %v346_v58 = vadd.f32 %v345_v55, %v344_v51  ;;  %v309_v23 = vsel %vm305_vm4, %v852_v45, 0.0 }
 0x105   :  { %v367_v59 = vsel %vm361_vm1, %v858_v52, 0.0  ;;  %v327_v60 = vsel %vm321_vm2, %v858_v52, 0.0  ;;  %v347_v61 = vsel %vm341_vm3, %v858_v52, 0.0  ;;  %v310_v26 = vadd.f32 %v309_v23, %v308_v25 }
 0x106   :  { %v368_v62 = vadd.f32 %v367_v59, %v366_v56  ;;  %v328_v63 = vadd.f32 %v327_v60, %v326_v57  ;;  %v348_v0 = vadd.f32 %v347_v61, %v346_v58  ;;  %v311_v27 = vsel %vm305_vm4, %v858_v52, 0.0 }
 0x107   :  { %v312_v28 = vadd.f32 %v311_v27, %v310_v26  ;;  %v883_v46 = vsub.s32 0, %v383_v41 }
 0x108   :  { %v369_v1 = vrot.slane %v368_v62, 4  ;;  %v329_v2 = vrot.slane %v328_v63, 4  ;;  %v349_v3 = vrot.slane %v348_v0, 4 }
 0x109   :  { %v313_v29 = vrot.slane %v312_v28, 4 }
 0x10a   :  { %v370_v4 = vadd.f32 %v369_v1, %v368_v62  ;;  %v330_v5 = vadd.f32 %v329_v2, %v328_v63  ;;  %v350_v6 = vadd.f32 %v349_v3, %v348_v0 }
 0x10b   :  { %v314_v30 = vadd.f32 %v313_v29, %v312_v28 }
 0x10c   :  { %v371_v7 = vrot.slane %v370_v4, 2  ;;  %v331_v8 = vrot.slane %v330_v5, 2  ;;  %v351_v9 = vrot.slane %v350_v6, 2 }
 0x10d   :  { %v315_v31 = vrot.slane %v314_v30, 2 }
 0x10e   :  { %v372_v10 = vadd.f32 %v371_v7, %v370_v4  ;;  %v332_v11 = vadd.f32 %v331_v8, %v330_v5  ;;  %v352_v12 = vadd.f32 %v351_v9, %v350_v6 }
 0x10f   :  { %v316_v32 = vadd.f32 %v315_v31, %v314_v30 }
 0x110   :  { %v373_v13 = vrot.slane %v372_v10, 1  ;;  %v333_v14 = vrot.slane %v332_v11, 1  ;;  %v353_v15 = vrot.slane %v352_v12, 1 }
 0x111   :  { %v317_v33 = vrot.slane %v316_v32, 1 }
 0x112   :  { %v374_v16 = vadd.f32 %v373_v13, %v372_v10  ;;  %v334_v17 = vadd.f32 %v333_v14, %v332_v11  ;;  %v354_v20 = vadd.f32 %v353_v15, %v352_v12 }
 0x113   :  { %v318_v36 = vadd.f32 %v317_v33, %v316_v32 }
 0x114   :  { %v375_v18 = vmul.f32 0.03125, %v374_v16  ;;  %v335_v19 = vmul.f32 0.03125, %v334_v17  ;;  %v355_v21 = vmul.f32 0.03125, %v354_v20 }
 0x115   :  { %v320_v39 = vmul.f32 0.03125, %v318_v36 }
 0x116   :  { %377 = vrot.lane.b32.xlu1 %v375_v18, %s737_s0  ;;  %337 = vrot.lane.b32.xlu0 %v335_v19, %s738_s1 }
 0x11a   :  { %357 = vrot.lane.b32.xlu0 %v355_v21, %s739_s11 }
 0x188   :  { %v338_v38 = vpop.permute.xlu0 %337  ;;  %v378_v44 = vpop.permute.xlu1 %377 }
 0x189   :  { %v340_v40 = vadd.f32 %v338_v38, %v320_v39 }
 0x18c   :  { %v358_v42 = vpop.permute.xlu0 %357 }
 0x18d   :  { %v360_v43 = vadd.f32 %v358_v42, %v340_v40 }
 0x18f   :  { %v380_v47 = vadd.f32 %v378_v44, %v360_v43 }
 0x191   :  { %v885_v48 = vmul.f32 0.25, %v380_v47 }
 0x193   :  { %v889_v49 = vrot.slane %v885_v48, %v883_v46 }
 0x195   :  { %439 = vrot.lane.b32.xlu0 %v889_v49, %s740_s12  ;;  %409 = vrot.lane.b32.xlu1 %v889_v49, %s741_s13 }
 0x199   :  { %469 = vrot.lane.b32.xlu1 %v889_v49, %s742_s14 }
 0x207   :  { %v440_v50 = vpop.permute.xlu0 %439  ;;  %v410_v51 = vpop.permute.xlu1 %409 }
 0x208   :  { %v442_v53 = vsub.f32 %v840_v34, %v440_v50  ;;  %v443_v54 = vsub.f32 %v842_v35, %v440_v50  ;;  %v444_v55 = vsub.f32 %v852_v45, %v440_v50  ;;  %v445_v56 = vsub.f32 %v858_v52, %v440_v50 }
 0x209   :  { %v412_v57 = vsub.f32 %v840_v34, %v410_v51  ;;  %v413_v58 = vsub.f32 %v842_v35, %v410_v51  ;;  %v414_v59 = vsub.f32 %v852_v45, %v410_v51  ;;  %v415_v60 = vsub.f32 %v858_v52, %v410_v51 }
 0x20a   :  { %v446_v61 = vmul.f32 %v442_v53, %v442_v53  ;;  %v447_v62 = vmul.f32 %v443_v54, %v443_v54  ;;  %v448_v63 = vmul.f32 %v444_v55, %v444_v55  ;;  %v449_v4 = vmul.f32 %v445_v56, %v445_v56 }
 0x20b   :  { %v416_v0 = vmul.f32 %v412_v57, %v412_v57  ;;  %v417_v1 = vmul.f32 %v413_v58, %v413_v58  ;;  %v418_v2 = vmul.f32 %v414_v59, %v414_v59  ;;  %v470_v3 = vpop.permute.xlu1 %469  ;;  %v419_v8 = vmul.f32 %v415_v60, %v415_v60 }
 0x20c   :  { %v450_v5 = vsel %vm341_vm3, %v446_v61, 0.0  ;;  %v451_v6 = vsel %vm341_vm3, %v447_v62, 0.0  ;;  %v453_v11 = vsel %vm341_vm3, %v448_v63, 0.0  ;;  %v472_v13 = vsub.f32 %v840_v34, %v470_v3 }
 0x20d   :  { %v452_v7 = vadd.f32 %v451_v6, %v450_v5  ;;  %v420_v9 = vsel %vm321_vm2, %v416_v0, 0.0  ;;  %v421_v10 = vsel %vm321_vm2, %v417_v1, 0.0  ;;  %v473_v14 = vsub.f32 %v842_v35, %v470_v3 }
 0x20e   :  { %v422_v12 = vadd.f32 %v421_v10, %v420_v9  ;;  %v423_v16 = vsel %vm321_vm2, %v418_v2, 0.0  ;;  %v474_v17 = vsub.f32 %v852_v45, %v470_v3  ;;  %v475_v18 = vsub.f32 %v858_v52, %v470_v3 }
 0x20f   :  { %v454_v15 = vadd.f32 %v453_v11, %v452_v7  ;;  %v455_v19 = vsel %vm341_vm3, %v449_v4, 0.0  ;;  %v476_v21 = vmul.f32 %v472_v13, %v472_v13  ;;  %v477_v22 = vmul.f32 %v473_v14, %v473_v14 }
 0x210   :  { %v424_v20 = vadd.f32 %v423_v16, %v422_v12  ;;  %v425_v24 = vsel %vm321_vm2, %v419_v8, 0.0  ;;  %v478_v25 = vmul.f32 %v474_v17, %v474_v17  ;;  %v479_v27 = vmul.f32 %v475_v18, %v475_v18 }
 0x211   :  { %v456_v23 = vadd.f32 %v455_v19, %v454_v15  ;;  %v480_v28 = vsel %vm361_vm1, %v476_v21, 0.0  ;;  %v481_v29 = vsel %vm361_vm1, %v477_v22, 0.0  ;;  %v386_v63 = vsub.f32 %v840_v34, %v889_v49 }
 0x212   :  { %v426_v26 = vadd.f32 %v425_v24, %v424_v20  ;;  %v482_v30 = vadd.f32 %v481_v29, %v480_v28  ;;  %v483_v32 = vsel %vm361_vm1, %v478_v25, 0.0  ;;  %v485_v38 = vsel %vm361_vm1, %v479_v27, 0.0  ;;  %v500_v28 = vld [vmem:[%s1034_s2] sm:$0x1] }
 0x213   :  { %v457_v31 = vrot.slane %v456_v23, 4  ;;  %v387_v0 = vsub.f32 %v842_v35, %v889_v49  ;;  %v390_v1 = vmul.f32 %v386_v63, %v386_v63  ;;  %v388_v3 = vsub.f32 %v852_v45, %v889_v49 }
 0x214   :  { %v427_v33 = vrot.slane %v426_v26, 4  ;;  %v484_v36 = vadd.f32 %v483_v32, %v482_v30  ;;  %v389_v6 = vsub.f32 %v858_v52, %v889_v49 }
 0x215   :  { %v458_v37 = vadd.f32 %v457_v31, %v456_v23  ;;  %v391_v2 = vmul.f32 %v387_v0, %v387_v0  ;;  %v394_v4 = vsel %vm305_vm4, %v390_v1, 0.0  ;;  %v392_v7 = vmul.f32 %v388_v3, %v388_v3  ;;  %v504_v31 = vld [vmem:[%s1035_s3] sm:$0x1] }
 0x216   :  { %v428_v39 = vadd.f32 %v427_v33, %v426_v26  ;;  %v486_v40 = vadd.f32 %v485_v38, %v484_v36  ;;  %v393_v9 = vmul.f32 %v389_v6, %v389_v6 }
 0x217   :  { %v459_v41 = vrot.slane %v458_v37, 2  ;;  %v395_v5 = vsel %vm305_vm4, %v391_v2, 0.0  ;;  %v397_v10 = vsel %vm305_vm4, %v392_v7, 0.0 }
 0x218   :  { %v429_v42 = vrot.slane %v428_v39, 2  ;;  %v487_v44 = vrot.slane %v486_v40, 4  ;;  %v396_v8 = vadd.f32 %v395_v5, %v394_v4  ;;  %v399_v12 = vsel %vm305_vm4, %v393_v9, 0.0 }
 0x219   :  { %v460_v43 = vadd.f32 %v459_v41, %v458_v37 }
 0x21a   :  { %v430_v47 = vadd.f32 %v429_v42, %v428_v39  ;;  %v488_v51 = vadd.f32 %v487_v44, %v486_v40  ;;  %v398_v11 = vadd.f32 %v397_v10, %v396_v8 }
 0x21b   :  { %v461_v50 = vrot.slane %v460_v43, 1 }
 0x21c   :  { %v431_v53 = vrot.slane %v430_v47, 1  ;;  %v489_v55 = vrot.slane %v488_v51, 2  ;;  %v400_v13 = vadd.f32 %v399_v12, %v398_v11 }
 0x21d   :  { %v462_v54 = vadd.f32 %v461_v50, %v460_v43 }
 0x21e   :  { %v432_v56 = vadd.f32 %v431_v53, %v430_v47  ;;  %v490_v58 = vadd.f32 %v489_v55, %v488_v51  ;;  %v401_v14 = vrot.slane %v400_v13, 4 }
 0x21f   :  { %v463_v57 = vmul.f32 0.03125, %v462_v54 }
 0x220   :  { %v433_v59 = vmul.f32 0.03125, %v432_v56  ;;  %v491_v60 = vrot.slane %v490_v58, 1  ;;  %v402_v15 = vadd.f32 %v401_v14, %v400_v13 }
 0x221   :  { %465 = vrot.lane.b32.xlu1 %v463_v57, %s739_s11 }
 0x222   :  { %435 = vrot.lane.b32.xlu0 %v433_v59, %s738_s1  ;;  %v492_v61 = vadd.f32 %v491_v60, %v490_v58  ;;  %v403_v16 = vrot.slane %v402_v15, 2 }
 0x224   :  { %v493_v62 = vmul.f32 0.03125, %v492_v61  ;;  %v404_v17 = vadd.f32 %v403_v16, %v402_v15 }
 0x226   :  { %495 = vrot.lane.b32.xlu0 %v493_v62, %s737_s0  ;;  %v405_v18 = vrot.slane %v404_v17, 1 }
 0x228   :  { %v406_v19 = vadd.f32 %v405_v18, %v404_v17 }
 0x22a   :  { %v407_v20 = vmul.f32 0.03125, %v406_v19 }
 0x293   :  { %v466_v23 = vpop.permute.xlu1 %465 }
 0x294   :  { %v436_v21 = vpop.permute.xlu0 %435 }
 0x295   :  { %v438_v22 = vadd.f32 %v436_v21, %v407_v20 }
 0x297   :  { %v468_v49 = vadd.f32 %v466_v23, %v438_v22 }
 0x298   :  { %v496_v24 = vpop.permute.xlu0 %495 }
 0x299   :  { %v498_v25 = vadd.f32 %v496_v24, %v468_v49 }
 0x29b   :  { %v499_v26 = vmul.f32 0.25, %v498_v25 }
 0x29d   :  { %v501_v27 = vadd.f32 1e-05, %v499_v26 }
 0x29f   :  { %735 = vrsqrt.f32 %v501_v27 }
 0x2a9   :  { %v736_v29 = vpop.eup %735 }
 0x2aa   :  { %v503_v30 = vmul.f32 %v736_v29, %v500_v28 }
 0x2ac   :  { %v505_v32 = vmul.f32 %v503_v30, %v885_v48  ;;  %v511_v33 = vrot.slane %v503_v30, %v883_v46 }
 0x2ae   :  { %v506_v36 = vsub.f32 %v504_v31, %v505_v32  ;;  %573 = vrot.lane.b32.xlu0 %v511_v33, %s740_s12  ;;  %543 = vrot.lane.b32.xlu1 %v511_v33, %s741_s13  ;;  %v513_v38 = vmul.f32 %v511_v33, %v840_v34  ;;  %v514_v39 = vmul.f32 %v511_v33, %v842_v35 }
 0x2af   :  { %v515_v40 = vmul.f32 %v511_v33, %v852_v45  ;;  %v516_v41 = vmul.f32 %v511_v33, %v858_v52 }
 0x2b0   :  { %v521_v37 = vrot.slane %v506_v36, %v883_v46 }
 0x2b2   :  { %603 = vrot.lane.b32.xlu0 %v511_v33, %s742_s14  ;;  %550 = vrot.lane.b32.xlu1 %v521_v37, %s741_s13  ;;  %v523_v48 = vadd.f32 %v521_v37, %v513_v38  ;;  %v524_v42 = vadd.f32 %v521_v37, %v514_v39  ;;  %v525_v43 = vadd.f32 %v521_v37, %v515_v40 }
 0x2b3   :  { %v526_v44 = vadd.f32 %v521_v37, %v516_v41 }
 0x2b4   :  { %vm527_vm5 = vcmp.ge.f32.partialorder %v523_v48, 0.0  ;;  %vm528_vm6 = vcmp.ge.f32.partialorder %v524_v42, 0.0  ;;  %vm529_vm7 = vcmp.ge.f32.partialorder %v525_v43, 0.0  ;;  %v531_v46 = vmul.f32 0.01, %v523_v48 }
 0x2b5   :  { %vm530_vm8 = vcmp.ge.f32.partialorder %v526_v44, 0.0  ;;  %v532_v47 = vmul.f32 0.01, %v524_v42  ;;  %v533_v50 = vmul.f32 0.01, %v525_v43 }
 0x2b6   :  { %610 = vrot.lane.b32.xlu0 %v521_v37, %s742_s14  ;;  %580 = vrot.lane.b32.xlu1 %v521_v37, %s740_s12  ;;  %v534_v51 = vmul.f32 0.01, %v526_v44  ;;  %v535_v53 = vsel %vm527_vm5, %v523_v48, %v531_v46 }
 0x2b7   :  { %v536_v54 = vsel %vm528_vm6, %v524_v42, %v532_v47  ;;  %v537_v55 = vsel %vm529_vm7, %v525_v43, %v533_v50  ;;  %539 = vst.msk [vmem:[%s1036_s4] sm:$0xff] %vm305_vm4, %v535_v53 }
 0x2b8   :  { %v538_v56 = vsel %vm530_vm8, %v526_v44, %v534_v51  ;;  %540 = vst.msk [vmem:[%s1036_s4 + $0x8] sm:$0xff] %vm305_vm4, %v536_v54  ;;  %541 = vst.msk [vmem:[%s1036_s4 + $0x10] sm:$0xff] %vm305_vm4, %v537_v55 }
 0x2b9   :  { %542 = vst.msk [vmem:[%s1036_s4 + $0x18] sm:$0xff] %vm305_vm4, %v538_v56 }
 0x320   :  { %v574_v57 = vpop.permute.xlu0 %573  ;;  %v544_v58 = vpop.permute.xlu1 %543 }
 0x321   :  { %v546_v59 = vmul.f32 %v544_v58, %v840_v34  ;;  %v547_v60 = vmul.f32 %v544_v58, %v842_v35  ;;  %v548_v61 = vmul.f32 %v544_v58, %v852_v45  ;;  %v549_v62 = vmul.f32 %v544_v58, %v858_v52 }
 0x322   :  { %v576_v8 = vmul.f32 %v574_v57, %v840_v34  ;;  %v577_v23 = vmul.f32 %v574_v57, %v842_v35  ;;  %v578_v49 = vmul.f32 %v574_v57, %v852_v45  ;;  %v579_v24 = vmul.f32 %v574_v57, %v858_v52 }
 0x324   :  { %v604_v63 = vpop.permute.xlu0 %603  ;;  %v551_v0 = vpop.permute.xlu1 %550 }
 0x325   :  { %v553_v1 = vadd.f32 %v551_v0, %v546_v59  ;;  %v554_v2 = vadd.f32 %v551_v0, %v547_v60  ;;  %v555_v3 = vadd.f32 %v551_v0, %v548_v61  ;;  %v556_v4 = vadd.f32 %v551_v0, %v549_v62 }
 0x326   :  { %v606_v5 = vmul.f32 %v604_v63, %v840_v34  ;;  %v607_v6 = vmul.f32 %v604_v63, %v842_v35  ;;  %v608_v7 = vmul.f32 %v604_v63, %v852_v45  ;;  %v609_v12 = vmul.f32 %v604_v63, %v858_v52 }
 0x327   :  { %vm557_vm9 = vcmp.ge.f32.partialorder %v553_v1, 0.0  ;;  %vm558_vm10 = vcmp.ge.f32.partialorder %v554_v2, 0.0  ;;  %vm559_vm11 = vcmp.ge.f32.partialorder %v555_v3, 0.0  ;;  %vm560_vm12 = vcmp.ge.f32.partialorder %v556_v4, 0.0 }
 0x328   :  { %v561_v9 = vmul.f32 0.01, %v553_v1  ;;  %v562_v10 = vmul.f32 0.01, %v554_v2  ;;  %v563_v11 = vmul.f32 0.01, %v555_v3  ;;  %v611_v13 = vpop.permute.xlu0 %610  ;;  %v581_v18 = vpop.permute.xlu1 %580 }
 0x329   :  { %v564_v14 = vmul.f32 0.01, %v556_v4  ;;  %v613_v15 = vadd.f32 %v611_v13, %v606_v5  ;;  %v614_v16 = vadd.f32 %v611_v13, %v607_v6  ;;  %v615_v17 = vadd.f32 %v611_v13, %v608_v7 }
 0x32a   :  { %v565_v19 = vsel %vm557_vm9, %v553_v1, %v561_v9  ;;  %v566_v20 = vsel %vm558_vm10, %v554_v2, %v562_v10  ;;  %v567_v21 = vsel %vm559_vm11, %v555_v3, %v563_v11  ;;  %v616_v22 = vadd.f32 %v611_v13, %v609_v12 }
 0x32b   :  { %v568_v34 = vsel %vm560_vm12, %v556_v4, %v564_v14  ;;  %569 = vst.msk [vmem:[%s1036_s4] sm:$0xff] %vm321_vm2, %v565_v19  ;;  %570 = vst.msk [vmem:[%s1036_s4 + $0x8] sm:$0xff] %vm321_vm2, %v566_v20  ;;  %vm617_vm13 = vcmp.ge.f32.partialorder %v613_v15, 0.0  ;;  %v583_v25 = vadd.f32 %v581_v18, %v576_v8  ;;  %v621_v26 = vmul.f32 0.01, %v613_v15 }
 0x32c   :  { %571 = vst.msk [vmem:[%s1036_s4 + $0x10] sm:$0xff] %vm321_vm2, %v567_v21  ;;  %572 = vst.msk [vmem:[%s1036_s4 + $0x18] sm:$0xff] %vm321_vm2, %v568_v34  ;;  %v622_v27 = vmul.f32 0.01, %v614_v16  ;;  %v584_v28 = vadd.f32 %v581_v18, %v577_v23  ;;  %v585_v29 = vadd.f32 %v581_v18, %v578_v49  ;;  %vm618_vm14 = vcmp.ge.f32.partialorder %v614_v16, 0.0 }
 0x32d   :  { %v623_v30 = vmul.f32 0.01, %v615_v17  ;;  %v624_v31 = vmul.f32 0.01, %v616_v22  ;;  %v586_v32 = vadd.f32 %v581_v18, %v579_v24  ;;  %vm619_vm15 = vcmp.ge.f32.partialorder %v615_v17, 0.0 }
 0x32e   :  { %vm620_vm0 = vcmp.ge.f32.partialorder %v616_v22, 0.0  ;;  %vm587_vm4 = vcmp.ge.f32.partialorder %v583_v25, 0.0  ;;  %vm588_vm5 = vcmp.ge.f32.partialorder %v584_v28, 0.0  ;;  %vm589_vm6 = vcmp.ge.f32.partialorder %v585_v29, 0.0 }
 0x32f   :  { %vm590_vm7 = vcmp.ge.f32.partialorder %v586_v32, 0.0  ;;  %v591_v35 = vmul.f32 0.01, %v583_v25  ;;  %v592_v45 = vmul.f32 0.01, %v584_v28  ;;  %v625_v33 = vsel %vm617_vm13, %v613_v15, %v621_v26 }
 0x330   :  { %v626_v52 = vsel %vm618_vm14, %v614_v16, %v622_v27  ;;  %v593_v36 = vmul.f32 0.01, %v585_v29  ;;  %v594_v37 = vmul.f32 0.01, %v586_v32  ;;  %v627_v38 = vsel %vm619_vm15, %v615_v17, %v623_v30 }
 0x331   :  { %v628_v39 = vsel %vm620_vm0, %v616_v22, %v624_v31  ;;  %v595_v40 = vsel %vm587_vm4, %v583_v25, %v591_v35  ;;  %v596_v41 = vsel %vm588_vm5, %v584_v28, %v592_v45 }
 0x332   :  { %v597_v48 = vsel %vm589_vm6, %v585_v29, %v593_v36  ;;  %v598_v42 = vsel %vm590_vm7, %v586_v32, %v594_v37  ;;  %599 = vst.msk [vmem:[%s1036_s4] sm:$0xff] %vm341_vm3, %v595_v40  ;;  %600 = vst.msk [vmem:[%s1036_s4 + $0x8] sm:$0xff] %vm341_vm3, %v596_v41 }
 0x333   :  { %601 = vst.msk [vmem:[%s1036_s4 + $0x10] sm:$0xff] %vm341_vm3, %v597_v48  ;;  %602 = vst.msk [vmem:[%s1036_s4 + $0x18] sm:$0xff] %vm341_vm3, %v598_v42 }
 0x334   :  { %629 = vst.msk [vmem:[%s1036_s4] sm:$0xff] %vm361_vm1, %v625_v33  ;;  %630 = vst.msk [vmem:[%s1036_s4 + $0x8] sm:$0xff] %vm361_vm1, %v626_v52 }
 0x335   :  { %631 = vst.msk [vmem:[%s1036_s4 + $0x10] sm:$0xff] %vm361_vm1, %v627_v38  ;;  %632 = vst.msk [vmem:[%s1036_s4 + $0x18] sm:$0xff] %vm361_vm1, %v628_v39 }

// kernel: decoder_forward.22
= control target key start
LH: loop header
LB: loop body
LE: loop exit
PB: predicated region body
PF: predicated region fallthrough
CT: control target
= control target key end

     0   :  { %v1040_v0 = vmov 0   ;;  %vm1634_vm0 = vcmask 130048   ;;  %s1625_s1 = inlined_call_operand.vmem [shape: bf16[144,16], index: 1, kind: input, shape index: {}]   ;;  %s1626_s0 = inlined_call_operand.vmem [shape: bf16[128,144], index: 0, kind: input, shape index: {}]   ;;  %s1627_s4 = inlined_call_operand.vmem [shape: bf16[16,16], index: 4, kind: input, shape index: {}]   ;;  %s1628_s2 = inlined_call_operand.vmem [shape: f32[1,16], index: 2, kind: input, shape index: {}]   ;;  %s1629_s3 = inlined_call_operand.vmem [shape: f32[1,16], index: 3, kind: input, shape index: {}]   ;;  %s1630_s5 = inlined_call_operand.vmem [shape: f32[1,16], index: 5, kind: input, shape index: {}]   ;;  %s1631_s6 = inlined_call_operand.vmem [shape: f32[1,16], index: 6, kind: input, shape index: {}]   ;;  %s1632_s7 = inlined_call_operand.vmem [shape: f32[128,16], index: 7, kind: input, shape index: {}]   ;;  %s1633_s8 = inlined_call_operand.vmem [shape: f32[128,16], index: 8, kind: output, shape index: {}]  }
   0x1   :  { %215 = vmatprep.subr.bf16.mxu0 %v1040_v0  ;;  %v1002_v1 = vld [vmem:[%s1625_s1] sm:$0xff]   ;;  %983 = vmatprep.subr.bf16.mxu1 %v1040_v0  ;;  %v1003_v2 = vld [vmem:[%s1625_s1 + $0x8] sm:$0xff]   ;;  %v1004_v3 = vld [vmem:[%s1625_s1 + $0x10] sm:$0xff]  }
   0x2   :  { %216 = vmatpush1.bf16.msra.mxu0 %v1002_v1  ;;  %992 = vmatpush1.bf16.msra.mxu1 %v1002_v1  ;;  %v1005_v4 = vld [vmem:[%s1625_s1 + $0x18] sm:$0xff]   ;;  %v1013_v5 = vld [vmem:[%s1626_s0 + $0x4] ss:$8 sps:$4 sm:$0xff]   ;;  %v1008_v9 = vld [vmem:[%s1625_s1 + $0x30] sm:$0xff]  }
   0x3   :  { %217 = vmatprep.subr.bf16.mxu0 %v1040_v0  ;;  %984 = vmatprep.subr.bf16.mxu1 %v1040_v0  ;;  %v1006_v6 = vld [vmem:[%s1625_s1 + $0x20] sm:$0xff]   ;;  %v1007_v8 = vld [vmem:[%s1625_s1 + $0x28] sm:$0xff]   ;;  %v1009_v10 = vld [vmem:[%s1625_s1 + $0x38] sm:$0xff]  }
   0x4   :  { %937 = vmatprep.mubr.msk.bf16.mxu0 %vm1634_vm0, %v1013_v5  ;;  %v1028_v7 = vld [vmem:[%s1626_s0 + $0x64] ss:$8 sps:$4 sm:$0xff]   ;;  %v1011_v12 = vld [vmem:[%s1626_s0] ss:$8 sps:$4 sm:$0xff]   ;;  %v1014_v14 = vld [vmem:[%s1626_s0 + $0x14] ss:$8 sps:$4 sm:$0xff]  }
   0x5   :  { %943 = vmatprep.mubr.msk.bf16.mxu1 %vm1634_vm0, %v1028_v7  ;;  %v1010_v11 = vld [vmem:[%s1625_s1 + $0x40] sm:$0xff]   ;;  %v1032_v15 = vld [vmem:[%s1626_s0 + $0x74] ss:$8 sps:$4 sm:$0xff]   ;;  %v1016_v16 = vld [vmem:[%s1626_s0 + $0x10] ss:$8 sps:$4 sm:$0xff]  }
   0x6   :  { %218 = vmatpush1.bf16.msra.mxu0 %v1003_v2  ;;  %993 = vmatpush1.bf16.msra.mxu1 %v1003_v2  ;;  %v1026_v13 = vld [vmem:[%s1626_s0 + $0x60] ss:$8 sps:$4 sm:$0xff]   ;;  %v1034_v17 = vld [vmem:[%s1626_s0 + $0x70] ss:$8 sps:$4 sm:$0xff]   ;;  %v1017_v18 = vld [vmem:[%s1626_s0 + $0x24] ss:$8 sps:$4 sm:$0xff]  }
   0x7   :  { %219 = vmatprep.subr.bf16.mxu0 %v1040_v0  ;;  %985 = vmatprep.subr.bf16.mxu1 %v1040_v0  ;;  %v1019_v19 = vld [vmem:[%s1626_s0 + $0x20] ss:$8 sps:$4 sm:$0xff]   ;;  %v1020_v20 = vld [vmem:[%s1626_s0 + $0x34] ss:$8 sps:$4 sm:$0xff]   ;;  %v1022_v21 = vld [vmem:[%s1626_s0 + $0x30] ss:$8 sps:$4 sm:$0xff]  }
   0x8   :  { %v1023_v22 = vld [vmem:[%s1626_s0 + $0x44] ss:$8 sps:$4 sm:$0xff]   ;;  %v1025_v23 = vld [vmem:[%s1626_s0 + $0x40] ss:$8 sps:$4 sm:$0xff]   ;;  %v1029_v24 = vld [vmem:[%s1626_s0 + $0x54] ss:$8 sps:$4 sm:$0xff]  }
   0x9   :  { %v1031_v25 = vld [vmem:[%s1626_s0 + $0x50] ss:$8 sps:$4 sm:$0xff]   ;;  %v1035_v49 = vld [vmem:[%s1627_s4] sm:$0xff]  }
   0xa   :  { %220 = vmatpush1.bf16.msra.mxu0 %v1004_v3  ;;  %994 = vmatpush1.bf16.msra.mxu1 %v1004_v3 }
   0xb   :  { %221 = vmatprep.subr.bf16.mxu0 %v1040_v0  ;;  %986 = vmatprep.subr.bf16.mxu1 %v1040_v0 }
   0xe   :  { %222 = vmatpush1.bf16.msra.mxu0 %v1005_v4  ;;  %995 = vmatpush1.bf16.msra.mxu1 %v1005_v4 }
   0xf   :  { %223 = vmatprep.subr.bf16.mxu0 %v1040_v0  ;;  %987 = vmatprep.subr.bf16.mxu1 %v1040_v0 }
  0x12   :  { %224 = vmatpush1.bf16.msra.mxu0 %v1006_v6  ;;  %996 = vmatpush1.bf16.msra.mxu1 %v1006_v6 }
  0x13   :  { %225 = vmatprep.subr.bf16.mxu0 %v1040_v0  ;;  %988 = vmatprep.subr.bf16.mxu1 %v1040_v0 }
  0x16   :  { %226 = vmatpush1.bf16.msra.mxu0 %v1007_v8  ;;  %997 = vmatpush1.bf16.msra.mxu1 %v1007_v8 }
  0x17   :  { %227 = vmatprep.subr.bf16.mxu0 %v1040_v0  ;;  %989 = vmatprep.subr.bf16.mxu1 %v1040_v0 }
  0x1a   :  { %228 = vmatpush1.bf16.msra.mxu0 %v1008_v9  ;;  %998 = vmatpush1.bf16.msra.mxu1 %v1008_v9 }
  0x1b   :  { %229 = vmatprep.subr.bf16.mxu0 %v1040_v0  ;;  %990 = vmatprep.subr.bf16.mxu1 %v1040_v0 }
  0x1e   :  { %230 = vmatpush1.bf16.msra.mxu0 %v1009_v10  ;;  %999 = vmatpush1.bf16.msra.mxu1 %v1009_v10 }
  0x1f   :  { %231 = vmatprep.subr.bf16.mxu0 %v1040_v0  ;;  %991 = vmatprep.subr.bf16.mxu1 %v1040_v0 }
  0x22   :  { %232 = vmatpush1.bf16.msra.mxu0 %v1010_v11  ;;  %1000 = vmatpush1.bf16.msra.mxu1 %v1010_v11 }
  0x23   :  { %965 = vmatprep.subr.bf16.mxu1 %v1035_v49 }
  0x25   :  { %248 = vmatmul.mubr.bf16.vlgmr.msra.gmra.mrb[0].mxu0 %v1011_v12  ;;  %296 = vmatmul.mubr.bf16.vlgmr.msra.gmra.mrb[0].mxu1 %v1026_v13 }
  0x26   :  { %938 = vmatprep.mubr.msk.bf16.mxu0 %vm1634_vm0, %v1014_v14  ;;  %944 = vmatprep.mubr.msk.bf16.mxu1 %vm1634_vm0, %v1032_v15 }
  0x27   :  { %966 = vmatpush3.bf16.msra.mxu1 %v1035_v49 }
  0x2d   :  { %256 = vmatmul.mubr.bf16.gmra.mrb[4].mxu0 %v1016_v16  ;;  %304 = vmatmul.mubr.bf16.gmra.mrb[4].mxu1 %v1034_v17 }
  0x2e   :  { %939 = vmatprep.mubr.msk.bf16.mxu0 %vm1634_vm0, %v1017_v18 }
  0x35   :  { %264 = vmatmul.mubr.bf16.gmra.mrb[8].mxu0 %v1019_v19 }
  0x36   :  { %940 = vmatprep.mubr.msk.bf16.mxu0 %vm1634_vm0, %v1020_v20 }
  0x3d   :  { %272 = vmatmul.mubr.bf16.gmra.mrb[12].mxu0 %v1022_v21 }
  0x3e   :  { %941 = vmatprep.mubr.msk.bf16.mxu0 %vm1634_vm0, %v1023_v22 }
  0x45   :  { %280 = vmatmul.mubr.bf16.gmra.mrb[16].mxu0 %v1025_v23 }
  0x46   :  { %942 = vmatprep.mubr.msk.bf16.mxu0 %vm1634_vm0, %v1029_v24 }
  0x4d   :  { %288 = vmatmul.mubr.bf16.gmra.mrb[20].mxu0 %v1031_v25 }
  0xf8   :  { %v1169_v26 = vpop.f32.mrb[0].mxu0  ;;  %v1171_v27 = vpop.f32.mrb[0].mxu1 }
  0xf9   :  { %v251_v28 = vpop.f32.mrb[1].mxu0  ;;  %v299_v29 = vpop.f32.mrb[1].mxu1  ;;  %v314_v32 = vsel %vm1634_vm0, %v1169_v26, 0.0  ;;  %v337_v18 = vsel %vm1634_vm0, %v1171_v27, 0.0 }
  0xfa   :  { %v1173_v30 = vpop.f32.mrb[2].mxu0  ;;  %v1175_v31 = vpop.f32.mrb[2].mxu1 }
  0xfb   :  { %v315_v33 = vsel %vm1634_vm0, %v1173_v30, 0.0  ;;  %v254_v34 = vpop.f32.mrb[3].mxu0  ;;  %v302_v35 = vpop.f32.mrb[3].mxu1  ;;  %v339_v20 = vsel %vm1634_vm0, %v1175_v31, 0.0 }
  0xfc   :  { %v316_v36 = vadd.f32 %v315_v33, %v314_v32 }
 0x100   :  { %v1181_v37 = vpop.f32.mrb[4].mxu0  ;;  %v1183_v38 = vpop.f32.mrb[4].mxu1 }
 0x101   :  { %v317_v39 = vsel %vm1634_vm0, %v1181_v37, 0.0  ;;  %v259_v40 = vpop.f32.mrb[5].mxu0  ;;  %v307_v41 = vpop.f32.mrb[5].mxu1  ;;  %v341_v21 = vsel %vm1634_vm0, %v1183_v38, 0.0 }
 0x102   :  { %v318_v42 = vadd.f32 %v317_v39, %v316_v36  ;;  %v260_v43 = vpop.f32.mrb[6].mxu0  ;;  %v1187_v44 = vpop.f32.mrb[6].mxu1 }
 0x103   :  { %v319_v45 = vsel %vm1634_vm0, %v260_v43, 0.0  ;;  %v262_v46 = vpop.f32.mrb[7].mxu0  ;;  %v310_v47 = vpop.f32.mrb[7].mxu1  ;;  %v343_v24 = vsel %vm1634_vm0, %v1187_v44, 0.0 }
 0x104   :  { %v320_v48 = vadd.f32 %v319_v45, %v318_v42 }
 0x108   :  { %v265_v50 = vpop.f32.mrb[8].mxu0 }
 0x109   :  { %v321_v51 = vsel %vm1634_vm0, %v265_v50, 0.0  ;;  %v267_v52 = vpop.f32.mrb[9].mxu0 }
 0x10a   :  { %v322_v53 = vadd.f32 %v321_v51, %v320_v48  ;;  %v268_v54 = vpop.f32.mrb[10].mxu0 }
 0x10b   :  { %v323_v55 = vsel %vm1634_vm0, %v268_v54, 0.0  ;;  %v270_v56 = vpop.f32.mrb[11].mxu0 }
 0x10c   :  { %v324_v57 = vadd.f32 %v323_v55, %v322_v53 }
 0x110   :  { %v273_v58 = vpop.f32.mrb[12].mxu0 }
 0x111   :  { %v325_v59 = vsel %vm1634_vm0, %v273_v58, 0.0  ;;  %v275_v60 = vpop.f32.mrb[13].mxu0 }
 0x112   :  { %v326_v61 = vadd.f32 %v325_v59, %v324_v57  ;;  %v276_v62 = vpop.f32.mrb[14].mxu0 }
 0x113   :  { %v327_v63 = vsel %vm1634_vm0, %v276_v62, 0.0  ;;  %v278_v0 = vpop.f32.mrb[15].mxu0 }
 0x114   :  { %v328_v1 = vadd.f32 %v327_v63, %v326_v61 }
 0x118   :  { %v281_v2 = vpop.f32.mrb[16].mxu0 }
 0x119   :  { %v329_v3 = vsel %vm1634_vm0, %v281_v2, 0.0  ;;  %v283_v4 = vpop.f32.mrb[17].mxu0 }
 0x11a   :  { %v330_v5 = vadd.f32 %v329_v3, %v328_v1  ;;  %v284_v6 = vpop.f32.mrb[18].mxu0 }
 0x11b   :  { %v331_v7 = vsel %vm1634_vm0, %v284_v6, 0.0  ;;  %v286_v8 = vpop.f32.mrb[19].mxu0 }
 0x11c   :  { %v332_v9 = vadd.f32 %v331_v7, %v330_v5 }
 0x120   :  { %v289_v10 = vpop.f32.mrb[20].mxu0 }
 0x121   :  { %v333_v11 = vsel %vm1634_vm0, %v289_v10, 0.0  ;;  %v291_v12 = vpop.f32.mrb[21].mxu0 }
 0x122   :  { %v334_v13 = vadd.f32 %v333_v11, %v332_v9  ;;  %v292_v14 = vpop.f32.mrb[22].mxu0 }
 0x123   :  { %v335_v15 = vsel %vm1634_vm0, %v292_v14, 0.0  ;;  %v294_v16 = vpop.f32.mrb[23].mxu0 }
 0x124   :  { %v336_v17 = vadd.f32 %v335_v15, %v334_v13 }
 0x126   :  { %v338_v19 = vadd.f32 %v337_v18, %v336_v17 }
 0x128   :  { %v340_v22 = vadd.f32 %v339_v20, %v338_v19 }
 0x12a   :  { %v342_v23 = vadd.f32 %v341_v21, %v340_v22 }
 0x12c   :  { %v344_v25 = vadd.f32 %v343_v24, %v342_v23 }
 0x12e   :  { %v345_v28 = vrot.slane %v344_v25, 4 }
 0x130   :  { %v346_v29 = vadd.f32 %v345_v28, %v344_v25 }
 0x132   :  { %v347_v32 = vrot.slane %v346_v29, 2 }
 0x134   :  { %v348_v33 = vadd.f32 %v347_v32, %v346_v29 }
 0x136   :  { %v349_v34 = vrot.slane %v348_v33, 1 }
 0x138   :  { %v350_v35 = vadd.f32 %v349_v34, %v348_v33 }
 0x13a   :  { %v352_v36 = vmul.f32 0.0078125, %v350_v35 }
 0x13c   :  { %v1210_v39 = vsub.f32 %v1169_v26, %v352_v36  ;;  %v1213_v40 = vsub.f32 %v1173_v30, %v352_v36  ;;  %v1216_v41 = vsub.f32 %v1181_v37, %v352_v36  ;;  %v1218_v42 = vsub.f32 %v260_v43, %v352_v36 }
 0x13d   :  { %v1220_v45 = vsub.f32 %v265_v50, %v352_v36  ;;  %v1222_v46 = vsub.f32 %v268_v54, %v352_v36  ;;  %v1224_v47 = vsub.f32 %v273_v58, %v352_v36  ;;  %v1226_v48 = vsub.f32 %v276_v62, %v352_v36 }
 0x13e   :  { %v1228_v49 = vsub.f32 %v281_v2, %v352_v36  ;;  %v1230_v26 = vsub.f32 %v284_v6, %v352_v36  ;;  %v1232_v51 = vsub.f32 %v289_v10, %v352_v36  ;;  %v1234_v30 = vsub.f32 %v292_v14, %v352_v36 }
 0x13f   :  { %v1237_v37 = vsub.f32 %v1171_v27, %v352_v36  ;;  %v1240_v43 = vsub.f32 %v1175_v31, %v352_v36  ;;  %v1243_v50 = vsub.f32 %v1183_v38, %v352_v36  ;;  %v1246_v52 = vsub.f32 %v1187_v44, %v352_v36 }
 0x140   :  { %v369_v53 = vmul.f32 %v1210_v39, %v1210_v39  ;;  %v370_v54 = vmul.f32 %v1213_v40, %v1213_v40  ;;  %v371_v55 = vmul.f32 %v1216_v41, %v1216_v41  ;;  %v372_v27 = vmul.f32 %v1218_v42, %v1218_v42 }
 0x141   :  { %v373_v44 = vmul.f32 %v1220_v45, %v1220_v45  ;;  %v374_v59 = vmul.f32 %v1222_v46, %v1222_v46  ;;  %v375_v62 = vmul.f32 %v1224_v47, %v1224_v47  ;;  %v376_v1 = vmul.f32 %v1226_v48, %v1226_v48 }
 0x142   :  { %v385_v31 = vsel %vm1634_vm0, %v369_v53, 0.0  ;;  %v386_v38 = vsel %vm1634_vm0, %v370_v54, 0.0  ;;  %v388_v57 = vsel %vm1634_vm0, %v371_v55, 0.0  ;;  %v390_v60 = vsel %vm1634_vm0, %v372_v27, 0.0 }
 0x143   :  { %v387_v56 = vadd.f32 %v386_v38, %v385_v31  ;;  %v392_v63 = vsel %vm1634_vm0, %v373_v44, 0.0  ;;  %v394_v2 = vsel %vm1634_vm0, %v374_v59, 0.0  ;;  %v377_v4 = vmul.f32 %v1228_v49, %v1228_v49 }
 0x144   :  { %v396_v5 = vsel %vm1634_vm0, %v375_v62, 0.0  ;;  %v378_v7 = vmul.f32 %v1230_v26, %v1230_v26  ;;  %v398_v8 = vsel %vm1634_vm0, %v376_v1, 0.0  ;;  %v379_v10 = vmul.f32 %v1232_v51, %v1232_v51 }
 0x145   :  { %v389_v58 = vadd.f32 %v388_v57, %v387_v56  ;;  %v400_v11 = vsel %vm1634_vm0, %v377_v4, 0.0  ;;  %v380_v13 = vmul.f32 %v1234_v30, %v1234_v30  ;;  %v381_v16 = vmul.f32 %v1237_v37, %v1237_v37 }
 0x146   :  { %v402_v14 = vsel %vm1634_vm0, %v378_v7, 0.0  ;;  %v404_v17 = vsel %vm1634_vm0, %v379_v10, 0.0  ;;  %v382_v19 = vmul.f32 %v1240_v43, %v1240_v43  ;;  %v383_v22 = vmul.f32 %v1243_v50, %v1243_v50 }
 0x147   :  { %v391_v61 = vadd.f32 %v390_v60, %v389_v58  ;;  %v406_v20 = vsel %vm1634_vm0, %v380_v13, 0.0  ;;  %v408_v23 = vsel %vm1634_vm0, %v381_v16, 0.0  ;;  %v384_v25 = vmul.f32 %v1246_v52, %v1246_v52  ;;  %v312_v58 = vld [vmem:[%s1628_s2] sm:$0x1] }
 0x148   :  { %v410_v28 = vsel %vm1634_vm0, %v382_v19, 0.0  ;;  %v412_v32 = vsel %vm1634_vm0, %v383_v22, 0.0  ;;  %v427_v44 = vlaneseq }
 0x149   :  { %v393_v0 = vadd.f32 %v392_v63, %v391_v61  ;;  %v414_v34 = vsel %vm1634_vm0, %v384_v25, 0.0  ;;  %v1309_v63 = vld [vmem:[%s1629_s3] ss:$0 sm:$0xff] }
 0x14a   :  { %v1296_v57 = vshrl.u32 %v427_v44, 7 }
 0x14b   :  { %v395_v3 = vadd.f32 %v394_v2, %v393_v0 }
 0x14c   :  { %v429_v59 = vsub.s32 0, %v1296_v57 }
 0x14d   :  { %v397_v6 = vadd.f32 %v396_v5, %v395_v3 }
 0x14f   :  { %v399_v9 = vadd.f32 %v398_v8, %v397_v6 }
 0x151   :  { %v401_v12 = vadd.f32 %v400_v11, %v399_v9 }
 0x153   :  { %v403_v15 = vadd.f32 %v402_v14, %v401_v12 }
 0x155   :  { %v405_v18 = vadd.f32 %v404_v17, %v403_v15 }
 0x157   :  { %v407_v21 = vadd.f32 %v406_v20, %v405_v18 }
 0x159   :  { %v409_v24 = vadd.f32 %v408_v23, %v407_v21 }
 0x15b   :  { %v411_v29 = vadd.f32 %v410_v28, %v409_v24 }
 0x15d   :  { %v413_v33 = vadd.f32 %v412_v32, %v411_v29 }
 0x15f   :  { %v415_v35 = vadd.f32 %v414_v34, %v413_v33 }
 0x161   :  { %v416_v36 = vrot.slane %v415_v35, 4 }
 0x163   :  { %v417_v53 = vadd.f32 %v416_v36, %v415_v35 }
 0x165   :  { %v418_v54 = vrot.slane %v417_v53, 2 }
 0x167   :  { %v419_v55 = vadd.f32 %v418_v54, %v417_v53 }
 0x169   :  { %v420_v27 = vrot.slane %v419_v55, 1 }
 0x16b   :  { %v421_v31 = vadd.f32 %v420_v27, %v419_v55 }
 0x16d   :  { %v422_v38 = vmul.f32 0.0078125, %v421_v31 }
 0x16f   :  { %v423_v56 = vadd.f32 1e-05, %v422_v38 }
 0x171   :  { %1036 = vrsqrt.f32 %v423_v56 }
 0x17b   :  { %v1037_v60 = vpop.eup %1036 }
 0x17c   :  { %v425_v61 = vmul.f32 %v1037_v60, %v312_v58 }
 0x17e   :  { %v1304_v62 = vrot.slane %v425_v61, %v429_v59 }
 0x180   :  { %v447_v0 = vmul.f32 %v1304_v62, %v1246_v52  ;;  %v432_v1 = vmul.f32 %v1304_v62, %v1210_v39  ;;  %v433_v2 = vmul.f32 %v1304_v62, %v1213_v40  ;;  %v434_v3 = vmul.f32 %v1304_v62, %v1216_v41 }
 0x181   :  { %v435_v4 = vmul.f32 %v1304_v62, %v1218_v42  ;;  %v436_v5 = vmul.f32 %v1304_v62, %v1220_v45  ;;  %v437_v6 = vmul.f32 %v1304_v62, %v1222_v46  ;;  %v438_v52 = vmul.f32 %v1304_v62, %v1224_v47 }
 0x182   :  { %v1328_v39 = vadd.f32 %v1309_v63, %v447_v0  ;;  %v454_v40 = vadd.f32 %v1309_v63, %v432_v1  ;;  %v455_v7 = vadd.f32 %v1309_v63, %v433_v2  ;;  %v456_v41 = vadd.f32 %v1309_v63, %v434_v3 }
 0x183   :  { %v457_v42 = vadd.f32 %v1309_v63, %v435_v4  ;;  %v458_v8 = vadd.f32 %v1309_v63, %v436_v5  ;;  %v459_v45 = vadd.f32 %v1309_v63, %v437_v6  ;;  %v439_v46 = vmul.f32 %v1304_v62, %v1226_v48 }
 0x184   :  { %v1339_v47 = vmul.f32 0.01, %v1328_v39  ;;  %vm470_vm1 = vcmp.ge.f32.partialorder %v454_v40, 0.0  ;;  %vm471_vm2 = vcmp.ge.f32.partialorder %v455_v7, 0.0  ;;  %v486_v9 = vmul.f32 0.01, %v454_v40 }
 0x185   :  { %v487_v10 = vmul.f32 0.01, %v455_v7  ;;  %vm472_vm3 = vcmp.ge.f32.partialorder %v456_v41, 0.0  ;;  %vm473_vm4 = vcmp.ge.f32.partialorder %v457_v42, 0.0  ;;  %v488_v11 = vmul.f32 0.01, %v456_v41 }
 0x186   :  { %v489_v12 = vmul.f32 0.01, %v457_v42  ;;  %vm474_vm5 = vcmp.ge.f32.partialorder %v458_v8, 0.0  ;;  %vm475_vm6 = vcmp.ge.f32.partialorder %v459_v45, 0.0  ;;  %v502_v13 = vsel %vm470_vm1, %v454_v40, %v486_v9 }
 0x187   :  { %v503_v14 = vsel %vm471_vm2, %v455_v7, %v487_v10  ;;  %v490_v15 = vmul.f32 0.01, %v458_v8  ;;  %v491_v16 = vmul.f32 0.01, %v459_v45  ;;  %v504_v18 = vsel %vm472_vm3, %v456_v41, %v488_v11 }
 0x188   :  { %v518_v17 = vpack.c.bf16 %v503_v14, %v502_v13  ;;  %v505_v48 = vsel %vm473_vm4, %v457_v42, %v489_v12  ;;  %v460_v19 = vadd.f32 %v1309_v63, %v438_v52  ;;  %v461_v23 = vadd.f32 %v1309_v63, %v439_v46 }
 0x189   :  { %v519_v20 = vpack.c.bf16 %v505_v48, %v504_v18  ;;  %v506_v21 = vsel %vm474_vm5, %v458_v8, %v490_v15  ;;  %v507_v22 = vsel %vm475_vm6, %v459_v45, %v491_v16  ;;  %vm485_vm7 = vcmp.ge.f32.partialorder %v1328_v39, 0.0 }
 0x18a   :  { %967 = vmatprep.mubr.msk.bf16.mxu1 %vm1634_vm0, %v518_v17  ;;  %v520_v24 = vpack.c.bf16 %v507_v22, %v506_v21  ;;  %vm476_vm8 = vcmp.ge.f32.partialorder %v460_v19, 0.0  ;;  %v492_v25 = vmul.f32 0.01, %v460_v19  ;;  %v440_v28 = vmul.f32 %v1304_v62, %v1228_v49 }
 0x18b   :  { %968 = vmatmul.mubr.msk.bf16.vlgmr.msra.gmra.mrb[8].mxu1 %vm1634_vm0, %v519_v20  ;;  %vm477_vm9 = vcmp.ge.f32.partialorder %v461_v23, 0.0  ;;  %v493_v29 = vmul.f32 0.01, %v461_v23  ;;  %v441_v32 = vmul.f32 %v1304_v62, %v1230_v26  ;;  %v442_v33 = vmul.f32 %v1304_v62, %v1232_v51 }
 0x18c   :  { %971 = vmatprep.mubr.msk.bf16.mxu1 %vm1634_vm0, %v520_v24  ;;  %v508_v34 = vsel %vm476_vm8, %v460_v19, %v492_v25  ;;  %v462_v35 = vadd.f32 %v1309_v63, %v440_v28  ;;  %v443_v36 = vmul.f32 %v1304_v62, %v1234_v30  ;;  %v444_v49 = vmul.f32 %v1304_v62, %v1237_v37 }
 0x18d   :  { %v509_v53 = vsel %vm477_vm9, %v461_v23, %v493_v29  ;;  %v463_v54 = vadd.f32 %v1309_v63, %v441_v32  ;;  %v464_v55 = vadd.f32 %v1309_v63, %v442_v33  ;;  %v445_v26 = vmul.f32 %v1304_v62, %v1240_v43 }
 0x18e   :  { %v521_v51 = vpack.c.bf16 %v509_v53, %v508_v34  ;;  %vm478_vm10 = vcmp.ge.f32.partialorder %v462_v35, 0.0  ;;  %v494_v27 = vmul.f32 0.01, %v462_v35  ;;  %v465_v31 = vadd.f32 %v1309_v63, %v443_v36 }
 0x18f   :  { %vm479_vm11 = vcmp.ge.f32.partialorder %v463_v54, 0.0  ;;  %v495_v38 = vmul.f32 0.01, %v463_v54  ;;  %vm480_vm12 = vcmp.ge.f32.partialorder %v464_v55, 0.0  ;;  %v496_v30 = vmul.f32 0.01, %v464_v55 }
 0x190   :  { %v510_v56 = vsel %vm478_vm10, %v462_v35, %v494_v27  ;;  %vm481_vm13 = vcmp.ge.f32.partialorder %v465_v31, 0.0  ;;  %v497_v37 = vmul.f32 0.01, %v465_v31  ;;  %v466_v44 = vadd.f32 %v1309_v63, %v444_v49 }
 0x191   :  { %v511_v58 = vsel %vm479_vm11, %v463_v54, %v495_v38  ;;  %v512_v60 = vsel %vm480_vm12, %v464_v55, %v496_v30  ;;  %v467_v61 = vadd.f32 %v1309_v63, %v445_v26  ;;  %v446_v43 = vmul.f32 %v1304_v62, %v1243_v50 }
 0x192   :  { %v522_v0 = vpack.c.bf16 %v511_v58, %v510_v56  ;;  %v513_v1 = vsel %vm481_vm13, %v465_v31, %v497_v37  ;;  %vm482_vm14 = vcmp.ge.f32.partialorder %v466_v44, 0.0  ;;  %v498_v2 = vmul.f32 0.01, %v466_v44 }
 0x193   :  { %972 = vmatmul.mubr.msk.bf16.gmra.mrb[12].mxu1 %vm1634_vm0, %v521_v51  ;;  %v523_v3 = vpack.c.bf16 %v513_v1, %v512_v60  ;;  %vm483_vm15 = vcmp.ge.f32.partialorder %v467_v61, 0.0  ;;  %v499_v4 = vmul.f32 0.01, %v467_v61  ;;  %v468_v5 = vadd.f32 %v1309_v63, %v446_v43 }
 0x194   :  { %975 = vmatprep.mubr.msk.bf16.mxu1 %vm1634_vm0, %v522_v0  ;;  %v514_v6 = vsel %vm482_vm14, %v466_v44, %v498_v2  ;;  %v517_v50 = vsel %vm485_vm7, %v1328_v39, %v1339_v47  ;;  %vm1635_vm14 = vcmask 130048  }
 0x195   :  { %v515_v52 = vsel %vm483_vm15, %v467_v61, %v499_v4  ;;  %vm484_vm1 = vcmp.ge.f32.partialorder %v468_v5, 0.0  ;;  %v500_v40 = vmul.f32 0.01, %v468_v5 }
 0x196   :  { %v524_v62 = vpack.c.bf16 %v515_v52, %v514_v6 }
 0x197   :  { %v516_v7 = vsel %vm484_vm1, %v468_v5, %v500_v40 }
 0x198   :  { %v525_v41 = vpack.c.bf16 %v517_v50, %v516_v7 }
 0x19b   :  { %976 = vmatmul.mubr.msk.bf16.gmra.mrb[16].mxu1 %vm1634_vm0, %v523_v3 }
 0x19c   :  { %979 = vmatprep.mubr.msk.bf16.mxu1 %vm1634_vm0, %v524_v62 }
 0x1a3   :  { %980 = vmatmul.mubr.msk.bf16.gmra.mrb[20].mxu1 %vm1634_vm0, %v525_v41 }
 0x25e   :  { %v969_v63 = vpop.f32.mrb[8].mxu1 }
 0x25f   :  { %v592_v42 = vpop.f32.mrb[9].mxu1  ;;  %v660_v39 = vsel %vm1634_vm0, %v969_v63, 0.0 }
 0x260   :  { %v970_v8 = vpop.f32.mrb[10].mxu1  ;;  %v657_v46 = vsel %vm1634_vm0, %v592_v42, 0.0 }
 0x261   :  { %v595_v45 = vpop.f32.mrb[11].mxu1  ;;  %v662_v11 = vsel %vm1634_vm0, %v970_v8, 0.0 }
 0x262   :  { %v658_v9 = vsel %vm1634_vm0, %v595_v45, 0.0 }
 0x263   :  { %v659_v10 = vadd.f32 %v658_v9, %v657_v46 }
 0x265   :  { %v661_v47 = vadd.f32 %v660_v39, %v659_v10 }
 0x266   :  { %v973_v12 = vpop.f32.mrb[12].mxu1 }
 0x267   :  { %v608_v13 = vpop.f32.mrb[13].mxu1  ;;  %v663_v14 = vadd.f32 %v662_v11, %v661_v47  ;;  %v668_v20 = vsel %vm1634_vm0, %v973_v12, 0.0 }
 0x268   :  { %v664_v15 = vsel %vm1634_vm0, %v608_v13, 0.0  ;;  %v974_v16 = vpop.f32.mrb[14].mxu1 }
 0x269   :  { %v665_v17 = vadd.f32 %v664_v15, %v663_v14  ;;  %v611_v18 = vpop.f32.mrb[15].mxu1  ;;  %v670_v22 = vsel %vm1634_vm0, %v974_v16, 0.0 }
 0x26a   :  { %v666_v48 = vsel %vm1634_vm0, %v611_v18, 0.0 }
 0x26b   :  { %v667_v19 = vadd.f32 %v666_v48, %v665_v17 }
 0x26d   :  { %v669_v21 = vadd.f32 %v668_v20, %v667_v19 }
 0x26e   :  { %v977_v23 = vpop.f32.mrb[16].mxu1 }
 0x26f   :  { %v624_v24 = vpop.f32.mrb[17].mxu1  ;;  %v671_v25 = vadd.f32 %v670_v22, %v669_v21  ;;  %v676_v36 = vsel %vm1634_vm0, %v977_v23, 0.0 }
 0x270   :  { %v672_v28 = vsel %vm1634_vm0, %v624_v24, 0.0  ;;  %v978_v29 = vpop.f32.mrb[18].mxu1 }
 0x271   :  { %v673_v32 = vadd.f32 %v672_v28, %v671_v25  ;;  %v627_v33 = vpop.f32.mrb[19].mxu1  ;;  %v678_v53 = vsel %vm1634_vm0, %v978_v29, 0.0 }
 0x272   :  { %v674_v34 = vsel %vm1634_vm0, %v627_v33, 0.0 }
 0x273   :  { %v675_v35 = vadd.f32 %v674_v34, %v673_v32 }
 0x275   :  { %v677_v49 = vadd.f32 %v676_v36, %v675_v35 }
 0x276   :  { %v981_v54 = vpop.f32.mrb[20].mxu1 }
 0x277   :  { %v640_v55 = vpop.f32.mrb[21].mxu1  ;;  %v679_v26 = vadd.f32 %v678_v53, %v677_v49  ;;  %v684_v37 = vsel %vm1634_vm0, %v981_v54, 0.0 }
 0x278   :  { %v680_v51 = vsel %vm1634_vm0, %v640_v55, 0.0  ;;  %v982_v27 = vpop.f32.mrb[22].mxu1 }
 0x279   :  { %v681_v31 = vadd.f32 %v680_v51, %v679_v26  ;;  %v643_v38 = vpop.f32.mrb[23].mxu1  ;;  %v686_v58 = vsel %vm1634_vm0, %v982_v27, 0.0 }
 0x27a   :  { %v682_v30 = vsel %vm1634_vm0, %v643_v38, 0.0 }
 0x27b   :  { %v683_v56 = vadd.f32 %v682_v30, %v681_v31 }
 0x27d   :  { %v685_v44 = vadd.f32 %v684_v37, %v683_v56 }
 0x27f   :  { %v687_v60 = vadd.f32 %v686_v58, %v685_v44 }
 0x281   :  { %v688_v61 = vrot.slane %v687_v60, 4 }
 0x283   :  { %v689_v43 = vadd.f32 %v688_v61, %v687_v60 }
 0x285   :  { %v690_v0 = vrot.slane %v689_v43, 2 }
 0x287   :  { %v691_v1 = vadd.f32 %v690_v0, %v689_v43 }
 0x289   :  { %v692_v2 = vrot.slane %v691_v1, 1 }
 0x28b   :  { %v693_v3 = vadd.f32 %v692_v2, %v691_v1 }
 0x28d   :  { %v694_v4 = vmul.f32 0.0078125, %v693_v3 }
 0x28f   :  { %v1393_v5 = vsub.f32 %v592_v42, %v694_v4  ;;  %v1395_v6 = vsub.f32 %v595_v45, %v694_v4  ;;  %v1397_v52 = vsub.f32 %v969_v63, %v694_v4  ;;  %v1399_v40 = vsub.f32 %v970_v8, %v694_v4 }
 0x290   :  { %v1401_v50 = vsub.f32 %v608_v13, %v694_v4  ;;  %v1403_v62 = vsub.f32 %v611_v18, %v694_v4  ;;  %v1405_v7 = vsub.f32 %v973_v12, %v694_v4  ;;  %v1407_v41 = vsub.f32 %v974_v16, %v694_v4 }
 0x291   :  { %v1409_v46 = vsub.f32 %v624_v24, %v694_v4  ;;  %v1411_v9 = vsub.f32 %v627_v33, %v694_v4  ;;  %v1413_v42 = vsub.f32 %v977_v23, %v694_v4  ;;  %v1415_v45 = vsub.f32 %v978_v29, %v694_v4 }
 0x292   :  { %v1417_v63 = vsub.f32 %v640_v55, %v694_v4  ;;  %v1419_v8 = vsub.f32 %v643_v38, %v694_v4  ;;  %v1421_v10 = vsub.f32 %v981_v54, %v694_v4  ;;  %v1423_v39 = vsub.f32 %v982_v27, %v694_v4 }
 0x293   :  { %v711_v47 = vmul.f32 %v1393_v5, %v1393_v5  ;;  %v712_v11 = vmul.f32 %v1395_v6, %v1395_v6  ;;  %v713_v12 = vmul.f32 %v1397_v52, %v1397_v52  ;;  %v714_v13 = vmul.f32 %v1399_v40, %v1399_v40 }
 0x294   :  { %v715_v17 = vmul.f32 %v1401_v50, %v1401_v50  ;;  %v716_v19 = vmul.f32 %v1403_v62, %v1403_v62  ;;  %v717_v22 = vmul.f32 %v1405_v7, %v1405_v7  ;;  %v718_v25 = vmul.f32 %v1407_v41, %v1407_v41 }
 0x295   :  { %v727_v14 = vsel %vm1634_vm0, %v711_v47, 0.0  ;;  %v728_v15 = vsel %vm1634_vm0, %v712_v11, 0.0  ;;  %v730_v18 = vsel %vm1634_vm0, %v713_v12, 0.0  ;;  %v732_v20 = vsel %vm1634_vm0, %v714_v13, 0.0 }
 0x296   :  { %v729_v16 = vadd.f32 %v728_v15, %v727_v14  ;;  %v734_v23 = vsel %vm1634_vm0, %v715_v17, 0.0  ;;  %v736_v28 = vsel %vm1634_vm0, %v716_v19, 0.0  ;;  %v719_v32 = vmul.f32 %v1409_v46, %v1409_v46 }
 0x297   :  { %v738_v33 = vsel %vm1634_vm0, %v717_v22, 0.0  ;;  %v720_v35 = vmul.f32 %v1411_v9, %v1411_v9  ;;  %v740_v36 = vsel %vm1634_vm0, %v718_v25, 0.0  ;;  %v721_v53 = vmul.f32 %v1413_v42, %v1413_v42 }
 0x298   :  { %v731_v48 = vadd.f32 %v730_v18, %v729_v16  ;;  %v742_v54 = vsel %vm1634_vm0, %v719_v32, 0.0  ;;  %v722_v26 = vmul.f32 %v1415_v45, %v1415_v45  ;;  %v723_v31 = vmul.f32 %v1417_v63, %v1417_v63 }
 0x299   :  { %v744_v51 = vsel %vm1634_vm0, %v720_v35, 0.0  ;;  %v746_v38 = vsel %vm1634_vm0, %v721_v53, 0.0  ;;  %v724_v56 = vmul.f32 %v1419_v8, %v1419_v8  ;;  %v725_v58 = vmul.f32 %v1421_v10, %v1421_v10  ;;  %v817_v53 = vld [vmem:[%s1632_s7 + $0x28] sm:$0xff] }
 0x29a   :  { %v733_v21 = vadd.f32 %v732_v20, %v731_v48  ;;  %v748_v37 = vsel %vm1634_vm0, %v722_v26, 0.0  ;;  %v750_v60 = vsel %vm1634_vm0, %v723_v31, 0.0  ;;  %v726_v43 = vmul.f32 %v1423_v39, %v1423_v39  ;;  %v655_v48 = vld [vmem:[%s1630_s5] sm:$0x1]  ;;  %v819_v31 = vld [vmem:[%s1632_s7 + $0x38] sm:$0xff] }
 0x29b   :  { %v752_v0 = vsel %vm1634_vm0, %v724_v56, 0.0  ;;  %v754_v2 = vsel %vm1634_vm0, %v725_v58, 0.0 }
 0x29c   :  { %v735_v24 = vadd.f32 %v734_v23, %v733_v21  ;;  %v756_v4 = vsel %vm1634_vm0, %v726_v43, 0.0  ;;  %v824_v43 = vld [vmem:[%s1632_s7 + $0x60] sm:$0xff]  ;;  %vm1636_vm0 = vmmov %vm1635_vm14 }
 0x29e   :  { %v737_v29 = vadd.f32 %v736_v28, %v735_v24  ;;  %v955_v28 = vld [vmem:[%s1631_s6] ss:$0 sm:$0xff] }
 0x2a0   :  { %v739_v34 = vadd.f32 %v738_v33, %v737_v29 }
 0x2a2   :  { %v741_v49 = vadd.f32 %v740_v36, %v739_v34 }
 0x2a4   :  { %v743_v55 = vadd.f32 %v742_v54, %v741_v49  ;;  %v816_v49 = vld [vmem:[%s1632_s7 + $0x20] sm:$0xff]  ;;  %v818_v54 = vld [vmem:[%s1632_s7 + $0x30] sm:$0xff] }
 0x2a6   :  { %v745_v27 = vadd.f32 %v744_v51, %v743_v55 }
 0x2a8   :  { %v747_v30 = vadd.f32 %v746_v38, %v745_v27  ;;  %v820_v38 = vld [vmem:[%s1632_s7 + $0x40] sm:$0xff] }
 0x2aa   :  { %v749_v44 = vadd.f32 %v748_v37, %v747_v30  ;;  %v821_v30 = vld [vmem:[%s1632_s7 + $0x48] sm:$0xff] }
 0x2ac   :  { %v751_v61 = vadd.f32 %v750_v60, %v749_v44  ;;  %v822_v60 = vld [vmem:[%s1632_s7 + $0x50] sm:$0xff] }
 0x2ae   :  { %v753_v1 = vadd.f32 %v752_v0, %v751_v61  ;;  %v823_v61 = vld [vmem:[%s1632_s7 + $0x58] sm:$0xff]  ;;  %v825_v0 = vld [vmem:[%s1632_s7 + $0x68] sm:$0xff] }
 0x2b0   :  { %v755_v3 = vadd.f32 %v754_v2, %v753_v1  ;;  %v826_v1 = vld [vmem:[%s1632_s7 + $0x70] sm:$0xff]  ;;  %v827_v2 = vld [vmem:[%s1632_s7 + $0x78] sm:$0xff] }
 0x2b2   :  { %v757_v47 = vadd.f32 %v756_v4, %v755_v3 }
 0x2b4   :  { %v758_v11 = vrot.slane %v757_v47, 4 }
 0x2b6   :  { %v759_v12 = vadd.f32 %v758_v11, %v757_v47 }
 0x2b8   :  { %v760_v13 = vrot.slane %v759_v12, 2 }
 0x2ba   :  { %v761_v14 = vadd.f32 %v760_v13, %v759_v12 }
 0x2bc   :  { %v762_v15 = vrot.slane %v761_v14, 1 }
 0x2be   :  { %v763_v16 = vadd.f32 %v762_v15, %v761_v14 }
 0x2c0   :  { %v764_v17 = vmul.f32 0.0078125, %v763_v16 }
 0x2c2   :  { %v765_v18 = vadd.f32 1e-05, %v764_v17 }
 0x2c4   :  { %1038 = vrsqrt.f32 %v765_v18 }
 0x2ce   :  { %v1039_v19 = vpop.eup %1038 }
 0x2cf   :  { %v767_v20 = vmul.f32 %v1039_v19, %v655_v48 }
 0x2d1   :  { %v772_v21 = vrot.slane %v767_v20, %v429_v59 }
 0x2d3   :  { %v774_v22 = vmul.f32 %v772_v21, %v1393_v5  ;;  %v775_v23 = vmul.f32 %v772_v21, %v1395_v6  ;;  %v776_v24 = vmul.f32 %v772_v21, %v1397_v52  ;;  %v777_v25 = vmul.f32 %v772_v21, %v1399_v40 }
 0x2d4   :  { %v778_v29 = vmul.f32 %v772_v21, %v1401_v50  ;;  %v779_v32 = vmul.f32 %v772_v21, %v1403_v62  ;;  %v780_v33 = vmul.f32 %v772_v21, %v1405_v7  ;;  %v781_v57 = vmul.f32 %v772_v21, %v1407_v41  ;;  %v812_v7 = vld [vmem:[%s1632_s7] sm:$0xff] }
 0x2d5   :  { %v782_v59 = vmul.f32 %v772_v21, %v1409_v46  ;;  %v783_v5 = vmul.f32 %v772_v21, %v1411_v9  ;;  %v784_v6 = vmul.f32 %v772_v21, %v1413_v42  ;;  %v785_v52 = vmul.f32 %v772_v21, %v1415_v45  ;;  %v813_v42 = vld [vmem:[%s1632_s7 + $0x8] sm:$0xff]  ;;  %v814_v45 = vld [vmem:[%s1632_s7 + $0x10] sm:$0xff] }
 0x2d6   :  { %v786_v40 = vmul.f32 %v772_v21, %v1417_v63  ;;  %v787_v34 = vmul.f32 %v772_v21, %v1419_v8  ;;  %v788_v50 = vmul.f32 %v772_v21, %v1421_v10  ;;  %v789_v62 = vmul.f32 %v772_v21, %v1423_v39  ;;  %v815_v63 = vld [vmem:[%s1632_s7 + $0x18] sm:$0xff] }
 0x2d7   :  { %v796_v41 = vadd.f32 %v955_v28, %v774_v22  ;;  %v797_v46 = vadd.f32 %v955_v28, %v775_v23  ;;  %v798_v35 = vadd.f32 %v955_v28, %v776_v24  ;;  %v799_v9 = vadd.f32 %v955_v28, %v777_v25 }
 0x2d8   :  { %v800_v8 = vadd.f32 %v955_v28, %v778_v29  ;;  %v801_v10 = vadd.f32 %v955_v28, %v779_v32  ;;  %v802_v39 = vadd.f32 %v955_v28, %v780_v33  ;;  %v803_v36 = vadd.f32 %v955_v28, %v781_v57 }
 0x2d9   :  { %v804_v55 = vadd.f32 %v955_v28, %v782_v59  ;;  %v805_v26 = vadd.f32 %v955_v28, %v783_v5  ;;  %v806_v51 = vadd.f32 %v955_v28, %v784_v6  ;;  %v807_v27 = vadd.f32 %v955_v28, %v785_v52 }
 0x2da   :  { %v808_v56 = vadd.f32 %v955_v28, %v786_v40  ;;  %v809_v37 = vadd.f32 %v955_v28, %v787_v34  ;;  %v810_v44 = vadd.f32 %v955_v28, %v788_v50  ;;  %v811_v58 = vadd.f32 %v955_v28, %v789_v62 }
 0x2db   :  { %v828_v3 = vadd.f32 %v812_v7, %v796_v41  ;;  %v829_v4 = vadd.f32 %v813_v42, %v797_v46  ;;  %v830_v47 = vadd.f32 %v814_v45, %v798_v35  ;;  %v831_v11 = vadd.f32 %v815_v63, %v799_v9 }
 0x2dc   :  { %v832_v12 = vadd.f32 %v816_v49, %v800_v8  ;;  %v833_v13 = vadd.f32 %v817_v53, %v801_v10  ;;  %v834_v14 = vadd.f32 %v818_v54, %v802_v39  ;;  %v835_v15 = vadd.f32 %v819_v31, %v803_v36 }
 0x2dd   :  { %v836_v16 = vadd.f32 %v820_v38, %v804_v55  ;;  %v837_v17 = vadd.f32 %v821_v30, %v805_v26  ;;  %v838_v18 = vadd.f32 %v822_v60, %v806_v51  ;;  %v839_v48 = vadd.f32 %v823_v61, %v807_v27 }
 0x2de   :  { %v840_v19 = vadd.f32 %v824_v43, %v808_v56  ;;  %v841_v20 = vadd.f32 %v825_v0, %v809_v37  ;;  %v842_v21 = vadd.f32 %v826_v1, %v810_v44  ;;  %v843_v22 = vadd.f32 %v827_v2, %v811_v58 }
 0x2df   :  { %vm844_vm2 = vcmp.ge.f32.partialorder %v828_v3, 0.0  ;;  %vm845_vm3 = vcmp.ge.f32.partialorder %v829_v4, 0.0  ;;  %vm846_vm4 = vcmp.ge.f32.partialorder %v830_v47, 0.0  ;;  %vm847_vm5 = vcmp.ge.f32.partialorder %v831_v11, 0.0 }
 0x2e0   :  { %vm848_vm6 = vcmp.ge.f32.partialorder %v832_v12, 0.0  ;;  %vm849_vm7 = vcmp.ge.f32.partialorder %v833_v13, 0.0  ;;  %vm850_vm8 = vcmp.ge.f32.partialorder %v834_v14, 0.0  ;;  %vm851_vm9 = vcmp.ge.f32.partialorder %v835_v15, 0.0 }
 0x2e1   :  { %vm852_vm10 = vcmp.ge.f32.partialorder %v836_v16, 0.0  ;;  %vm853_vm11 = vcmp.ge.f32.partialorder %v837_v17, 0.0  ;;  %vm854_vm12 = vcmp.ge.f32.partialorder %v838_v18, 0.0  ;;  %vm855_vm13 = vcmp.ge.f32.partialorder %v839_v48, 0.0 }
 0x2e2   :  { %vm857_vm15 = vcmp.ge.f32.partialorder %v841_v20, 0.0  ;;  %vm858_vm1 = vcmp.ge.f32.partialorder %v842_v21, 0.0  ;;  %v860_v23 = vmul.f32 0.01, %v828_v3  ;;  %v861_v24 = vmul.f32 0.01, %v829_v4 }
 0x2e3   :  { %v862_v25 = vmul.f32 0.01, %v830_v47  ;;  %v863_v28 = vmul.f32 0.01, %v831_v11  ;;  %v864_v29 = vmul.f32 0.01, %v832_v12 }
 0x2e4   :  { %v865_v32 = vmul.f32 0.01, %v833_v13  ;;  %v866_v33 = vmul.f32 0.01, %v834_v14  ;;  %v867_v57 = vmul.f32 0.01, %v835_v15  ;;  %v876_v5 = vsel %vm844_vm2, %v828_v3, %v860_v23  ;;  %vm1637_vm2 = vmmov %vm1636_vm0 }
 0x2e5   :  { %v868_v59 = vmul.f32 0.01, %v836_v16  ;;  %v869_v6 = vmul.f32 0.01, %v837_v17  ;;  %v870_v52 = vmul.f32 0.01, %v838_v18  ;;  %v877_v34 = vsel %vm845_vm3, %v829_v4, %v861_v24  ;;  %vm1638_vm3 = vmmov %vm1636_vm0 }
 0x2e6   :  { %v871_v40 = vmul.f32 0.01, %v839_v48  ;;  %892 = vst.msk [vmem:[%s1633_s8] sm:$0xff] %vm1635_vm14, %v876_v5  ;;  %v872_v50 = vmul.f32 0.01, %v840_v19  ;;  %v878_v41 = vsel %vm846_vm4, %v830_v47, %v862_v25  ;;  %v879_v35 = vsel %vm847_vm5, %v831_v11, %v863_v28  ;;  %vm1639_vm4 = vmmov %vm1636_vm0 }
 0x2e7   :  { %v873_v62 = vmul.f32 0.01, %v841_v20  ;;  %v874_v7 = vmul.f32 0.01, %v842_v21  ;;  %893 = vst.msk [vmem:[%s1633_s8 + $0x8] sm:$0xff] %vm1636_vm0, %v877_v34  ;;  %v880_v9 = vsel %vm848_vm6, %v832_v12, %v864_v29  ;;  %v881_v42 = vsel %vm849_vm7, %v833_v13, %v865_v32  ;;  %895 = vst.msk [vmem:[%s1633_s8 + $0x18] sm:$0xff] %vm1636_vm0, %v879_v35 }
 0x2e8   :  { %v875_v46 = vmul.f32 0.01, %v843_v22  ;;  %894 = vst.msk [vmem:[%s1633_s8 + $0x10] sm:$0xff] %vm1637_vm2, %v878_v41  ;;  %v882_v45 = vsel %vm850_vm8, %v834_v14, %v866_v33  ;;  %v883_v63 = vsel %vm851_vm9, %v835_v15, %v867_v57  ;;  %v884_v8 = vsel %vm852_vm10, %v836_v16, %v868_v59  ;;  %vm1641_vm6 = vmmov %vm1636_vm0 }
 0x2e9   :  { %v885_v10 = vsel %vm853_vm11, %v837_v17, %v869_v6  ;;  %896 = vst.msk [vmem:[%s1633_s8 + $0x20] sm:$0xff] %vm1638_vm3, %v880_v9  ;;  %v886_v39 = vsel %vm854_vm12, %v838_v18, %v870_v52  ;;  %v887_v36 = vsel %vm855_vm13, %v839_v48, %v871_v40  ;;  %vm1640_vm5 = vcmp.ge.f32.partialorder %v840_v19, 0.0  ;;  %vm1642_vm7 = vmmov %vm1636_vm0 }
 0x2ea   :  { %897 = vst.msk [vmem:[%s1633_s8 + $0x28] sm:$0xff] %vm1639_vm4, %v881_v42  ;;  %v888_v49 = vsel %vm1640_vm5, %v840_v19, %v872_v50  ;;  %v889_v53 = vsel %vm857_vm15, %v841_v20, %v873_v62  ;;  %vm1643_vm8 = vmmov %vm1636_vm0  ;;  %v890_v54 = vsel %vm858_vm1, %v842_v21, %v874_v7  ;;  %vm1645_vm10 = vcmp.ge.f32.partialorder %v843_v22, 0.0 }
 0x2eb   :  { %898 = vst.msk [vmem:[%s1633_s8 + $0x30] sm:$0xff] %vm1641_vm6, %v882_v45  ;;  %vm1644_vm9 = vmmov %vm1636_vm0  ;;  %v891_v55 = vsel %vm1645_vm10, %v843_v22, %v875_v46 }
 0x2ec   :  { %899 = vst.msk [vmem:[%s1633_s8 + $0x38] sm:$0xff] %vm1642_vm7, %v883_v63  ;;  %vm1646_vm11 = vmmov %vm1636_vm0 }
 0x2ed   :  { %900 = vst.msk [vmem:[%s1633_s8 + $0x40] sm:$0xff] %vm1643_vm8, %v884_v8  ;;  %vm1647_vm12 = vmmov %vm1636_vm0 }
 0x2ee   :  { %901 = vst.msk [vmem:[%s1633_s8 + $0x48] sm:$0xff] %vm1644_vm9, %v885_v10  ;;  %vm1648_vm13 = vmmov %vm1636_vm0 }
 0x2ef   :  { %902 = vst.msk [vmem:[%s1633_s8 + $0x50] sm:$0xff] %vm1646_vm11, %v886_v39  ;;  %vm1649_vm14 = vmmov %vm1636_vm0 }
 0x2f0   :  { %903 = vst.msk [vmem:[%s1633_s8 + $0x58] sm:$0xff] %vm1647_vm12, %v887_v36  ;;  %vm1650_vm15 = vmmov %vm1636_vm0 }
 0x2f1   :  { %904 = vst.msk [vmem:[%s1633_s8 + $0x60] sm:$0xff] %vm1648_vm13, %v888_v49  ;;  %vm1651_vm1 = vmmov %vm1636_vm0 }
 0x2f2   :  { %905 = vst.msk [vmem:[%s1633_s8 + $0x68] sm:$0xff] %vm1649_vm14, %v889_v53 }
 0x2f3   :  { %906 = vst.msk [vmem:[%s1633_s8 + $0x70] sm:$0xff] %vm1650_vm15, %v890_v54 }
 0x2f4   :  { %907 = vst.msk [vmem:[%s1633_s8 + $0x78] sm:$0xff] %vm1651_vm1, %v891_v55 }

// kernel: decoder_forward.26
= control target key start
LH: loop header
LB: loop body
LE: loop exit
PB: predicated region body
PF: predicated region fallthrough
CT: control target
= control target key end

     0   :  { %v1301_v0 = vmov 0   ;;  %vm178_vm0 = vcmask 130048   ;;  %vm2274_vm1 = vcmask 261312   ;;  %vm2276_vm2 = vcmask 130112   ;;  %s1303_s12 = smov 120   ;;  %s1304_s13 = smov 112   ;;  %s2269_s1 = inlined_call_operand.vmem [shape: bf16[144,32], index: 1, kind: input, shape index: {}]   ;;  %s2270_s0 = inlined_call_operand.vmem [shape: bf16[128,144], index: 0, kind: input, shape index: {}]   ;;  %s2271_s2 = inlined_call_operand.vmem [shape: f32[1,8], index: 2, kind: input, shape index: {}]   ;;  %s2272_s3 = inlined_call_operand.vmem [shape: f32[1,8], index: 3, kind: input, shape index: {}]   ;;  %s2273_s4 = inlined_call_operand.vmem [shape: f32[128,32], index: 4, kind: output, shape index: {}]  }
   0x1   :  { %203 = vmatprep.subr.bf16.mxu0 %v1301_v0  ;;  %v1266_v1 = vld [vmem:[%s2269_s1] sm:$0xff]   ;;  %1241 = vmatprep.subr.bf16.mxu1 %v1301_v0  ;;  %v1267_v2 = vld [vmem:[%s2269_s1 + $0x8] sm:$0xff]   ;;  %v1268_v3 = vld [vmem:[%s2269_s1 + $0x10] sm:$0xff]   ;;  %vm2275_vm3 = vcmask 195712   ;;  %vm2277_vm4 = vcmask 64512   ;;  %s1305_s14 = smov 16  }
   0x2   :  { %204 = vmatpush1.bf16.msra.mxu0 %v1266_v1  ;;  %1250 = vmatpush1.bf16.msra.mxu1 %v1266_v1  ;;  %v1269_v4 = vld [vmem:[%s2269_s1 + $0x18] sm:$0xff]   ;;  %v1277_v5 = vld [vmem:[%s2270_s0 + $0x4] ss:$8 sps:$4 sm:$0xff]   ;;  %v1272_v9 = vld [vmem:[%s2269_s1 + $0x30] sm:$0xff]   ;;  %s1306_s15 = smov 8   ;;  %s1307_s16 = smov 24  }
   0x3   :  { %205 = vmatprep.subr.bf16.mxu0 %v1301_v0  ;;  %1242 = vmatprep.subr.bf16.mxu1 %v1301_v0  ;;  %v1283_v6 = vld [vmem:[%s2270_s0 + $0x44] ss:$8 sps:$4 sm:$0xff]   ;;  %v1273_v10 = vld [vmem:[%s2269_s1 + $0x38] sm:$0xff]   ;;  %v1275_v12 = vld [vmem:[%s2270_s0] ss:$8 sps:$4 sm:$0xff]  }
   0x4   :  { %1233 = vmatprep.mubr.msk.bf16.mxu0 %vm178_vm0, %v1277_v5  ;;  %v1270_v7 = vld [vmem:[%s2269_s1 + $0x20] sm:$0xff]   ;;  %1237 = vmatprep.mubr.msk.bf16.mxu1 %vm178_vm0, %v1283_v6  ;;  %v1271_v8 = vld [vmem:[%s2269_s1 + $0x28] sm:$0xff]   ;;  %v1278_v14 = vld [vmem:[%s2270_s0 + $0x14] ss:$8 sps:$4 sm:$0xff]  }
   0x5   :  { %v1274_v11 = vld [vmem:[%s2269_s1 + $0x40] sm:$0xff]   ;;  %v1287_v15 = vld [vmem:[%s2270_s0 + $0x54] ss:$8 sps:$4 sm:$0xff]   ;;  %v1280_v16 = vld [vmem:[%s2270_s0 + $0x10] ss:$8 sps:$4 sm:$0xff]  }
   0x6   :  { %206 = vmatpush1.bf16.msra.mxu0 %v1267_v2  ;;  %1251 = vmatpush1.bf16.msra.mxu1 %v1267_v2  ;;  %v1281_v13 = vld [vmem:[%s2270_s0 + $0x40] ss:$8 sps:$4 sm:$0xff]   ;;  %v1289_v17 = vld [vmem:[%s2270_s0 + $0x50] ss:$8 sps:$4 sm:$0xff]   ;;  %v1284_v18 = vld [vmem:[%s2270_s0 + $0x24] ss:$8 sps:$4 sm:$0xff]  }
   0x7   :  { %207 = vmatprep.subr.bf16.mxu0 %v1301_v0  ;;  %1243 = vmatprep.subr.bf16.mxu1 %v1301_v0  ;;  %v1293_v19 = vld [vmem:[%s2270_s0 + $0x64] ss:$8 sps:$4 sm:$0xff]   ;;  %v1286_v20 = vld [vmem:[%s2270_s0 + $0x20] ss:$8 sps:$4 sm:$0xff]   ;;  %v1290_v22 = vld [vmem:[%s2270_s0 + $0x34] ss:$8 sps:$4 sm:$0xff]  }
   0x8   :  { %v1295_v21 = vld [vmem:[%s2270_s0 + $0x60] ss:$8 sps:$4 sm:$0xff]   ;;  %v1296_v23 = vld [vmem:[%s2270_s0 + $0x74] ss:$8 sps:$4 sm:$0xff]   ;;  %v1292_v24 = vld [vmem:[%s2270_s0 + $0x30] ss:$8 sps:$4 sm:$0xff]  }
   0x9   :  { %v1298_v25 = vld [vmem:[%s2270_s0 + $0x70] ss:$8 sps:$4 sm:$0xff]   ;;  %s1302_s0 = smov 104  }
   0xa   :  { %208 = vmatpush1.bf16.msra.mxu0 %v1268_v3  ;;  %1252 = vmatpush1.bf16.msra.mxu1 %v1268_v3 }
   0xb   :  { %209 = vmatprep.subr.bf16.mxu0 %v1301_v0  ;;  %1244 = vmatprep.subr.bf16.mxu1 %v1301_v0 }
   0xe   :  { %210 = vmatpush1.bf16.msra.mxu0 %v1269_v4  ;;  %1253 = vmatpush1.bf16.msra.mxu1 %v1269_v4 }
   0xf   :  { %211 = vmatprep.subr.bf16.mxu0 %v1301_v0  ;;  %1245 = vmatprep.subr.bf16.mxu1 %v1301_v0 }
  0x12   :  { %212 = vmatpush1.bf16.msra.mxu0 %v1270_v7  ;;  %1254 = vmatpush1.bf16.msra.mxu1 %v1270_v7 }
  0x13   :  { %213 = vmatprep.subr.bf16.mxu0 %v1301_v0  ;;  %1246 = vmatprep.subr.bf16.mxu1 %v1301_v0 }
  0x16   :  { %214 = vmatpush1.bf16.msra.mxu0 %v1271_v8  ;;  %1255 = vmatpush1.bf16.msra.mxu1 %v1271_v8 }
  0x17   :  { %215 = vmatprep.subr.bf16.mxu0 %v1301_v0  ;;  %1247 = vmatprep.subr.bf16.mxu1 %v1301_v0 }
  0x1a   :  { %216 = vmatpush1.bf16.msra.mxu0 %v1272_v9  ;;  %1256 = vmatpush1.bf16.msra.mxu1 %v1272_v9 }
  0x1b   :  { %217 = vmatprep.subr.bf16.mxu0 %v1301_v0  ;;  %1248 = vmatprep.subr.bf16.mxu1 %v1301_v0 }
  0x1e   :  { %218 = vmatpush1.bf16.msra.mxu0 %v1273_v10  ;;  %1257 = vmatpush1.bf16.msra.mxu1 %v1273_v10 }
  0x1f   :  { %219 = vmatprep.subr.bf16.mxu0 %v1301_v0  ;;  %1249 = vmatprep.subr.bf16.mxu1 %v1301_v0 }
  0x22   :  { %220 = vmatpush1.bf16.msra.mxu0 %v1274_v11  ;;  %1258 = vmatpush1.bf16.msra.mxu1 %v1274_v11 }
  0x25   :  { %236 = vmatmul.mubr.bf16.vlgmr.msra.gmra.mrb[0].mxu0 %v1275_v12  ;;  %268 = vmatmul.mubr.bf16.vlgmr.msra.gmra.mrb[0].mxu1 %v1281_v13 }
  0x26   :  { %1234 = vmatprep.mubr.msk.bf16.mxu0 %vm178_vm0, %v1278_v14  ;;  %1238 = vmatprep.mubr.msk.bf16.mxu1 %vm178_vm0, %v1287_v15 }
  0x2d   :  { %244 = vmatmul.mubr.bf16.gmra.mrb[4].mxu0 %v1280_v16  ;;  %276 = vmatmul.mubr.bf16.gmra.mrb[4].mxu1 %v1289_v17 }
  0x2e   :  { %1235 = vmatprep.mubr.msk.bf16.mxu0 %vm178_vm0, %v1284_v18  ;;  %1239 = vmatprep.mubr.msk.bf16.mxu1 %vm178_vm0, %v1293_v19 }
  0x35   :  { %252 = vmatmul.mubr.bf16.gmra.mrb[8].mxu0 %v1286_v20  ;;  %284 = vmatmul.mubr.bf16.gmra.mrb[8].mxu1 %v1295_v21 }
  0x36   :  { %1236 = vmatprep.mubr.msk.bf16.mxu0 %vm178_vm0, %v1290_v22  ;;  %1240 = vmatprep.mubr.msk.bf16.mxu1 %vm178_vm0, %v1296_v23 }
  0x3d   :  { %260 = vmatmul.mubr.bf16.gmra.mrb[12].mxu0 %v1292_v24  ;;  %292 = vmatmul.mubr.bf16.gmra.mrb[12].mxu1 %v1298_v25 }
  0xf8   :  { %v1416_v26 = vpop.f32.mrb[0].mxu0  ;;  %v1418_v27 = vpop.f32.mrb[0].mxu1 }
  0xf9   :  { %v239_v28 = vpop.f32.mrb[1].mxu0  ;;  %v271_v29 = vpop.f32.mrb[1].mxu1  ;;  %v429_v34 = vsel %vm2274_vm1, %v1416_v26, 0.0  ;;  %v341_v36 = vsel %vm2276_vm2, %v1416_v26, 0.0  ;;  %v385_v40 = vsel %vm2275_vm3, %v1416_v26, 0.0  ;;  %v301_v43 = vsel %vm2277_vm4, %v1416_v26, 0.0 }
  0xfa   :  { %v1420_v30 = vpop.f32.mrb[2].mxu0  ;;  %v1422_v31 = vpop.f32.mrb[2].mxu1 }
  0xfb   :  { %v242_v32 = vpop.f32.mrb[3].mxu0  ;;  %v274_v33 = vpop.f32.mrb[3].mxu1  ;;  %v430_v35 = vsel %vm2274_vm1, %v1420_v30, 0.0  ;;  %v342_v37 = vsel %vm2276_vm2, %v1420_v30, 0.0  ;;  %v386_v41 = vsel %vm2275_vm3, %v1420_v30, 0.0  ;;  %v302_v44 = vsel %vm2277_vm4, %v1420_v30, 0.0 }
  0xfc   :  { %v431_v38 = vadd.f32 %v430_v35, %v429_v34  ;;  %v343_v39 = vadd.f32 %v342_v37, %v341_v36  ;;  %v387_v42 = vadd.f32 %v386_v41, %v385_v40  ;;  %v303_v45 = vadd.f32 %v302_v44, %v301_v43 }
 0x100   :  { %v1440_v46 = vpop.f32.mrb[4].mxu0  ;;  %v1442_v47 = vpop.f32.mrb[4].mxu1 }
 0x101   :  { %v247_v48 = vpop.f32.mrb[5].mxu0  ;;  %v279_v49 = vpop.f32.mrb[5].mxu1  ;;  %v432_v50 = vsel %vm2274_vm1, %v1440_v46, 0.0  ;;  %v344_v51 = vsel %vm2276_vm2, %v1440_v46, 0.0  ;;  %v388_v56 = vsel %vm2275_vm3, %v1440_v46, 0.0  ;;  %v304_v1 = vsel %vm2277_vm4, %v1440_v46, 0.0 }
 0x102   :  { %v1448_v52 = vpop.f32.mrb[6].mxu0  ;;  %v1450_v53 = vpop.f32.mrb[6].mxu1  ;;  %v433_v54 = vadd.f32 %v432_v50, %v431_v38  ;;  %v345_v55 = vadd.f32 %v344_v51, %v343_v39  ;;  %v389_v63 = vadd.f32 %v388_v56, %v387_v42  ;;  %v305_v4 = vadd.f32 %v304_v1, %v303_v45 }
 0x103   :  { %v250_v57 = vpop.f32.mrb[7].mxu0  ;;  %v282_v58 = vpop.f32.mrb[7].mxu1  ;;  %v434_v59 = vsel %vm2274_vm1, %v1448_v52, 0.0  ;;  %v346_v60 = vsel %vm2276_vm2, %v1448_v52, 0.0  ;;  %v390_v0 = vsel %vm2275_vm3, %v1448_v52, 0.0  ;;  %v306_v2 = vsel %vm2277_vm4, %v1448_v52, 0.0 }
 0x104   :  { %v435_v61 = vadd.f32 %v434_v59, %v433_v54  ;;  %v347_v62 = vadd.f32 %v346_v60, %v345_v55  ;;  %v391_v3 = vadd.f32 %v390_v0, %v389_v63  ;;  %v307_v7 = vadd.f32 %v306_v2, %v305_v4 }
 0x105   :  { %v444_v50 = vsel %vm2274_vm1, %v1418_v27, 0.0  ;;  %v356_v58 = vsel %vm2276_vm2, %v1418_v27, 0.0  ;;  %v400_v59 = vsel %vm2275_vm3, %v1418_v27, 0.0  ;;  %v446_v2 = vsel %vm2274_vm1, %v1422_v31, 0.0 }
 0x106   :  { %v402_v4 = vsel %vm2275_vm3, %v1422_v31, 0.0 }
 0x108   :  { %v1464_v5 = vpop.f32.mrb[8].mxu0  ;;  %v1466_v6 = vpop.f32.mrb[8].mxu1 }
 0x109   :  { %v255_v8 = vpop.f32.mrb[9].mxu0  ;;  %v287_v9 = vpop.f32.mrb[9].mxu1  ;;  %v436_v10 = vsel %vm2274_vm1, %v1464_v5, 0.0  ;;  %v348_v11 = vsel %vm2276_vm2, %v1464_v5, 0.0  ;;  %v392_v16 = vsel %vm2275_vm3, %v1464_v5, 0.0  ;;  %v308_v25 = vsel %vm2277_vm4, %v1464_v5, 0.0 }
 0x10a   :  { %v1472_v12 = vpop.f32.mrb[10].mxu0  ;;  %v1474_v13 = vpop.f32.mrb[10].mxu1  ;;  %v437_v14 = vadd.f32 %v436_v10, %v435_v61  ;;  %v349_v15 = vadd.f32 %v348_v11, %v347_v62  ;;  %v393_v23 = vadd.f32 %v392_v16, %v391_v3  ;;  %v309_v32 = vadd.f32 %v308_v25, %v307_v7 }
 0x10b   :  { %v258_v17 = vpop.f32.mrb[11].mxu0  ;;  %v290_v18 = vpop.f32.mrb[11].mxu1  ;;  %v438_v19 = vsel %vm2274_vm1, %v1472_v12, 0.0  ;;  %v350_v20 = vsel %vm2276_vm2, %v1472_v12, 0.0  ;;  %v394_v24 = vsel %vm2275_vm3, %v1472_v12, 0.0  ;;  %v310_v28 = vsel %vm2277_vm4, %v1472_v12, 0.0 }
 0x10c   :  { %v439_v21 = vadd.f32 %v438_v19, %v437_v14  ;;  %v351_v22 = vadd.f32 %v350_v20, %v349_v15  ;;  %v395_v29 = vadd.f32 %v394_v24, %v393_v23  ;;  %v311_v35 = vadd.f32 %v310_v28, %v309_v32 }
 0x10d   :  { %v316_v61 = vsel %vm2277_vm4, %v1418_v27, 0.0  ;;  %v358_v3 = vsel %vm2276_vm2, %v1422_v31, 0.0  ;;  %v448_v14 = vsel %vm2274_vm1, %v1442_v47, 0.0  ;;  %v360_v15 = vsel %vm2276_vm2, %v1442_v47, 0.0 }
 0x10e   :  { %v404_v16 = vsel %vm2275_vm3, %v1442_v47, 0.0  ;;  %v318_v17 = vsel %vm2277_vm4, %v1422_v31, 0.0  ;;  %v362_v23 = vsel %vm2276_vm2, %v1450_v53, 0.0  ;;  %v406_v24 = vsel %vm2275_vm3, %v1450_v53, 0.0 }
 0x10f   :  { %v320_v25 = vsel %vm2277_vm4, %v1442_v47, 0.0 }
 0x110   :  { %v1488_v33 = vpop.f32.mrb[12].mxu0  ;;  %v1490_v34 = vpop.f32.mrb[12].mxu1 }
 0x111   :  { %v263_v36 = vpop.f32.mrb[13].mxu0  ;;  %v295_v37 = vpop.f32.mrb[13].mxu1  ;;  %v440_v38 = vsel %vm2274_vm1, %v1488_v33, 0.0  ;;  %v352_v39 = vsel %vm2276_vm2, %v1488_v33, 0.0  ;;  %v396_v44 = vsel %vm2275_vm3, %v1488_v33, 0.0  ;;  %v312_v60 = vsel %vm2277_vm4, %v1488_v33, 0.0 }
 0x112   :  { %v1496_v40 = vpop.f32.mrb[14].mxu0  ;;  %v1498_v41 = vpop.f32.mrb[14].mxu1  ;;  %v441_v42 = vadd.f32 %v440_v38, %v439_v21  ;;  %v353_v43 = vadd.f32 %v352_v39, %v351_v22  ;;  %v397_v56 = vadd.f32 %v396_v44, %v395_v29  ;;  %v313_v1 = vadd.f32 %v312_v60, %v311_v35 }
 0x113   :  { %v266_v45 = vpop.f32.mrb[15].mxu0  ;;  %v298_v48 = vpop.f32.mrb[15].mxu1  ;;  %v442_v49 = vsel %vm2274_vm1, %v1496_v40, 0.0  ;;  %v354_v51 = vsel %vm2276_vm2, %v1496_v40, 0.0  ;;  %v398_v57 = vsel %vm2275_vm3, %v1496_v40, 0.0  ;;  %v314_v7 = vsel %vm2277_vm4, %v1496_v40, 0.0 }
 0x114   :  { %v443_v54 = vadd.f32 %v442_v49, %v441_v42  ;;  %v355_v55 = vadd.f32 %v354_v51, %v353_v43  ;;  %v399_v0 = vadd.f32 %v398_v57, %v397_v56  ;;  %v315_v11 = vadd.f32 %v314_v7, %v313_v1 }
 0x115   :  { %v450_v22 = vsel %vm2274_vm1, %v1450_v53, 0.0  ;;  %v452_v36 = vsel %vm2274_vm1, %v1466_v6, 0.0  ;;  %v364_v37 = vsel %vm2276_vm2, %v1466_v6, 0.0  ;;  %v408_v38 = vsel %vm2275_vm3, %v1466_v6, 0.0 }
 0x116   :  { %v445_v62 = vadd.f32 %v444_v50, %v443_v54  ;;  %v357_v63 = vadd.f32 %v356_v58, %v355_v55  ;;  %v401_v10 = vadd.f32 %v400_v59, %v399_v0  ;;  %v317_v21 = vadd.f32 %v316_v61, %v315_v11 }
 0x117   :  { %v322_v39 = vsel %vm2277_vm4, %v1450_v53, 0.0  ;;  %v454_v48 = vsel %vm2274_vm1, %v1474_v13, 0.0  ;;  %v456_v49 = vsel %vm2274_vm1, %v1490_v34, 0.0  ;;  %v366_v50 = vsel %vm2276_vm2, %v1474_v13, 0.0 }
 0x118   :  { %v447_v8 = vadd.f32 %v446_v2, %v445_v62  ;;  %v359_v9 = vadd.f32 %v358_v3, %v357_v63  ;;  %v403_v20 = vadd.f32 %v402_v4, %v401_v10  ;;  %v319_v35 = vadd.f32 %v318_v17, %v317_v21 }
 0x119   :  { %v368_v51 = vsel %vm2276_vm2, %v1490_v34, 0.0  ;;  %v410_v58 = vsel %vm2275_vm3, %v1474_v13, 0.0  ;;  %v412_v59 = vsel %vm2275_vm3, %v1490_v34, 0.0  ;;  %v324_v60 = vsel %vm2277_vm4, %v1466_v6, 0.0 }
 0x11a   :  { %v449_v18 = vadd.f32 %v448_v14, %v447_v8  ;;  %v361_v19 = vadd.f32 %v360_v15, %v359_v9  ;;  %v405_v32 = vadd.f32 %v404_v16, %v403_v20  ;;  %v321_v45 = vadd.f32 %v320_v25, %v319_v35 }
 0x11b   :  { %v458_v1 = vsel %vm2274_vm1, %v1498_v41, 0.0  ;;  %v370_v2 = vsel %vm2276_vm2, %v1498_v41, 0.0  ;;  %v326_v3 = vsel %vm2277_vm4, %v1474_v13, 0.0  ;;  %v328_v4 = vsel %vm2277_vm4, %v1490_v34, 0.0 }
 0x11c   :  { %v451_v28 = vadd.f32 %v450_v22, %v449_v18  ;;  %v363_v29 = vadd.f32 %v362_v23, %v361_v19  ;;  %v407_v44 = vadd.f32 %v406_v24, %v405_v32  ;;  %v323_v57 = vadd.f32 %v322_v39, %v321_v45 }
 0x11d   :  { %v414_v11 = vsel %vm2275_vm3, %v1498_v41, 0.0  ;;  %v330_v18 = vsel %vm2277_vm4, %v1498_v41, 0.0 }
 0x11e   :  { %v453_v42 = vadd.f32 %v452_v36, %v451_v28  ;;  %v365_v43 = vadd.f32 %v364_v37, %v363_v29  ;;  %v409_v56 = vadd.f32 %v408_v38, %v407_v44  ;;  %v325_v0 = vadd.f32 %v324_v60, %v323_v57 }
 0x11f   :  { %v473_v57 = vlaneseq }
 0x120   :  { %v455_v54 = vadd.f32 %v454_v48, %v453_v42  ;;  %v367_v55 = vadd.f32 %v366_v50, %v365_v43  ;;  %v411_v63 = vadd.f32 %v410_v58, %v409_v56  ;;  %v327_v10 = vadd.f32 %v326_v3, %v325_v0 }
 0x122   :  { %v457_v61 = vadd.f32 %v456_v49, %v455_v54  ;;  %v369_v62 = vadd.f32 %v368_v51, %v367_v55  ;;  %v413_v9 = vadd.f32 %v412_v59, %v411_v63  ;;  %v329_v17 = vadd.f32 %v328_v4, %v327_v10 }
 0x124   :  { %v459_v7 = vadd.f32 %v458_v1, %v457_v61  ;;  %v371_v8 = vadd.f32 %v370_v2, %v369_v62  ;;  %v415_v16 = vadd.f32 %v414_v11, %v413_v9  ;;  %v331_v22 = vadd.f32 %v330_v18, %v329_v17 }
 0x125   :  { %v474_v61 = vshrl.u32 %v473_v57, 7 }
 0x126   :  { %v460_v14 = vrot.slane %v459_v7, 4  ;;  %v372_v15 = vrot.slane %v371_v8, 4  ;;  %v416_v21 = vrot.slane %v415_v16, 4  ;;  %v332_v49 = vrot.slane %v331_v22, 4 }
 0x127   :  { %v1579_v1 = vsub.s32 0, %v474_v61 }
 0x128   :  { %v461_v19 = vadd.f32 %v460_v14, %v459_v7  ;;  %v373_v20 = vadd.f32 %v372_v15, %v371_v8  ;;  %v417_v25 = vadd.f32 %v416_v21, %v415_v16  ;;  %v333_v50 = vadd.f32 %v332_v49, %v331_v22 }
 0x12a   :  { %v462_v23 = vrot.slane %v461_v19, 2  ;;  %v374_v24 = vrot.slane %v373_v20, 2  ;;  %v418_v32 = vrot.slane %v417_v25, 2  ;;  %v334_v51 = vrot.slane %v333_v50, 2 }
 0x12c   :  { %v463_v28 = vadd.f32 %v462_v23, %v461_v19  ;;  %v375_v29 = vadd.f32 %v374_v24, %v373_v20  ;;  %v419_v37 = vadd.f32 %v418_v32, %v417_v25  ;;  %v335_v54 = vadd.f32 %v334_v51, %v333_v50 }
 0x12e   :  { %v464_v35 = vrot.slane %v463_v28, 1  ;;  %v376_v36 = vrot.slane %v375_v29, 1  ;;  %v420_v42 = vrot.slane %v419_v37, 1  ;;  %v336_v55 = vrot.slane %v335_v54, 1 }
 0x130   :  { %v465_v38 = vadd.f32 %v464_v35, %v463_v28  ;;  %v377_v39 = vadd.f32 %v376_v36, %v375_v29  ;;  %v421_v45 = vadd.f32 %v420_v42, %v419_v37  ;;  %v337_v56 = vadd.f32 %v336_v55, %v335_v54 }
 0x132   :  { %v466_v43 = vmul.f32 0.0078125, %v465_v38  ;;  %v378_v44 = vmul.f32 0.0078125, %v377_v39  ;;  %v422_v48 = vmul.f32 0.0078125, %v421_v45  ;;  %v339_v59 = vmul.f32 0.0078125, %v337_v56 }
 0x134   :  { %468 = vrot.lane.b32.xlu1 %v466_v43, %s1302_s0  ;;  %380 = vrot.lane.b32.xlu0 %v378_v44, %s1303_s12 }
 0x138   :  { %424 = vrot.lane.b32.xlu0 %v422_v48, %s1304_s13 }
 0x1a6   :  { %v381_v58 = vpop.permute.xlu0 %380  ;;  %v469_v0 = vpop.permute.xlu1 %468 }
 0x1a7   :  { %v383_v60 = vadd.f32 %v381_v58, %v339_v59 }
 0x1aa   :  { %v425_v62 = vpop.permute.xlu0 %424 }
 0x1ab   :  { %v427_v63 = vadd.f32 %v425_v62, %v383_v60 }
 0x1ad   :  { %v471_v2 = vadd.f32 %v469_v0, %v427_v63 }
 0x1af   :  { %v1581_v3 = vmul.f32 0.25, %v471_v2 }
 0x1b1   :  { %v476_v4 = vrot.slane %v1581_v3, %v1579_v1 }
 0x1b3   :  { %626 = vrot.lane.b32.xlu0 %v476_v4, %s1305_s14  ;;  %548 = vrot.lane.b32.xlu1 %v476_v4, %s1306_s15  ;;  %v477_v7 = vsub.f32 %v1416_v26, %v476_v4  ;;  %v478_v8 = vsub.f32 %v1420_v30, %v476_v4  ;;  %v479_v9 = vsub.f32 %v1440_v46, %v476_v4 }
 0x1b4   :  { %v480_v10 = vsub.f32 %v1448_v52, %v476_v4  ;;  %v481_v11 = vsub.f32 %v1464_v5, %v476_v4  ;;  %v482_v14 = vsub.f32 %v1472_v12, %v476_v4  ;;  %v483_v15 = vsub.f32 %v1488_v33, %v476_v4 }
 0x1b5   :  { %v484_v16 = vsub.f32 %v1496_v40, %v476_v4  ;;  %v485_v17 = vsub.f32 %v1418_v27, %v476_v4  ;;  %v486_v18 = vsub.f32 %v1422_v31, %v476_v4  ;;  %v487_v19 = vsub.f32 %v1442_v47, %v476_v4 }
 0x1b6   :  { %v488_v20 = vsub.f32 %v1450_v53, %v476_v4  ;;  %v489_v21 = vsub.f32 %v1466_v6, %v476_v4  ;;  %v490_v22 = vsub.f32 %v1474_v13, %v476_v4  ;;  %v491_v23 = vsub.f32 %v1490_v34, %v476_v4 }
 0x1b7   :  { %704 = vrot.lane.b32.xlu1 %v476_v4, %s1307_s16  ;;  %v492_v24 = vsub.f32 %v1498_v41, %v476_v4  ;;  %v493_v25 = vmul.f32 %v477_v7, %v477_v7  ;;  %v494_v28 = vmul.f32 %v478_v8, %v478_v8  ;;  %v495_v29 = vmul.f32 %v479_v9, %v479_v9 }
 0x1b8   :  { %v496_v32 = vmul.f32 %v480_v10, %v480_v10  ;;  %v497_v38 = vmul.f32 %v481_v11, %v481_v11  ;;  %v498_v43 = vmul.f32 %v482_v14, %v482_v14  ;;  %v499_v48 = vmul.f32 %v483_v15, %v483_v15 }
 0x1b9   :  { %v509_v35 = vsel %vm2277_vm4, %v493_v25, 0.0  ;;  %v510_v36 = vsel %vm2277_vm4, %v494_v28, 0.0  ;;  %v512_v39 = vsel %vm2277_vm4, %v495_v29, 0.0  ;;  %v500_v51 = vmul.f32 %v484_v16, %v484_v16 }
 0x1ba   :  { %v511_v37 = vadd.f32 %v510_v36, %v509_v35  ;;  %v514_v44 = vsel %vm2277_vm4, %v496_v32, 0.0  ;;  %v516_v49 = vsel %vm2277_vm4, %v497_v38, 0.0  ;;  %v518_v54 = vsel %vm2277_vm4, %v498_v43, 0.0 }
 0x1bb   :  { %v501_v56 = vmul.f32 %v485_v17, %v485_v17  ;;  %v520_v57 = vsel %vm2277_vm4, %v499_v48, 0.0  ;;  %v502_v59 = vmul.f32 %v486_v18, %v486_v18  ;;  %v522_v60 = vsel %vm2277_vm4, %v500_v51, 0.0 }
 0x1bc   :  { %v513_v42 = vadd.f32 %v512_v39, %v511_v37  ;;  %v503_v62 = vmul.f32 %v487_v19, %v487_v19  ;;  %v504_v2 = vmul.f32 %v488_v20, %v488_v20  ;;  %v505_v8 = vmul.f32 %v489_v21, %v489_v21 }
 0x1bd   :  { %v524_v63 = vsel %vm2277_vm4, %v501_v56, 0.0  ;;  %v526_v4 = vsel %vm2277_vm4, %v502_v59, 0.0  ;;  %v506_v11 = vmul.f32 %v490_v22, %v490_v22  ;;  %v507_v16 = vmul.f32 %v491_v23, %v491_v23 }
 0x1be   :  { %v515_v45 = vadd.f32 %v514_v44, %v513_v42  ;;  %v528_v9 = vsel %vm2277_vm4, %v503_v62, 0.0  ;;  %v530_v14 = vsel %vm2277_vm4, %v504_v2, 0.0  ;;  %v532_v17 = vsel %vm2277_vm4, %v505_v8, 0.0 }
 0x1bf   :  { %v508_v19 = vmul.f32 %v492_v24, %v492_v24  ;;  %v534_v25 = vsel %vm2277_vm4, %v506_v11, 0.0  ;;  %v536_v20 = vsel %vm2277_vm4, %v507_v16, 0.0 }
 0x1c0   :  { %v517_v50 = vadd.f32 %v516_v49, %v515_v45 }
 0x1c1   :  { %v538_v21 = vsel %vm2277_vm4, %v508_v19, 0.0 }
 0x1c2   :  { %v519_v55 = vadd.f32 %v518_v54, %v517_v50 }
 0x1c4   :  { %v521_v58 = vadd.f32 %v520_v57, %v519_v55 }
 0x1c6   :  { %v523_v61 = vadd.f32 %v522_v60, %v521_v58 }
 0x1c8   :  { %v525_v0 = vadd.f32 %v524_v63, %v523_v61 }
 0x1ca   :  { %v527_v7 = vadd.f32 %v526_v4, %v525_v0 }
 0x1cc   :  { %v529_v10 = vadd.f32 %v528_v9, %v527_v7 }
 0x1ce   :  { %v531_v15 = vadd.f32 %v530_v14, %v529_v10 }
 0x1d0   :  { %v533_v18 = vadd.f32 %v532_v17, %v531_v15 }
 0x1d2   :  { %v535_v28 = vadd.f32 %v534_v25, %v533_v18 }
 0x1d4   :  { %v537_v29 = vadd.f32 %v536_v20, %v535_v28 }
 0x1d6   :  { %v1620_v32 = vadd.f32 %v538_v21, %v537_v29 }
 0x225   :  { %v627_v35 = vpop.permute.xlu0 %626  ;;  %v1630_v50 = vpop.permute.xlu1 %548 }
 0x226   :  { %v629_v22 = vsub.f32 %v1416_v26, %v627_v35  ;;  %v630_v36 = vsub.f32 %v1420_v30, %v627_v35  ;;  %v631_v23 = vsub.f32 %v1440_v46, %v627_v35  ;;  %v632_v37 = vsub.f32 %v1448_v52, %v627_v35 }
 0x227   :  { %v633_v39 = vsub.f32 %v1464_v5, %v627_v35  ;;  %v634_v43 = vsub.f32 %v1472_v12, %v627_v35  ;;  %v635_v51 = vsub.f32 %v1488_v33, %v627_v35  ;;  %v636_v57 = vsub.f32 %v1496_v40, %v627_v35 }
 0x228   :  { %v645_v24 = vmul.f32 %v629_v22, %v629_v22  ;;  %v646_v38 = vmul.f32 %v630_v36, %v630_v36  ;;  %v647_v42 = vmul.f32 %v631_v23, %v631_v23  ;;  %v648_v44 = vmul.f32 %v632_v37, %v632_v37 }
 0x229   :  { %v649_v54 = vmul.f32 %v633_v39, %v633_v39  ;;  %v650_v58 = vmul.f32 %v634_v43, %v634_v43  ;;  %v551_v61 = vsub.f32 %v1416_v26, %v1630_v50  ;;  %v637_v62 = vsub.f32 %v1418_v27, %v627_v35 }
 0x22a   :  { %v661_v45 = vsel %vm2275_vm3, %v645_v24, 0.0  ;;  %v662_v48 = vsel %vm2275_vm3, %v646_v38, 0.0  ;;  %v664_v55 = vsel %vm2275_vm3, %v647_v42, 0.0  ;;  %v666_v59 = vsel %vm2275_vm3, %v648_v44, 0.0 }
 0x22b   :  { %v663_v49 = vadd.f32 %v662_v48, %v661_v45  ;;  %v651_v63 = vmul.f32 %v635_v51, %v635_v51  ;;  %v668_v0 = vsel %vm2275_vm3, %v649_v54, 0.0  ;;  %v552_v2 = vsub.f32 %v1420_v30, %v1630_v50 }
 0x22c   :  { %v638_v4 = vsub.f32 %v1422_v31, %v627_v35  ;;  %v639_v7 = vsub.f32 %v1442_v47, %v627_v35  ;;  %v640_v9 = vsub.f32 %v1450_v53, %v627_v35  ;;  %v652_v10 = vmul.f32 %v636_v57, %v636_v57 }
 0x22d   :  { %v665_v56 = vadd.f32 %v664_v55, %v663_v49  ;;  %v670_v11 = vsel %vm2275_vm3, %v650_v58, 0.0  ;;  %v553_v14 = vsub.f32 %v1440_v46, %v1630_v50  ;;  %v641_v15 = vsub.f32 %v1466_v6, %v627_v35 }
 0x22e   :  { %v642_v16 = vsub.f32 %v1474_v13, %v627_v35  ;;  %v567_v18 = vmul.f32 %v551_v61, %v551_v61  ;;  %v653_v19 = vmul.f32 %v637_v62, %v637_v62  ;;  %v672_v25 = vsel %vm2275_vm3, %v651_v63, 0.0 }
 0x22f   :  { %v667_v60 = vadd.f32 %v666_v59, %v665_v56  ;;  %v554_v28 = vsub.f32 %v1448_v52, %v1630_v50  ;;  %v568_v20 = vmul.f32 %v552_v2, %v552_v2  ;;  %v643_v29 = vsub.f32 %v1490_v34, %v627_v35  ;;  %v1668_v2 = vpop.permute.xlu1 %704 }
 0x230   :  { %v644_v21 = vsub.f32 %v1498_v41, %v627_v35  ;;  %v654_v22 = vmul.f32 %v638_v4, %v638_v4  ;;  %v655_v23 = vmul.f32 %v639_v7, %v639_v7  ;;  %v674_v37 = vsel %vm2275_vm3, %v652_v10, 0.0 }
 0x231   :  { %v669_v8 = vadd.f32 %v668_v0, %v667_v60  ;;  %v555_v24 = vsub.f32 %v1464_v5, %v1630_v50  ;;  %v569_v38 = vmul.f32 %v553_v14, %v553_v14  ;;  %v656_v39 = vmul.f32 %v640_v9, %v640_v9 }
 0x232   :  { %v657_v42 = vmul.f32 %v641_v15, %v641_v15  ;;  %v583_v44 = vsel %vm2276_vm2, %v567_v18, 0.0  ;;  %v676_v45 = vsel %vm2275_vm3, %v653_v19, 0.0  ;;  %v556_v48 = vsub.f32 %v1472_v12, %v1630_v50 }
 0x233   :  { %v671_v17 = vadd.f32 %v670_v11, %v669_v8  ;;  %v570_v35 = vmul.f32 %v554_v28, %v554_v28  ;;  %v584_v49 = vsel %vm2276_vm2, %v568_v20, 0.0  ;;  %v658_v51 = vmul.f32 %v642_v16, %v642_v16 }
 0x234   :  { %v659_v54 = vmul.f32 %v643_v29, %v643_v29  ;;  %v585_v56 = vadd.f32 %v584_v49, %v583_v44  ;;  %v678_v57 = vsel %vm2275_vm3, %v654_v22, 0.0  ;;  %v557_v58 = vsub.f32 %v1488_v33, %v1630_v50 }
 0x235   :  { %v673_v36 = vadd.f32 %v672_v25, %v671_v17  ;;  %v571_v59 = vmul.f32 %v555_v24, %v555_v24  ;;  %v586_v60 = vsel %vm2276_vm2, %v569_v38, 0.0  ;;  %v660_v61 = vmul.f32 %v644_v21, %v644_v21 }
 0x236   :  { %v680_v63 = vsel %vm2275_vm3, %v655_v23, 0.0  ;;  %v587_v0 = vadd.f32 %v586_v60, %v585_v56  ;;  %v682_v4 = vsel %vm2275_vm3, %v656_v39, 0.0  ;;  %v558_v7 = vsub.f32 %v1496_v40, %v1630_v50 }
 0x237   :  { %v675_v43 = vadd.f32 %v674_v37, %v673_v36  ;;  %v572_v8 = vmul.f32 %v556_v48, %v556_v48  ;;  %v588_v9 = vsel %vm2276_vm2, %v570_v35, 0.0  ;;  %v684_v11 = vsel %vm2275_vm3, %v657_v42, 0.0 }
 0x238   :  { %v686_v14 = vsel %vm2275_vm3, %v658_v51, 0.0  ;;  %v589_v15 = vadd.f32 %v588_v9, %v587_v0  ;;  %v688_v16 = vsel %vm2275_vm3, %v659_v54, 0.0  ;;  %v559_v17 = vsub.f32 %v1418_v27, %v1630_v50 }
 0x239   :  { %v677_v55 = vadd.f32 %v676_v45, %v675_v43  ;;  %v573_v18 = vmul.f32 %v557_v58, %v557_v58  ;;  %v590_v19 = vsel %vm2276_vm2, %v571_v59, 0.0  ;;  %v690_v28 = vsel %vm2275_vm3, %v660_v61, 0.0 }
 0x23a   :  { %v591_v20 = vadd.f32 %v590_v19, %v589_v15  ;;  %v707_v29 = vsub.f32 %v1416_v26, %v1668_v2  ;;  %v560_v21 = vsub.f32 %v1422_v31, %v1630_v50  ;;  %v574_v22 = vmul.f32 %v558_v7, %v558_v7 }
 0x23b   :  { %v679_v62 = vadd.f32 %v678_v57, %v677_v55  ;;  %v592_v36 = vsel %vm2276_vm2, %v572_v8, 0.0  ;;  %v708_v23 = vsub.f32 %v1420_v30, %v1668_v2  ;;  %v561_v24 = vsub.f32 %v1442_v47, %v1630_v50 }
 0x23c   :  { %v562_v38 = vsub.f32 %v1450_v53, %v1630_v50  ;;  %v593_v39 = vadd.f32 %v592_v36, %v591_v20  ;;  %v563_v42 = vsub.f32 %v1466_v6, %v1630_v50  ;;  %v575_v43 = vmul.f32 %v559_v17, %v559_v17 }
 0x23d   :  { %v681_v10 = vadd.f32 %v680_v63, %v679_v62  ;;  %v594_v44 = vsel %vm2276_vm2, %v573_v18, 0.0  ;;  %v709_v45 = vsub.f32 %v1440_v46, %v1668_v2  ;;  %v564_v35 = vsub.f32 %v1474_v13, %v1630_v50 }
 0x23e   :  { %v595_v49 = vadd.f32 %v594_v44, %v593_v39  ;;  %v723_v51 = vmul.f32 %v707_v29, %v707_v29  ;;  %v576_v54 = vmul.f32 %v560_v21, %v560_v21  ;;  %v596_v55 = vsel %vm2276_vm2, %v574_v22, 0.0 }
 0x23f   :  { %v683_v25 = vadd.f32 %v682_v4, %v681_v10  ;;  %v710_v56 = vsub.f32 %v1448_v52, %v1668_v2  ;;  %v724_v57 = vmul.f32 %v708_v23, %v708_v23  ;;  %v565_v59 = vsub.f32 %v1490_v34, %v1630_v50 }
 0x240   :  { %v566_v60 = vsub.f32 %v1498_v41, %v1630_v50  ;;  %v597_v61 = vadd.f32 %v596_v55, %v595_v49  ;;  %v577_v62 = vmul.f32 %v561_v24, %v561_v24  ;;  %v598_v63 = vsel %vm2276_vm2, %v575_v43, 0.0 }
 0x241   :  { %v685_v37 = vadd.f32 %v684_v11, %v683_v25  ;;  %v711_v0 = vsub.f32 %v1464_v5, %v1668_v2  ;;  %v725_v4 = vmul.f32 %v709_v45, %v709_v45  ;;  %v578_v8 = vmul.f32 %v562_v38, %v562_v38 }
 0x242   :  { %v599_v9 = vadd.f32 %v598_v63, %v597_v61  ;;  %v739_v10 = vsel %vm2274_vm1, %v723_v51, 0.0  ;;  %v600_v11 = vsel %vm2276_vm2, %v576_v54, 0.0  ;;  %v726_v15 = vmul.f32 %v710_v56, %v710_v56 }
 0x243   :  { %v687_v48 = vadd.f32 %v686_v14, %v685_v37  ;;  %v712_v14 = vsub.f32 %v1472_v12, %v1668_v2  ;;  %v740_v50 = vsel %vm2274_vm1, %v724_v57, 0.0  ;;  %v579_v17 = vmul.f32 %v563_v42, %v563_v42 }
 0x244   :  { %v601_v18 = vadd.f32 %v600_v11, %v599_v9  ;;  %v741_v19 = vadd.f32 %v740_v50, %v739_v10  ;;  %v602_v25 = vsel %vm2276_vm2, %v577_v62, 0.0  ;;  %v727_v20 = vmul.f32 %v711_v0, %v711_v0 }
 0x245   :  { %v689_v58 = vadd.f32 %v688_v16, %v687_v48  ;;  %v742_v29 = vsel %vm2274_vm1, %v725_v4, 0.0  ;;  %v580_v22 = vmul.f32 %v564_v35, %v564_v35  ;;  %v604_v37 = vsel %vm2276_vm2, %v578_v8, 0.0 }
 0x246   :  { %v603_v36 = vadd.f32 %v602_v25, %v601_v18  ;;  %v743_v23 = vadd.f32 %v742_v29, %v741_v19  ;;  %v714_v24 = vsub.f32 %v1496_v40, %v1668_v2  ;;  %v728_v38 = vmul.f32 %v712_v14, %v712_v14 }
 0x247   :  { %v691_v7 = vadd.f32 %v690_v28, %v689_v58  ;;  %v713_v28 = vsub.f32 %v1488_v33, %v1668_v2  ;;  %v744_v39 = vsel %vm2274_vm1, %v726_v15, 0.0  ;;  %v581_v43 = vmul.f32 %v565_v59, %v565_v59 }
 0x248   :  { %v605_v44 = vadd.f32 %v604_v37, %v603_v36  ;;  %v745_v45 = vadd.f32 %v744_v39, %v743_v23  ;;  %v606_v48 = vsel %vm2276_vm2, %v579_v17, 0.0  ;;  %v715_v49 = vsub.f32 %v1418_v27, %v1668_v2 }
 0x249   :  { %v692_v16 = vrot.slane %v691_v7, 4  ;;  %v729_v35 = vmul.f32 %v713_v28, %v713_v28  ;;  %v746_v51 = vsel %vm2274_vm1, %v727_v20, 0.0  ;;  %v582_v55 = vmul.f32 %v566_v60, %v566_v60 }
 0x24a   :  { %v607_v56 = vadd.f32 %v606_v48, %v605_v44  ;;  %v747_v57 = vadd.f32 %v746_v51, %v745_v45  ;;  %v608_v58 = vsel %vm2276_vm2, %v580_v22, 0.0  ;;  %v716_v61 = vsub.f32 %v1422_v31, %v1668_v2 }
 0x24b   :  { %v693_v21 = vadd.f32 %v692_v16, %v691_v7  ;;  %v730_v59 = vmul.f32 %v714_v24, %v714_v24  ;;  %v748_v62 = vsel %vm2274_vm1, %v728_v38, 0.0  ;;  %v610_v7 = vsel %vm2276_vm2, %v581_v43, 0.0 }
 0x24c   :  { %v609_v0 = vadd.f32 %v608_v58, %v607_v56  ;;  %v749_v4 = vadd.f32 %v748_v62, %v747_v57  ;;  %v717_v8 = vsub.f32 %v1442_v47, %v1668_v2  ;;  %v731_v9 = vmul.f32 %v715_v49, %v715_v49 }
 0x24d   :  { %v694_v42 = vrot.slane %v693_v21, 2  ;;  %v750_v60 = vsel %vm2274_vm1, %v729_v35, 0.0  ;;  %v612_v15 = vsel %vm2276_vm2, %v582_v55, 0.0  ;;  %v718_v50 = vsub.f32 %v1450_v53, %v1668_v2 }
 0x24e   :  { %v611_v11 = vadd.f32 %v610_v7, %v609_v0  ;;  %v751_v14 = vadd.f32 %v750_v60, %v749_v4  ;;  %v732_v16 = vmul.f32 %v716_v61, %v716_v61  ;;  %v752_v17 = vsel %vm2274_vm1, %v730_v59, 0.0 }
 0x24f   :  { %v695_v54 = vadd.f32 %v694_v42, %v693_v21  ;;  %v719_v28 = vsub.f32 %v1466_v6, %v1668_v2  ;;  %v733_v20 = vmul.f32 %v717_v8, %v717_v8  ;;  %v754_v29 = vsel %vm2274_vm1, %v731_v9, 0.0 }
 0x250   :  { %v613_v19 = vadd.f32 %v612_v15, %v611_v11  ;;  %v753_v25 = vadd.f32 %v752_v17, %v751_v14  ;;  %v720_v36 = vsub.f32 %v1474_v13, %v1668_v2  ;;  %v734_v23 = vmul.f32 %v718_v50, %v718_v50 }
 0x251   :  { %v696_v63 = vrot.slane %v695_v54, 1  ;;  %v756_v37 = vsel %vm2274_vm1, %v732_v16, 0.0  ;;  %v721_v39 = vsub.f32 %v1490_v34, %v1668_v2  ;;  %v735_v42 = vmul.f32 %v719_v28, %v719_v28 }
 0x252   :  { %v614_v21 = vrot.slane %v613_v19, 4  ;;  %v755_v22 = vadd.f32 %v754_v29, %v753_v25  ;;  %v758_v43 = vsel %vm2274_vm1, %v733_v20, 0.0  ;;  %v722_v48 = vsub.f32 %v1498_v41, %v1668_v2 }
 0x253   :  { %v697_v10 = vadd.f32 %v696_v63, %v695_v54  ;;  %v736_v49 = vmul.f32 %v720_v36, %v720_v36  ;;  %v760_v35 = vsel %vm2274_vm1, %v734_v23, 0.0  ;;  %v737_v55 = vmul.f32 %v721_v39, %v721_v39  ;;  %v783_v39 = vld [vmem:[%s2271_s2] sm:$0x1] }
 0x254   :  { %v615_v24 = vadd.f32 %v614_v21, %v613_v19  ;;  %v757_v38 = vadd.f32 %v756_v37, %v755_v22  ;;  %v762_v56 = vsel %vm2274_vm1, %v735_v42, 0.0  ;;  %v738_v61 = vmul.f32 %v722_v48, %v722_v48 }
 0x255   :  { %v698_v18 = vmul.f32 0.0078125, %v697_v10  ;;  %v764_v59 = vsel %vm2274_vm1, %v736_v49, 0.0  ;;  %v766_v0 = vsel %vm2274_vm1, %v737_v55, 0.0  ;;  %v540_v16 = vrot.slane %v1620_v32, 4 }
 0x256   :  { %v616_v44 = vrot.slane %v615_v24, 2  ;;  %v759_v45 = vadd.f32 %v758_v43, %v757_v38  ;;  %v768_v2 = vsel %vm2274_vm1, %v738_v61, 0.0  ;;  %v787_v43 = vld [vmem:[%s2272_s3] sm:$0x1]  ;;  %vm2278_vm1 = vcmask 64512  }
 0x257   :  { %700 = vrot.lane.b32.xlu1 %v698_v18, %s1304_s13  ;;  %v541_v17 = vadd.f32 %v540_v16, %v1620_v32  ;;  %vm2279_vm4 = vmmov %vm2278_vm1 }
 0x258   :  { %v617_v51 = vadd.f32 %v616_v44, %v615_v24  ;;  %v761_v54 = vadd.f32 %v760_v35, %v759_v45 }
 0x259   :  { %v542_v18 = vrot.slane %v541_v17, 2 }
 0x25a   :  { %v618_v57 = vrot.slane %v617_v51, 1  ;;  %v763_v58 = vadd.f32 %v762_v56, %v761_v54 }
 0x25b   :  { %v543_v19 = vadd.f32 %v542_v18, %v541_v17 }
 0x25c   :  { %v619_v62 = vadd.f32 %v618_v57, %v617_v51  ;;  %v765_v63 = vadd.f32 %v764_v59, %v763_v58 }
 0x25d   :  { %v544_v25 = vrot.slane %v543_v19, 1 }
 0x25e   :  { %v620_v4 = vmul.f32 0.0078125, %v619_v62  ;;  %v767_v7 = vadd.f32 %v766_v0, %v765_v63 }
 0x25f   :  { %v545_v28 = vadd.f32 %v544_v25, %v543_v19 }
 0x260   :  { %622 = vrot.lane.b32.xlu0 %v620_v4, %s1303_s12  ;;  %v769_v8 = vadd.f32 %v768_v2, %v767_v7 }
 0x261   :  { %v546_v29 = vmul.f32 0.0078125, %v545_v28 }
 0x262   :  { %v770_v9 = vrot.slane %v769_v8, 4 }
 0x264   :  { %v771_v60 = vadd.f32 %v770_v9, %v769_v8 }
 0x266   :  { %v772_v10 = vrot.slane %v771_v60, 2 }
 0x268   :  { %v773_v11 = vadd.f32 %v772_v10, %v771_v60 }
 0x26a   :  { %v774_v14 = vrot.slane %v773_v11, 1 }
 0x26c   :  { %v775_v15 = vadd.f32 %v774_v14, %v773_v11 }
 0x26e   :  { %v776_v50 = vmul.f32 0.0078125, %v775_v15 }
 0x270   :  { %778 = vrot.lane.b32.xlu0 %v776_v50, %s1302_s0 }
 0x2c9   :  { %v701_v22 = vpop.permute.xlu1 %700 }
 0x2d2   :  { %v623_v20 = vpop.permute.xlu0 %622 }
 0x2d3   :  { %v625_v21 = vadd.f32 %v623_v20, %v546_v29 }
 0x2d5   :  { %v703_v36 = vadd.f32 %v701_v22, %v625_v21 }
 0x2e2   :  { %v779_v23 = vpop.permute.xlu0 %778 }
 0x2e3   :  { %v781_v37 = vadd.f32 %v779_v23, %v703_v36 }
 0x2e5   :  { %v782_v24 = vmul.f32 0.25, %v781_v37 }
 0x2e7   :  { %v784_v38 = vadd.f32 1e-05, %v782_v24 }
 0x2e9   :  { %1299 = vrsqrt.f32 %v784_v38 }
 0x2f3   :  { %v1300_v42 = vpop.eup %1299 }
 0x2f4   :  { %v786_v32 = vmul.f32 %v1300_v42, %v783_v39 }
 0x2f6   :  { %v788_v44 = vmul.f32 %v786_v32, %v1581_v3  ;;  %v794_v45 = vrot.slane %v786_v32, %v1579_v1 }
 0x2f8   :  { %v789_v48 = vsub.f32 %v787_v43, %v788_v44  ;;  %1000 = vrot.lane.b32.xlu0 %v794_v45, %s1305_s14  ;;  %898 = vrot.lane.b32.xlu1 %v794_v45, %s1306_s15  ;;  %v796_v49 = vmul.f32 %v794_v45, %v1416_v26  ;;  %v797_v35 = vmul.f32 %v794_v45, %v1420_v30 }
 0x2f9   :  { %v798_v51 = vmul.f32 %v794_v45, %v1440_v46  ;;  %v799_v54 = vmul.f32 %v794_v45, %v1448_v52  ;;  %v800_v55 = vmul.f32 %v794_v45, %v1464_v5  ;;  %v801_v56 = vmul.f32 %v794_v45, %v1472_v12 }
 0x2fa   :  { %v816_v3 = vrot.slane %v789_v48, %v1579_v1  ;;  %v802_v57 = vmul.f32 %v794_v45, %v1488_v33  ;;  %v803_v58 = vmul.f32 %v794_v45, %v1496_v40  ;;  %v804_v61 = vmul.f32 %v794_v45, %v1418_v27 }
 0x2fb   :  { %v805_v59 = vmul.f32 %v794_v45, %v1422_v31  ;;  %v806_v62 = vmul.f32 %v794_v45, %v1442_v47  ;;  %v807_v63 = vmul.f32 %v794_v45, %v1450_v53  ;;  %v808_v0 = vmul.f32 %v794_v45, %v1466_v6 }
 0x2fc   :  { %1102 = vrot.lane.b32.xlu0 %v794_v45, %s1307_s16  ;;  %917 = vrot.lane.b32.xlu1 %v816_v3, %s1306_s15  ;;  %v809_v1 = vmul.f32 %v794_v45, %v1474_v13  ;;  %v810_v4 = vmul.f32 %v794_v45, %v1490_v34  ;;  %v811_v7 = vmul.f32 %v794_v45, %v1498_v41 }
 0x2fd   :  { %v818_v2 = vadd.f32 %v816_v3, %v796_v49  ;;  %v819_v8 = vadd.f32 %v816_v3, %v797_v35  ;;  %v820_v9 = vadd.f32 %v816_v3, %v798_v51  ;;  %v821_v60 = vadd.f32 %v816_v3, %v799_v54 }
 0x2fe   :  { %v822_v10 = vadd.f32 %v816_v3, %v800_v55  ;;  %v823_v11 = vadd.f32 %v816_v3, %v801_v56  ;;  %v824_v14 = vadd.f32 %v816_v3, %v802_v57  ;;  %v825_v15 = vadd.f32 %v816_v3, %v803_v58 }
 0x2ff   :  { %v826_v50 = vadd.f32 %v816_v3, %v804_v61  ;;  %v827_v16 = vadd.f32 %v816_v3, %v805_v59  ;;  %v828_v17 = vadd.f32 %v816_v3, %v806_v62  ;;  %v829_v18 = vadd.f32 %v816_v3, %v807_v63 }
 0x300   :  { %1121 = vrot.lane.b32.xlu0 %v816_v3, %s1307_s16  ;;  %1019 = vrot.lane.b32.xlu1 %v816_v3, %s1305_s14  ;;  %v830_v19 = vadd.f32 %v816_v3, %v808_v0  ;;  %v831_v25 = vadd.f32 %v816_v3, %v809_v1  ;;  %v832_v28 = vadd.f32 %v816_v3, %v810_v4  ;;  %vm834_vm5 = vcmp.ge.f32.partialorder %v818_v2, 0.0 }
 0x301   :  { %v833_v20 = vadd.f32 %v816_v3, %v811_v7  ;;  %vm835_vm6 = vcmp.ge.f32.partialorder %v819_v8, 0.0  ;;  %vm836_vm7 = vcmp.ge.f32.partialorder %v820_v9, 0.0  ;;  %vm837_vm8 = vcmp.ge.f32.partialorder %v821_v60, 0.0 }
 0x302   :  { %vm838_vm9 = vcmp.ge.f32.partialorder %v822_v10, 0.0  ;;  %vm839_vm10 = vcmp.ge.f32.partialorder %v823_v11, 0.0  ;;  %vm840_vm11 = vcmp.ge.f32.partialorder %v824_v14, 0.0  ;;  %vm841_vm12 = vcmp.ge.f32.partialorder %v825_v15, 0.0 }
 0x303   :  { %vm842_vm13 = vcmp.ge.f32.partialorder %v826_v50, 0.0  ;;  %vm843_vm14 = vcmp.ge.f32.partialorder %v827_v16, 0.0  ;;  %vm844_vm15 = vcmp.ge.f32.partialorder %v828_v17, 0.0  ;;  %vm845_vm0 = vcmp.ge.f32.partialorder %v829_v18, 0.0 }
 0x304   :  { %vm847_vm3 = vcmp.ge.f32.partialorder %v831_v25, 0.0  ;;  %vm848_vm2 = vcmp.ge.f32.partialorder %v832_v28, 0.0  ;;  %v850_v29 = vmul.f32 0.01, %v818_v2  ;;  %v851_v21 = vmul.f32 0.01, %v819_v8 }
 0x305   :  { %v852_v22 = vmul.f32 0.01, %v820_v9  ;;  %v853_v36 = vmul.f32 0.01, %v821_v60  ;;  %v854_v23 = vmul.f32 0.01, %v822_v10 }
 0x306   :  { %v855_v37 = vmul.f32 0.01, %v823_v11  ;;  %v856_v24 = vmul.f32 0.01, %v824_v14  ;;  %v857_v38 = vmul.f32 0.01, %v825_v15  ;;  %v866_v42 = vsel %vm834_vm5, %v818_v2, %v850_v29  ;;  %vm2280_vm5 = vmmov %vm2278_vm1 }
 0x307   :  { %v858_v39 = vmul.f32 0.01, %v826_v50  ;;  %v859_v32 = vmul.f32 0.01, %v827_v16  ;;  %v860_v43 = vmul.f32 0.01, %v828_v17  ;;  %v867_v45 = vsel %vm835_vm6, %v819_v8, %v851_v21  ;;  %vm2282_vm6 = vmmov %vm2278_vm1 }
 0x308   :  { %v861_v44 = vmul.f32 0.01, %v829_v18  ;;  %882 = vst.msk [vmem:[%s2273_s4] sm:$0xff] %vm2278_vm1, %v866_v42  ;;  %v862_v48 = vmul.f32 0.01, %v830_v19  ;;  %v868_v51 = vsel %vm836_vm7, %v820_v9, %v852_v22  ;;  %v869_v55 = vsel %vm837_vm8, %v821_v60, %v853_v36  ;;  %vm2284_vm8 = vmmov %vm2278_vm1 }
 0x309   :  { %v863_v49 = vmul.f32 0.01, %v831_v25  ;;  %v864_v35 = vmul.f32 0.01, %v832_v28  ;;  %883 = vst.msk [vmem:[%s2273_s4 + $0x8] sm:$0xff] %vm2279_vm4, %v867_v45  ;;  %v870_v56 = vsel %vm838_vm9, %v822_v10, %v854_v23  ;;  %v871_v3 = vsel %vm839_vm10, %v823_v11, %v855_v37  ;;  %vm2281_vm4 = vmmov %vm2278_vm1 }
 0x30a   :  { %v865_v54 = vmul.f32 0.01, %v833_v20  ;;  %884 = vst.msk [vmem:[%s2273_s4 + $0x10] sm:$0xff] %vm2280_vm5, %v868_v51  ;;  %v872_v57 = vsel %vm840_vm11, %v824_v14, %v856_v24  ;;  %v873_v58 = vsel %vm841_vm12, %v825_v15, %v857_v38  ;;  %v874_v61 = vsel %vm842_vm13, %v826_v50, %v858_v39  ;;  %vm2285_vm9 = vmmov %vm2278_vm1 }
 0x30b   :  { %v875_v59 = vsel %vm843_vm14, %v827_v16, %v859_v32  ;;  %885 = vst.msk [vmem:[%s2273_s4 + $0x18] sm:$0xff] %vm2278_vm1, %v869_v55  ;;  %v876_v62 = vsel %vm844_vm15, %v828_v17, %v860_v43  ;;  %v877_v63 = vsel %vm845_vm0, %v829_v18, %v861_v44  ;;  %vm2283_vm7 = vcmp.ge.f32.partialorder %v830_v19, 0.0  ;;  %vm2286_vm10 = vmmov %vm2278_vm1 }
 0x30c   :  { %886 = vst.msk [vmem:[%s2273_s4 + $0x20] sm:$0xff] %vm2281_vm4, %v870_v56  ;;  %v878_v0 = vsel %vm2283_vm7, %v830_v19, %v862_v48  ;;  %v879_v1 = vsel %vm847_vm3, %v831_v25, %v863_v49  ;;  %vm2287_vm11 = vmmov %vm2278_vm1  ;;  %v880_v4 = vsel %vm848_vm2, %v832_v28, %v864_v35  ;;  %vm2288_vm3 = vcmp.ge.f32.partialorder %v833_v20, 0.0 }
 0x30d   :  { %887 = vst.msk [vmem:[%s2273_s4 + $0x28] sm:$0xff] %vm2282_vm6, %v871_v3  ;;  %v881_v7 = vsel %vm2288_vm3, %v833_v20, %v865_v54  ;;  %vm2289_vm12 = vmmov %vm2278_vm1 }
 0x30e   :  { %888 = vst.msk [vmem:[%s2273_s4 + $0x30] sm:$0xff] %vm2284_vm8, %v872_v57  ;;  %vm2290_vm13 = vmmov %vm2278_vm1 }
 0x30f   :  { %889 = vst.msk [vmem:[%s2273_s4 + $0x38] sm:$0xff] %vm2285_vm9, %v873_v58  ;;  %vm2291_vm14 = vmmov %vm2278_vm1 }
 0x310   :  { %890 = vst.msk [vmem:[%s2273_s4 + $0x40] sm:$0xff] %vm2286_vm10, %v874_v61  ;;  %vm2292_vm15 = vmmov %vm2278_vm1 }
 0x311   :  { %891 = vst.msk [vmem:[%s2273_s4 + $0x48] sm:$0xff] %vm2287_vm11, %v875_v59  ;;  %vm2293_vm2 = vmmov %vm2278_vm1 }
 0x312   :  { %892 = vst.msk [vmem:[%s2273_s4 + $0x50] sm:$0xff] %vm2289_vm12, %v876_v62  ;;  %vm2294_vm0 = vmmov %vm2278_vm1 }
 0x313   :  { %893 = vst.msk [vmem:[%s2273_s4 + $0x58] sm:$0xff] %vm2290_vm13, %v877_v63 }
 0x314   :  { %894 = vst.msk [vmem:[%s2273_s4 + $0x60] sm:$0xff] %vm2291_vm14, %v878_v0 }
 0x315   :  { %895 = vst.msk [vmem:[%s2273_s4 + $0x68] sm:$0xff] %vm2292_vm15, %v879_v1 }
 0x316   :  { %896 = vst.msk [vmem:[%s2273_s4 + $0x70] sm:$0xff] %vm2293_vm2, %v880_v4  ;;  %vm2295_vm2 = vcmask 130112  }
 0x317   :  { %897 = vst.msk [vmem:[%s2273_s4 + $0x78] sm:$0xff] %vm2294_vm0, %v881_v7  ;;  %vm2296_vm0 = vmmov %vm2295_vm2 }
 0x36a   :  { %v899_v2 = vpop.permute.xlu1 %898  ;;  %v1886_v54 = vpop.permute.xlu0 %1000 }
 0x36b   :  { %v901_v8 = vmul.f32 %v899_v2, %v1416_v26  ;;  %v902_v9 = vmul.f32 %v899_v2, %v1420_v30  ;;  %v903_v60 = vmul.f32 %v899_v2, %v1440_v46  ;;  %v904_v10 = vmul.f32 %v899_v2, %v1448_v52 }
 0x36c   :  { %v905_v11 = vmul.f32 %v899_v2, %v1464_v5  ;;  %v906_v14 = vmul.f32 %v899_v2, %v1472_v12  ;;  %v907_v15 = vmul.f32 %v899_v2, %v1488_v33  ;;  %v908_v50 = vmul.f32 %v899_v2, %v1496_v40 }
 0x36d   :  { %v909_v16 = vmul.f32 %v899_v2, %v1418_v27  ;;  %v910_v17 = vmul.f32 %v899_v2, %v1422_v31  ;;  %v911_v18 = vmul.f32 %v899_v2, %v1442_v47  ;;  %v912_v19 = vmul.f32 %v899_v2, %v1450_v53 }
 0x36e   :  { %v913_v25 = vmul.f32 %v899_v2, %v1466_v6  ;;  %v914_v28 = vmul.f32 %v899_v2, %v1474_v13  ;;  %v915_v20 = vmul.f32 %v899_v2, %v1490_v34  ;;  %v916_v29 = vmul.f32 %v899_v2, %v1498_v41  ;;  %v918_v21 = vpop.permute.xlu1 %917  ;;  %v1889_v1 = vpop.permute.xlu0 %1102 }
 0x36f   :  { %v920_v22 = vadd.f32 %v918_v21, %v901_v8  ;;  %v921_v36 = vadd.f32 %v918_v21, %v902_v9  ;;  %v922_v23 = vadd.f32 %v918_v21, %v903_v60  ;;  %v923_v37 = vadd.f32 %v918_v21, %v904_v10 }
 0x370   :  { %v924_v24 = vadd.f32 %v918_v21, %v905_v11  ;;  %v925_v38 = vadd.f32 %v918_v21, %v906_v14  ;;  %v926_v39 = vadd.f32 %v918_v21, %v907_v15  ;;  %v927_v42 = vadd.f32 %v918_v21, %v908_v50 }
 0x371   :  { %v928_v32 = vadd.f32 %v918_v21, %v909_v16  ;;  %v929_v43 = vadd.f32 %v918_v21, %v910_v17  ;;  %v930_v44 = vadd.f32 %v918_v21, %v911_v18  ;;  %v931_v45 = vadd.f32 %v918_v21, %v912_v19 }
 0x372   :  { %v932_v48 = vadd.f32 %v918_v21, %v913_v25  ;;  %v933_v49 = vadd.f32 %v918_v21, %v914_v28  ;;  %v934_v35 = vadd.f32 %v918_v21, %v915_v20  ;;  %v935_v51 = vadd.f32 %v918_v21, %v916_v29 }
 0x373   :  { %vm936_vm5 = vcmp.ge.f32.partialorder %v920_v22, 0.0  ;;  %vm937_vm1 = vcmp.ge.f32.partialorder %v921_v36, 0.0  ;;  %vm938_vm4 = vcmp.ge.f32.partialorder %v922_v23, 0.0  ;;  %vm939_vm6 = vcmp.ge.f32.partialorder %v923_v37, 0.0 }
 0x374   :  { %vm940_vm7 = vcmp.ge.f32.partialorder %v924_v24, 0.0  ;;  %vm941_vm8 = vcmp.ge.f32.partialorder %v925_v38, 0.0  ;;  %vm942_vm9 = vcmp.ge.f32.partialorder %v926_v39, 0.0  ;;  %vm943_vm10 = vcmp.ge.f32.partialorder %v927_v42, 0.0 }
 0x375   :  { %vm944_vm11 = vcmp.ge.f32.partialorder %v928_v32, 0.0  ;;  %vm945_vm3 = vcmp.ge.f32.partialorder %v929_v43, 0.0  ;;  %vm946_vm12 = vcmp.ge.f32.partialorder %v930_v44, 0.0  ;;  %vm947_vm13 = vcmp.ge.f32.partialorder %v931_v45, 0.0 }
 0x376   :  { %vm948_vm14 = vcmp.ge.f32.partialorder %v932_v48, 0.0  ;;  %vm949_vm15 = vcmp.ge.f32.partialorder %v933_v49, 0.0  ;;  %v952_v55 = vmul.f32 0.01, %v920_v22  ;;  %v953_v56 = vmul.f32 0.01, %v921_v36 }
 0x377   :  { %v954_v3 = vmul.f32 0.01, %v922_v23  ;;  %v955_v57 = vmul.f32 0.01, %v923_v37  ;;  %v956_v58 = vmul.f32 0.01, %v924_v24 }
 0x378   :  { %v957_v61 = vmul.f32 0.01, %v925_v38  ;;  %v958_v59 = vmul.f32 0.01, %v926_v39  ;;  %v959_v62 = vmul.f32 0.01, %v927_v42  ;;  %v968_v0 = vsel %vm936_vm5, %v920_v22, %v952_v55  ;;  %vm2297_vm5 = vmmov %vm2296_vm0 }
 0x379   :  { %v960_v63 = vmul.f32 0.01, %v928_v32  ;;  %v961_v4 = vmul.f32 0.01, %v929_v43  ;;  %v962_v7 = vmul.f32 0.01, %v930_v44  ;;  %v969_v8 = vsel %vm937_vm1, %v921_v36, %v953_v56  ;;  %vm2298_vm1 = vmmov %vm2296_vm0 }
 0x37a   :  { %v963_v2 = vmul.f32 0.01, %v931_v45  ;;  %984 = vst.msk [vmem:[%s2273_s4] sm:$0xff] %vm2295_vm2, %v968_v0  ;;  %v964_v9 = vmul.f32 0.01, %v932_v48  ;;  %v970_v11 = vsel %vm938_vm4, %v922_v23, %v954_v3  ;;  %v971_v15 = vsel %vm939_vm6, %v923_v37, %v955_v57  ;;  %vm2299_vm4 = vmmov %vm2296_vm0 }
 0x37b   :  { %v965_v60 = vmul.f32 0.01, %v933_v49  ;;  %v966_v10 = vmul.f32 0.01, %v934_v35  ;;  %985 = vst.msk [vmem:[%s2273_s4 + $0x8] sm:$0xff] %vm2296_vm0, %v969_v8  ;;  %v972_v50 = vsel %vm940_vm7, %v924_v24, %v956_v58  ;;  %v973_v16 = vsel %vm941_vm8, %v925_v38, %v957_v61  ;;  %vm2300_vm6 = vmmov %vm2296_vm0 }
 0x37c   :  { %v967_v14 = vmul.f32 0.01, %v935_v51  ;;  %986 = vst.msk [vmem:[%s2273_s4 + $0x10] sm:$0xff] %vm2297_vm5, %v970_v11  ;;  %v974_v17 = vsel %vm942_vm9, %v926_v39, %v958_v59  ;;  %v975_v18 = vsel %vm943_vm10, %v927_v42, %v959_v62  ;;  %v976_v19 = vsel %vm944_vm11, %v928_v32, %v960_v63  ;;  %vm2301_vm7 = vmmov %vm2296_vm0  ;;  %v1122_v39 = vpop.permute.xlu0 %1121 }
 0x37d   :  { %v977_v25 = vsel %vm945_vm3, %v929_v43, %v961_v4  ;;  %987 = vst.msk [vmem:[%s2273_s4 + $0x18] sm:$0xff] %vm2298_vm1, %v971_v15  ;;  %v978_v28 = vsel %vm946_vm12, %v930_v44, %v962_v7  ;;  %v979_v20 = vsel %vm947_vm13, %v931_v45, %v963_v2  ;;  %v980_v29 = vsel %vm948_vm14, %v932_v48, %v964_v9  ;;  %vm2302_vm8 = vmmov %vm2296_vm0 }
 0x37e   :  { %988 = vst.msk [vmem:[%s2273_s4 + $0x20] sm:$0xff] %vm2299_vm4, %v972_v50  ;;  %v981_v21 = vsel %vm949_vm15, %v933_v49, %v965_v60  ;;  %vm2303_vm9 = vmmov %vm2296_vm0  ;;  %vm2305_vm11 = vcmp.ge.f32.partialorder %v934_v35, 0.0  ;;  %vm2306_vm3 = vcmp.ge.f32.partialorder %v935_v51, 0.0  ;;  %v1105_v23 = vmul.f32 %v1889_v1, %v1416_v26 }
 0x37f   :  { %989 = vst.msk [vmem:[%s2273_s4 + $0x28] sm:$0xff] %vm2300_vm6, %v973_v16  ;;  %vm2304_vm10 = vmmov %vm2296_vm0  ;;  %v982_v22 = vsel %vm2305_vm11, %v934_v35, %v966_v10  ;;  %v983_v36 = vsel %vm2306_vm3, %v935_v51, %v967_v14  ;;  %v1106_v37 = vmul.f32 %v1889_v1, %v1420_v30  ;;  %v1107_v24 = vmul.f32 %v1889_v1, %v1440_v46 }
 0x380   :  { %990 = vst.msk [vmem:[%s2273_s4 + $0x30] sm:$0xff] %vm2301_vm7, %v974_v17  ;;  %vm2307_vm12 = vmmov %vm2296_vm0  ;;  %v1108_v38 = vmul.f32 %v1889_v1, %v1448_v52  ;;  %v1109_v42 = vmul.f32 %v1889_v1, %v1464_v5  ;;  %v1110_v32 = vmul.f32 %v1889_v1, %v1472_v12  ;;  %v1111_v43 = vmul.f32 %v1889_v1, %v1488_v33 }
 0x381   :  { %991 = vst.msk [vmem:[%s2273_s4 + $0x38] sm:$0xff] %vm2302_vm8, %v975_v18  ;;  %vm2308_vm13 = vmmov %vm2296_vm0  ;;  %v1112_v44 = vmul.f32 %v1889_v1, %v1496_v40  ;;  %v1113_v45 = vmul.f32 %v1889_v1, %v1418_v27  ;;  %v1114_v48 = vmul.f32 %v1889_v1, %v1422_v31  ;;  %v1115_v49 = vmul.f32 %v1889_v1, %v1442_v47 }
 0x382   :  { %992 = vst.msk [vmem:[%s2273_s4 + $0x40] sm:$0xff] %vm2303_vm9, %v976_v19  ;;  %vm2309_vm14 = vmmov %vm2296_vm0  ;;  %v1116_v35 = vmul.f32 %v1889_v1, %v1450_v53  ;;  %v1117_v51 = vmul.f32 %v1889_v1, %v1466_v6  ;;  %v1118_v55 = vmul.f32 %v1889_v1, %v1474_v13  ;;  %v1124_v56 = vadd.f32 %v1122_v39, %v1105_v23 }
 0x383   :  { %993 = vst.msk [vmem:[%s2273_s4 + $0x48] sm:$0xff] %vm2304_vm10, %v977_v25  ;;  %vm2310_vm15 = vmmov %vm2296_vm0  ;;  %v1125_v3 = vadd.f32 %v1122_v39, %v1106_v37  ;;  %v1126_v57 = vadd.f32 %v1122_v39, %v1107_v24  ;;  %v1127_v58 = vadd.f32 %v1122_v39, %v1108_v38  ;;  %v1128_v61 = vadd.f32 %v1122_v39, %v1109_v42 }
 0x384   :  { %994 = vst.msk [vmem:[%s2273_s4 + $0x50] sm:$0xff] %vm2307_vm12, %v978_v28  ;;  %vm2311_vm2 = vmmov %vm2296_vm0  ;;  %v1129_v59 = vadd.f32 %v1122_v39, %v1110_v32  ;;  %v1130_v62 = vadd.f32 %v1122_v39, %v1111_v43  ;;  %v1131_v63 = vadd.f32 %v1122_v39, %v1112_v44  ;;  %v1132_v0 = vadd.f32 %v1122_v39, %v1113_v45 }
 0x385   :  { %995 = vst.msk [vmem:[%s2273_s4 + $0x58] sm:$0xff] %vm2308_vm13, %v979_v20  ;;  %v1133_v4 = vadd.f32 %v1122_v39, %v1114_v48  ;;  %v1134_v7 = vadd.f32 %v1122_v39, %v1115_v49  ;;  %v1135_v2 = vadd.f32 %v1122_v39, %v1116_v35  ;;  %v1136_v8 = vadd.f32 %v1122_v39, %v1117_v51 }
 0x386   :  { %996 = vst.msk [vmem:[%s2273_s4 + $0x60] sm:$0xff] %vm2309_vm14, %v980_v29  ;;  %v1137_v9 = vadd.f32 %v1122_v39, %v1118_v55  ;;  %v1119_v60 = vmul.f32 %v1889_v1, %v1490_v34  ;;  %v1120_v10 = vmul.f32 %v1889_v1, %v1498_v41  ;;  %vm1140_vm5 = vcmp.ge.f32.partialorder %v1124_v56, 0.0 }
 0x387   :  { %997 = vst.msk [vmem:[%s2273_s4 + $0x68] sm:$0xff] %vm2310_vm15, %v981_v21  ;;  %vm1141_vm1 = vcmp.ge.f32.partialorder %v1125_v3, 0.0  ;;  %vm1142_vm4 = vcmp.ge.f32.partialorder %v1126_v57, 0.0  ;;  %vm1143_vm6 = vcmp.ge.f32.partialorder %v1127_v58, 0.0  ;;  %vm1144_vm7 = vcmp.ge.f32.partialorder %v1128_v61, 0.0 }
 0x388   :  { %998 = vst.msk [vmem:[%s2273_s4 + $0x70] sm:$0xff] %vm2311_vm2, %v982_v22  ;;  %vm1145_vm8 = vcmp.ge.f32.partialorder %v1129_v59, 0.0  ;;  %vm1146_vm9 = vcmp.ge.f32.partialorder %v1130_v62, 0.0  ;;  %vm1147_vm10 = vcmp.ge.f32.partialorder %v1131_v63, 0.0  ;;  %vm1148_vm11 = vcmp.ge.f32.partialorder %v1132_v0, 0.0 }
 0x389   :  { %999 = vst.msk [vmem:[%s2273_s4 + $0x78] sm:$0xff] %vm2296_vm0, %v983_v36  ;;  %vm1149_vm3 = vcmp.ge.f32.partialorder %v1133_v4, 0.0  ;;  %vm1150_vm12 = vcmp.ge.f32.partialorder %v1134_v7, 0.0  ;;  %vm1151_vm13 = vcmp.ge.f32.partialorder %v1135_v2, 0.0  ;;  %vm1152_vm14 = vcmp.ge.f32.partialorder %v1136_v8, 0.0 }
 0x38a   :  { %vm1153_vm15 = vcmp.ge.f32.partialorder %v1137_v9, 0.0  ;;  %v2002_v11 = vadd.f32 %v1122_v39, %v1119_v60  ;;  %v1156_v14 = vmul.f32 0.01, %v1124_v56  ;;  %v1157_v15 = vmul.f32 0.01, %v1125_v3 }
 0x38b   :  { %v1158_v50 = vmul.f32 0.01, %v1126_v57  ;;  %v2004_v1 = vadd.f32 %v1122_v39, %v1120_v10  ;;  %v1159_v16 = vmul.f32 0.01, %v1127_v58  ;;  %v1160_v17 = vmul.f32 0.01, %v1128_v61 }
 0x38c   :  { %v1161_v18 = vmul.f32 0.01, %v1129_v59  ;;  %v1162_v19 = vmul.f32 0.01, %v1130_v62  ;;  %v1163_v25 = vmul.f32 0.01, %v1131_v63  ;;  %v1003_v20 = vmul.f32 %v1886_v54, %v1416_v26 }
 0x38d   :  { %v1164_v28 = vmul.f32 0.01, %v1132_v0  ;;  %v1165_v29 = vmul.f32 0.01, %v1133_v4  ;;  %v1166_v21 = vmul.f32 0.01, %v1134_v7  ;;  %v1004_v36 = vmul.f32 %v1886_v54, %v1420_v30 }
 0x38e   :  { %v1167_v22 = vmul.f32 0.01, %v1135_v2  ;;  %v1168_v23 = vmul.f32 0.01, %v1136_v8  ;;  %v1169_v37 = vmul.f32 0.01, %v1137_v9  ;;  %v2011_v24 = vsel %vm1140_vm5, %v1124_v56, %v1156_v14 }
 0x38f   :  { %v2014_v38 = vsel %vm1141_vm1, %v1125_v3, %v1157_v15  ;;  %v2017_v39 = vmul.f32 0.01, %v2002_v11  ;;  %v2020_v42 = vmul.f32 0.01, %v2004_v1  ;;  %v2023_v26 = vsel %vm1142_vm4, %v1126_v57, %v1158_v50 }
 0x390   :  { %v2026_v32 = vsel %vm1143_vm6, %v1127_v58, %v1159_v16  ;;  %v2029_v30 = vsel %vm1144_vm7, %v1128_v61, %v1160_v17  ;;  %v2032_v43 = vsel %vm1145_vm8, %v1129_v59, %v1161_v18  ;;  %v2035_v44 = vsel %vm1146_vm9, %v1130_v62, %v1162_v19 }
 0x391   :  { %v2038_v45 = vsel %vm1147_vm10, %v1131_v63, %v1163_v25  ;;  %v2041_v48 = vsel %vm1148_vm11, %v1132_v0, %v1164_v28  ;;  %v2044_v49 = vsel %vm1149_vm3, %v1133_v4, %v1165_v29  ;;  %v2047_v35 = vsel %vm1150_vm12, %v1134_v7, %v1166_v21  ;;  %v1020_v63 = vpop.permute.xlu1 %1019 }
 0x392   :  { %v2050_v51 = vsel %vm1151_vm13, %v1135_v2, %v1167_v22  ;;  %v2053_v55 = vsel %vm1152_vm14, %v1136_v8, %v1168_v23  ;;  %v2056_v56 = vsel %vm1153_vm15, %v1137_v9, %v1169_v37  ;;  %v1005_v3 = vmul.f32 %v1886_v54, %v1440_v46 }
 0x393   :  { %v1006_v57 = vmul.f32 %v1886_v54, %v1448_v52  ;;  %v1007_v58 = vmul.f32 %v1886_v54, %v1464_v5  ;;  %v1008_v61 = vmul.f32 %v1886_v54, %v1472_v12  ;;  %v1009_v59 = vmul.f32 %v1886_v54, %v1488_v33 }
 0x394   :  { %v1010_v62 = vmul.f32 %v1886_v54, %v1496_v40  ;;  %v1011_v46 = vmul.f32 %v1886_v54, %v1418_v27  ;;  %v1012_v52 = vmul.f32 %v1886_v54, %v1422_v31  ;;  %v1013_v5 = vmul.f32 %v1886_v54, %v1442_v47 }
 0x395   :  { %v1014_v12 = vmul.f32 %v1886_v54, %v1450_v53  ;;  %v1015_v33 = vmul.f32 %v1886_v54, %v1466_v6  ;;  %v1016_v40 = vmul.f32 %v1886_v54, %v1474_v13  ;;  %v1017_v0 = vmul.f32 %v1886_v54, %v1490_v34 }
 0x396   :  { %v1018_v27 = vmul.f32 %v1886_v54, %v1498_v41  ;;  %v1022_v4 = vadd.f32 %v1020_v63, %v1003_v20  ;;  %v1023_v31 = vadd.f32 %v1020_v63, %v1004_v36  ;;  %v1024_v7 = vadd.f32 %v1020_v63, %v1005_v3 }
 0x397   :  { %v1025_v2 = vadd.f32 %v1020_v63, %v1006_v57  ;;  %v1026_v47 = vadd.f32 %v1020_v63, %v1007_v58  ;;  %v1027_v8 = vadd.f32 %v1020_v63, %v1008_v61  ;;  %v1028_v9 = vadd.f32 %v1020_v63, %v1009_v59 }
 0x398   :  { %v1029_v53 = vadd.f32 %v1020_v63, %v1010_v62  ;;  %v1030_v60 = vadd.f32 %v1020_v63, %v1011_v46  ;;  %v1031_v10 = vadd.f32 %v1020_v63, %v1012_v52  ;;  %v1032_v6 = vadd.f32 %v1020_v63, %v1013_v5 }
 0x399   :  { %v1033_v14 = vadd.f32 %v1020_v63, %v1014_v12  ;;  %v1034_v15 = vadd.f32 %v1020_v63, %v1015_v33  ;;  %v1035_v13 = vadd.f32 %v1020_v63, %v1016_v40  ;;  %v2088_v50 = vadd.f32 %v1020_v63, %v1017_v0 }
 0x39a   :  { %v2090_v34 = vadd.f32 %v1020_v63, %v1018_v27  ;;  %vm1038_vm5 = vcmp.ge.f32.partialorder %v1022_v4, 0.0  ;;  %vm1040_vm4 = vcmp.ge.f32.partialorder %v1024_v7, 0.0  ;;  %vm1041_vm6 = vcmp.ge.f32.partialorder %v1025_v2, 0.0 }
 0x39b   :  { %vm1042_vm7 = vcmp.ge.f32.partialorder %v1026_v47, 0.0  ;;  %vm1043_vm8 = vcmp.ge.f32.partialorder %v1027_v8, 0.0  ;;  %vm1044_vm9 = vcmp.ge.f32.partialorder %v1028_v9, 0.0  ;;  %vm1045_vm10 = vcmp.ge.f32.partialorder %v1029_v53, 0.0 }
 0x39c   :  { %vm1046_vm11 = vcmp.ge.f32.partialorder %v1030_v60, 0.0  ;;  %vm1047_vm3 = vcmp.ge.f32.partialorder %v1031_v10, 0.0  ;;  %vm1049_vm13 = vcmp.ge.f32.partialorder %v1033_v14, 0.0  ;;  %vm1050_vm14 = vcmp.ge.f32.partialorder %v1034_v15, 0.0 }
 0x39d   :  { %vm1051_vm15 = vcmp.ge.f32.partialorder %v1035_v13, 0.0  ;;  %vm1052_vm0 = vcmp.ge.f32.partialorder %v2088_v50, 0.0  ;;  %vm2312_vm1 = vcmp.ge.f32.partialorder %v2002_v11, 0.0  ;;  %v1054_v54 = vmul.f32 0.01, %v1022_v4 }
 0x39e   :  { %v2098_v41 = vsel %vm2312_vm1, %v2002_v11, %v2017_v39  ;;  %v1055_v16 = vmul.f32 0.01, %v1023_v31  ;;  %v1056_v17 = vmul.f32 0.01, %v1024_v7  ;;  %vm2313_vm12 = vcmp.ge.f32.partialorder %v2004_v1, 0.0 }
 0x39f   :  { %v1187_v18 = vsel %vm2313_vm12, %v2004_v1, %v2020_v42  ;;  %v1057_v19 = vmul.f32 0.01, %v1025_v2  ;;  %v1058_v25 = vmul.f32 0.01, %v1026_v47  ;;  %v1059_v28 = vmul.f32 0.01, %v1027_v8 }
 0x3a0   :  { %v1060_v20 = vmul.f32 0.01, %v1028_v9  ;;  %v1061_v29 = vmul.f32 0.01, %v1029_v53  ;;  %v1062_v21 = vmul.f32 0.01, %v1030_v60  ;;  %v1070_v22 = vsel %vm1038_vm5, %v1022_v4, %v1054_v54 }
 0x3a1   :  { %v1063_v36 = vmul.f32 0.01, %v1031_v10  ;;  %v1064_v23 = vmul.f32 0.01, %v1032_v6  ;;  %v1065_v11 = vmul.f32 0.01, %v1033_v14  ;;  %v1072_v3 = vsel %vm1040_vm4, %v1024_v7, %v1056_v17 }
 0x3a2   :  { %vm2314_vm1 = vcmp.ge.f32.partialorder %v1023_v31, 0.0  ;;  %vm2315_vm2 = vcmask 195712   ;;  %v1066_v39 = vmul.f32 0.01, %v1034_v15  ;;  %v1067_v1 = vmul.f32 0.01, %v1035_v13 }
 0x3a3   :  { %v1071_v37 = vsel %vm2314_vm1, %v1023_v31, %v1055_v16  ;;  %1086 = vst.msk [vmem:[%s2273_s4] sm:$0xff] %vm2315_vm2, %v1070_v22  ;;  %v1068_v42 = vmul.f32 0.01, %v2088_v50  ;;  %vm2316_vm12 = vmmov %vm2315_vm2  ;;  %vm2317_vm5 = vcmask 261312   ;;  %v1069_v57 = vmul.f32 0.01, %v2090_v34 }
 0x3a4   :  { %1087 = vst.msk [vmem:[%s2273_s4 + $0x8] sm:$0xff] %vm2316_vm12, %v1071_v37  ;;  %v1073_v58 = vsel %vm1041_vm6, %v1025_v2, %v1057_v19  ;;  %v1074_v61 = vsel %vm1042_vm7, %v1026_v47, %v1058_v25  ;;  %v1075_v59 = vsel %vm1043_vm8, %v1027_v8, %v1059_v28  ;;  %vm2318_vm4 = vmmov %vm2317_vm5  ;;  %v1077_v62 = vsel %vm1045_vm10, %v1029_v53, %v1061_v29 }
 0x3a5   :  { %1188 = vst.msk [vmem:[%s2273_s4] sm:$0xff] %vm2317_vm5, %v2011_v24  ;;  %v1076_v24 = vsel %vm1044_vm9, %v1028_v9, %v1060_v20  ;;  %v1078_v63 = vsel %vm1046_vm11, %v1030_v60, %v1062_v21  ;;  %v1079_v46 = vsel %vm1047_vm3, %v1031_v10, %v1063_v36  ;;  %vm2319_vm6 = vmmov %vm2315_vm2  ;;  %vm2323_vm10 = vcmp.ge.f32.partialorder %v1032_v6, 0.0 }
 0x3a6   :  { %1088 = vst.msk [vmem:[%s2273_s4 + $0x10] sm:$0xff] %vm2315_vm2, %v1072_v3  ;;  %vm2320_vm7 = vmmov %vm2315_vm2  ;;  %v1081_v52 = vsel %vm1049_vm13, %v1033_v14, %v1065_v11  ;;  %v1082_v5 = vsel %vm1050_vm14, %v1034_v15, %v1066_v39  ;;  %v1083_v12 = vsel %vm1051_vm15, %v1035_v13, %v1067_v1  ;;  %vm2331_vm5 = vcmp.ge.f32.partialorder %v2090_v34, 0.0 }
 0x3a7   :  { %1189 = vst.msk [vmem:[%s2273_s4 + $0x8] sm:$0xff] %vm2318_vm4, %v2014_v38  ;;  %vm2321_vm8 = vmmov %vm2315_vm2  ;;  %v1080_v38 = vsel %vm2323_vm10, %v1032_v6, %v1064_v23 }
 0x3a8   :  { %1089 = vst.msk [vmem:[%s2273_s4 + $0x18] sm:$0xff] %vm2319_vm6, %v1073_v58  ;;  %vm2322_vm9 = vmmov %vm2318_vm4 }
 0x3a9   :  { %1090 = vst.msk [vmem:[%s2273_s4 + $0x20] sm:$0xff] %vm2320_vm7, %v1074_v61  ;;  %vm2324_vm11 = vmmov %vm2315_vm2 }
 0x3aa   :  { %1091 = vst.msk [vmem:[%s2273_s4 + $0x28] sm:$0xff] %vm2321_vm8, %v1075_v59  ;;  %vm2325_vm3 = vmmov %vm2315_vm2 }
 0x3ab   :  { %1190 = vst.msk [vmem:[%s2273_s4 + $0x10] sm:$0xff] %vm2322_vm9, %v2023_v26  ;;  %vm2326_vm1 = vmmov %vm2315_vm2  ;;  %v1084_v26 = vsel %vm1052_vm0, %v2088_v50, %v1068_v42 }
 0x3ac   :  { %1092 = vst.msk [vmem:[%s2273_s4 + $0x30] sm:$0xff] %vm2324_vm11, %v1076_v24  ;;  %vm2327_vm13 = vmmov %vm2326_vm1 }
 0x3ad   :  { %1093 = vst.msk [vmem:[%s2273_s4 + $0x38] sm:$0xff] %vm2325_vm3, %v1077_v62  ;;  %vm2328_vm14 = vmmov %vm2318_vm4 }
 0x3ae   :  { %1094 = vst.msk [vmem:[%s2273_s4 + $0x40] sm:$0xff] %vm2326_vm1, %v1078_v63  ;;  %vm2329_vm15 = vmmov %vm2318_vm4 }
 0x3af   :  { %1095 = vst.msk [vmem:[%s2273_s4 + $0x48] sm:$0xff] %vm2327_vm13, %v1079_v46  ;;  %vm2330_vm12 = vmmov %vm2318_vm4 }
 0x3b0   :  { %1191 = vst.msk [vmem:[%s2273_s4 + $0x18] sm:$0xff] %vm2328_vm14, %v2026_v32  ;;  %v1085_v32 = vsel %vm2331_vm5, %v2090_v34, %v1069_v57  ;;  %vm2332_vm2 = vmmov %vm2326_vm1 }
 0x3b1   :  { %1192 = vst.msk [vmem:[%s2273_s4 + $0x20] sm:$0xff] %vm2329_vm15, %v2029_v30  ;;  %vm2333_vm4 = vmmov %vm2326_vm1 }
 0x3b2   :  { %1193 = vst.msk [vmem:[%s2273_s4 + $0x28] sm:$0xff] %vm2330_vm12, %v2032_v43  ;;  %vm2334_vm6 = vmmov %vm2326_vm1 }
 0x3b3   :  { %1096 = vst.msk [vmem:[%s2273_s4 + $0x50] sm:$0xff] %vm2332_vm2, %v1080_v38  ;;  %vm2335_vm0 = vmmov %vm2326_vm1 }
 0x3b4   :  { %1097 = vst.msk [vmem:[%s2273_s4 + $0x58] sm:$0xff] %vm2333_vm4, %v1081_v52  ;;  %vm2336_vm7 = vmmov %vm2322_vm9 }
 0x3b5   :  { %1098 = vst.msk [vmem:[%s2273_s4 + $0x60] sm:$0xff] %vm2334_vm6, %v1082_v5  ;;  %vm2337_vm8 = vmmov %vm2336_vm7 }
 0x3b6   :  { %1099 = vst.msk [vmem:[%s2273_s4 + $0x68] sm:$0xff] %vm2335_vm0, %v1083_v12  ;;  %vm2338_vm9 = vmmov %vm2336_vm7 }
 0x3b7   :  { %1194 = vst.msk [vmem:[%s2273_s4 + $0x30] sm:$0xff] %vm2336_vm7, %v2035_v44  ;;  %vm2339_vm10 = vmmov %vm2336_vm7 }
 0x3b8   :  { %1195 = vst.msk [vmem:[%s2273_s4 + $0x38] sm:$0xff] %vm2337_vm8, %v2038_v45  ;;  %vm2340_vm11 = vmmov %vm2335_vm0 }
 0x3b9   :  { %1196 = vst.msk [vmem:[%s2273_s4 + $0x40] sm:$0xff] %vm2338_vm9, %v2041_v48  ;;  %vm2341_vm3 = vmmov %vm2335_vm0 }
 0x3ba   :  { %1197 = vst.msk [vmem:[%s2273_s4 + $0x48] sm:$0xff] %vm2339_vm10, %v2044_v49  ;;  %vm2342_vm1 = vmmov %vm2336_vm7 }
 0x3bb   :  { %1100 = vst.msk [vmem:[%s2273_s4 + $0x70] sm:$0xff] %vm2340_vm11, %v1084_v26  ;;  %vm2343_vm13 = vmmov %vm2342_vm1 }
 0x3bc   :  { %1101 = vst.msk [vmem:[%s2273_s4 + $0x78] sm:$0xff] %vm2341_vm3, %v1085_v32  ;;  %vm2344_vm14 = vmmov %vm2342_vm1 }
 0x3bd   :  { %1198 = vst.msk [vmem:[%s2273_s4 + $0x50] sm:$0xff] %vm2342_vm1, %v2047_v35  ;;  %vm2345_vm15 = vmmov %vm2342_vm1 }
 0x3be   :  { %1199 = vst.msk [vmem:[%s2273_s4 + $0x58] sm:$0xff] %vm2343_vm13, %v2050_v51  ;;  %vm2346_vm12 = vmmov %vm2342_vm1 }
 0x3bf   :  { %1200 = vst.msk [vmem:[%s2273_s4 + $0x60] sm:$0xff] %vm2344_vm14, %v2053_v55  ;;  %vm2347_vm5 = vmmov %vm2342_vm1 }
 0x3c0   :  { %1201 = vst.msk [vmem:[%s2273_s4 + $0x68] sm:$0xff] %vm2345_vm15, %v2056_v56 }
 0x3c1   :  { %1202 = vst.msk [vmem:[%s2273_s4 + $0x70] sm:$0xff] %vm2346_vm12, %v2098_v41 }
 0x3c2   :  { %1203 = vst.msk [vmem:[%s2273_s4 + $0x78] sm:$0xff] %vm2347_vm5, %v1187_v18 }

// kernel: decoder_forward.27
= control target key start
LH: loop header
LB: loop body
LE: loop exit
PB: predicated region body
PF: predicated region fallthrough
CT: control target
= control target key end

     0   :  { %vm272_vm0 = vcmask 588800   ;;  %vm369_vm1 = vcmask 1043456   ;;  %vm1046_vm2 = vcmask 31744   ;;  %s2204_s1 = inlined_call_operand.vmem [shape: bf16[72,4], index: 1, kind: input, shape index: {}]   ;;  %s2205_s0 = inlined_call_operand.vmem [shape: bf16[512,72], index: 0, kind: input, shape index: {}]   ;;  %s2206_s2 = inlined_call_operand.vmem [shape: f32[512,4], index: 2, kind: output, shape index: {}]  }
   0x1   :  { %v1371_v0 = vld [vmem:[%s2204_s1] sm:$0xff]   ;;  %v1372_v1 = vld [vmem:[%s2204_s1 + $0x8] sm:$0xff]   ;;  %v1373_v2 = vld [vmem:[%s2204_s1 + $0x10] sm:$0xff]  }
   0x2   :  { %1285 = vmatprep.subr.bf16.mxu0 %v1371_v0  ;;  %1359 = vmatprep.subr.bf16.mxu1 %v1371_v0  ;;  %v1376_v3 = vld [vmem:[%s2205_s0] sm:$0xff]   ;;  %v1374_v5 = vld [vmem:[%s2204_s1 + $0x18] sm:$0xff]   ;;  %v1378_v8 = vld [vmem:[%s2205_s0 + $0x8] sm:$0xff]  }
   0x3   :  { %1286 = vmatpush3.bf16.msra.mxu0 %v1371_v0  ;;  %1364 = vmatpush3.bf16.msra.mxu1 %v1371_v0  ;;  %v1377_v4 = vld [vmem:[%s2205_s0 + $0x80] sm:$0xff]   ;;  %v1379_v9 = vld [vmem:[%s2205_s0 + $0x88] sm:$0xff]   ;;  %v1380_v10 = vld [vmem:[%s2205_s0 + $0x10] sm:$0xff]  }
   0x4   :  { %1287 = vmatprep.subr.bf16.mxu0 %v1372_v1  ;;  %1360 = vmatprep.subr.bf16.mxu1 %v1372_v1  ;;  %v1375_v6 = vld [vmem:[%s2204_s1 + $0x20] ss:$0 sps:$4 sm:$0xff]   ;;  %v1381_v11 = vld [vmem:[%s2205_s0 + $0x90] sm:$0xff]   ;;  %v1382_v12 = vld [vmem:[%s2205_s0 + $0x18] sm:$0xff]  }
   0x5   :  { %1295 = vmatprep.mubr.msk.bf16.mxu0 %vm272_vm0, %v1376_v3  ;;  %1327 = vmatprep.mubr.msk.bf16.mxu1 %vm272_vm0, %v1377_v4  ;;  %v371_v7 = vsel %vm369_vm1, %v1375_v6, 0  ;;  %v1383_v13 = vld [vmem:[%s2205_s0 + $0x98] sm:$0xff]   ;;  %v1384_v14 = vld [vmem:[%s2205_s0 + $0x20] sm:$0xff]   ;;  %v1386_v16 = vld [vmem:[%s2205_s0 + $0x28] sm:$0xff]  }
   0x6   :  { %v1385_v15 = vld [vmem:[%s2205_s0 + $0xa0] sm:$0xff]   ;;  %v1387_v17 = vld [vmem:[%s2205_s0 + $0xa8] sm:$0xff]   ;;  %v1388_v18 = vld [vmem:[%s2205_s0 + $0x30] sm:$0xff]  }
   0x7   :  { %1288 = vmatpush3.bf16.msra.mxu0 %v1372_v1  ;;  %1365 = vmatpush3.bf16.msra.mxu1 %v1372_v1  ;;  %v1389_v19 = vld [vmem:[%s2205_s0 + $0xb0] sm:$0xff]   ;;  %v1390_v20 = vld [vmem:[%s2205_s0 + $0x38] sm:$0xff]   ;;  %v1392_v22 = vld [vmem:[%s2205_s0 + $0x40] sm:$0xff]  }
   0x8   :  { %1289 = vmatprep.subr.bf16.mxu0 %v1373_v2  ;;  %1361 = vmatprep.subr.bf16.mxu1 %v1373_v2  ;;  %v1391_v21 = vld [vmem:[%s2205_s0 + $0xb8] sm:$0xff]   ;;  %v1393_v23 = vld [vmem:[%s2205_s0 + $0xc0] sm:$0xff]   ;;  %v1394_v24 = vld [vmem:[%s2205_s0 + $0x48] sm:$0xff]  }
   0x9   :  { %v1395_v25 = vld [vmem:[%s2205_s0 + $0xc8] sm:$0xff]   ;;  %v1396_v26 = vld [vmem:[%s2205_s0 + $0x50] sm:$0xff]   ;;  %v1398_v28 = vld [vmem:[%s2205_s0 + $0x58] sm:$0xff]  }
   0xa   :  { %v1397_v27 = vld [vmem:[%s2205_s0 + $0xd0] sm:$0xff]   ;;  %v1399_v29 = vld [vmem:[%s2205_s0 + $0xd8] sm:$0xff]   ;;  %v1400_v30 = vld [vmem:[%s2205_s0 + $0x60] sm:$0xff]  }
   0xb   :  { %1290 = vmatpush3.bf16.msra.mxu0 %v1373_v2  ;;  %1366 = vmatpush3.bf16.msra.mxu1 %v1373_v2  ;;  %v1401_v31 = vld [vmem:[%s2205_s0 + $0xe0] sm:$0xff]   ;;  %v1402_v32 = vld [vmem:[%s2205_s0 + $0x68] sm:$0xff]   ;;  %v1404_v34 = vld [vmem:[%s2205_s0 + $0x70] sm:$0xff]  }
   0xc   :  { %1291 = vmatprep.subr.bf16.mxu0 %v1374_v5  ;;  %1362 = vmatprep.subr.bf16.mxu1 %v1374_v5  ;;  %v1403_v33 = vld [vmem:[%s2205_s0 + $0xe8] sm:$0xff]   ;;  %v1405_v35 = vld [vmem:[%s2205_s0 + $0xf0] sm:$0xff]   ;;  %v1406_v36 = vld [vmem:[%s2205_s0 + $0x78] sm:$0xff]  }
   0xd   :  { %v1407_v37 = vld [vmem:[%s2205_s0 + $0xf8] sm:$0xff]  }
   0xf   :  { %1292 = vmatpush3.bf16.msra.mxu0 %v1374_v5  ;;  %1367 = vmatpush3.bf16.msra.mxu1 %v1374_v5 }
  0x10   :  { %1369 = vmatprep.subr.msk.bf16.mxu0 %vm369_vm1, %v1375_v6  ;;  %1370 = vmatprep.subr.msk.bf16.mxu1 %vm369_vm1, %v1375_v6 }
  0x13   :  { %1294 = vmatpush3.bf16.msra.mxu0 %v371_v7  ;;  %1368 = vmatpush3.bf16.msra.mxu1 %v371_v7 }
  0x16   :  { %1296 = vmatmul.mubr.msk.bf16.vlgmr.msra.gmra.mrb[0].mxu0 %vm272_vm0, %v1378_v8  ;;  %1328 = vmatmul.mubr.msk.bf16.vlgmr.msra.gmra.mrb[0].mxu1 %vm272_vm0, %v1379_v9 }
  0x17   :  { %1299 = vmatprep.mubr.msk.bf16.mxu0 %vm272_vm0, %v1380_v10  ;;  %1331 = vmatprep.mubr.msk.bf16.mxu1 %vm272_vm0, %v1381_v11 }
  0x1e   :  { %1300 = vmatmul.mubr.msk.bf16.gmra.mrb[4].mxu0 %vm272_vm0, %v1382_v12  ;;  %1332 = vmatmul.mubr.msk.bf16.gmra.mrb[4].mxu1 %vm272_vm0, %v1383_v13 }
  0x1f   :  { %1303 = vmatprep.mubr.msk.bf16.mxu0 %vm272_vm0, %v1384_v14  ;;  %1335 = vmatprep.mubr.msk.bf16.mxu1 %vm272_vm0, %v1385_v15 }
  0x26   :  { %1304 = vmatmul.mubr.msk.bf16.gmra.mrb[8].mxu0 %vm272_vm0, %v1386_v16  ;;  %1336 = vmatmul.mubr.msk.bf16.gmra.mrb[8].mxu1 %vm272_vm0, %v1387_v17 }
  0x27   :  { %1307 = vmatprep.mubr.msk.bf16.mxu0 %vm272_vm0, %v1388_v18  ;;  %1339 = vmatprep.mubr.msk.bf16.mxu1 %vm272_vm0, %v1389_v19 }
  0x2e   :  { %1308 = vmatmul.mubr.msk.bf16.gmra.mrb[12].mxu0 %vm272_vm0, %v1390_v20  ;;  %1340 = vmatmul.mubr.msk.bf16.gmra.mrb[12].mxu1 %vm272_vm0, %v1391_v21 }
  0x2f   :  { %1311 = vmatprep.mubr.msk.bf16.mxu0 %vm272_vm0, %v1392_v22  ;;  %1343 = vmatprep.mubr.msk.bf16.mxu1 %vm272_vm0, %v1393_v23 }
  0x36   :  { %1312 = vmatmul.mubr.msk.bf16.gmra.mrb[16].mxu0 %vm272_vm0, %v1394_v24  ;;  %1344 = vmatmul.mubr.msk.bf16.gmra.mrb[16].mxu1 %vm272_vm0, %v1395_v25 }
  0x37   :  { %1315 = vmatprep.mubr.msk.bf16.mxu0 %vm272_vm0, %v1396_v26  ;;  %1347 = vmatprep.mubr.msk.bf16.mxu1 %vm272_vm0, %v1397_v27 }
  0x3e   :  { %1316 = vmatmul.mubr.msk.bf16.gmra.mrb[20].mxu0 %vm272_vm0, %v1398_v28  ;;  %1348 = vmatmul.mubr.msk.bf16.gmra.mrb[20].mxu1 %vm272_vm0, %v1399_v29 }
  0x3f   :  { %1319 = vmatprep.mubr.msk.bf16.mxu0 %vm272_vm0, %v1400_v30  ;;  %1351 = vmatprep.mubr.msk.bf16.mxu1 %vm272_vm0, %v1401_v31 }
  0x46   :  { %1320 = vmatmul.mubr.msk.bf16.gmra.mrb[24].mxu0 %vm272_vm0, %v1402_v32  ;;  %1352 = vmatmul.mubr.msk.bf16.gmra.mrb[24].mxu1 %vm272_vm0, %v1403_v33 }
  0x47   :  { %1323 = vmatprep.mubr.msk.bf16.mxu0 %vm272_vm0, %v1404_v34  ;;  %1355 = vmatprep.mubr.msk.bf16.mxu1 %vm272_vm0, %v1405_v35 }
  0x4e   :  { %1324 = vmatmul.mubr.msk.bf16.gmra.mrb[28].mxu0 %vm272_vm0, %v1406_v36  ;;  %1356 = vmatmul.mubr.msk.bf16.gmra.mrb[28].mxu1 %vm272_vm0, %v1407_v37 }
  0xe9   :  { %v1297_v38 = vpop.f32.mrb[0].mxu0  ;;  %v1329_v39 = vpop.f32.mrb[0].mxu1 }
  0xea   :  { %v1186_v40 = vmul.f32 -1.442695, %v1297_v38  ;;  %v1218_v41 = vmul.f32 -1.442695, %v1329_v39  ;;  %v407_v42 = vpop.f32.mrb[1].mxu0  ;;  %v535_v43 = vpop.f32.mrb[1].mxu1 }
  0xeb   :  { %v1184_v44 = vmul.f32 -1.442695, %v407_v42  ;;  %v1216_v45 = vmul.f32 -1.442695, %v535_v43  ;;  %v1298_v46 = vpop.f32.mrb[2].mxu0  ;;  %v1330_v47 = vpop.f32.mrb[2].mxu1 }
  0xec   :  { %1408 = vpow2.f32 %v1186_v40  ;;  %v1187_v48 = vmul.f32 -1.442695, %v1298_v46  ;;  %v410_v49 = vpop.f32.mrb[3].mxu0  ;;  %v538_v50 = vpop.f32.mrb[3].mxu1  ;;  %v1219_v51 = vmul.f32 -1.442695, %v1330_v47 }
  0xed   :  { %1410 = vpow2.f32 %v1218_v41  ;;  %v1185_v52 = vmul.f32 -1.442695, %v410_v49  ;;  %v1217_v53 = vmul.f32 -1.442695, %v538_v50 }
  0xee   :  { %1412 = vpow2.f32 %v1184_v44 }
  0xef   :  { %1414 = vpow2.f32 %v1216_v45 }
  0xf0   :  { %1416 = vpow2.f32 %v1187_v48 }
  0xf1   :  { %1418 = vpow2.f32 %v1219_v51  ;;  %v1301_v54 = vpop.f32.mrb[4].mxu0  ;;  %v1333_v55 = vpop.f32.mrb[4].mxu1 }
  0xf2   :  { %1420 = vpow2.f32 %v1185_v52  ;;  %v1190_v56 = vmul.f32 -1.442695, %v1301_v54  ;;  %v1222_v57 = vmul.f32 -1.442695, %v1333_v55  ;;  %v423_v58 = vpop.f32.mrb[5].mxu0  ;;  %v551_v59 = vpop.f32.mrb[5].mxu1 }
  0xf3   :  { %1422 = vpow2.f32 %v1217_v53  ;;  %v1188_v60 = vmul.f32 -1.442695, %v423_v58  ;;  %v1220_v61 = vmul.f32 -1.442695, %v551_v59  ;;  %v1302_v62 = vpop.f32.mrb[6].mxu0  ;;  %v1334_v63 = vpop.f32.mrb[6].mxu1 }
  0xf4   :  { %1424 = vpow2.f32 %v1190_v56  ;;  %v1191_v0 = vmul.f32 -1.442695, %v1302_v62  ;;  %v426_v1 = vpop.f32.mrb[7].mxu0  ;;  %v554_v2 = vpop.f32.mrb[7].mxu1  ;;  %v1223_v38 = vmul.f32 -1.442695, %v1334_v63 }
  0xf5   :  { %1426 = vpow2.f32 %v1222_v57  ;;  %v1189_v42 = vmul.f32 -1.442695, %v426_v1  ;;  %v1221_v46 = vmul.f32 -1.442695, %v554_v2 }
  0xf6   :  { %v1409_v3 = vpop.eup %1408  ;;  %1428 = vpow2.f32 %v1188_v60 }
  0xf7   :  { %v1411_v4 = vpop.eup %1410  ;;  %v856_v5 = vadd.f32 1.0, %v1409_v3  ;;  %1430 = vpow2.f32 %v1220_v61 }
  0xf8   :  { %v1413_v6 = vpop.eup %1412  ;;  %v888_v7 = vadd.f32 1.0, %v1411_v4  ;;  %1432 = vpow2.f32 %v1191_v0 }
  0xf9   :  { %v1415_v8 = vpop.eup %1414  ;;  %1434 = vrcp.f32 %v856_v5  ;;  %v854_v9 = vadd.f32 1.0, %v1413_v6  ;;  %v1305_v10 = vpop.f32.mrb[8].mxu0 }
  0xfa   :  { %v1337_v11 = vpop.f32.mrb[8].mxu1  ;;  %v1417_v12 = vpop.eup %1416  ;;  %1436 = vrcp.f32 %v888_v7  ;;  %v886_v13 = vadd.f32 1.0, %v1415_v8  ;;  %v1194_v50 = vmul.f32 -1.442695, %v1305_v10 }
  0xfb   :  { %v439_v14 = vpop.f32.mrb[9].mxu0  ;;  %v1419_v15 = vpop.eup %1418  ;;  %1438 = vrcp.f32 %v854_v9  ;;  %v857_v16 = vadd.f32 1.0, %v1417_v12  ;;  %v1226_v53 = vmul.f32 -1.442695, %v1337_v11 }
  0xfc   :  { %v567_v17 = vpop.f32.mrb[9].mxu1  ;;  %v1306_v18 = vpop.f32.mrb[10].mxu0  ;;  %1440 = vrcp.f32 %v886_v13  ;;  %v889_v20 = vadd.f32 1.0, %v1419_v15  ;;  %v1192_v55 = vmul.f32 -1.442695, %v439_v14 }
  0xfd   :  { %v1421_v19 = vpop.eup %1420  ;;  %v1822_v21 = vpop.f32.mrb[10].mxu1  ;;  %1442 = vrcp.f32 %v857_v16  ;;  %v1224_v57 = vmul.f32 -1.442695, %v567_v17  ;;  %v1195_v59 = vmul.f32 -1.442695, %v1306_v18 }
  0xfe   :  { %v1423_v22 = vpop.eup %1422  ;;  %v855_v23 = vadd.f32 1.0, %v1421_v19  ;;  %v1824_v24 = vpop.f32.mrb[11].mxu0  ;;  %1444 = vrcp.f32 %v889_v20  ;;  %v1227_v63 = vmul.f32 -1.442695, %v1822_v21 }
  0xff   :  { %v1826_v25 = vpop.f32.mrb[11].mxu1  ;;  %v1425_v26 = vpop.eup %1424  ;;  %v887_v27 = vadd.f32 1.0, %v1423_v22  ;;  %v1193_v3 = vmul.f32 -1.442695, %v1824_v24 }
 0x100   :  { %v1427_v28 = vpop.eup %1426  ;;  %1446 = vrcp.f32 %v855_v23  ;;  %v860_v29 = vadd.f32 1.0, %v1425_v26  ;;  %v1225_v7 = vmul.f32 -1.442695, %v1826_v25 }
 0x101   :  { %v1429_v30 = vpop.eup %1428  ;;  %1448 = vrcp.f32 %v887_v27  ;;  %v892_v31 = vadd.f32 1.0, %v1427_v28  ;;  %v1309_v34 = vpop.f32.mrb[12].mxu0 }
 0x102   :  { %v1431_v32 = vpop.eup %1430  ;;  %1450 = vrcp.f32 %v860_v29  ;;  %v858_v33 = vadd.f32 1.0, %v1429_v30  ;;  %v1828_v35 = vpop.f32.mrb[12].mxu1  ;;  %v1198_v11 = vmul.f32 -1.442695, %v1309_v34 }
 0x103   :  { %v1433_v36 = vpop.eup %1432  ;;  %1452 = vrcp.f32 %v892_v31  ;;  %v890_v37 = vadd.f32 1.0, %v1431_v32  ;;  %v1830_v39 = vpop.f32.mrb[13].mxu0  ;;  %v1230_v13 = vmul.f32 -1.442695, %v1828_v35 }
 0x104   :  { %v1435_v40 = vpop.eup %1434  ;;  %1454 = vrcp.f32 %v858_v33  ;;  %v861_v41 = vadd.f32 1.0, %v1433_v36  ;;  %v1832_v43 = vpop.f32.mrb[13].mxu1 }
 0x105   :  { %v1834_v44 = vpop.f32.mrb[14].mxu0  ;;  %v1437_v45 = vpop.eup %1436  ;;  %1049 = vst.msk [vmem:[%s2206_s2 + $0x10] sm:$0xff] %vm1046_vm2, %v1435_v40  ;;  %1456 = vrcp.f32 %v890_v37 }
 0x106   :  { %v1840_v47 = vpop.f32.mrb[14].mxu1  ;;  %v1842_v48 = vpop.f32.mrb[15].mxu0  ;;  %1081 = vst.msk [vmem:[%s2206_s2 + $0x110] sm:$0xff] %vm1046_vm2, %v1437_v45  ;;  %1458 = vrcp.f32 %v861_v41 }
 0x107   :  { %v1439_v49 = vpop.eup %1438  ;;  %v1848_v51 = vpop.f32.mrb[15].mxu1  ;;  %1460 = vpow2.f32 %v1223_v38 }
 0x108   :  { %v1441_v52 = vpop.eup %1440  ;;  %1047 = vst.msk [vmem:[%s2206_s2] sm:$0xff] %vm1046_vm2, %v1439_v49  ;;  %1462 = vpow2.f32 %v1189_v42 }
 0x109   :  { %v1443_v54 = vpop.eup %1442  ;;  %1079 = vst.msk [vmem:[%s2206_s2 + $0x100] sm:$0xff] %vm1046_vm2, %v1441_v52  ;;  %1464 = vpow2.f32 %v1221_v46  ;;  %v1866_v60 = vpop.f32.mrb[16].mxu0 }
 0x10a   :  { %v1445_v56 = vpop.eup %1444  ;;  %1050 = vst.msk [vmem:[%s2206_s2 + $0x18] sm:$0xff] %vm1046_vm2, %v1443_v54  ;;  %1466 = vpow2.f32 %v1194_v50  ;;  %v1868_v61 = vpop.f32.mrb[16].mxu1 }
 0x10b   :  { %v1447_v58 = vpop.eup %1446  ;;  %1082 = vst.msk [vmem:[%s2206_s2 + $0x118] sm:$0xff] %vm1046_vm2, %v1445_v56  ;;  %1468 = vpow2.f32 %v1226_v53  ;;  %v1875_v0 = vpop.f32.mrb[17].mxu0 }
 0x10c   :  { %v1449_v62 = vpop.eup %1448  ;;  %1048 = vst.msk [vmem:[%s2206_s2 + $0x8] sm:$0xff] %vm1046_vm2, %v1447_v58  ;;  %v1877_v1 = vpop.f32.mrb[17].mxu1  ;;  %1470 = vpow2.f32 %v1192_v55 }
 0x10d   :  { %v1451_v2 = vpop.eup %1450  ;;  %1080 = vst.msk [vmem:[%s2206_s2 + $0x108] sm:$0xff] %vm1046_vm2, %v1449_v62  ;;  %v1884_v4 = vpop.f32.mrb[18].mxu0  ;;  %1472 = vpow2.f32 %v1224_v57 }
 0x10e   :  { %v1886_v5 = vpop.f32.mrb[18].mxu1  ;;  %v1453_v6 = vpop.eup %1452  ;;  %1053 = vst.msk [vmem:[%s2206_s2 + $0x30] sm:$0xff] %vm1046_vm2, %v1451_v2  ;;  %1474 = vpow2.f32 %v1195_v59  ;;  %v1196_v59 = vmul.f32 -1.442695, %v1830_v39  ;;  %v1199_v39 = vmul.f32 -1.442695, %v1834_v44 }
 0x10f   :  { %v1893_v8 = vpop.f32.mrb[19].mxu0  ;;  %v1895_v9 = vpop.f32.mrb[19].mxu1  ;;  %1085 = vst.msk [vmem:[%s2206_s2 + $0x130] sm:$0xff] %vm1046_vm2, %v1453_v6  ;;  %1476 = vpow2.f32 %v1227_v63  ;;  %v1229_v44 = vmul.f32 -1.442695, %v1848_v51 }
 0x110   :  { %v1455_v10 = vpop.eup %1454  ;;  %1478 = vpow2.f32 %v1193_v3  ;;  %v1228_v3 = vmul.f32 -1.442695, %v1832_v43  ;;  %v1231_v43 = vmul.f32 -1.442695, %v1840_v47  ;;  %v1234_v51 = vmul.f32 -1.442695, %v1868_v61 }
 0x111   :  { %v1457_v12 = vpop.eup %1456  ;;  %1051 = vst.msk [vmem:[%s2206_s2 + $0x20] sm:$0xff] %vm1046_vm2, %v1455_v10  ;;  %1480 = vpow2.f32 %v1225_v7  ;;  %v1914_v18 = vpop.f32.mrb[20].mxu0  ;;  %v1232_v61 = vmul.f32 -1.442695, %v1877_v1  ;;  %v1201_v1 = vmul.f32 -1.442695, %v1893_v8 }
 0x112   :  { %v1459_v14 = vpop.eup %1458  ;;  %1083 = vst.msk [vmem:[%s2206_s2 + $0x120] sm:$0xff] %vm1046_vm2, %v1457_v12  ;;  %1482 = vpow2.f32 %v1198_v11  ;;  %v1916_v19 = vpop.f32.mrb[20].mxu1 }
 0x113   :  { %v1461_v15 = vpop.eup %1460  ;;  %1054 = vst.msk [vmem:[%s2206_s2 + $0x38] sm:$0xff] %vm1046_vm2, %v1459_v14  ;;  %1484 = vpow2.f32 %v1230_v13  ;;  %v1918_v22 = vpop.f32.mrb[21].mxu0  ;;  %v1197_v13 = vmul.f32 -1.442695, %v1842_v48  ;;  %v1202_v48 = vmul.f32 -1.442695, %v1866_v60 }
 0x114   :  { %v1463_v16 = vpop.eup %1462  ;;  %v893_v17 = vadd.f32 1.0, %v1461_v15  ;;  %v1920_v25 = vpop.f32.mrb[21].mxu1  ;;  %v1200_v60 = vmul.f32 -1.442695, %v1875_v0  ;;  %v1203_v0 = vmul.f32 -1.442695, %v1884_v4 }
 0x115   :  { %v1465_v20 = vpop.eup %1464  ;;  %v859_v21 = vadd.f32 1.0, %v1463_v16  ;;  %v1922_v26 = vpop.f32.mrb[22].mxu0 }
 0x116   :  { %v1467_v23 = vpop.eup %1466  ;;  %1486 = vrcp.f32 %v893_v17  ;;  %v891_v24 = vadd.f32 1.0, %v1465_v20  ;;  %v1924_v29 = vpop.f32.mrb[22].mxu1 }
 0x117   :  { %v1469_v27 = vpop.eup %1468  ;;  %1488 = vrcp.f32 %v859_v21  ;;  %v864_v28 = vadd.f32 1.0, %v1467_v23  ;;  %v1926_v32 = vpop.f32.mrb[23].mxu0 }
 0x118   :  { %v1471_v30 = vpop.eup %1470  ;;  %1490 = vrcp.f32 %v891_v24  ;;  %v896_v31 = vadd.f32 1.0, %v1469_v27  ;;  %v1928_v33 = vpop.f32.mrb[23].mxu1 }
 0x119   :  { %v1473_v34 = vpop.eup %1472  ;;  %1492 = vrcp.f32 %v864_v28  ;;  %v862_v35 = vadd.f32 1.0, %v1471_v30  ;;  %v1930_v45 = vpop.f32.mrb[24].mxu0 }
 0x11a   :  { %v1475_v36 = vpop.eup %1474  ;;  %1494 = vrcp.f32 %v896_v31  ;;  %v894_v37 = vadd.f32 1.0, %v1473_v34  ;;  %v1932_v46 = vpop.f32.mrb[24].mxu1 }
 0x11b   :  { %v1477_v38 = vpop.eup %1476  ;;  %1496 = vrcp.f32 %v862_v35  ;;  %v865_v40 = vadd.f32 1.0, %v1475_v36  ;;  %v1934_v52 = vpop.f32.mrb[25].mxu0  ;;  %v1235_v36 = vmul.f32 -1.442695, %v1886_v5 }
 0x11c   :  { %v1479_v41 = vpop.eup %1478  ;;  %1498 = vrcp.f32 %v894_v37  ;;  %v897_v42 = vadd.f32 1.0, %v1477_v38  ;;  %v1936_v55 = vpop.f32.mrb[25].mxu1 }
 0x11d   :  { %v1481_v49 = vpop.eup %1480  ;;  %1500 = vrcp.f32 %v865_v40  ;;  %v863_v50 = vadd.f32 1.0, %v1479_v41  ;;  %v1938_v56 = vpop.f32.mrb[26].mxu0 }
 0x11e   :  { %v1483_v53 = vpop.eup %1482  ;;  %1502 = vrcp.f32 %v897_v42  ;;  %v895_v54 = vadd.f32 1.0, %v1481_v49  ;;  %v1941_v62 = vpop.f32.mrb[26].mxu1 }
 0x11f   :  { %v1485_v57 = vpop.eup %1484  ;;  %1504 = vrcp.f32 %v863_v50  ;;  %v868_v58 = vadd.f32 1.0, %v1483_v53  ;;  %v1944_v6 = vpop.f32.mrb[27].mxu0 }
 0x120   :  { %v1487_v63 = vpop.eup %1486  ;;  %1506 = vrcp.f32 %v895_v54  ;;  %v900_v2 = vadd.f32 1.0, %v1485_v57  ;;  %v1946_v7 = vpop.f32.mrb[27].mxu1 }
 0x121   :  { %v1489_v10 = vpop.eup %1488  ;;  %1086 = vst.msk [vmem:[%s2206_s2 + $0x138] sm:$0xff] %vm1046_vm2, %v1487_v63  ;;  %1508 = vrcp.f32 %v868_v58  ;;  %v1968_v15 = vpop.f32.mrb[28].mxu0 }
 0x122   :  { %v1491_v11 = vpop.eup %1490  ;;  %1052 = vst.msk [vmem:[%s2206_s2 + $0x28] sm:$0xff] %vm1046_vm2, %v1489_v10  ;;  %1510 = vrcp.f32 %v900_v2  ;;  %v1970_v47 = vpop.f32.mrb[28].mxu1 }
 0x123   :  { %v1493_v12 = vpop.eup %1492  ;;  %1084 = vst.msk [vmem:[%s2206_s2 + $0x128] sm:$0xff] %vm1046_vm2, %v1491_v11  ;;  %1512 = vpow2.f32 %v1196_v59  ;;  %v1977_v17 = vpop.f32.mrb[29].mxu0 }
 0x124   :  { %v1495_v14 = vpop.eup %1494  ;;  %1057 = vst.msk [vmem:[%s2206_s2 + $0x50] sm:$0xff] %vm1046_vm2, %v1493_v12  ;;  %1514 = vpow2.f32 %v1228_v3  ;;  %v1979_v20 = vpop.f32.mrb[29].mxu1 }
 0x125   :  { %v1497_v16 = vpop.eup %1496  ;;  %1089 = vst.msk [vmem:[%s2206_s2 + $0x150] sm:$0xff] %vm1046_vm2, %v1495_v14  ;;  %1516 = vpow2.f32 %v1199_v39  ;;  %v1986_v23 = vpop.f32.mrb[30].mxu0 }
 0x126   :  { %v1499_v21 = vpop.eup %1498  ;;  %1055 = vst.msk [vmem:[%s2206_s2 + $0x40] sm:$0xff] %vm1046_vm2, %v1497_v16  ;;  %1518 = vpow2.f32 %v1231_v43  ;;  %v1988_v24 = vpop.f32.mrb[30].mxu1 }
 0x127   :  { %v1501_v27 = vpop.eup %1500  ;;  %1087 = vst.msk [vmem:[%s2206_s2 + $0x140] sm:$0xff] %vm1046_vm2, %v1499_v21  ;;  %1520 = vpow2.f32 %v1197_v13  ;;  %v1995_v28 = vpop.f32.mrb[31].mxu0 }
 0x128   :  { %v1997_v30 = vpop.f32.mrb[31].mxu1  ;;  %v1503_v31 = vpop.eup %1502  ;;  %1058 = vst.msk [vmem:[%s2206_s2 + $0x58] sm:$0xff] %vm1046_vm2, %v1501_v27  ;;  %1522 = vpow2.f32 %v1229_v44  ;;  %v1206_v27 = vmul.f32 -1.442695, %v1914_v18  ;;  %v1236_v18 = vmul.f32 -1.442695, %v1920_v25 }
 0x129   :  { %v1505_v34 = vpop.eup %1504  ;;  %1090 = vst.msk [vmem:[%s2206_s2 + $0x158] sm:$0xff] %vm1046_vm2, %v1503_v31  ;;  %1524 = vpow2.f32 %v1202_v48  ;;  %v1233_v48 = vmul.f32 -1.442695, %v1895_v9  ;;  %v1238_v31 = vmul.f32 -1.442695, %v1916_v19 }
 0x12a   :  { %v1507_v35 = vpop.eup %1506  ;;  %1056 = vst.msk [vmem:[%s2206_s2 + $0x48] sm:$0xff] %vm1046_vm2, %v1505_v34  ;;  %1526 = vpow2.f32 %v1234_v51  ;;  %v1204_v9 = vmul.f32 -1.442695, %v1918_v22  ;;  %v1207_v19 = vmul.f32 -1.442695, %v1922_v26 }
 0x12b   :  { %v1509_v37 = vpop.eup %1508  ;;  %1088 = vst.msk [vmem:[%s2206_s2 + $0x148] sm:$0xff] %vm1046_vm2, %v1507_v35  ;;  %1528 = vpow2.f32 %v1200_v60  ;;  %v1239_v22 = vmul.f32 -1.442695, %v1924_v29  ;;  %v1205_v25 = vmul.f32 -1.442695, %v1926_v32 }
 0x12c   :  { %v1511_v38 = vpop.eup %1510  ;;  %1061 = vst.msk [vmem:[%s2206_s2 + $0x70] sm:$0xff] %vm1046_vm2, %v1509_v37  ;;  %1530 = vpow2.f32 %v1232_v61  ;;  %v1237_v26 = vmul.f32 -1.442695, %v1928_v33  ;;  %v1210_v29 = vmul.f32 -1.442695, %v1930_v45 }
 0x12d   :  { %v1513_v4 = vpop.eup %1512  ;;  %1093 = vst.msk [vmem:[%s2206_s2 + $0x170] sm:$0xff] %vm1046_vm2, %v1511_v38  ;;  %1532 = vpow2.f32 %v1203_v0  ;;  %v1242_v32 = vmul.f32 -1.442695, %v1932_v46  ;;  %v1208_v33 = vmul.f32 -1.442695, %v1934_v52 }
 0x12e   :  { %v1515_v5 = vpop.eup %1514  ;;  %v866_v40 = vadd.f32 1.0, %v1513_v4  ;;  %1534 = vpow2.f32 %v1235_v36  ;;  %v1240_v45 = vmul.f32 -1.442695, %v1936_v55 }
 0x12f   :  { %v1517_v41 = vpop.eup %1516  ;;  %v898_v42 = vadd.f32 1.0, %v1515_v5  ;;  %1536 = vpow2.f32 %v1201_v1 }
 0x130   :  { %v1519_v8 = vpop.eup %1518  ;;  %1538 = vrcp.f32 %v866_v40  ;;  %v869_v49 = vadd.f32 1.0, %v1517_v41 }
 0x131   :  { %v1521_v50 = vpop.eup %1520  ;;  %1540 = vrcp.f32 %v898_v42  ;;  %v901_v53 = vadd.f32 1.0, %v1519_v8 }
 0x132   :  { %v1523_v54 = vpop.eup %1522  ;;  %1542 = vrcp.f32 %v869_v49  ;;  %v867_v57 = vadd.f32 1.0, %v1521_v50 }
 0x133   :  { %v1525_v58 = vpop.eup %1524  ;;  %1544 = vrcp.f32 %v901_v53  ;;  %v899_v59 = vadd.f32 1.0, %v1523_v54 }
 0x134   :  { %v1527_v63 = vpop.eup %1526  ;;  %1546 = vrcp.f32 %v867_v57  ;;  %v872_v2 = vadd.f32 1.0, %v1525_v58 }
 0x135   :  { %v1529_v3 = vpop.eup %1528  ;;  %1548 = vrcp.f32 %v899_v59  ;;  %v904_v10 = vadd.f32 1.0, %v1527_v63 }
 0x136   :  { %v1531_v39 = vpop.eup %1530  ;;  %1550 = vrcp.f32 %v872_v2  ;;  %v870_v11 = vadd.f32 1.0, %v1529_v3 }
 0x137   :  { %v1533_v43 = vpop.eup %1532  ;;  %1552 = vrcp.f32 %v904_v10  ;;  %v902_v12 = vadd.f32 1.0, %v1531_v39 }
 0x138   :  { %v1535_v13 = vpop.eup %1534  ;;  %1554 = vrcp.f32 %v870_v11  ;;  %v873_v14 = vadd.f32 1.0, %v1533_v43 }
 0x139   :  { %v1537_v44 = vpop.eup %1536  ;;  %1556 = vrcp.f32 %v902_v12  ;;  %v905_v16 = vadd.f32 1.0, %v1535_v13 }
 0x13a   :  { %v1539_v21 = vpop.eup %1538  ;;  %1558 = vrcp.f32 %v873_v14  ;;  %v871_v51 = vadd.f32 1.0, %v1537_v44 }
 0x13b   :  { %v1541_v60 = vpop.eup %1540  ;;  %1059 = vst.msk [vmem:[%s2206_s2 + $0x60] sm:$0xff] %vm1046_vm2, %v1539_v21  ;;  %1560 = vrcp.f32 %v905_v16 }
 0x13c   :  { %v1543_v61 = vpop.eup %1542  ;;  %1091 = vst.msk [vmem:[%s2206_s2 + $0x160] sm:$0xff] %vm1046_vm2, %v1541_v60  ;;  %1562 = vrcp.f32 %v871_v51 }
 0x13d   :  { %v1545_v34 = vpop.eup %1544  ;;  %1062 = vst.msk [vmem:[%s2206_s2 + $0x78] sm:$0xff] %vm1046_vm2, %v1543_v61  ;;  %1564 = vpow2.f32 %v1233_v48  ;;  %v1211_v48 = vmul.f32 -1.442695, %v1938_v56  ;;  %v1241_v56 = vmul.f32 -1.442695, %v1946_v7 }
 0x13e   :  { %v1547_v0 = vpop.eup %1546  ;;  %1094 = vst.msk [vmem:[%s2206_s2 + $0x178] sm:$0xff] %vm1046_vm2, %v1545_v34  ;;  %1566 = vpow2.f32 %v1206_v27  ;;  %v1243_v27 = vmul.f32 -1.442695, %v1941_v62  ;;  %v1214_v62 = vmul.f32 -1.442695, %v1968_v15 }
 0x13f   :  { %v1549_v35 = vpop.eup %1548  ;;  %1060 = vst.msk [vmem:[%s2206_s2 + $0x68] sm:$0xff] %vm1046_vm2, %v1547_v0  ;;  %1568 = vpow2.f32 %v1238_v31  ;;  %v1209_v31 = vmul.f32 -1.442695, %v1944_v6  ;;  %v1246_v6 = vmul.f32 -1.442695, %v1970_v47 }
 0x140   :  { %v1551_v36 = vpop.eup %1550  ;;  %1092 = vst.msk [vmem:[%s2206_s2 + $0x168] sm:$0xff] %vm1046_vm2, %v1549_v35  ;;  %1570 = vpow2.f32 %v1204_v9  ;;  %v1212_v7 = vmul.f32 -1.442695, %v1977_v17  ;;  %v1244_v15 = vmul.f32 -1.442695, %v1979_v20 }
 0x141   :  { %v1553_v37 = vpop.eup %1552  ;;  %1065 = vst.msk [vmem:[%s2206_s2 + $0x90] sm:$0xff] %vm1046_vm2, %v1551_v36  ;;  %1572 = vpow2.f32 %v1236_v18  ;;  %v1215_v47 = vmul.f32 -1.442695, %v1986_v23  ;;  %v1247_v17 = vmul.f32 -1.442695, %v1988_v24 }
 0x142   :  { %v1555_v1 = vpop.eup %1554  ;;  %1097 = vst.msk [vmem:[%s2206_s2 + $0x190] sm:$0xff] %vm1046_vm2, %v1553_v37  ;;  %1574 = vpow2.f32 %v1207_v19  ;;  %v1213_v20 = vmul.f32 -1.442695, %v1995_v28  ;;  %v1245_v23 = vmul.f32 -1.442695, %v1997_v30 }
 0x143   :  { %v1557_v38 = vpop.eup %1556  ;;  %1063 = vst.msk [vmem:[%s2206_s2 + $0x80] sm:$0xff] %vm1046_vm2, %v1555_v1  ;;  %1576 = vpow2.f32 %v1239_v22 }
 0x144   :  { %v1559_v4 = vpop.eup %1558  ;;  %1095 = vst.msk [vmem:[%s2206_s2 + $0x180] sm:$0xff] %vm1046_vm2, %v1557_v38  ;;  %1578 = vpow2.f32 %v1205_v25 }
 0x145   :  { %v1561_v5 = vpop.eup %1560  ;;  %1066 = vst.msk [vmem:[%s2206_s2 + $0x98] sm:$0xff] %vm1046_vm2, %v1559_v4  ;;  %1580 = vpow2.f32 %v1237_v26 }
 0x146   :  { %v1563_v40 = vpop.eup %1562  ;;  %1098 = vst.msk [vmem:[%s2206_s2 + $0x198] sm:$0xff] %vm1046_vm2, %v1561_v5  ;;  %1582 = vpow2.f32 %v1210_v29 }
 0x147   :  { %v1565_v46 = vpop.eup %1564  ;;  %1064 = vst.msk [vmem:[%s2206_s2 + $0x88] sm:$0xff] %vm1046_vm2, %v1563_v40  ;;  %1584 = vpow2.f32 %v1242_v32 }
 0x148   :  { %v1567_v52 = vpop.eup %1566  ;;  %v903_v41 = vadd.f32 1.0, %v1565_v46  ;;  %1586 = vpow2.f32 %v1208_v33 }
 0x149   :  { %v1569_v42 = vpop.eup %1568  ;;  %v876_v8 = vadd.f32 1.0, %v1567_v52  ;;  %1588 = vpow2.f32 %v1240_v45 }
 0x14a   :  { %v1571_v55 = vpop.eup %1570  ;;  %1590 = vrcp.f32 %v903_v41  ;;  %v908_v49 = vadd.f32 1.0, %v1569_v42 }
 0x14b   :  { %v1573_v50 = vpop.eup %1572  ;;  %1592 = vrcp.f32 %v876_v8  ;;  %v874_v53 = vadd.f32 1.0, %v1571_v55 }
 0x14c   :  { %v1575_v54 = vpop.eup %1574  ;;  %1594 = vrcp.f32 %v908_v49  ;;  %v906_v57 = vadd.f32 1.0, %v1573_v50 }
 0x14d   :  { %v1577_v58 = vpop.eup %1576  ;;  %1596 = vrcp.f32 %v874_v53  ;;  %v877_v59 = vadd.f32 1.0, %v1575_v54 }
 0x14e   :  { %v1579_v63 = vpop.eup %1578  ;;  %1598 = vrcp.f32 %v906_v57  ;;  %v909_v2 = vadd.f32 1.0, %v1577_v58 }
 0x14f   :  { %v1581_v3 = vpop.eup %1580  ;;  %1600 = vrcp.f32 %v877_v59  ;;  %v875_v10 = vadd.f32 1.0, %v1579_v63 }
 0x150   :  { %v1583_v39 = vpop.eup %1582  ;;  %1602 = vrcp.f32 %v909_v2  ;;  %v907_v11 = vadd.f32 1.0, %v1581_v3 }
 0x151   :  { %v1585_v43 = vpop.eup %1584  ;;  %1604 = vrcp.f32 %v875_v10  ;;  %v880_v12 = vadd.f32 1.0, %v1583_v39 }
 0x152   :  { %v1587_v13 = vpop.eup %1586  ;;  %1606 = vrcp.f32 %v907_v11  ;;  %v912_v14 = vadd.f32 1.0, %v1585_v43 }
 0x153   :  { %v1589_v44 = vpop.eup %1588  ;;  %1608 = vrcp.f32 %v880_v12  ;;  %v878_v16 = vadd.f32 1.0, %v1587_v13 }
 0x154   :  { %v1591_v21 = vpop.eup %1590  ;;  %1610 = vrcp.f32 %v912_v14  ;;  %v910_v51 = vadd.f32 1.0, %v1589_v44 }
 0x155   :  { %v1593_v60 = vpop.eup %1592  ;;  %1096 = vst.msk [vmem:[%s2206_s2 + $0x188] sm:$0xff] %vm1046_vm2, %v1591_v21  ;;  %1612 = vrcp.f32 %v878_v16 }
 0x156   :  { %v1595_v61 = vpop.eup %1594  ;;  %1069 = vst.msk [vmem:[%s2206_s2 + $0xb0] sm:$0xff] %vm1046_vm2, %v1593_v60  ;;  %1614 = vrcp.f32 %v910_v51 }
 0x157   :  { %v1597_v9 = vpop.eup %1596  ;;  %1101 = vst.msk [vmem:[%s2206_s2 + $0x1b0] sm:$0xff] %vm1046_vm2, %v1595_v61  ;;  %1616 = vpow2.f32 %v1211_v48 }
 0x158   :  { %v1599_v34 = vpop.eup %1598  ;;  %1067 = vst.msk [vmem:[%s2206_s2 + $0xa0] sm:$0xff] %vm1046_vm2, %v1597_v9  ;;  %1618 = vpow2.f32 %v1243_v27 }
 0x159   :  { %v1601_v18 = vpop.eup %1600  ;;  %1099 = vst.msk [vmem:[%s2206_s2 + $0x1a0] sm:$0xff] %vm1046_vm2, %v1599_v34  ;;  %1620 = vpow2.f32 %v1209_v31 }
 0x15a   :  { %v1603_v0 = vpop.eup %1602  ;;  %1070 = vst.msk [vmem:[%s2206_s2 + $0xb8] sm:$0xff] %vm1046_vm2, %v1601_v18  ;;  %1622 = vpow2.f32 %v1241_v56 }
 0x15b   :  { %v1605_v19 = vpop.eup %1604  ;;  %1102 = vst.msk [vmem:[%s2206_s2 + $0x1b8] sm:$0xff] %vm1046_vm2, %v1603_v0  ;;  %1624 = vpow2.f32 %v1214_v62 }
 0x15c   :  { %v1607_v35 = vpop.eup %1606  ;;  %1068 = vst.msk [vmem:[%s2206_s2 + $0xa8] sm:$0xff] %vm1046_vm2, %v1605_v19  ;;  %1626 = vpow2.f32 %v1246_v6 }
 0x15d   :  { %v1609_v22 = vpop.eup %1608  ;;  %1100 = vst.msk [vmem:[%s2206_s2 + $0x1a8] sm:$0xff] %vm1046_vm2, %v1607_v35  ;;  %1628 = vpow2.f32 %v1212_v7 }
 0x15e   :  { %v1611_v36 = vpop.eup %1610  ;;  %1073 = vst.msk [vmem:[%s2206_s2 + $0xd0] sm:$0xff] %vm1046_vm2, %v1609_v22  ;;  %1630 = vpow2.f32 %v1244_v15 }
 0x15f   :  { %v1613_v25 = vpop.eup %1612  ;;  %1105 = vst.msk [vmem:[%s2206_s2 + $0x1d0] sm:$0xff] %vm1046_vm2, %v1611_v36  ;;  %1632 = vpow2.f32 %v1215_v47 }
 0x160   :  { %v1615_v24 = vpop.eup %1614  ;;  %1071 = vst.msk [vmem:[%s2206_s2 + $0xc0] sm:$0xff] %vm1046_vm2, %v1613_v25  ;;  %1634 = vpow2.f32 %v1247_v17 }
 0x161   :  { %v1617_v28 = vpop.eup %1616  ;;  %1103 = vst.msk [vmem:[%s2206_s2 + $0x1c0] sm:$0xff] %vm1046_vm2, %v1615_v24  ;;  %1636 = vpow2.f32 %v1213_v20 }
 0x162   :  { %v1619_v30 = vpop.eup %1618  ;;  %v881_v37 = vadd.f32 1.0, %v1617_v28  ;;  %1638 = vpow2.f32 %v1245_v23 }
 0x163   :  { %v1621_v26 = vpop.eup %1620  ;;  %v913_v1 = vadd.f32 1.0, %v1619_v30 }
 0x164   :  { %v1623_v29 = vpop.eup %1622  ;;  %1640 = vrcp.f32 %v881_v37  ;;  %v879_v38 = vadd.f32 1.0, %v1621_v26 }
 0x165   :  { %v1625_v32 = vpop.eup %1624  ;;  %1642 = vrcp.f32 %v913_v1  ;;  %v911_v4 = vadd.f32 1.0, %v1623_v29 }
 0x166   :  { %v1627_v33 = vpop.eup %1626  ;;  %1644 = vrcp.f32 %v879_v38  ;;  %v884_v5 = vadd.f32 1.0, %v1625_v32 }
 0x167   :  { %v1629_v45 = vpop.eup %1628  ;;  %1646 = vrcp.f32 %v911_v4  ;;  %v916_v40 = vadd.f32 1.0, %v1627_v33 }
 0x168   :  { %v1631_v46 = vpop.eup %1630  ;;  %1648 = vrcp.f32 %v884_v5  ;;  %v882_v52 = vadd.f32 1.0, %v1629_v45 }
 0x169   :  { %v1633_v41 = vpop.eup %1632  ;;  %1650 = vrcp.f32 %v916_v40  ;;  %v914_v42 = vadd.f32 1.0, %v1631_v46 }
 0x16a   :  { %v1635_v8 = vpop.eup %1634  ;;  %1652 = vrcp.f32 %v882_v52  ;;  %v885_v55 = vadd.f32 1.0, %v1633_v41 }
 0x16b   :  { %v1637_v49 = vpop.eup %1636  ;;  %1654 = vrcp.f32 %v914_v42  ;;  %v917_v50 = vadd.f32 1.0, %v1635_v8 }
 0x16c   :  { %v1639_v53 = vpop.eup %1638  ;;  %1656 = vrcp.f32 %v885_v55  ;;  %v883_v54 = vadd.f32 1.0, %v1637_v49 }
 0x16d   :  { %1658 = vrcp.f32 %v917_v50  ;;  %v915_v57 = vadd.f32 1.0, %v1639_v53 }
 0x16e   :  { %v1641_v58 = vpop.eup %1640  ;;  %1660 = vrcp.f32 %v883_v54 }
 0x16f   :  { %v1643_v59 = vpop.eup %1642  ;;  %1074 = vst.msk [vmem:[%s2206_s2 + $0xd8] sm:$0xff] %vm1046_vm2, %v1641_v58  ;;  %1662 = vrcp.f32 %v915_v57 }
 0x170   :  { %v1645_v63 = vpop.eup %1644  ;;  %1106 = vst.msk [vmem:[%s2206_s2 + $0x1d8] sm:$0xff] %vm1046_vm2, %v1643_v59 }
 0x171   :  { %v1647_v2 = vpop.eup %1646  ;;  %1072 = vst.msk [vmem:[%s2206_s2 + $0xc8] sm:$0xff] %vm1046_vm2, %v1645_v63 }
 0x172   :  { %v1649_v3 = vpop.eup %1648  ;;  %1104 = vst.msk [vmem:[%s2206_s2 + $0x1c8] sm:$0xff] %vm1046_vm2, %v1647_v2 }
 0x173   :  { %v1651_v10 = vpop.eup %1650  ;;  %1077 = vst.msk [vmem:[%s2206_s2 + $0xf0] sm:$0xff] %vm1046_vm2, %v1649_v3 }
 0x174   :  { %v1653_v39 = vpop.eup %1652  ;;  %1109 = vst.msk [vmem:[%s2206_s2 + $0x1f0] sm:$0xff] %vm1046_vm2, %v1651_v10 }
 0x175   :  { %v1655_v11 = vpop.eup %1654  ;;  %1075 = vst.msk [vmem:[%s2206_s2 + $0xe0] sm:$0xff] %vm1046_vm2, %v1653_v39 }
 0x176   :  { %v1657_v43 = vpop.eup %1656  ;;  %1107 = vst.msk [vmem:[%s2206_s2 + $0x1e0] sm:$0xff] %vm1046_vm2, %v1655_v11 }
 0x177   :  { %v1659_v12 = vpop.eup %1658  ;;  %1078 = vst.msk [vmem:[%s2206_s2 + $0xf8] sm:$0xff] %vm1046_vm2, %v1657_v43 }
 0x178   :  { %v1661_v13 = vpop.eup %1660  ;;  %1110 = vst.msk [vmem:[%s2206_s2 + $0x1f8] sm:$0xff] %vm1046_vm2, %v1659_v12 }
 0x179   :  { %v1663_v14 = vpop.eup %1662  ;;  %1076 = vst.msk [vmem:[%s2206_s2 + $0xe8] sm:$0xff] %vm1046_vm2, %v1661_v13 }
 0x17a   :  { %1108 = vst.msk [vmem:[%s2206_s2 + $0x1e8] sm:$0xff] %vm1046_vm2, %v1663_v14 }

</bundles_post_ra>
